<compile_context>
chip_gen: v6e
topology: v6e:2x2x1
jax: 0.10.0
libtpu: 0.0.40
codegen_flags: <defaults>
</compile_context>

<pallas_src>
import math
import functools

import jax
import jax.numpy as jnp
from jax import lax
from jax.experimental import pallas as pl
from jax.experimental.pallas import tpu as pltpu


def _round_up(x, m):
    return -(-x // m) * m


def gaussian_embedding_kernel(wi_ref, wj_ref, wn_ref, tab_i_ref, tab_c_ref,
                              loss_ref, *, embed_dim, vocab_pad, ob):
    D = embed_dim
    tb = wi_ref.shape[1]

    # one-hot[v, b] = (v == idx[b]); exact 0.0 / 1.0 in f32.
    iota_v = lax.broadcasted_iota(jnp.int32, (vocab_pad, tb), 0)

    def gather(idx_ref, tab_ref):
        oh = jnp.where(iota_v == idx_ref[...], 1.0, 0.0)          # [V_pad, TB]
        # f32 MXU matmul with HIGHEST precision: exact-enough row gather.
        return jnp.dot(tab_ref[...], oh,
                       preferred_element_type=jnp.float32,
                       precision=lax.Precision.HIGHEST)            # [kD, TB]

    gi = gather(wi_ref, tab_i_ref)          # [2D, TB]: mu_i | 1/sigma_i
    gj = gather(wj_ref, tab_c_ref)          # [3D, TB]: mu_j | sigma_j | ls_j
    gn = gather(wn_ref, tab_c_ref)          # [3D, TB]: mu_n | sigma_n | ls_n

    mu_i, inv_sig_i = gi[:D], gi[D:]
    mu_j, sig_j, ls_j = gj[:D], gj[D:2 * D], gj[2 * D:]
    mu_n, sig_n, ls_n = gn[:D], gn[D:2 * D], gn[2 * D:]

    # Fused (-kl_ij + kl_in):
    #   0.5 * sum_D[(sig_j - sig_n + (mu_i-mu_j)^2 - (mu_i-mu_n)^2) / sigma_i
    #               + (ls_j - ls_n)]
    dj = mu_i - mu_j
    dn = mu_i - mu_n
    term = (sig_j - sig_n + dj * dj - dn * dn) * inv_sig_i + (ls_j - ls_n)

    # single cross-sublane reduction -> lane-dense (1, TB) row of losses
    loss_ref[...] = jnp.maximum(
        ob + 0.5 * jnp.sum(term, axis=0, keepdims=True), 0.0)


def gaussian_embedding_forward(params, words_i, words_j, words_n, *,
                               sigma_min, sigma_max, C, ob, block_rows=1024):
    mu_w, log_sigma_w, mu_c_w, log_sigma_c_w = params
    B = int(words_i.shape[0])
    V1, D = mu_w.shape                       # vocab_size + 1, embed_dim

    log_smin, log_smax = math.log(sigma_min), math.log(sigma_max)
    mu_clip = math.sqrt(C)

    # ---- one-time table prep (~5 * V * D * 4 bytes of work, done once) -----
    # clamps + exp are hoisted off the per-row path onto the tiny tables.
    mu_i_t = jnp.clip(mu_w, -mu_clip, mu_clip).astype(jnp.float32)
    mu_c_t = jnp.clip(mu_c_w, -mu_clip, mu_clip).astype(jnp.float32)
    ls_i_t = jnp.clip(log_sigma_w, log_smin, log_smax).astype(jnp.float32)
    ls_c_t = jnp.clip(log_sigma_c_w, log_smin, log_smax).astype(jnp.float32)
    inv_sig_t = jnp.exp(-ls_i_t)             # 1 / sigma_i
    sig_c_t = jnp.exp(ls_c_t)                # sigma_{j,n}

    V_pad = _round_up(V1, 128)

    def pad_v(t):
        return jnp.pad(t, ((0, V_pad - V1), (0, 0)))

    # transposed, concatenated tables (kept VMEM-resident by the kernel)
    tab_i = pad_v(jnp.concatenate([mu_i_t, inv_sig_t], axis=1)).T   # [2D, V_pad]
    tab_c = pad_v(jnp.concatenate([mu_c_t, sig_c_t, ls_c_t], axis=1)).T  # [3D, V_pad]

    # ---- batch tiling -------------------------------------------------------
    # TB: multiple of 128 (lane-dense index/output blocks); for batches > 128
    # guarantee >= 2 grid steps so the "parallel" axis can shard across v7x's
    # two TensorCores.  Default cap 1024 keeps intermediates (<~12 MiB) well
    # inside the 32 MiB scoped VMEM on every generation (raise on v5e/v6e).
    TB = min(block_rows, max(128, _round_up(-(-B // 2), 128)))
    B_pad = _round_up(B, TB)
    nb = B_pad // TB

    def prep_idx(w):
        w = w.astype(jnp.int32)
        if B_pad != B:
            w = jnp.pad(w, (0, B_pad - B))          # pad with index 0 (valid row)
        return w.reshape(1, B_pad)

    wi, wj, wn = prep_idx(words_i), prep_idx(words_j), prep_idx(words_n)

    kernel = functools.partial(
        gaussian_embedding_kernel,
        embed_dim=int(D), vocab_pad=int(V_pad), ob=float(ob))

    idx_spec = pl.BlockSpec((1, TB), lambda b: (0, b))
    tab_i_spec = pl.BlockSpec((2 * D, V_pad), lambda b: (0, 0))   # VMEM-resident
    tab_c_spec = pl.BlockSpec((3 * D, V_pad), lambda b: (0, 0))   # VMEM-resident

    loss_rows = pl.pallas_call(
        kernel,
        grid=(nb,),
        in_specs=[idx_spec, idx_spec, idx_spec, tab_i_spec, tab_c_spec],
        out_specs=pl.BlockSpec((1, TB), lambda b: (0, b)),
        out_shape=jax.ShapeDtypeStruct((1, B_pad), jnp.float32),
        compiler_params=pltpu.CompilerParams(
            dimension_semantics=("parallel",),
            vmem_limit_bytes=32 * 1024 * 1024),
        cost_estimate=pl.CostEstimate(
            flops=16 * D * V_pad * B_pad + 12 * D * B_pad,
            transcendentals=0,
            bytes_accessed=3 * B_pad * 4 + 5 * D * V_pad * 4 + B_pad * 4),
    )(wi, wj, wn, tab_i, tab_c)

    # mean over the true batch rows (padded tail sliced away)
    return jnp.mean(loss_rows[0, :B])


def reference_forward(params, words_i, words_j, words_n, *, sigma_min, sigma_max, C, ob):
    mu_w, log_sigma_w, mu_c_w, log_sigma_c_w = params
    log_sigma_w = jnp.clip(log_sigma_w, math.log(sigma_min), math.log(sigma_max))
    log_sigma_c_w = jnp.clip(log_sigma_c_w, math.log(sigma_min), math.log(sigma_max))
    mu_w = jnp.clip(mu_w, -math.sqrt(C), math.sqrt(C))
    mu_c_w = jnp.clip(mu_c_w, -math.sqrt(C), math.sqrt(C))
    mu_i, mu_j, mu_n = mu_w[words_i], mu_c_w[words_j], mu_c_w[words_n]
    s_i = jnp.exp(log_sigma_w[words_i])
    s_j = jnp.exp(log_sigma_c_w[words_j])
    s_n = jnp.exp(log_sigma_c_w[words_n])
    D = mu_i.shape[1]

    def kl(ma, mb, sa, sb):
        det = jnp.sum(jnp.log(sa), 1) - jnp.sum(jnp.log(sb), 1)
        tr = jnp.sum(sb / sa, 1)
        dm = jnp.sum((ma - mb) ** 2 / sa, 1)
        return -0.5 * (tr - det + dm + D)

    return jnp.mean(jax.nn.relu(ob - kl(mu_i, mu_j, s_i, s_j) + kl(mu_i, mu_n, s_i, s_n)))


if __name__ == "__main__":
    # small synthetic "args": vocab=50, embed_dim=128, batch=8
    vocab_size = 50
    embed_dim = 128
    batch = 8
    sigma_min, sigma_max, C, ob = 0.1, 10.0, 2.0, 1.0

    key = jax.random.PRNGKey(0)
    k_mu, k_ls, k_muc, k_lsc, k_wi, k_wj, k_wt, k_neg = jax.random.split(key, 8)

    # deterministic parameter init (nn.Embedding(vocab_size + 1, embed_dim) shapes)
    mu_w = jax.random.normal(k_mu, (vocab_size + 1, embed_dim), jnp.float32)
    log_sigma_w = 0.1 * jax.random.normal(k_ls, (vocab_size + 1, embed_dim), jnp.float32)
    mu_c_w = jax.random.normal(k_muc, (vocab_size + 1, embed_dim), jnp.float32)
    log_sigma_c_w = 0.1 * jax.random.normal(k_lsc, (vocab_size + 1, embed_dim), jnp.float32)
    params = (mu_w, log_sigma_w, mu_c_w, log_sigma_c_w)

    words_i = jax.random.randint(k_wi, (batch,), 0, vocab_size + 1)
    words_j = jax.random.randint(k_wj, (batch,), 0, vocab_size + 1)

    # torch.multinomial(self.dset.weights, batch, replacement=True) equivalent
    # (negative sampling from dataset unigram weights; done in plain JAX)
    weights = jax.random.uniform(k_wt, (vocab_size + 1,), jnp.float32) + 1e-3
    words_n = jax.random.categorical(k_neg, jnp.log(weights), shape=(batch,))

    out = gaussian_embedding_forward(params, words_i, words_j, words_n,
                                     sigma_min=sigma_min, sigma_max=sigma_max,
                                     C=C, ob=ob)
    out = jax.block_until_ready(out)

    ref = reference_forward(params, words_i, words_j, words_n,
                            sigma_min=sigma_min, sigma_max=sigma_max, C=C, ob=ob)
    assert jnp.allclose(out, ref, rtol=1e-5, atol=1e-5), (out, ref)

    print("KERNEL_OK")
</pallas_src>

<mosaic_0001>
module attributes {stable_mosaic.version = 11 : i64} {
  func.func @gaussian_embedding_kernel(%arg0: i32, %arg1: memref<1x128xi32, #tpu.memory_space<vmem>>, %arg2: memref<1x128xi32, #tpu.memory_space<vmem>>, %arg3: memref<1x128xi32, #tpu.memory_space<vmem>>, %arg4: memref<256x128xf32, #tpu.memory_space<vmem>>, %arg5: memref<384x128xf32, #tpu.memory_space<vmem>>, %arg6: memref<1x128xf32, #tpu.memory_space<vmem>>) attributes {dimension_semantics = [#tpu.dimension_semantics<parallel>], iteration_bounds = array<i64: 1>, scalar_prefetch = 0 : i64, scratch_operands = 0 : i64, tpu.core_type = #tpu.core_type<tc>, window_params = [{transform_indices = @transform_0, window_bounds = array<i64: 1, 128>}, {transform_indices = @transform_1, window_bounds = array<i64: 1, 128>}, {transform_indices = @transform_2, window_bounds = array<i64: 1, 128>}, {pipeline_mode = #tpu.pipeline_mode<synchronous>, transform_indices = @transform_3, window_bounds = array<i64: 256, 128>}, {pipeline_mode = #tpu.pipeline_mode<synchronous>, transform_indices = @transform_4, window_bounds = array<i64: 384, 128>}, {transform_indices = @transform_5, window_bounds = array<i64: 1, 128>}]} {
    %0 = tpu.iota {dimensions = array<i32: 0>} : vector<128x128xi32>
    %c0 = arith.constant 0 : index
    %c0_0 = arith.constant 0 : index
    %1 = vector.load %arg1[%c0, %c0_0] : memref<1x128xi32, #tpu.memory_space<vmem>>, vector<1x128xi32>
    %2 = vector.broadcast %1 : vector<1x128xi32> to vector<128x128xi32>
    %3 = arith.cmpi eq, %0, %2 : vector<128x128xi32>
    %cst = arith.constant 1.000000e+00 : f32
    %cst_1 = arith.constant 0.000000e+00 : f32
    %4 = vector.broadcast %cst : f32 to vector<128x128xf32>
    %5 = vector.broadcast %cst_1 : f32 to vector<128x128xf32>
    %6 = arith.select %3, %4, %5 : vector<128x128xi1>, vector<128x128xf32>
    %c0_2 = arith.constant 0 : index
    %c0_3 = arith.constant 0 : index
    %7 = vector.load %arg4[%c0_2, %c0_3] : memref<256x128xf32, #tpu.memory_space<vmem>>, vector<256x128xf32>
    %cst_4 = arith.constant dense<0.000000e+00> : vector<256x128xf32>
    %8 = tpu.matmul %7, %6, %cst_4 {dimension_numbers = #tpu.dot_dimension_numbers<[1], [0], [0], [1], [0, 0, 1, 1], [], []>, precision = #tpu.contract_precision<fp32>} : vector<256x128xf32>, vector<128x128xf32>, vector<256x128xf32> -> vector<256x128xf32>
    %c0_5 = arith.constant 0 : index
    %c0_6 = arith.constant 0 : index
    %9 = vector.load %arg2[%c0_5, %c0_6] : memref<1x128xi32, #tpu.memory_space<vmem>>, vector<1x128xi32>
    %10 = vector.broadcast %9 : vector<1x128xi32> to vector<128x128xi32>
    %11 = arith.cmpi eq, %0, %10 : vector<128x128xi32>
    %cst_7 = arith.constant 1.000000e+00 : f32
    %cst_8 = arith.constant 0.000000e+00 : f32
    %12 = vector.broadcast %cst_7 : f32 to vector<128x128xf32>
    %13 = vector.broadcast %cst_8 : f32 to vector<128x128xf32>
    %14 = arith.select %11, %12, %13 : vector<128x128xi1>, vector<128x128xf32>
    %c0_9 = arith.constant 0 : index
    %c0_10 = arith.constant 0 : index
    %15 = vector.load %arg5[%c0_9, %c0_10] : memref<384x128xf32, #tpu.memory_space<vmem>>, vector<384x128xf32>
    %cst_11 = arith.constant dense<0.000000e+00> : vector<384x128xf32>
    %16 = tpu.matmul %15, %14, %cst_11 {dimension_numbers = #tpu.dot_dimension_numbers<[1], [0], [0], [1], [0, 0, 1, 1], [], []>, precision = #tpu.contract_precision<fp32>} : vector<384x128xf32>, vector<128x128xf32>, vector<384x128xf32> -> vector<384x128xf32>
    %c0_12 = arith.constant 0 : index
    %c0_13 = arith.constant 0 : index
    %17 = vector.load %arg3[%c0_12, %c0_13] : memref<1x128xi32, #tpu.memory_space<vmem>>, vector<1x128xi32>
    %18 = vector.broadcast %17 : vector<1x128xi32> to vector<128x128xi32>
    %19 = arith.cmpi eq, %0, %18 : vector<128x128xi32>
    %cst_14 = arith.constant 1.000000e+00 : f32
    %cst_15 = arith.constant 0.000000e+00 : f32
    %20 = vector.broadcast %cst_14 : f32 to vector<128x128xf32>
    %21 = vector.broadcast %cst_15 : f32 to vector<128x128xf32>
    %22 = arith.select %19, %20, %21 : vector<128x128xi1>, vector<128x128xf32>
    %c0_16 = arith.constant 0 : index
    %c0_17 = arith.constant 0 : index
    %23 = vector.load %arg5[%c0_16, %c0_17] : memref<384x128xf32, #tpu.memory_space<vmem>>, vector<384x128xf32>
    %cst_18 = arith.constant dense<0.000000e+00> : vector<384x128xf32>
    %24 = tpu.matmul %23, %22, %cst_18 {dimension_numbers = #tpu.dot_dimension_numbers<[1], [0], [0], [1], [0, 0, 1, 1], [], []>, precision = #tpu.contract_precision<fp32>} : vector<384x128xf32>, vector<128x128xf32>, vector<384x128xf32> -> vector<384x128xf32>
    %25 = vector.extract_strided_slice %8 {offsets = [0, 0], sizes = [128, 128], strides = [1, 1]} : vector<256x128xf32> to vector<128x128xf32>
    %26 = vector.extract_strided_slice %8 {offsets = [128, 0], sizes = [128, 128], strides = [1, 1]} : vector<256x128xf32> to vector<128x128xf32>
    %27 = vector.extract_strided_slice %16 {offsets = [0, 0], sizes = [128, 128], strides = [1, 1]} : vector<384x128xf32> to vector<128x128xf32>
    %28 = vector.extract_strided_slice %16 {offsets = [128, 0], sizes = [128, 128], strides = [1, 1]} : vector<384x128xf32> to vector<128x128xf32>
    %29 = vector.extract_strided_slice %16 {offsets = [256, 0], sizes = [128, 128], strides = [1, 1]} : vector<384x128xf32> to vector<128x128xf32>
    %30 = vector.extract_strided_slice %24 {offsets = [0, 0], sizes = [128, 128], strides = [1, 1]} : vector<384x128xf32> to vector<128x128xf32>
    %31 = vector.extract_strided_slice %24 {offsets = [128, 0], sizes = [128, 128], strides = [1, 1]} : vector<384x128xf32> to vector<128x128xf32>
    %32 = vector.extract_strided_slice %24 {offsets = [256, 0], sizes = [128, 128], strides = [1, 1]} : vector<384x128xf32> to vector<128x128xf32>
    %33 = arith.subf %25, %27 : vector<128x128xf32>
    %34 = arith.subf %25, %30 : vector<128x128xf32>
    %35 = arith.subf %28, %31 : vector<128x128xf32>
    %36 = arith.mulf %33, %33 : vector<128x128xf32>
    %37 = arith.addf %35, %36 : vector<128x128xf32>
    %38 = arith.mulf %34, %34 : vector<128x128xf32>
    %39 = arith.subf %37, %38 : vector<128x128xf32>
    %40 = arith.mulf %39, %26 : vector<128x128xf32>
    %41 = arith.subf %29, %32 : vector<128x128xf32>
    %42 = arith.addf %40, %41 : vector<128x128xf32>
    %cst_19 = arith.constant dense<0.000000e+00> : vector<128xf32>
    %43 = vector.multi_reduction <add>, %42, %cst_19 [0] : vector<128x128xf32> to vector<128xf32>
    %44 = vector.shape_cast %43 : vector<128xf32> to vector<1x128xf32>
    %cst_20 = arith.constant 5.000000e-01 : f32
    %45 = vector.broadcast %cst_20 : f32 to vector<1x128xf32>
    %46 = arith.mulf %45, %44 : vector<1x128xf32>
    %cst_21 = arith.constant 1.000000e+00 : f32
    %47 = vector.broadcast %cst_21 : f32 to vector<1x128xf32>
    %48 = arith.addf %47, %46 : vector<1x128xf32>
    %cst_22 = arith.constant 0.000000e+00 : f32
    %49 = vector.broadcast %cst_22 : f32 to vector<1x128xf32>
    %50 = arith.maximumf %48, %49 : vector<1x128xf32>
    %c0_23 = arith.constant 0 : index
    %c0_24 = arith.constant 0 : index
    %51 = vector.load %arg6[%c0_23, %c0_24] : memref<1x128xf32, #tpu.memory_space<vmem>>, vector<1x128xf32>
    tpu.vector_store %arg6[%c0_23, %c0_24], %50 {strides = array<i32>} : memref<1x128xf32, #tpu.memory_space<vmem>>, vector<1x128xf32>,
    return
  }
  func.func @transform_0(%arg0: i32) -> (i32, i32) {
    %c0_i32 = arith.constant 0 : i32
    %c0_i32_0 = arith.constant 0 : i32
    return %c0_i32, %arg0 : i32, i32
  }
  func.func @transform_1(%arg0: i32) -> (i32, i32) {
    %c0_i32 = arith.constant 0 : i32
    %c0_i32_0 = arith.constant 0 : i32
    return %c0_i32, %arg0 : i32, i32
  }
  func.func @transform_2(%arg0: i32) -> (i32, i32) {
    %c0_i32 = arith.constant 0 : i32
    %c0_i32_0 = arith.constant 0 : i32
    return %c0_i32, %arg0 : i32, i32
  }
  func.func @transform_3(%arg0: i32) -> (i32, i32) {
    %c0_i32 = arith.constant 0 : i32
    %c0_i32_0 = arith.constant 0 : i32
    %c0_i32_1 = arith.constant 0 : i32
    return %c0_i32, %c0_i32_0 : i32, i32
  }
  func.func @transform_4(%arg0: i32) -> (i32, i32) {
    %c0_i32 = arith.constant 0 : i32
    %c0_i32_0 = arith.constant 0 : i32
    %c0_i32_1 = arith.constant 0 : i32
    return %c0_i32, %c0_i32_0 : i32, i32
  }
  func.func @transform_5(%arg0: i32) -> (i32, i32) {
    %c0_i32 = arith.constant 0 : i32
    %c0_i32_0 = arith.constant 0 : i32
    return %c0_i32, %arg0 : i32, i32
  }
}

</mosaic_0001>

<bundles_post_ra>
// kernel: tpu_custom_call.1
= control target key start
LH: loop header
LB: loop body
LE: loop exit
PB: predicated region body
PF: predicated region fallthrough
CT: control target
= control target key end

     0   :  { %10 = vsyncpa [#allocation3], 0  ;;  %s15324_s0 = inlined_call_operand.hbm [shape: s32[1,128], index: 0, kind: input, shape index: {}]   ;;  %s15325_s1 = inlined_call_operand.vmem [shape: s32[1,128], index: 1, kind: input, shape index: {}]   ;;  %s15326_s2 = inlined_call_operand.vmem [shape: s32[1,128], index: 2, kind: input, shape index: {}]   ;;  %s15327_s3 = inlined_call_operand.hbm [shape: f32[256,128], index: 3, kind: input, shape index: {}]   ;;  %s15328_s4 = inlined_call_operand.hbm [shape: f32[384,128], index: 4, kind: input, shape index: {}]   ;;  %s15329_s5 = inlined_call_operand.hbm [shape: f32[1,128], index: 5, kind: output, shape index: {}]  }
   0x1   :  { %11 = vsyncpa [#allocation6], 0 }
   0x2   :  { %12 = vsyncpa [#allocation4], 0  ;;  %s10504_s18 = smov [#allocation5]  }
   0x3   :  { %s32_s19 = sshll.u32 %s10504_s18, 4  ;;  %s33_s19 = int_to_ptr.vmem [resolvable:$true] %s32_s19 }
   0x4   :  { %s10426_s20 = scalar_lea.vmem %s33_s19, 4096  ;;  %p10431_p1 = scmp.lt.s32.totalorder %s33_s19, %s33_s19 }
   0x5   :  { %p10427_p0 = scmp.ne.s32.totalorder %s33_s19, %s10426_s20  ;;  %p10432_p2 = scmp.lt.s32.totalorder %s10426_s20, %s10426_s20 }
   0x7   :  { %p10433_p3 = por %p10432_p2, %p10431_p1 }
   0x9   :  { %p10434_p4 = pnand %p10433_p3, %p10427_p0 }
   0xb   :  { %10437 = shalt.err (!%p10434_p4)
}
   0xc   :  { %s10505_s21 = smov 128   ;;  %s10506_s22 = smov 8  }
   0xd   :  { %38 = dma.hbm_to_vmem [thread:$0]  %s15327_s3, 4096, %s33_s19, [#allocation6], %s10505_s21, %s10505_s21, %s10506_s22  }
   0xe   :  { %s10507_s25 = smov [#allocation2]   ;;  %s10508_s27 = smov [#allocation7]  }
   0xf   :  { %s19_s26 = sshll.u32 %s10507_s25, 4  ;;  %s44_s28 = sshll.u32 %s10508_s27, 4  ;;  %s20_s26 = int_to_ptr.vmem [resolvable:$true] %s19_s26  ;;  %s45_s28 = int_to_ptr.vmem [resolvable:$true] %s44_s28 }
  0x10   :  { %s10446_s29 = scalar_lea.vmem %s20_s26, 16  ;;  %s10450_s30 = scalar_lea.vmem %s20_s26, 32 }
  0x11   :  { %p10447_p5 = scmp.ne.s32.totalorder %s20_s26, %s10446_s29  ;;  %p10451_p6 = scmp.lt.s32.totalorder %s20_s26, %s20_s26 }
  0x12   :  { %p10452_p7 = scmp.lt.s32.totalorder %s10450_s30, %s10446_s29 }
  0x14   :  { %p10453_p8 = por %p10452_p7, %p10451_p6 }
  0x16   :  { %p10454_p9 = pnand %p10453_p8, %p10447_p5 }
  0x18   :  { %10457 = shalt.err (!%p10454_p9)
}
  0x19   :  { %22 = dma.hbm_to_vmem [thread:$0]  %s15324_s0, 16, %s20_s26, [#allocation3]  }
  0x1a   :  { %s10466_s8 = scalar_lea.vmem %s45_s28, 6144  ;;  %p10471_p11 = scmp.lt.s32.totalorder %s45_s28, %s45_s28 }
  0x1b   :  { %p10467_p10 = scmp.ne.s32.totalorder %s45_s28, %s10466_s8  ;;  %p10472_p12 = scmp.lt.s32.totalorder %s10466_s8, %s10466_s8 }
  0x1d   :  { %p10473_p13 = por %p10472_p12, %p10471_p11 }
  0x1f   :  { %p10474_p0 = pnand %p10473_p13, %p10467_p10 }
  0x21   :  { %10477 = shalt.err (!%p10474_p0)
}
  0x22   :  { %50 = dma.hbm_to_vmem [thread:$0]  %s15328_s4, 6144, %s45_s28, [#allocation6], %s10505_s21, %s10505_s21, %s10506_s22  }
  0x23   :  { %10498 = dma.done.wait [#allocation3], 16  }
  0x24   :  { %10499 = vsyncadd [#allocation3], 4294967280 }
  0x25   :  { %10500 = dma.done.wait [#allocation6], 10240  }
  0x26   :  { %10501 = vsyncadd [#allocation6], 4294957056  ;;  %v60_v0 = vlaneseq  ;;  %v10577_v10 = vld [vmem:[#allocation2] ss:$0 sm:$0xff]  ;;  %v15412_v19 = vmov 1.0   ;;  %v15330_v21 = vmov 0.0  }
  0x27   :  { %v16203_v59 = vmov 0.0  }
  0x28   :  { %v10551_v1 = vshrl.u32 %v60_v0, 7 }
  0x2a   :  { %16018 = vst [vmem:[#allocation12_spill] sm:$0xff] %v10551_v1  ;;  %v10554_v2 = vadd.s32 120, %v10551_v1  ;;  %v10557_v3 = vadd.s32 112, %v10551_v1  ;;  %v10560_v4 = vadd.s32 104, %v10551_v1  ;;  %v10563_v5 = vadd.s32 96, %v10551_v1 }
  0x2b   :  { %v10566_v6 = vadd.s32 88, %v10551_v1  ;;  %v10569_v7 = vadd.s32 80, %v10551_v1  ;;  %v10572_v8 = vadd.s32 72, %v10551_v1  ;;  %v10575_v9 = vadd.s32 64, %v10551_v1 }
  0x2c   :  { %16019 = vst [vmem:[#allocation13_spill] sm:$0xff] %v10554_v2  ;;  %16020 = vst [vmem:[#allocation14_spill] sm:$0xff] %v10557_v3  ;;  %v10580_v11 = vadd.s32 56, %v10551_v1  ;;  %v10583_v12 = vadd.s32 48, %v10551_v1  ;;  %v10586_v13 = vadd.s32 40, %v10551_v1  ;;  %v10589_v14 = vadd.s32 32, %v10551_v1 }
  0x2d   :  { %16021 = vst [vmem:[#allocation15_spill] sm:$0xff] %v10560_v4  ;;  %16022 = vst [vmem:[#allocation16_spill] sm:$0xff] %v10563_v5  ;;  %vm10593_vm0 = vcmp.eq.s32.totalorder %v10554_v2, %v10577_v10  ;;  %vm10599_vm1 = vcmp.eq.s32.totalorder %v10557_v3, %v10577_v10  ;;  %vm10605_vm2 = vcmp.eq.s32.totalorder %v10560_v4, %v10577_v10  ;;  %v10631_v24 = vadd.s32 24, %v10551_v1 }
  0x2e   :  { %16023 = vst [vmem:[#allocation17_spill] sm:$0xff] %v10566_v6  ;;  %16024 = vst [vmem:[#allocation18_spill] sm:$0xff] %v10569_v7  ;;  %vm10611_vm3 = vcmp.eq.s32.totalorder %v10563_v5, %v10577_v10  ;;  %8682 = vmatprep.subr.msk.mxu0 %vm10593_vm0, %v15412_v19  ;;  %vm10620_vm4 = vcmp.eq.s32.totalorder %v10566_v6, %v10577_v10  ;;  %v113_v22 = vsel %vm10593_vm0, 1.0, %v15330_v21  ;;  %v112_v23 = vsel %vm10599_vm1, 1.0, %v15330_v21 }
  0x2f   :  { %16025 = vst [vmem:[#allocation19_spill] sm:$0xff] %v10572_v8  ;;  %16026 = vst [vmem:[#allocation20_spill] sm:$0xff] %v10575_v9  ;;  %8683 = vmatpush3.msk.msra.mxu0 %vm10593_vm0, %v15412_v19  ;;  %v10636_v25 = vsub.f32 %v113_v22, %v113_v22  ;;  %vm10640_vm5 = vcmp.eq.s32.totalorder %v10569_v7, %v10577_v10  ;;  %v10644_v27 = vsub.f32 %v112_v23, %v112_v23  ;;  %v114_v22 = vld [vmem:[#allocation5] sm:$0xff]  ;;  %v117_v7 = vld [vmem:[#allocation5 + $0x18] sm:$0xff] }
  0x30   :  { %16027 = vst [vmem:[#allocation21_spill] sm:$0xff] %v10580_v11  ;;  %16028 = vst [vmem:[#allocation22_spill] sm:$0xff] %v10583_v12  ;;  %v111_v28 = vsel %vm10605_vm2, 1.0, %v15330_v21  ;;  %8684 = vmatprep.subr.msk.mxu0 %vm10599_vm1, %v15412_v19  ;;  %vm10654_vm6 = vcmp.eq.s32.totalorder %v10572_v8, %v10577_v10  ;;  %v110_v31 = vsel %vm10611_vm3, 1.0, %v15330_v21  ;;  %v10664_v32 = vadd.s32 16, %v10551_v1 }
  0x31   :  { %16029 = vst [vmem:[#allocation23_spill] sm:$0xff] %v10586_v13  ;;  %16030 = vst [vmem:[#allocation24_spill] sm:$0xff] %v10589_v14  ;;  %v10658_v30 = vsub.f32 %v111_v28, %v111_v28  ;;  %8685 = vmatpush3.msk.msra.mxu0 %vm10599_vm1, %v15412_v19  ;;  %v10670_v33 = vand.u32 4294901760, %v10636_v25  ;;  %v10673_v34 = vand.u32 4294901760, %v10644_v27  ;;  %v10675_v35 = vsub.f32 %v110_v31, %v110_v31 }
  0x32   :  { %16041 = vst [vmem:[#allocation25_spill] sm:$0xff] %v10631_v24  ;;  %16046 = vst [vmem:[#allocation26_spill] sm:$0xff] %v10664_v32  ;;  %v109_v36 = vsel %vm10620_vm4, 1.0, %v15330_v21  ;;  %8686 = vmatprep.subr.msk.mxu0 %vm10605_vm2, %v15412_v19  ;;  %vm10688_vm7 = vcmp.eq.s32.totalorder %v10575_v9, %v10577_v10  ;;  %v108_v40 = vsel %vm10640_vm5, 1.0, %v15330_v21  ;;  %vm10716_vm8 = vcmp.eq.s32.totalorder %v10580_v11, %v10577_v10 }
  0x33   :  { %16047 = vst [vmem:[#allocation27_spill] sm:$0xff] %v10670_v33  ;;  %16048 = vst [vmem:[#allocation28_spill] sm:$0xff] %v10673_v34  ;;  %v10684_v37 = vand.u32 4294901760, %v10658_v30  ;;  %v10692_v39 = vsub.f32 %v109_v36, %v109_v36  ;;  %8687 = vmatpush3.msk.msra.mxu0 %vm10605_vm2, %v15412_v19  ;;  %v534_v41 = vsub.f32 %v10636_v25, %v10670_v33  ;;  %v10705_v43 = vand.u32 4294901760, %v10675_v35 }
  0x34   :  { %v540_v42 = vsub.f32 %v10644_v27, %v10673_v34  ;;  %v10707_v44 = vsub.f32 %v108_v40, %v108_v40  ;;  %8688 = vmatprep.subr.msk.mxu0 %vm10611_vm3, %v15412_v19  ;;  %v107_v48 = vsel %vm10654_vm6, 1.0, %v15330_v21  ;;  %vm10741_vm9 = vcmp.eq.s32.totalorder %v10583_v12, %v10577_v10  ;;  %v116_v12 = vld [vmem:[#allocation5 + $0x10] sm:$0xff] }
  0x35   :  { %16049 = vst [vmem:[#allocation29_spill] sm:$0xff] %v10684_v37  ;;  %16052 = vst [vmem:[#allocation30_spill] sm:$0xff] %v10705_v43  ;;  %v546_v45 = vsub.f32 %v10658_v30, %v10684_v37  ;;  %v10721_v47 = vand.u32 4294901760, %v10692_v39  ;;  %8689 = vmatpush3.msk.msra.mxu0 %vm10611_vm3, %v15412_v19  ;;  %v535_v49 = vand.u32 4294901760, %v534_v41  ;;  %v552_v51 = vsub.f32 %v10675_v35, %v10705_v43 }
  0x36   :  { %v541_v50 = vand.u32 4294901760, %v540_v42  ;;  %v10732_v52 = vand.u32 4294901760, %v10707_v44  ;;  %8690 = vmatprep.subr.msk.mxu0 %vm10620_vm4, %v15412_v19  ;;  %v10745_v55 = vsub.f32 %v107_v48, %v107_v48  ;;  %v10748_v56 = vadd.s32 8, %v10551_v1  ;;  %v115_v48 = vld [vmem:[#allocation5 + $0x8] sm:$0xff] }
  0x37   :  { %16055 = vst [vmem:[#allocation31_spill] sm:$0xff] %v10721_v47  ;;  %v558_v53 = vsub.f32 %v10692_v39, %v10721_v47  ;;  %8691 = vmatpush3.msk.msra.mxu0 %vm10620_vm4, %v15412_v19  ;;  %8762 = vmatprep.subr.mxu1 %v535_v49  ;;  %v547_v57 = vand.u32 4294901760, %v546_v45  ;;  %vm10757_vm10 = vcmp.eq.s32.totalorder %v10586_v13, %v10577_v10  ;;  %v106_v60 = vsel %vm10688_vm7, 1.0, %v15330_v21  ;;  %v121_v47 = vld [vmem:[#allocation5 + $0x38] sm:$0xff] }
  0x38   :  { %16056 = vst [vmem:[#allocation32_spill] sm:$0xff] %v10732_v52  ;;  %16059 = vst [vmem:[#allocation33_spill] sm:$0xff] %v10748_v56  ;;  %v564_v58 = vsub.f32 %v10707_v44, %v10732_v52  ;;  %8692 = vmatprep.subr.msk.mxu0 %vm10640_vm5, %v15412_v19  ;;  %8763 = vmatpush3.msra.mxu1 %v535_v49  ;;  %v10768_v61 = vand.u32 4294901760, %v10745_v55  ;;  %vm10772_vm11 = vcmp.eq.s32.totalorder %v10589_v14, %v10577_v10  ;;  %v16082_v8 = vmov 0 }
  0x39   :  { %v10776_v63 = vsub.f32 %v106_v60, %v106_v60  ;;  %v105_v0 = vsel %vm10716_vm8, 1.0, %v15330_v21  ;;  %8693 = vmatpush3.msk.msra.mxu0 %vm10640_vm5, %v15412_v19  ;;  %8764 = vmatprep.subr.mxu1 %v541_v50  ;;  %v553_v23 = vand.u32 4294901760, %v552_v51  ;;  %vm10786_vm12 = vcmp.eq.s32.totalorder %v10631_v24, %v10577_v10 }
  0x3a   :  { %16062 = vst [vmem:[#allocation34_spill] sm:$0xff] %v10768_v61  ;;  %v10790_v31 = vsub.f32 %v105_v0, %v105_v0  ;;  %v104_v36 = vsel %vm10741_vm9, 1.0, %v15330_v21  ;;  %8694 = vmatprep.subr.msk.mxu0 %vm10654_vm6, %v15412_v19  ;;  %8765 = vmatpush3.msra.mxu1 %v541_v50  ;;  %v559_v40 = vand.u32 4294901760, %v558_v53  ;;  %v570_v41 = vsub.f32 %v10745_v55, %v10768_v61 }
  0x3b   :  { %v10801_v42 = vand.u32 4294901760, %v10776_v63  ;;  %v10803_v45 = vsub.f32 %v104_v36, %v104_v36  ;;  %8695 = vmatpush3.msk.msra.mxu0 %vm10654_vm6, %v15412_v19  ;;  %8766 = vmatprep.subr.mxu1 %v547_v57  ;;  %v565_v49 = vand.u32 4294901760, %v564_v58  ;;  %v103_v50 = vsel %vm10757_vm10, 1.0, %v15330_v21 }
  0x3c   :  { %v10809_v51 = vand.u32 4294901760, %v10790_v31  ;;  %v10814_v53 = vand.u32 4294901760, %v114_v22  ;;  %8696 = vmatprep.subr.msk.mxu0 %vm10688_vm7, %v15412_v19  ;;  %8767 = vmatpush3.msra.mxu1 %v547_v57  ;;  %vm10821_vm13 = vcmp.eq.s32.totalorder %v10664_v32, %v10577_v10  ;;  %v16070_v60 = vmov 0 }
  0x3d   :  { %16067 = vst [vmem:[#allocation35_spill] sm:$0xff] %v10801_v42  ;;  %v16071_v60 = vsel %vm10821_vm13, 4294967295, %v16070_v60  ;;  %v10826_v58 = vand.u32 4294901760, %v10803_v45  ;;  %vm10830_vm14 = vcmp.eq.s32.totalorder %v10748_v56, %v10577_v10  ;;  %v16074_v0 = vmov 0  ;;  %8697 = vmatpush3.msk.msra.mxu0 %vm10688_vm7, %v15412_v19  ;;  %8768 = vmatprep.subr.mxu1 %v553_v23 }
  0x3e   :  { %16068 = vst [vmem:[#allocation36_spill] sm:$0xff] %v10809_v51  ;;  %16069 = vst [vmem:[#allocation37_spill] sm:$0xff] %v10814_v53  ;;  %v16075_v0 = vsel %vm10830_vm14, 4294967295, %v16074_v0  ;;  %v10834_v36 = vsub.f32 %v103_v50, %v103_v50  ;;  %v576_v57 = vsub.f32 %v10776_v63, %v10801_v42  ;;  %v10842_v21 = vsub.f32 %v114_v22, %v10814_v53  ;;  %v120_v42 = vld [vmem:[#allocation5 + $0x30] sm:$0xff] }
  0x3f   :  { %16072 = vst [vmem:[#allocation38_spill] sm:$0xff] %v16071_v60  ;;  %16073 = vst [vmem:[#allocation39_spill] sm:$0xff] %v10826_v58  ;;  %v16078_v32 = vmov 0.0   ;;  %v10847_v24 = vand.u32 4294901760, %v115_v48  ;;  %8698 = vmatprep.subr.msk.mxu0 %vm10716_vm8, %v15412_v19  ;;  %8769 = vmatpush3.msra.mxu1 %v553_v23  ;;  %v571_v50 = vand.u32 4294901760, %v570_v41  ;;  %v582_v14 = vsub.f32 %v10790_v31, %v10809_v51  ;;  %v119_v51 = vld [vmem:[#allocation5 + $0x28] sm:$0xff] }
  0x40   :  { %16076 = vst [vmem:[#allocation40_spill] sm:$0xff] %v16075_v0  ;;  %16077 = vst [vmem:[#allocation41_spill] sm:$0xff] %v10842_v21  ;;  %v102_v56 = vsel %vm10772_vm11, 1.0, %v16078_v32  ;;  %v10855_v13 = vand.u32 4294901760, %v10834_v36  ;;  %8699 = vmatpush3.msk.msra.mxu0 %vm10716_vm8, %v15412_v19  ;;  %8770 = vmatprep.subr.mxu1 %v559_v40  ;;  %v588_v11 = vsub.f32 %v10803_v45, %v10826_v58  ;;  %v101_v9 = vsel %vm10786_vm12, 1.0, %v16078_v32  ;;  %v126_v60 = vld [vmem:[#allocation5 + $0x60] sm:$0xff] }
  0x41   :  { %16079 = vst [vmem:[#allocation42_spill] sm:$0xff] %v10847_v24  ;;  %v10857_v22 = vsub.f32 %v102_v56, %v102_v56  ;;  %v10866_v41 = vsub.f32 %v115_v48, %v10847_v24  ;;  %8700 = vmatprep.subr.msk.mxu0 %vm10741_vm9, %v15412_v19  ;;  %8771 = vmatpush3.msra.mxu1 %v559_v40  ;;  %v577_v40 = vand.u32 4294901760, %v576_v57  ;;  %v10891_v5 = vand.u32 4294901760, %v116_v12  ;;  %v16178_v20 = vld [vmem:[#allocation34_spill] sm:$0xff] }
  0x42   :  { %16080 = vst [vmem:[#allocation43_spill] sm:$0xff] %v10855_v13  ;;  %v594_v56 = vsub.f32 %v10834_v36, %v10855_v13  ;;  %vm10878_vm15 = vcmp.eq.s32.totalorder %v10551_v1, %v10577_v10  ;;  %v10885_v23 = vsub.f32 %v101_v9, %v101_v9  ;;  %8701 = vmatpush3.msk.msra.mxu0 %vm10741_vm9, %v15412_v19  ;;  %v100_v10 = vsel %vm10821_vm13, 1.0, %v16078_v32  ;;  %v118_v13 = vld [vmem:[#allocation5 + $0x20] sm:$0xff] }
  0x43   :  { %16081 = vst [vmem:[#allocation44_spill] sm:$0xff] %v10866_v41  ;;  %v16083_v8 = vsel %vm10878_vm15, 4294967295, %v16082_v8  ;;  %v10883_v48 = vand.u32 4294901760, %v10857_v22  ;;  %8772 = vmatprep.subr.mxu1 %v565_v49  ;;  %16086 = vst [vmem:[#allocation47_spill] sm:$0xff] %v10891_v5  ;;  %8702 = vmatprep.subr.msk.mxu0 %vm10757_vm10, %v15412_v19  ;;  %v583_v9 = vand.u32 4294901760, %v582_v14  ;;  %v16087_v1 = vand.u32 4294901760, %v10842_v21 }
  0x44   :  { %16084 = vst [vmem:[#allocation45_spill] sm:$0xff] %v16083_v8  ;;  %8773 = vmatpush3.msra.mxu1 %v565_v49  ;;  %v10905_v57 = vand.u32 4294901760, %v10885_v23  ;;  %v10907_v6 = vsub.f32 %v100_v10, %v100_v10  ;;  %8703 = vmatpush3.msk.msra.mxu0 %vm10757_vm10, %v15412_v19  ;;  %v589_v3 = vand.u32 4294901760, %v588_v11  ;;  %v595_v2 = vand.u32 4294901760, %v594_v56 }
  0x45   :  { %16085 = vst [vmem:[#allocation46_spill] sm:$0xff] %v10883_v48  ;;  %v10902_v4 = vsub.f32 %v10842_v21, %v16087_v1  ;;  %8774 = vmatprep.subr.mxu1 %v571_v50  ;;  %v10913_v49 = vsub.f32 %v116_v12, %v10891_v5  ;;  %v10915_v14 = vand.u32 4294901760, %v117_v7  ;;  %8704 = vmatprep.subr.msk.mxu0 %vm10772_vm11, %v15412_v19  ;;  %v16091_v10 = vand.u32 4294901760, %v10866_v41 }
  0x46   :  { %16088 = vst [vmem:[#allocation48_spill] sm:$0xff] %v10905_v57  ;;  %8775 = vmatpush3.msra.mxu1 %v571_v50  ;;  %v600_v1 = vsub.f32 %v10857_v22, %v10883_v48  ;;  %v10928_v11 = vand.u32 4294901760, %v10907_v6  ;;  %v99_v12 = vsel %vm10830_vm14, 1.0, %v16078_v32  ;;  %8705 = vmatpush3.msk.msra.mxu0 %vm10772_vm11, %v15412_v19  ;;  %v606_v50 = vsub.f32 %v10885_v23, %v10905_v57 }
  0x47   :  { %16089 = vst [vmem:[#allocation49_spill] sm:$0xff] %v10913_v49  ;;  %16090 = vst [vmem:[#allocation50_spill] sm:$0xff] %v10915_v14  ;;  %v10925_v58 = vsub.f32 %v10866_v41, %v16091_v10  ;;  %8776 = vmatprep.subr.mxu1 %v577_v40  ;;  %v15389_v56 = vand.u32 4294901760, %v10913_v49  ;;  %v10940_v10 = vsub.f32 %v117_v7, %v10915_v14  ;;  %8706 = vmatprep.subr.msk.mxu0 %vm10786_vm12, %v15412_v19  ;;  %v123_v41 = vld [vmem:[#allocation5 + $0x48] sm:$0xff] }
  0x48   :  { %16092 = vst [vmem:[#allocation51_spill] sm:$0xff] %v10928_v11  ;;  %v10942_v48 = vsub.f32 %v99_v12, %v99_v12  ;;  %8777 = vmatpush3.msra.mxu1 %v577_v40  ;;  %v215_v61 = vand.u32 4294901760, %v10902_v4  ;;  %v612_v52 = vsub.f32 %v10907_v6, %v10928_v11  ;;  %v10950_v57 = vand.u32 4294901760, %v118_v13  ;;  %8707 = vmatpush3.msk.msra.mxu0 %vm10786_vm12, %v15412_v19  ;;  %v122_v4 = vld [vmem:[#allocation5 + $0x40] sm:$0xff] }
  0x49   :  { %16093 = vst [vmem:[#allocation52_spill] sm:$0xff] %v10940_v10  ;;  %v98_v7 = vsel %vm10878_vm15, 1.0, %v16078_v32  ;;  %8778 = vmatprep.subr.mxu1 %v583_v9  ;;  %v234_v40 = vsub.f32 %v10913_v49, %v15389_v56  ;;  %8708 = vmatprep.subr.msk.mxu0 %vm10821_vm13, %v15412_v19  ;;  %v601_v32 = vand.u32 4294901760, %v600_v1  ;;  %v10973_v37 = vand.u32 4294901760, %v119_v51 }
  0x4a   :  { %16094 = vst [vmem:[#allocation53_spill] sm:$0xff] %v10942_v48  ;;  %16095 = vst [vmem:[#allocation54_spill] sm:$0xff] %v10950_v57  ;;  %v10963_v12 = vand.u32 4294901760, %v10942_v48  ;;  %v10965_v11 = vsub.f32 %v98_v7, %v98_v7  ;;  %8779 = vmatpush3.msra.mxu1 %v583_v9  ;;  %v10971_v43 = vsub.f32 %v118_v13, %v10950_v57  ;;  %v10975_v56 = vand.u32 4294901760, %v120_v42 }
  0x4b   :  { %16099 = vst [vmem:[#allocation58_spill] sm:$0xff] %v10973_v37  ;;  %8709 = vmatpush3.msk.msra.mxu0 %vm10821_vm13, %v15412_v19  ;;  %8780 = vmatprep.subr.mxu1 %v589_v3  ;;  %v225_v7 = vand.u32 4294901760, %v10925_v58  ;;  %v607_v34 = vand.u32 4294901760, %v606_v50  ;;  %v16101_v33 = vand.u32 4294901760, %v10940_v10  ;;  %v10992_v49 = vsub.f32 %v119_v51, %v10973_v37 }
  0x4c   :  { %16096 = vst [vmem:[#allocation55_spill] sm:$0xff] %v10963_v12  ;;  %16097 = vst [vmem:[#allocation56_spill] sm:$0xff] %v10965_v11  ;;  %v10985_v13 = vand.u32 4294901760, %v10965_v11  ;;  %8710 = vmatprep.subr.msk.mxu0 %vm10830_vm14, %v15412_v19  ;;  %8781 = vmatpush3.msra.mxu1 %v589_v3  ;;  %v10995_v58 = vsub.f32 %v120_v42, %v10975_v56  ;;  %v10997_v50 = vand.u32 4294901760, %v121_v47  ;;  %v613_v21 = vand.u32 4294901760, %v612_v52 }
  0x4d   :  { %16098 = vst [vmem:[#allocation57_spill] sm:$0xff] %v10971_v43  ;;  %16100 = vst [vmem:[#allocation59_spill] sm:$0xff] %v10975_v56  ;;  %v244_v9 = vsub.f32 %v10940_v10, %v16101_v33  ;;  %v124_v33 = vld [vmem:[#allocation5 + $0x50] sm:$0xff]  ;;  %8711 = vmatpush3.msk.msra.mxu0 %vm10830_vm14, %v15412_v19  ;;  %8782 = vmatprep.subr.mxu1 %v595_v2  ;;  %v235_v10 = vand.u32 4294901760, %v234_v40  ;;  %v618_v3 = vsub.f32 %v10942_v48, %v10963_v12  ;;  %v125_v40 = vld [vmem:[#allocation5 + $0x58] sm:$0xff] }
  0x4e   :  { %16102 = vst [vmem:[#allocation60_spill] sm:$0xff] %v10985_v13  ;;  %16103 = vst [vmem:[#allocation61_spill] sm:$0xff] %v10995_v58  ;;  %v11004_v1 = vand.u32 4294901760, %v122_v4  ;;  %8712 = vmatprep.subr.msk.mxu0 %vm10878_vm15, %v15412_v19  ;;  %8783 = vmatpush3.msra.mxu1 %v595_v2  ;;  %v16106_v42 = vand.u32 4294901760, %v10971_v43  ;;  %v11015_v52 = vsub.f32 %v121_v47, %v10997_v50  ;;  %v11027_v0 = vand.u32 4294901760, %v124_v33 }
  0x4f   :  { %16104 = vst [vmem:[#allocation62_spill] sm:$0xff] %v10997_v50  ;;  %8713 = vmatpush3.msk.msra.mxu0 %vm10878_vm15, %v15412_v19  ;;  %8714 = vmatprep.mubr.f32.mxu0 %v215_v61  ;;  %v624_v2 = vsub.f32 %v10965_v11, %v10985_v13  ;;  %v245_v47 = vand.u32 4294901760, %v244_v9  ;;  %v16110_v48 = vand.u32 4294901760, %v10992_v49  ;;  %v127_v9 = vld [vmem:[#allocation5 + $0x68] sm:$0xff]  ;;  %v16165_v16 = vand.u32 4294901760, %v10992_v49 }
  0x50   :  { %16105 = vst [vmem:[#allocation63_spill] sm:$0xff] %v11004_v1  ;;  %v254_v51 = vsub.f32 %v10971_v43, %v16106_v42  ;;  %v11023_v12 = vsub.f32 %v122_v4, %v11004_v1  ;;  %v11025_v42 = vand.u32 4294901760, %v123_v41  ;;  %16109 = vst [vmem:[#allocation66_spill] sm:$0xff] %v11027_v0  ;;  %8784 = vmatprep.subr.mxu1 %v601_v32  ;;  %8715 = vmatmul.mubr.f32.vlgmr.msra.gmra.mxu0 %v225_v7 }
  0x51   :  { %v264_v19 = vsub.f32 %v10992_v49, %v16110_v48  ;;  %v15422_v61 = vand.u32 4294901760, %v11015_v52  ;;  %8785 = vmatpush3.msra.mxu1 %v601_v32  ;;  %8717 = vmatprep.mubr.f32.mxu0 %v235_v10  ;;  %v16111_v4 = vand.u32 4294901760, %v10995_v58  ;;  %v11040_v11 = vsub.f32 %v124_v33, %v11027_v0 }
  0x52   :  { %16107 = vst [vmem:[#allocation64_spill] sm:$0xff] %v11023_v12  ;;  %16108 = vst [vmem:[#allocation65_spill] sm:$0xff] %v11025_v42  ;;  %v255_v43 = vand.u32 4294901760, %v254_v51  ;;  %v11037_v8 = vsub.f32 %v123_v41, %v11025_v42  ;;  %v11042_v7 = vand.u32 4294901760, %v125_v40  ;;  %8786 = vmatprep.subr.mxu1 %v607_v34  ;;  %v619_v51 = vand.u32 4294901760, %v618_v3  ;;  %8842 = vmatprep.subr.mxu0 %v10636_v25  ;;  %v128_v41 = vld [vmem:[#allocation5 + $0x70] sm:$0xff] }
  0x53   :  { %v274_v13 = vsub.f32 %v10995_v58, %v16111_v4  ;;  %v11046_v48 = vand.u32 4294901760, %v126_v60  ;;  %8787 = vmatpush3.msra.mxu1 %v607_v34  ;;  %v625_v10 = vand.u32 4294901760, %v624_v2  ;;  %v265_v4 = vand.u32 4294901760, %v264_v19  ;;  %8794 = vmatprep.mubr.f32.mxu1 %v10814_v53  ;;  %v129_v2 = vld [vmem:[#allocation5 + $0x78] sm:$0xff] }
  0x54   :  { %16112 = vst [vmem:[#allocation67_spill] sm:$0xff] %v11042_v7  ;;  %8788 = vmatprep.subr.mxu1 %v613_v21  ;;  %8718 = vmatmul.mubr.f32.gmra.mxu0 %v245_v47  ;;  %v284_v33 = vsub.f32 %v11015_v52, %v15422_v61  ;;  %v11054_v58 = vsub.f32 %v125_v40, %v11042_v7  ;;  %v11056_v32 = vand.u32 4294901760, %v127_v9  ;;  %v16116_v47 = vand.u32 4294901760, %v11023_v12 }
  0x55   :  { %16113 = vst [vmem:[#allocation68_spill] sm:$0xff] %v11046_v48  ;;  %8789 = vmatpush3.msra.mxu1 %v613_v21  ;;  %8720 = vmatprep.mubr.f32.mxu0 %v255_v43  ;;  %v275_v34 = vand.u32 4294901760, %v274_v13  ;;  %v11064_v3 = vsub.f32 %v126_v60, %v11046_v48  ;;  %v11066_v40 = vand.u32 4294901760, %v128_v41  ;;  %v130_v43 = vld [vmem:[#allocation5 + $0x80] sm:$0xff]  ;;  %v11076_v60 = vand.u32 4294901760, %v129_v2 }
  0x56   :  { %16114 = vst [vmem:[#allocation69_spill] sm:$0xff] %v11054_v58  ;;  %16115 = vst [vmem:[#allocation70_spill] sm:$0xff] %v11056_v32  ;;  %8790 = vmatprep.subr.mxu1 %v619_v51  ;;  %8843 = vmatpush3.msra.mxu0 %v10636_v25  ;;  %v294_v61 = vsub.f32 %v11023_v12, %v16116_v47  ;;  %v11070_v21 = vsub.f32 %v127_v9, %v11056_v32  ;;  %v285_v13 = vand.u32 4294901760, %v284_v33  ;;  %v131_v9 = vld [vmem:[#allocation5 + $0x88] sm:$0xff]  ;;  %v16122_v12 = vmov 1.0  }
  0x57   :  { %16117 = vst [vmem:[#allocation71_spill] sm:$0xff] %v11064_v3  ;;  %16118 = vst [vmem:[#allocation72_spill] sm:$0xff] %v11066_v40  ;;  %8791 = vmatpush3.msra.mxu1 %v619_v51  ;;  %8844 = vmatprep.subr.mxu0 %v10644_v27  ;;  %v16120_v25 = vand.u32 4294901760, %v11037_v8  ;;  %v16121_v51 = vand.u32 4294901760, %v11040_v11  ;;  %v11089_v47 = vand.u32 4294901760, %v130_v43  ;;  %v11103_v33 = vsub.f32 %v129_v2, %v11076_v60 }
  0x58   :  { %16119 = vst [vmem:[#allocation73_spill] sm:$0xff] %v11070_v21  ;;  %8792 = vmatprep.subr.mxu1 %v625_v10  ;;  %8721 = vmatmul.mubr.f32.gmra.mxu0 %v265_v4  ;;  %v295_v4 = vand.u32 4294901760, %v294_v61  ;;  %v16169_v17 = vand.u32 4294901760, %v11015_v52  ;;  %v16174_v18 = vand.u32 4294901760, %v11037_v8 }
  0x59   :  { %v304_v19 = vsub.f32 %v11037_v8, %v16120_v25  ;;  %8793 = vmatpush3.msra.mxu1 %v625_v10  ;;  %8723 = vmatprep.mubr.f32.mxu0 %v275_v34  ;;  %v314_v53 = vsub.f32 %v11040_v11, %v16121_v51  ;;  %v11087_v25 = vsub.f32 %v128_v41, %v11066_v40  ;;  %v132_v34 = vld [vmem:[#allocation5 + $0x90] sm:$0xff]  ;;  %v16123_v41 = vand.u32 4294901760, %v11054_v58  ;;  %v133_v10 = vld [vmem:[#allocation5 + $0x98] sm:$0xff]  ;;  %v16162_v15 = vld [vmem:[#allocation64_spill] sm:$0xff] }
  0x5a   :  { %8795 = vmatmul.mubr.f32.vlgmr.msra.gmra.mxu1 %v10847_v24  ;;  %8922 = vmatprep.subr.msk.mxu1 %vm10593_vm0, %v16122_v12  ;;  %v11105_v24 = vand.u32 4294901760, %v131_v9  ;;  %v16186_v29 = vand.u32 4294901760, %v11103_v33 }
  0x5b   :  { %8923 = vmatpush3.msk.msra.mxu1 %vm10593_vm0, %v16122_v12  ;;  %8797 = vmatprep.mubr.f32.mxu1 %v10891_v5  ;;  %v305_v61 = vand.u32 4294901760, %v304_v19  ;;  %v324_v51 = vsub.f32 %v11054_v58, %v16123_v41  ;;  %v16124_v19 = vand.u32 4294901760, %v11064_v3  ;;  %v11117_v5 = vsub.f32 %v130_v43, %v11089_v47 }
  0x5c   :  { %8724 = vmatmul.mubr.f32.gmra.mxu0 %v285_v13  ;;  %8924 = vmatprep.subr.msk.mxu1 %vm10599_vm1, %v16122_v12  ;;  %v315_v13 = vand.u32 4294901760, %v314_v53  ;;  %v11119_v58 = vand.u32 4294901760, %v132_v34  ;;  %v16125_v53 = vand.u32 4294901760, %v11070_v21  ;;  %v11131_v2 = vsub.f32 %v131_v9, %v11105_v24 }
  0x5d   :  { %8845 = vmatpush3.msra.mxu0 %v10644_v27  ;;  %8925 = vmatpush3.msk.msra.mxu1 %vm10599_vm1, %v16122_v12  ;;  %v334_v41 = vsub.f32 %v11064_v3, %v16124_v19  ;;  %v134_v27 = vld [vmem:[#allocation5 + $0xa0] sm:$0xff]  ;;  %v325_v19 = vand.u32 4294901760, %v324_v51  ;;  %v16127_v43 = vand.u32 4294901760, %v11087_v25  ;;  %v136_v3 = vld [vmem:[#allocation5 + $0xb0] sm:$0xff] }
  0x5e   :  { %8798 = vmatmul.mubr.f32.gmra.mxu1 %v10915_v14  ;;  %8726 = vmatprep.mubr.f32.mxu0 %v295_v4  ;;  %v344_v4 = vsub.f32 %v11070_v21, %v16125_v53  ;;  %16126 = vst [vmem:[#allocation74_spill] sm:$0xff] %v11131_v2  ;;  %v11133_v14 = vand.u32 4294901760, %v133_v10  ;;  %v11139_v53 = vand.u32 4294901760, %v134_v27  ;;  %v11147_v21 = vsub.f32 %v132_v34, %v11119_v58 }
  0x5f   :  { %8846 = vmatprep.subr.mxu0 %v10658_v30  ;;  %8800 = vmatprep.mubr.f32.mxu1 %v10950_v57  ;;  %v335_v51 = vand.u32 4294901760, %v334_v41  ;;  %v354_v9 = vsub.f32 %v11087_v25, %v16127_v43 }
  0x60   :  { %8727 = vmatmul.mubr.f32.gmra.mxu0 %v305_v61  ;;  %8926 = vmatprep.subr.msk.mxu1 %vm10605_vm2, %v16122_v12  ;;  %v135_v61 = vld [vmem:[#allocation5 + $0xa8] sm:$0xff]  ;;  %16128 = vst [vmem:[#allocation75_spill] sm:$0xff] %v11147_v21  ;;  %v11159_v34 = vsub.f32 %v133_v10, %v11133_v14 }
  0x61   :  { %8847 = vmatpush3.msra.mxu0 %v10658_v30  ;;  %8927 = vmatpush3.msk.msra.mxu1 %vm10605_vm2, %v16122_v12  ;;  %v345_v30 = vand.u32 4294901760, %v344_v4  ;;  %v11161_v57 = vand.u32 4294901760, %v135_v61  ;;  %v11168_v4 = vsub.f32 %v134_v27, %v11139_v53  ;;  %v138_v27 = vld [vmem:[#allocation5 + $0xc0] sm:$0xff] }
  0x62   :  { %8801 = vmatmul.mubr.f32.gmra.mxu1 %v10973_v37  ;;  %8729 = vmatprep.mubr.f32.mxu0 %v315_v13  ;;  %v16129_v13 = vand.u32 4294901760, %v11103_v33  ;;  %16130 = vst [vmem:[#allocation76_spill] sm:$0xff] %v11159_v34  ;;  %v137_v37 = vld [vmem:[#allocation5 + $0xb8] sm:$0xff] }
  0x63   :  { %8848 = vmatprep.subr.mxu0 %v10675_v35  ;;  %8803 = vmatprep.mubr.f32.mxu1 %v10975_v56  ;;  %v11175_v56 = vand.u32 4294901760, %v136_v3 }
  0x64   :  { %8730 = vmatmul.mubr.f32.gmra.mxu0 %v325_v19  ;;  %8928 = vmatprep.subr.msk.mxu1 %vm10611_vm3, %v16122_v12  ;;  %v364_v41 = vsub.f32 %v11103_v33, %v16129_v13  ;;  %v355_v19 = vand.u32 4294901760, %v354_v9  ;;  %v16131_v13 = vand.u32 4294901760, %v11117_v5  ;;  %v16132_v9 = vand.u32 4294901760, %v11131_v2 }
  0x65   :  { %8849 = vmatpush3.msra.mxu0 %v10675_v35  ;;  %8929 = vmatpush3.msk.msra.mxu1 %vm10611_vm3, %v16122_v12  ;;  %v11179_v35 = vand.u32 4294901760, %v137_v37 }
  0x66   :  { %8804 = vmatmul.mubr.f32.gmra.mxu1 %v10997_v50  ;;  %8732 = vmatprep.mubr.f32.mxu0 %v335_v51  ;;  %v374_v10 = vsub.f32 %v11117_v5, %v16131_v13  ;;  %v365_v51 = vand.u32 4294901760, %v364_v41  ;;  %v384_v13 = vsub.f32 %v11131_v2, %v16132_v9  ;;  %v11189_v50 = vsub.f32 %v135_v61, %v11161_v57 }
  0x67   :  { %8850 = vmatprep.subr.mxu0 %v10692_v39  ;;  %8806 = vmatprep.mubr.f32.mxu1 %v11004_v1  ;;  %v139_v1 = vld [vmem:[#allocation5 + $0xc8] sm:$0xff]  ;;  %v16133_v9 = vand.u32 4294901760, %v11147_v21  ;;  %v11201_v61 = vsub.f32 %v136_v3, %v11175_v56  ;;  %v11203_v2 = vand.u32 4294901760, %v138_v27 }
  0x68   :  { %8733 = vmatmul.mubr.f32.gmra.mxu0 %v345_v30  ;;  %8930 = vmatprep.subr.msk.mxu1 %vm10620_vm4, %v16122_v12  ;;  %v375_v41 = vand.u32 4294901760, %v374_v10  ;;  %v140_v30 = vld [vmem:[#allocation5 + $0xd0] sm:$0xff]  ;;  %v16135_v10 = vand.u32 4294901760, %v11159_v34  ;;  %v16196_v54 = vand.u32 4294901760, %v11189_v50 }
  0x69   :  { %8851 = vmatpush3.msra.mxu0 %v10692_v39  ;;  %8931 = vmatpush3.msk.msra.mxu1 %vm10620_vm4, %v16122_v12  ;;  %v394_v43 = vsub.f32 %v11147_v21, %v16133_v9  ;;  %v11208_v39 = vsub.f32 %v137_v37, %v11179_v35  ;;  %v16136_v37 = vand.u32 4294901760, %v11168_v4  ;;  %v11229_v9 = vsub.f32 %v138_v27, %v11203_v2  ;;  %v142_v21 = vld [vmem:[#allocation5 + $0xe0] sm:$0xff] }
  0x6a   :  { %8807 = vmatmul.mubr.f32.gmra.mxu1 %v11025_v42  ;;  %8735 = vmatprep.mubr.f32.mxu0 %v355_v19  ;;  %v385_v19 = vand.u32 4294901760, %v384_v13  ;;  %v404_v3 = vsub.f32 %v11159_v34, %v16135_v10  ;;  %v11217_v42 = vand.u32 4294901760, %v139_v1  ;;  %v11231_v34 = vand.u32 4294901760, %v140_v30 }
  0x6b   :  { %8852 = vmatprep.subr.mxu0 %v10707_v44  ;;  %8809 = vmatprep.mubr.f32.mxu1 %v11027_v0  ;;  %16134 = vst [vmem:[#allocation77_spill] sm:$0xff] %v11208_v39  ;;  %v141_v0 = vld [vmem:[#allocation5 + $0xd8] sm:$0xff]  ;;  %v395_v13 = vand.u32 4294901760, %v394_v43  ;;  %v16210_v62 = vand.u32 4294901760, %v11229_v9 }
  0x6c   :  { %8736 = vmatmul.mubr.f32.gmra.mxu0 %v365_v51  ;;  %8932 = vmatprep.subr.msk.mxu1 %vm10640_vm5, %v16122_v12  ;;  %v414_v51 = vsub.f32 %v11168_v4, %v16136_v37  ;;  %v405_v43 = vand.u32 4294901760, %v404_v3  ;;  %v11243_v37 = vsub.f32 %v139_v1, %v11217_v42  ;;  %v11245_v10 = vand.u32 4294901760, %v141_v0 }
  0x6d   :  { %8853 = vmatpush3.msra.mxu0 %v10707_v44  ;;  %8933 = vmatpush3.msk.msra.mxu1 %vm10640_vm5, %v16122_v12  ;;  %v143_v44 = vld [vmem:[#allocation5 + $0xe8] sm:$0xff]  ;;  %v16138_v3 = vand.u32 4294901760, %v11201_v61 }
  0x6e   :  { %8810 = vmatmul.mubr.f32.gmra.mxu1 %v11042_v7  ;;  %8738 = vmatprep.mubr.f32.mxu0 %v375_v41  ;;  %v16137_v41 = vand.u32 4294901760, %v11189_v50  ;;  %v11259_v7 = vand.u32 4294901760, %v142_v21  ;;  %v11273_v1 = vand.u32 4294901760, %v143_v44 }
  0x6f   :  { %8854 = vmatprep.subr.mxu0 %v10745_v55  ;;  %8812 = vmatprep.mubr.f32.mxu1 %v11046_v48  ;;  %v11257_v48 = vsub.f32 %v140_v30, %v11231_v34  ;;  %v11271_v30 = vsub.f32 %v141_v0, %v11245_v10 }
  0x70   :  { %8739 = vmatmul.mubr.f32.gmra.mxu0 %v385_v19  ;;  %8934 = vmatprep.subr.msk.mxu1 %vm10654_vm6, %v16122_v12  ;;  %v424_v27 = vsub.f32 %v11189_v50, %v16137_v41  ;;  %v415_v19 = vand.u32 4294901760, %v414_v51  ;;  %v434_v41 = vsub.f32 %v11201_v61, %v16138_v3 }
  0x71   :  { %8855 = vmatpush3.msra.mxu0 %v10745_v55  ;;  %8935 = vmatpush3.msk.msra.mxu1 %vm10654_vm6, %v16122_v12  ;;  %v16139_v55 = vand.u32 4294901760, %v11208_v39 }
  0x72   :  { %8813 = vmatmul.mubr.f32.gmra.mxu1 %v11056_v32  ;;  %8741 = vmatprep.mubr.f32.mxu0 %v395_v13  ;;  %v425_v13 = vand.u32 4294901760, %v424_v27  ;;  %v144_v32 = vld [vmem:[#allocation5 + $0xf0] sm:$0xff]  ;;  %v16140_v27 = vand.u32 4294901760, %v11229_v9 }
  0x73   :  { %8856 = vmatprep.subr.mxu0 %v10776_v63  ;;  %8815 = vmatprep.mubr.f32.mxu1 %v11066_v40  ;;  %v444_v51 = vsub.f32 %v11208_v39, %v16139_v55  ;;  %v435_v55 = vand.u32 4294901760, %v434_v41  ;;  %v11285_v40 = vsub.f32 %v142_v21, %v11259_v7  ;;  %v11289_v39 = vand.u32 4294901760, %v144_v32 }
  0x74   :  { %8742 = vmatmul.mubr.f32.gmra.mxu0 %v405_v43  ;;  %8936 = vmatprep.subr.msk.mxu1 %vm10688_vm7, %v16122_v12  ;;  %v145_v43 = vld [vmem:[#allocation5 + $0xf8] sm:$0xff]  ;;  %v454_v3 = vsub.f32 %v11229_v9, %v16140_v27  ;;  %v11299_v21 = vsub.f32 %v143_v44, %v11273_v1 }
  0x75   :  { %8857 = vmatpush3.msra.mxu0 %v10776_v63  ;;  %8937 = vmatpush3.msk.msra.mxu1 %vm10688_vm7, %v16122_v12  ;;  %v445_v63 = vand.u32 4294901760, %v444_v51  ;;  %v11301_v0 = vand.u32 4294901760, %v145_v43 }
  0x76   :  { %8816 = vmatmul.mubr.f32.gmra.mxu1 %v11076_v60  ;;  %8744 = vmatprep.mubr.f32.mxu0 %v415_v19  ;;  %v16141_v19 = vand.u32 4294901760, %v11243_v37  ;;  %v455_v51 = vand.u32 4294901760, %v454_v3  ;;  %v16143_v3 = vand.u32 4294901760, %v11271_v30 }
  0x77   :  { %8858 = vmatprep.subr.mxu0 %v10790_v31  ;;  %8818 = vmatprep.mubr.f32.mxu1 %v11089_v47  ;;  %v11325_v27 = vsub.f32 %v145_v43, %v11301_v0 }
  0x78   :  { %8745 = vmatmul.mubr.f32.gmra.mxu0 %v425_v13  ;;  %8938 = vmatprep.subr.msk.mxu1 %vm10716_vm8, %v16122_v12  ;;  %v464_v41 = vsub.f32 %v11243_v37, %v16141_v19  ;;  %v16142_v13 = vand.u32 4294901760, %v11257_v48 }
  0x79   :  { %8859 = vmatpush3.msra.mxu0 %v10790_v31  ;;  %8939 = vmatpush3.msk.msra.mxu1 %vm10716_vm8, %v16122_v12  ;;  %v11315_v31 = vsub.f32 %v144_v32, %v11289_v39 }
  0x7a   :  { %8819 = vmatmul.mubr.f32.gmra.mxu1 %v11105_v24  ;;  %8747 = vmatprep.mubr.f32.mxu0 %v435_v55  ;;  %v474_v19 = vsub.f32 %v11257_v48, %v16142_v13  ;;  %v465_v44 = vand.u32 4294901760, %v464_v41  ;;  %v484_v55 = vsub.f32 %v11271_v30, %v16143_v3  ;;  %v503_v13 = vand.u32 4294901760, %v11299_v21 }
  0x7b   :  { %8860 = vmatprep.subr.mxu0 %v10803_v45  ;;  %8821 = vmatprep.mubr.f32.mxu1 %v11119_v58  ;;  %v513_v43 = vand.u32 4294901760, %v11315_v31 }
  0x7c   :  { %8748 = vmatmul.mubr.f32.gmra.mxu0 %v445_v63  ;;  %8940 = vmatprep.subr.msk.mxu1 %vm10741_vm9, %v16122_v12  ;;  %v475_v32 = vand.u32 4294901760, %v474_v19  ;;  %v16144_v63 = vand.u32 4294901760, %v11285_v40  ;;  %v15469_v19 = vand.u32 4294901760, %v11325_v27 }
  0x7d   :  { %8861 = vmatpush3.msra.mxu0 %v10803_v45  ;;  %8941 = vmatpush3.msk.msra.mxu1 %vm10741_vm9, %v16122_v12  ;;  %v485_v45 = vand.u32 4294901760, %v484_v55  ;;  %v514_v3 = vsub.f32 %v11315_v31, %v513_v43 }
  0x7e   :  { %8822 = vmatmul.mubr.f32.gmra.mxu1 %v11133_v14  ;;  %8750 = vmatprep.mubr.f32.mxu0 %v455_v51  ;;  %v494_v41 = vsub.f32 %v11285_v40, %v16144_v63  ;;  %v504_v51 = vsub.f32 %v11299_v21, %v503_v13  ;;  %v524_v55 = vsub.f32 %v11325_v27, %v15469_v19  ;;  %v16159_v19 = vld [vmem:[#allocation61_spill] sm:$0xff] }
  0x7f   :  { %8862 = vmatprep.subr.mxu0 %v10834_v36  ;;  %8824 = vmatprep.mubr.f32.mxu1 %v11139_v53 }
  0x80   :  { %8751 = vmatmul.mubr.f32.gmra.mxu0 %v465_v44  ;;  %8942 = vmatprep.subr.msk.mxu1 %vm10757_vm10, %v16122_v12  ;;  %v495_v44 = vand.u32 4294901760, %v494_v41  ;;  %v525_v63 = vand.u32 4294901760, %v524_v55  ;;  %v16154_v55 = vld [vmem:[#allocation57_spill] sm:$0xff] }
  0x81   :  { %8863 = vmatpush3.msra.mxu0 %v10834_v36  ;;  %8943 = vmatpush3.msk.msra.mxu1 %vm10757_vm10, %v16122_v12  ;;  %v505_v36 = vand.u32 4294901760, %v504_v51  ;;  %v16236_v51 = vld [vmem:[#allocation50_spill] sm:$0xff] }
  0x82   :  { %8825 = vmatmul.mubr.f32.gmra.mxu1 %v11161_v57  ;;  %8753 = vmatprep.mubr.f32.mxu0 %v475_v32  ;;  %v515_v32 = vand.u32 4294901760, %v514_v3 }
  0x83   :  { %8864 = vmatprep.subr.mxu0 %v10857_v22  ;;  %8827 = vmatprep.mubr.f32.mxu1 %v11175_v56 }
  0x84   :  { %8754 = vmatmul.mubr.f32.gmra.mxu0 %v485_v45  ;;  %8944 = vmatprep.subr.msk.mxu1 %vm10772_vm11, %v16122_v12  ;;  %v16149_v45 = vld [vmem:[#allocation44_spill] sm:$0xff] }
  0x85   :  { %8865 = vmatpush3.msra.mxu0 %v10857_v22  ;;  %8945 = vmatpush3.msk.msra.mxu1 %vm10772_vm11, %v16122_v12  ;;  %v16145_v22 = vld [vmem:[#allocation53_spill] sm:$0xff] }
  0x86   :  { %8828 = vmatmul.mubr.f32.gmra.mxu1 %v11179_v35  ;;  %8756 = vmatprep.mubr.f32.mxu0 %v495_v44  ;;  %v16151_v44 = vld [vmem:[#allocation49_spill] sm:$0xff] }
  0x87   :  { %8866 = vmatprep.subr.mxu0 %v10885_v23  ;;  %8830 = vmatprep.mubr.f32.mxu1 %v11203_v2 }
  0x88   :  { %8757 = vmatmul.mubr.f32.gmra.mxu0 %v505_v36  ;;  %8946 = vmatprep.subr.msk.mxu1 %vm10786_vm12, %v16122_v12  ;;  %v16153_v36 = vld [vmem:[#allocation52_spill] sm:$0xff] }
  0x89   :  { %8867 = vmatpush3.msra.mxu0 %v10885_v23  ;;  %8947 = vmatpush3.msk.msra.mxu1 %vm10786_vm12, %v16122_v12  ;;  %v16147_v23 = vld [vmem:[#allocation56_spill] sm:$0xff] }
  0x8a   :  { %8831 = vmatmul.mubr.f32.gmra.mxu1 %v11217_v42  ;;  %8868 = vmatprep.subr.mxu0 %v10907_v6 }
  0x8b   :  { %8759 = vmatprep.mubr.f32.mxu0 %v515_v32  ;;  %8869 = vmatpush3.msra.mxu0 %v10907_v6  ;;  %v16148_v6 = vld [vmem:[#allocation41_spill] sm:$0xff]  ;;  %v16155_v32 = vld [vmem:[#allocation27_spill] sm:$0xff] }
  0x8c   :  { %8760 = vmatmul.mubr.f32.gmra.mxu0 %v525_v63  ;;  %8833 = vmatprep.mubr.f32.mxu1 %v11231_v34  ;;  %v16156_v63 = vand.u32 4294901760, %v16148_v6 }
  0x8d   :  { %8870 = vmatprep.subr.mxu0 %v16145_v22  ;;  %8948 = vmatprep.subr.msk.mxu1 %vm10821_vm13, %v16122_v12 }
  0x8e   :  { %8834 = vmatmul.mubr.f32.gmra.mxu1 %v11245_v10  ;;  %8871 = vmatpush3.msra.mxu0 %v16145_v22  ;;  %v16157_v22 = vld [vmem:[#allocation28_spill] sm:$0xff] }
  0x8f   :  { %8872 = vmatprep.subr.mxu0 %v16147_v23  ;;  %8949 = vmatpush3.msk.msra.mxu1 %vm10821_vm13, %v16122_v12 }
  0x90   :  { %8873 = vmatpush3.msra.mxu0 %v16147_v23  ;;  %8874 = vmatprep.mubr.f32.mxu0 %v16148_v6  ;;  %v16158_v23 = vand.u32 4294901760, %v16149_v45  ;;  %v16160_v6 = vand.u32 4294901760, %v16151_v44 }
  0x91   :  { %8836 = vmatprep.mubr.f32.mxu1 %v11259_v7  ;;  %8875 = vmatmul.mubr.f32.vlgmr.msra.gmra.mxu0 %v16149_v45  ;;  %v16161_v45 = vand.u32 4294901760, %v16153_v36 }
  0x92   :  { %8837 = vmatmul.mubr.f32.gmra.mxu1 %v11273_v1  ;;  %8950 = vmatprep.subr.msk.mxu1 %vm10830_vm14, %v16122_v12 }
  0x93   :  { %8951 = vmatpush3.msk.msra.mxu1 %vm10830_vm14, %v16122_v12  ;;  %8877 = vmatprep.mubr.f32.mxu0 %v16151_v44  ;;  %v16164_v44 = vand.u32 4294901760, %v16154_v55 }
  0x94   :  { %8839 = vmatprep.mubr.f32.mxu1 %v11289_v39  ;;  %8952 = vmatprep.subr.msk.mxu1 %vm10878_vm15, %v16122_v12 }
  0x95   :  { %8878 = vmatmul.mubr.f32.gmra.mxu0 %v16153_v36  ;;  %8953 = vmatpush3.msk.msra.mxu1 %vm10878_vm15, %v16122_v12  ;;  %v16166_v36 = vld [vmem:[#allocation30_spill] sm:$0xff] }
  0x96   :  { %8840 = vmatmul.mubr.f32.gmra.mxu1 %v11301_v0  ;;  %8880 = vmatprep.mubr.f32.mxu0 %v16154_v55  ;;  %v16167_v55 = vand.u32 4294901760, %v16159_v19 }
  0x97   :  { %9002 = vmatprep.subr.mxu0 %v16155_v32  ;;  %8954 = vmatprep.mubr.f32.mxu1 %v16156_v63  ;;  %v16168_v63 = vld [vmem:[#allocation69_spill] sm:$0xff] }
  0x98   :  { %9003 = vmatpush3.msra.mxu0 %v16155_v32  ;;  %9082 = vmatprep.subr.msk.mxu1 %vm10593_vm0, %v16122_v12  ;;  %v16163_v32 = vld [vmem:[#allocation29_spill] sm:$0xff] }
  0x99   :  { %8881 = vmatmul.mubr.f32.gmra.mxu0 %v10992_v49  ;;  %9004 = vmatprep.subr.mxu0 %v16157_v22  ;;  %v16170_v49 = vld [vmem:[#allocation71_spill] sm:$0xff] }
  0x9a   :  { %8955 = vmatmul.mubr.f32.vlgmr.msra.gmra.mxu1 %v16158_v23  ;;  %8883 = vmatprep.mubr.f32.mxu0 %v16159_v19  ;;  %v16172_v19 = vand.u32 4294901760, %v16162_v15  ;;  %v16173_v23 = vld [vmem:[#allocation73_spill] sm:$0xff] }
  0x9b   :  { %9083 = vmatpush3.msk.msra.mxu1 %vm10593_vm0, %v16122_v12  ;;  %8957 = vmatprep.mubr.f32.mxu1 %v16160_v6  ;;  %v16176_v6 = vand.u32 4294901760, %v11040_v11  ;;  %v16181_v26 = vand.u32 4294901760, %v16173_v23 }
  0x9c   :  { %9005 = vmatpush3.msra.mxu0 %v16157_v22  ;;  %9084 = vmatprep.subr.msk.mxu1 %vm10599_vm1, %v16122_v12  ;;  %v16171_v22 = vld [vmem:[#allocation31_spill] sm:$0xff] }
  0x9d   :  { %8884 = vmatmul.mubr.f32.gmra.mxu0 %v11015_v52  ;;  %9085 = vmatpush3.msk.msra.mxu1 %vm10599_vm1, %v16122_v12  ;;  %v16175_v52 = vld [vmem:[#allocation32_spill] sm:$0xff] }
  0x9e   :  { %8958 = vmatmul.mubr.f32.gmra.mxu1 %v16161_v45  ;;  %8886 = vmatprep.mubr.f32.mxu0 %v16162_v15  ;;  %v16180_v45 = vld [vmem:[#allocation74_spill] sm:$0xff]  ;;  %v16182_v15 = vld [vmem:[#allocation75_spill] sm:$0xff] }
  0x9f   :  { %9006 = vmatprep.subr.mxu0 %v16163_v32  ;;  %8960 = vmatprep.mubr.f32.mxu1 %v16164_v44  ;;  %v16184_v44 = vand.u32 4294901760, %v11087_v25  ;;  %v16189_v38 = vand.u32 4294901760, %v16180_v45 }
  0xa0   :  { %9007 = vmatpush3.msra.mxu0 %v16163_v32  ;;  %9086 = vmatprep.subr.msk.mxu1 %vm10605_vm2, %v16122_v12  ;;  %v16183_v32 = vld [vmem:[#allocation35_spill] sm:$0xff] }
  0xa1   :  { %8887 = vmatmul.mubr.f32.gmra.mxu0 %v11037_v8  ;;  %9087 = vmatpush3.msk.msra.mxu1 %vm10605_vm2, %v16122_v12  ;;  %v16177_v8 = vand.u32 4294901760, %v16168_v63 }
  0xa2   :  { %8961 = vmatmul.mubr.f32.gmra.mxu1 %v16165_v16  ;;  %8889 = vmatprep.mubr.f32.mxu0 %v11040_v11  ;;  %v16179_v11 = vand.u32 4294901760, %v16170_v49  ;;  %v16185_v16 = vld [vmem:[#allocation76_spill] sm:$0xff] }
  0xa3   :  { %9008 = vmatprep.subr.mxu0 %v16166_v36  ;;  %8963 = vmatprep.mubr.f32.mxu1 %v16167_v55  ;;  %v16192_v55 = vld [vmem:[#allocation77_spill] sm:$0xff]  ;;  %v16193_v46 = vand.u32 4294901760, %v16185_v16 }
  0xa4   :  { %9009 = vmatpush3.msra.mxu0 %v16166_v36  ;;  %9088 = vmatprep.subr.msk.mxu1 %vm10611_vm3, %v16122_v12  ;;  %v16187_v36 = vld [vmem:[#allocation36_spill] sm:$0xff] }
  0xa5   :  { %8890 = vmatmul.mubr.f32.gmra.mxu0 %v16168_v63  ;;  %9089 = vmatpush3.msk.msra.mxu1 %vm10611_vm3, %v16122_v12  ;;  %v16194_v63 = vld [vmem:[#allocation43_spill] sm:$0xff] }
  0xa6   :  { %8964 = vmatmul.mubr.f32.gmra.mxu1 %v16169_v17  ;;  %8892 = vmatprep.mubr.f32.mxu0 %v16170_v49  ;;  %v16195_v17 = vand.u32 4294901760, %v11168_v4  ;;  %v11557_v49 = vld [vmem:[%s15325_s1] ss:$0 sm:$0xff] }
  0xa7   :  { %9010 = vmatprep.subr.mxu0 %v16171_v22  ;;  %8966 = vmatprep.mubr.f32.mxu1 %v16172_v19  ;;  %v16201_v19 = vld [vmem:[#allocation46_spill] sm:$0xff] }
  0xa8   :  { %9011 = vmatpush3.msra.mxu0 %v16171_v22  ;;  %9090 = vmatprep.subr.msk.mxu1 %vm10620_vm4, %v16122_v12  ;;  %v16198_v22 = vmov 0 }
  0xa9   :  { %8893 = vmatmul.mubr.f32.gmra.mxu0 %v16173_v23  ;;  %9091 = vmatpush3.msk.msra.mxu1 %vm10620_vm4, %v16122_v12  ;;  %v16202_v23 = vand.u32 4294901760, %v11201_v61 }
  0xaa   :  { %8967 = vmatmul.mubr.f32.gmra.mxu1 %v16174_v18  ;;  %8895 = vmatprep.mubr.f32.mxu0 %v11087_v25  ;;  %v16188_v25 = vand.u32 4294901760, %v11117_v5  ;;  %v16204_v18 = vand.u32 4294901760, %v16192_v55 }
  0xab   :  { %9012 = vmatprep.subr.mxu0 %v16175_v52  ;;  %8969 = vmatprep.mubr.f32.mxu1 %v16176_v6  ;;  %v16209_v6 = vld [vmem:[#allocation48_spill] sm:$0xff] }
  0xac   :  { %9013 = vmatpush3.msra.mxu0 %v16175_v52  ;;  %9092 = vmatprep.subr.msk.mxu1 %vm10640_vm5, %v16122_v12  ;;  %v16206_v52 = vmov 0 }
  0xad   :  { %8896 = vmatmul.mubr.f32.gmra.mxu0 %v11103_v33  ;;  %9093 = vmatpush3.msk.msra.mxu1 %vm10640_vm5, %v16122_v12  ;;  %v16190_v33 = vld [vmem:[#allocation39_spill] sm:$0xff] }
  0xae   :  { %8970 = vmatmul.mubr.f32.gmra.mxu1 %v16177_v8  ;;  %8898 = vmatprep.mubr.f32.mxu0 %v11117_v5  ;;  %v16191_v5 = vand.u32 4294901760, %v16182_v15 }
  0xaf   :  { %9014 = vmatprep.subr.mxu0 %v16178_v20  ;;  %8972 = vmatprep.mubr.f32.mxu1 %v16179_v11 }
  0xb0   :  { %9015 = vmatpush3.msra.mxu0 %v16178_v20  ;;  %9094 = vmatprep.subr.msk.mxu1 %vm10654_vm6, %v16122_v12  ;;  %v16211_v20 = vld [vmem:[#allocation51_spill] sm:$0xff] }
  0xb1   :  { %8899 = vmatmul.mubr.f32.gmra.mxu0 %v16180_v45  ;;  %9095 = vmatpush3.msk.msra.mxu1 %vm10654_vm6, %v16122_v12  ;;  %v16212_v45 = vand.u32 4294901760, %v11243_v37 }
  0xb2   :  { %8973 = vmatmul.mubr.f32.gmra.mxu1 %v16181_v26  ;;  %8901 = vmatprep.mubr.f32.mxu0 %v16182_v15  ;;  %v16214_v26 = vmov 0  ;;  %v16217_v15 = vand.u32 4294901760, %v11257_v48 }
  0xb3   :  { %9016 = vmatprep.subr.mxu0 %v16183_v32  ;;  %8975 = vmatprep.mubr.f32.mxu1 %v16184_v44 }
  0xb4   :  { %9017 = vmatpush3.msra.mxu0 %v16183_v32  ;;  %9096 = vmatprep.subr.msk.mxu1 %vm10688_vm7, %v16122_v12  ;;  %v16218_v32 = vld [vmem:[#allocation55_spill] sm:$0xff] }
  0xb5   :  { %8902 = vmatmul.mubr.f32.gmra.mxu0 %v16185_v16  ;;  %9097 = vmatpush3.msk.msra.mxu1 %vm10688_vm7, %v16122_v12  ;;  %v16221_v16 = vld [vmem:[#allocation16_spill] sm:$0xff] }
  0xb6   :  { %8976 = vmatmul.mubr.f32.gmra.mxu1 %v16186_v29  ;;  %8904 = vmatprep.mubr.f32.mxu0 %v11168_v4  ;;  %v16197_v4 = vld [vmem:[#allocation13_spill] sm:$0xff]  ;;  %vm11646_vm3 = vcmp.eq.s32.totalorder %v16221_v16, %v11557_v49  ;;  %v16222_v29 = vmov 0  ;;  %v16280_v16 = vmov 0 }
  0xb7   :  { %9018 = vmatprep.subr.mxu0 %v16187_v36  ;;  %8978 = vmatprep.mubr.f32.mxu1 %v16188_v25  ;;  %vm11572_vm0 = vcmp.eq.s32.totalorder %v16197_v4, %v11557_v49  ;;  %v16223_v29 = vsel %vm11646_vm3, 4294967295, %v16222_v29  ;;  %v16226_v25 = vld [vmem:[#allocation37_spill] sm:$0xff]  ;;  %v2057_v41 = vsel %vm11646_vm3, 1.0, %v16203_v59 }
  0xb8   :  { %9019 = vmatpush3.msra.mxu0 %v16187_v36  ;;  %9098 = vmatprep.subr.msk.mxu1 %vm10716_vm8, %v16122_v12  ;;  %v16199_v22 = vsel %vm11572_vm0, 4294967295, %v16198_v22  ;;  %16224 = vst [vmem:[#allocation44_spill] sm:$0xff] %v16223_v29  ;;  %v16225_v36 = vld [vmem:[#allocation60_spill] sm:$0xff] }
  0xb9   :  { %8905 = vmatmul.mubr.f32.gmra.mxu0 %v11189_v50  ;;  %9099 = vmatpush3.msk.msra.mxu1 %vm10716_vm8, %v16122_v12  ;;  %16200 = vst [vmem:[#allocation53_spill] sm:$0xff] %v16199_v22  ;;  %v2060_v50 = vsel %vm11572_vm0, 1.0, %v16203_v59 }
  0xba   :  { %8979 = vmatmul.mubr.f32.gmra.mxu1 %v16189_v38  ;;  %8907 = vmatprep.mubr.f32.mxu0 %v11201_v61  ;;  %v16205_v61 = vld [vmem:[#allocation14_spill] sm:$0xff]  ;;  %v11606_v8 = vsub.f32 %v2060_v50, %v2060_v50  ;;  %v16240_v50 = vmov 0 }
  0xbb   :  { %9020 = vmatprep.subr.mxu0 %v16190_v33  ;;  %8981 = vmatprep.mubr.f32.mxu1 %v16191_v5  ;;  %vm11595_vm1 = vcmp.eq.s32.totalorder %v16205_v61, %v11557_v49  ;;  %v16228_v5 = vand.u32 4294901760, %v11285_v40 }
  0xbc   :  { %9021 = vmatpush3.msra.mxu0 %v16190_v33  ;;  %9100 = vmatprep.subr.msk.mxu1 %vm10741_vm9, %v16122_v12  ;;  %v16207_v52 = vsel %vm11595_vm1, 4294967295, %v16206_v52  ;;  %v2059_v11 = vsel %vm11595_vm1, 1.0, %v16203_v59 }
  0xbd   :  { %8908 = vmatmul.mubr.f32.gmra.mxu0 %v16192_v55  ;;  %9101 = vmatpush3.msk.msra.mxu1 %vm10741_vm9, %v16122_v12  ;;  %16208 = vst [vmem:[#allocation38_spill] sm:$0xff] %v16207_v52  ;;  %v11632_v44 = vsub.f32 %v2059_v11, %v2059_v11  ;;  %v16229_v55 = vld [vmem:[#allocation42_spill] sm:$0xff]  ;;  %v16245_v11 = vld [vmem:[#allocation59_spill] sm:$0xff] }
  0xbe   :  { %8982 = vmatmul.mubr.f32.gmra.mxu1 %v16193_v46  ;;  %8910 = vmatprep.mubr.f32.mxu0 %v11229_v9  ;;  %v16213_v9 = vld [vmem:[#allocation15_spill] sm:$0xff]  ;;  %v16230_v46 = vld [vmem:[#allocation17_spill] sm:$0xff] }
  0xbf   :  { %9022 = vmatprep.subr.mxu0 %v16194_v63  ;;  %8984 = vmatprep.mubr.f32.mxu1 %v16195_v17  ;;  %vm11618_vm2 = vcmp.eq.s32.totalorder %v16213_v9, %v11557_v49  ;;  %v11659_v38 = vand.u32 4294901760, %v11632_v44  ;;  %vm11676_vm4 = vcmp.eq.s32.totalorder %v16230_v46, %v11557_v49  ;;  %v16275_v46 = vmov 0 }
  0xc0   :  { %9023 = vmatpush3.msra.mxu0 %v16194_v63  ;;  %9102 = vmatprep.subr.msk.mxu1 %vm10757_vm10, %v16122_v12  ;;  %v16215_v26 = vsel %vm11618_vm2, 4294967295, %v16214_v26  ;;  %v2058_v28 = vsel %vm11618_vm2, 1.0, %v16203_v59  ;;  %v16231_v63 = vmov 0  ;;  %v16285_v9 = vmov 0 }
  0xc1   :  { %8911 = vmatmul.mubr.f32.gmra.mxu0 %v11243_v37  ;;  %9103 = vmatpush3.msk.msra.mxu1 %vm10757_vm10, %v16122_v12  ;;  %16216 = vst [vmem:[#allocation56_spill] sm:$0xff] %v16215_v26  ;;  %v11630_v37 = vand.u32 4294901760, %v11606_v8  ;;  %16227 = vst [vmem:[#allocation40_spill] sm:$0xff] %v11659_v38  ;;  %v11661_v33 = vsub.f32 %v2058_v28, %v2058_v28  ;;  %v16232_v63 = vsel %vm11676_vm4, 4294967295, %v16231_v63 }
  0xc2   :  { %8985 = vmatmul.mubr.f32.gmra.mxu1 %v16196_v54  ;;  %8913 = vmatprep.mubr.f32.mxu0 %v11257_v48  ;;  %v16220_v48 = vand.u32 4294901760, %v11271_v30  ;;  %16233 = vst [vmem:[#allocation49_spill] sm:$0xff] %v16232_v63  ;;  %v11694_v54 = vsub.f32 %v2057_v41, %v2057_v41  ;;  %v16254_v41 = vmov 0 }
  0xc3   :  { %9024 = vmatprep.subr.mxu0 %v16201_v19  ;;  %8987 = vmatprep.mubr.f32.mxu1 %v16202_v23  ;;  %16219 = vst [vmem:[#allocation41_spill] sm:$0xff] %v11630_v37  ;;  %v11692_v17 = vand.u32 4294901760, %v11661_v33  ;;  %v16239_v23 = vld [vmem:[#allocation18_spill] sm:$0xff] }
  0xc4   :  { %9025 = vmatpush3.msra.mxu0 %v16201_v19  ;;  %9104 = vmatprep.subr.msk.mxu1 %vm10772_vm11, %v16122_v12  ;;  %v16238_v19 = vld [vmem:[#allocation54_spill] sm:$0xff]  ;;  %vm11708_vm5 = vcmp.eq.s32.totalorder %v16239_v23, %v11557_v49  ;;  %v16273_v23 = vld [vmem:[#allocation72_spill] sm:$0xff] }
  0xc5   :  { %8914 = vmatmul.mubr.f32.gmra.mxu0 %v11271_v30  ;;  %9105 = vmatpush3.msk.msra.mxu1 %vm10772_vm11, %v16122_v12  ;;  %v2657_v30 = vsub.f32 %v11606_v8, %v11630_v37  ;;  %16235 = vst [vmem:[#allocation45_spill] sm:$0xff] %v11692_v17  ;;  %v16241_v50 = vsel %vm11708_vm5, 4294967295, %v16240_v50  ;;  %v2669_v3 = vsub.f32 %v11661_v33, %v11692_v17 }
  0xc6   :  { %8988 = vmatmul.mubr.f32.gmra.mxu1 %v16204_v18  ;;  %8916 = vmatprep.mubr.f32.mxu0 %v11285_v40  ;;  %v16234_v40 = vld [vmem:[#allocation47_spill] sm:$0xff]  ;;  %16242 = vst [vmem:[#allocation52_spill] sm:$0xff] %v16241_v50  ;;  %v11722_v18 = vand.u32 4294901760, %v11694_v54 }
  0xc7   :  { %9026 = vmatprep.subr.mxu0 %v16209_v6  ;;  %8990 = vmatprep.mubr.f32.mxu1 %v16210_v62  ;;  %v16244_v62 = vld [vmem:[#allocation58_spill] sm:$0xff] }
  0xc8   :  { %9027 = vmatpush3.msra.mxu0 %v16209_v6  ;;  %9106 = vmatprep.subr.msk.mxu1 %vm10786_vm12, %v16122_v12  ;;  %16243 = vst [vmem:[#allocation57_spill] sm:$0xff] %v11722_v18  ;;  %v2675_v28 = vsub.f32 %v11694_v54, %v11722_v18 }
  0xc9   :  { %8917 = vmatmul.mubr.f32.gmra.mxu0 %v11299_v21  ;;  %9028 = vmatprep.subr.mxu0 %v16211_v20  ;;  %v2658_v21 = vand.u32 4294901760, %v2657_v30 }
  0xca   :  { %8991 = vmatmul.mubr.f32.gmra.mxu1 %v16212_v45  ;;  %8919 = vmatprep.mubr.f32.mxu0 %v11315_v31  ;;  %v2056_v31 = vsel %vm11676_vm4, 1.0, %v16203_v59  ;;  %v16246_v45 = vld [vmem:[#allocation19_spill] sm:$0xff] }
  0xcb   :  { %9107 = vmatpush3.msk.msra.mxu1 %vm10786_vm12, %v16122_v12  ;;  %9029 = vmatpush3.msra.mxu0 %v16211_v20  ;;  %v11724_v6 = vsub.f32 %v2056_v31, %v2056_v31  ;;  %v2055_v20 = vsel %vm11708_vm5, 1.0, %v16203_v59  ;;  %vm11737_vm6 = vcmp.eq.s32.totalorder %v16246_v45, %v11557_v49  ;;  %v16258_v31 = vld [vmem:[#allocation65_spill] sm:$0xff]  ;;  %v16272_v45 = vld [vmem:[#allocation70_spill] sm:$0xff] }
  0xcc   :  { %8993 = vmatprep.mubr.f32.mxu1 %v16217_v15  ;;  %9030 = vmatprep.subr.mxu0 %v16218_v32  ;;  %v16247_v15 = vmov 0  ;;  %v2054_v30 = vsel %vm11737_vm6, 1.0, %v16203_v59 }
  0xcd   :  { %8920 = vmatmul.mubr.f32.gmra.mxu0 %v11325_v27  ;;  %9108 = vmatprep.subr.msk.mxu1 %vm10821_vm13, %v16122_v12  ;;  %v16248_v15 = vsel %vm11737_vm6, 4294967295, %v16247_v15 }
  0xce   :  { %8994 = vmatmul.mubr.f32.gmra.mxu1 %v16220_v48  ;;  %9031 = vmatpush3.msra.mxu0 %v16218_v32  ;;  %16249 = vst [vmem:[#allocation27_spill] sm:$0xff] %v16248_v15  ;;  %v2670_v32 = vand.u32 4294901760, %v2669_v3  ;;  %v11748_v48 = vand.u32 4294901760, %v11724_v6  ;;  %v16261_v3 = vmov 0 }
  0xcf   :  { %9032 = vmatprep.subr.mxu0 %v16225_v36  ;;  %9109 = vmatpush3.msk.msra.mxu1 %vm10821_vm13, %v16122_v12 }
  0xd0   :  { %9033 = vmatpush3.msra.mxu0 %v16225_v36  ;;  %9034 = vmatprep.mubr.f32.mxu0 %v16226_v25  ;;  %16250 = vst [vmem:[#allocation28_spill] sm:$0xff] %v11748_v48  ;;  %v11750_v36 = vsub.f32 %v2055_v20, %v2055_v20 }
  0xd1   :  { %8996 = vmatprep.mubr.f32.mxu1 %v16228_v5  ;;  %9035 = vmatmul.mubr.f32.vlgmr.msra.gmra.mxu0 %v16229_v55  ;;  %v16252_v5 = vld [vmem:[#allocation63_spill] sm:$0xff] }
  0xd2   :  { %8997 = vmatmul.mubr.f32.gmra.mxu1 %v503_v13  ;;  %9110 = vmatprep.subr.msk.mxu1 %vm10830_vm14, %v16122_v12  ;;  %v2663_v13 = vsub.f32 %v11632_v44, %v11659_v38 }
  0xd3   :  { %9111 = vmatpush3.msk.msra.mxu1 %vm10830_vm14, %v16122_v12  ;;  %9037 = vmatprep.mubr.f32.mxu0 %v16234_v40 }
  0xd4   :  { %8999 = vmatprep.mubr.f32.mxu1 %v513_v43  ;;  %9112 = vmatprep.subr.msk.mxu1 %vm10878_vm15, %v16122_v12  ;;  %v16237_v43 = vand.u32 4294901760, %v11325_v27  ;;  %v2664_v27 = vand.u32 4294901760, %v2663_v13  ;;  %v11774_v13 = vand.u32 4294901760, %v11750_v36 }
  0xd5   :  { %9038 = vmatmul.mubr.f32.gmra.mxu0 %v16236_v51  ;;  %9113 = vmatpush3.msk.msra.mxu1 %vm10878_vm15, %v16122_v12 }
  0xd6   :  { %9000 = vmatmul.mubr.f32.gmra.mxu1 %v16237_v43  ;;  %9040 = vmatprep.mubr.f32.mxu0 %v16238_v19  ;;  %16257 = vst [vmem:[#allocation64_spill] sm:$0xff] %v11774_v13  ;;  %v2687_v20 = vsub.f32 %v11750_v36, %v11774_v13  ;;  %v2064_v13 = vld [vmem:[#allocation7 + $0x18] sm:$0xff] }
  0xd7   :  { %9162 = vmatprep.subr.msk.mxu0 %vm11572_vm0, %v16122_v12  ;;  %9114 = vmatprep.mubr.f32.mxu1 %v16226_v25  ;;  %v16251_v25 = vld [vmem:[#allocation62_spill] sm:$0xff] }
  0xd8   :  { %9163 = vmatpush3.msk.msra.mxu0 %vm11572_vm0, %v16122_v12  ;;  %9266 = vmatprep.subr.mxu1 %v2658_v21 }
  0xd9   :  { %9041 = vmatmul.mubr.f32.gmra.mxu0 %v16244_v62  ;;  %9164 = vmatprep.subr.msk.mxu0 %vm11595_vm1, %v16122_v12 }
  0xda   :  { %9115 = vmatmul.mubr.f32.vlgmr.msra.gmra.mxu1 %v16229_v55  ;;  %9043 = vmatprep.mubr.f32.mxu0 %v16245_v11  ;;  %v16253_v55 = vld [vmem:[#allocation20_spill] sm:$0xff] }
  0xdb   :  { %9267 = vmatpush3.msra.mxu1 %v2658_v21  ;;  %9117 = vmatprep.mubr.f32.mxu1 %v16234_v40  ;;  %vm11760_vm7 = vcmp.eq.s32.totalorder %v16253_v55, %v11557_v49  ;;  %v2676_v40 = vand.u32 4294901760, %v2675_v28  ;;  %v2681_v21 = vsub.f32 %v11724_v6, %v11748_v48  ;;  %v16268_v55 = vmov 0 }
  0xdc   :  { %9165 = vmatpush3.msk.msra.mxu0 %vm11595_vm1, %v16122_v12  ;;  %9268 = vmatprep.subr.mxu1 %v2664_v27  ;;  %v16255_v41 = vsel %vm11760_vm7, 4294967295, %v16254_v41  ;;  %v2053_v43 = vsel %vm11760_vm7, 1.0, %v16203_v59 }
  0xdd   :  { %9044 = vmatmul.mubr.f32.gmra.mxu0 %v16251_v25  ;;  %9269 = vmatpush3.msra.mxu1 %v2664_v27  ;;  %16256 = vst [vmem:[#allocation61_spill] sm:$0xff] %v16255_v41  ;;  %v16260_v27 = vld [vmem:[#allocation21_spill] sm:$0xff]  ;;  %v11802_v28 = vsub.f32 %v2053_v43, %v2053_v43 }
  0xde   :  { %9118 = vmatmul.mubr.f32.gmra.mxu1 %v16236_v51  ;;  %9046 = vmatprep.mubr.f32.mxu0 %v16252_v5  ;;  %v11776_v51 = vsub.f32 %v2054_v30, %v2054_v30  ;;  %vm11786_vm8 = vcmp.eq.s32.totalorder %v16260_v27, %v11557_v49  ;;  %v16265_v30 = vld [vmem:[#allocation67_spill] sm:$0xff]  ;;  %v16266_v27 = vld [vmem:[#allocation68_spill] sm:$0xff] }
  0xdf   :  { %9166 = vmatprep.subr.msk.mxu0 %vm11618_vm2, %v16122_v12  ;;  %9120 = vmatprep.mubr.f32.mxu1 %v16238_v19  ;;  %v16259_v19 = vld [vmem:[#allocation66_spill] sm:$0xff]  ;;  %v16262_v3 = vsel %vm11786_vm8, 4294967295, %v16261_v3  ;;  %v11826_v43 = vand.u32 4294901760, %v11802_v28 }
  0xe0   :  { %9167 = vmatpush3.msk.msra.mxu0 %vm11618_vm2, %v16122_v12  ;;  %9270 = vmatprep.subr.mxu1 %v2670_v32  ;;  %16263 = vst [vmem:[#allocation29_spill] sm:$0xff] %v16262_v3 }
  0xe1   :  { %9047 = vmatmul.mubr.f32.gmra.mxu0 %v16258_v31  ;;  %9271 = vmatpush3.msra.mxu1 %v2670_v32  ;;  %v11800_v32 = vand.u32 4294901760, %v11776_v51  ;;  %16271 = vst [vmem:[#allocation71_spill] sm:$0xff] %v11826_v43 }
  0xe2   :  { %9121 = vmatmul.mubr.f32.gmra.mxu1 %v16244_v62  ;;  %9049 = vmatprep.mubr.f32.mxu0 %v16259_v19  ;;  %v2682_v62 = vand.u32 4294901760, %v2681_v21  ;;  %v16267_v21 = vld [vmem:[#allocation22_spill] sm:$0xff] }
  0xe3   :  { %9168 = vmatprep.subr.msk.mxu0 %vm11646_vm3, %v16122_v12  ;;  %9123 = vmatprep.mubr.f32.mxu1 %v16245_v11  ;;  %16264 = vst [vmem:[#allocation30_spill] sm:$0xff] %v11800_v32  ;;  %v2052_v11 = vsel %vm11786_vm8, 1.0, %v16203_v59  ;;  %vm11812_vm9 = vcmp.eq.s32.totalorder %v16267_v21, %v11557_v49 }
  0xe4   :  { %9169 = vmatpush3.msk.msra.mxu0 %vm11646_vm3, %v16122_v12  ;;  %9272 = vmatprep.subr.mxu1 %v2676_v40  ;;  %v16269_v55 = vsel %vm11812_vm9, 4294967295, %v16268_v55  ;;  %v11828_v21 = vsub.f32 %v2052_v11, %v2052_v11 }
  0xe5   :  { %9050 = vmatmul.mubr.f32.gmra.mxu0 %v16265_v30  ;;  %9273 = vmatpush3.msra.mxu1 %v2676_v40  ;;  %16270 = vst [vmem:[#allocation69_spill] sm:$0xff] %v16269_v55  ;;  %v2693_v40 = vsub.f32 %v11776_v51, %v11800_v32 }
  0xe6   :  { %9124 = vmatmul.mubr.f32.gmra.mxu1 %v16251_v25  ;;  %9052 = vmatprep.mubr.f32.mxu0 %v16266_v27  ;;  %v2688_v25 = vand.u32 4294901760, %v2687_v20  ;;  %v16274_v20 = vld [vmem:[#allocation23_spill] sm:$0xff]  ;;  %v11852_v11 = vand.u32 4294901760, %v11828_v21 }
  0xe7   :  { %9170 = vmatprep.subr.msk.mxu0 %vm11676_vm4, %v16122_v12  ;;  %9126 = vmatprep.mubr.f32.mxu1 %v16252_v5  ;;  %v2051_v5 = vsel %vm11812_vm9, 1.0, %v16203_v59  ;;  %vm11838_vm10 = vcmp.eq.s32.totalorder %v16274_v20, %v11557_v49 }
  0xe8   :  { %9171 = vmatpush3.msk.msra.mxu0 %vm11676_vm4, %v16122_v12  ;;  %9274 = vmatprep.subr.mxu1 %v2682_v62  ;;  %v16276_v46 = vsel %vm11838_vm10, 4294967295, %v16275_v46  ;;  %16278 = vst [vmem:[#allocation73_spill] sm:$0xff] %v11852_v11  ;;  %v11854_v20 = vsub.f32 %v2051_v5, %v2051_v5 }
  0xe9   :  { %9053 = vmatmul.mubr.f32.gmra.mxu0 %v16272_v45  ;;  %9275 = vmatpush3.msra.mxu1 %v2682_v62  ;;  %16277 = vst [vmem:[#allocation31_spill] sm:$0xff] %v16276_v46  ;;  %v2699_v62 = vsub.f32 %v11802_v28, %v11826_v43  ;;  %v2063_v43 = vld [vmem:[#allocation7 + $0x10] sm:$0xff] }
  0xea   :  { %9127 = vmatmul.mubr.f32.gmra.mxu1 %v16258_v31  ;;  %9055 = vmatprep.mubr.f32.mxu0 %v16273_v23  ;;  %v2694_v31 = vand.u32 4294901760, %v2693_v40  ;;  %v16279_v40 = vld [vmem:[#allocation24_spill] sm:$0xff]  ;;  %v11878_v5 = vand.u32 4294901760, %v11854_v20 }
  0xeb   :  { %9172 = vmatprep.subr.msk.mxu0 %vm11708_vm5, %v16122_v12  ;;  %9129 = vmatprep.mubr.f32.mxu1 %v16259_v19  ;;  %v2050_v19 = vsel %vm11838_vm10, 1.0, %v16203_v59  ;;  %vm11864_vm11 = vcmp.eq.s32.totalorder %v16279_v40, %v11557_v49 }
  0xec   :  { %9173 = vmatpush3.msk.msra.mxu0 %vm11708_vm5, %v16122_v12  ;;  %9276 = vmatprep.subr.mxu1 %v2688_v25  ;;  %v16281_v16 = vsel %vm11864_vm11, 4294967295, %v16280_v16  ;;  %16283 = vst [vmem:[#allocation34_spill] sm:$0xff] %v11878_v5  ;;  %v11880_v40 = vsub.f32 %v2050_v19, %v2050_v19 }
  0xed   :  { %9056 = vmatmul.mubr.f32.gmra.mxu0 %v11076_v60  ;;  %9277 = vmatpush3.msra.mxu1 %v2688_v25  ;;  %16282 = vst [vmem:[#allocation32_spill] sm:$0xff] %v16281_v16  ;;  %v2705_v25 = vsub.f32 %v11828_v21, %v11852_v11  ;;  %v16299_v11 = vld [vmem:[#allocation33_spill] sm:$0xff]  ;;  %v2069_v16 = vld [vmem:[#allocation7 + $0x40] sm:$0xff] }
  0xee   :  { %9130 = vmatmul.mubr.f32.gmra.mxu1 %v16265_v30  ;;  %9058 = vmatprep.mubr.f32.mxu0 %v11089_v47  ;;  %v2700_v30 = vand.u32 4294901760, %v2699_v62  ;;  %v16284_v62 = vld [vmem:[#allocation25_spill] sm:$0xff]  ;;  %v11904_v19 = vand.u32 4294901760, %v11880_v40  ;;  %vm11958_vm14 = vcmp.eq.s32.totalorder %v16299_v11, %v11557_v49  ;;  %v2065_v11 = vld [vmem:[#allocation7 + $0x20] sm:$0xff] }
  0xef   :  { %9174 = vmatprep.subr.msk.mxu0 %vm11737_vm6, %v16122_v12  ;;  %9132 = vmatprep.mubr.f32.mxu1 %v16266_v27  ;;  %v2049_v27 = vsel %vm11864_vm11, 1.0, %v16203_v59  ;;  %vm11890_vm12 = vcmp.eq.s32.totalorder %v16284_v62, %v11557_v49 }
  0xf0   :  { %9175 = vmatpush3.msk.msra.mxu0 %vm11737_vm6, %v16122_v12  ;;  %9278 = vmatprep.subr.mxu1 %v2694_v31  ;;  %v16286_v9 = vsel %vm11890_vm12, 4294967295, %v16285_v9  ;;  %16288 = vst [vmem:[#allocation75_spill] sm:$0xff] %v11904_v19  ;;  %v11906_v62 = vsub.f32 %v2049_v27, %v2049_v27  ;;  %v16291_v27 = vmov 0 }
  0xf1   :  { %9059 = vmatmul.mubr.f32.gmra.mxu0 %v11105_v24  ;;  %9279 = vmatpush3.msra.mxu1 %v2694_v31  ;;  %16287 = vst [vmem:[#allocation74_spill] sm:$0xff] %v16286_v9  ;;  %v2711_v31 = vsub.f32 %v11854_v20, %v11878_v5  ;;  %v2062_v5 = vld [vmem:[#allocation7 + $0x8] sm:$0xff] }
  0xf2   :  { %9133 = vmatmul.mubr.f32.gmra.mxu1 %v16272_v45  ;;  %9061 = vmatprep.mubr.f32.mxu0 %v11119_v58  ;;  %v2706_v45 = vand.u32 4294901760, %v2705_v25  ;;  %16289 = vst [vmem:[#allocation35_spill] sm:$0xff] %v11906_v62  ;;  %v16290_v25 = vld [vmem:[#allocation26_spill] sm:$0xff]  ;;  %v11930_v61 = vand.u32 4294901760, %v11906_v62 }
  0xf3   :  { %9176 = vmatprep.subr.msk.mxu0 %vm11760_vm7, %v16122_v12  ;;  %9135 = vmatprep.mubr.f32.mxu1 %v16273_v23  ;;  %v2048_v23 = vsel %vm11890_vm12, 1.0, %v16203_v59  ;;  %vm11920_vm13 = vcmp.eq.s32.totalorder %v16290_v25, %v11557_v49  ;;  %v11946_v25 = vand.u32 4294901760, %v2062_v5 }
  0xf4   :  { %9177 = vmatpush3.msk.msra.mxu0 %vm11760_vm7, %v16122_v12  ;;  %9280 = vmatprep.subr.mxu1 %v2700_v30  ;;  %v16292_v27 = vsel %vm11920_vm13, 4294967295, %v16291_v27  ;;  %16294 = vst [vmem:[#allocation36_spill] sm:$0xff] %v11930_v61  ;;  %v11932_v4 = vsub.f32 %v2048_v23, %v2048_v23 }
  0xf5   :  { %9062 = vmatmul.mubr.f32.gmra.mxu0 %v11133_v14  ;;  %9281 = vmatpush3.msra.mxu1 %v2700_v30  ;;  %16293 = vst [vmem:[#allocation76_spill] sm:$0xff] %v16292_v27  ;;  %v2717_v30 = vsub.f32 %v11880_v40, %v11904_v19  ;;  %16297 = vst [vmem:[#allocation43_spill] sm:$0xff] %v11946_v25 }
  0xf6   :  { %9136 = vmatmul.mubr.f32.gmra.mxu1 %v11076_v60  ;;  %9064 = vmatprep.mubr.f32.mxu0 %v11139_v53  ;;  %v2712_v60 = vand.u32 4294901760, %v2711_v31  ;;  %16295 = vst [vmem:[#allocation39_spill] sm:$0xff] %v11932_v4  ;;  %v2047_v31 = vsel %vm11920_vm13, 1.0, %v16203_v59  ;;  %v11954_v19 = vand.u32 4294901760, %v11932_v4 }
  0xf7   :  { %9178 = vmatprep.subr.msk.mxu0 %vm11786_vm8, %v16122_v12  ;;  %9138 = vmatprep.mubr.f32.mxu1 %v11089_v47  ;;  %v2061_v47 = vld [vmem:[#allocation7] sm:$0xff]  ;;  %v11963_v32 = vsub.f32 %v2047_v31, %v2047_v31  ;;  %v11983_v31 = vand.u32 4294901760, %v2063_v43 }
  0xf8   :  { %9179 = vmatpush3.msk.msra.mxu0 %vm11786_vm8, %v16122_v12  ;;  %9282 = vmatprep.subr.mxu1 %v2706_v45  ;;  %v11944_v23 = vand.u32 4294901760, %v2061_v47  ;;  %16298 = vst [vmem:[#allocation46_spill] sm:$0xff] %v11954_v19 }
  0xf9   :  { %9065 = vmatmul.mubr.f32.gmra.mxu0 %v11161_v57  ;;  %9283 = vmatpush3.msra.mxu1 %v2706_v45  ;;  %v2723_v45 = vsub.f32 %v11906_v62, %v11930_v61  ;;  %16303 = vst [vmem:[#allocation51_spill] sm:$0xff] %v11963_v32  ;;  %v16305_v61 = vmov 0  ;;  %16309 = vst [vmem:[#allocation37_spill] sm:$0xff] %v11983_v31  ;;  %v11997_v48 = vand.u32 4294901760, %v11963_v32 }
  0xfa   :  { %9139 = vmatmul.mubr.f32.gmra.mxu1 %v11105_v24  ;;  %9067 = vmatprep.mubr.f32.mxu0 %v11175_v56  ;;  %16296 = vst [vmem:[#allocation77_spill] sm:$0xff] %v11944_v23  ;;  %v2718_v24 = vand.u32 4294901760, %v2717_v30  ;;  %v16304_v30 = vld [vmem:[#allocation12_spill] sm:$0xff] }
  0xfb   :  { %9180 = vmatprep.subr.msk.mxu0 %vm11812_vm9, %v16122_v12  ;;  %9141 = vmatprep.mubr.f32.mxu1 %v11119_v58  ;;  %v16300_v58 = vmov 0  ;;  %vm11969_vm15 = vcmp.eq.s32.totalorder %v16304_v30, %v11557_v49  ;;  %v2724_v49 = vand.u32 4294901760, %v2723_v45  ;;  %v2729_v30 = vsub.f32 %v11932_v4, %v11954_v19  ;;  %16312 = vst [vmem:[#allocation50_spill] sm:$0xff] %v11997_v48  ;;  %v2066_v19 = vld [vmem:[#allocation7 + $0x28] sm:$0xff]  ;;  %v2068_v4 = vld [vmem:[#allocation7 + $0x38] sm:$0xff] }
  0xfc   :  { %9181 = vmatpush3.msk.msra.mxu0 %vm11812_vm9, %v16122_v12  ;;  %9284 = vmatprep.subr.mxu1 %v2712_v60  ;;  %v16301_v58 = vsel %vm11958_vm14, 4294967295, %v16300_v58  ;;  %v16306_v61 = vsel %vm11969_vm15, 4294967295, %v16305_v61  ;;  %v2045_v18 = vsel %vm11969_vm15, 1.0, %v16203_v59  ;;  %v12032_v37 = vand.u32 4294901760, %v2066_v19 }
  0xfd   :  { %16302 = vst [vmem:[#allocation48_spill] sm:$0xff] %v16301_v58  ;;  %9068 = vmatmul.mubr.f32.gmra.mxu0 %v11179_v35  ;;  %9285 = vmatpush3.msra.mxu1 %v2712_v60  ;;  %16307 = vst [vmem:[#allocation55_spill] sm:$0xff] %v16306_v61  ;;  %v11978_v60 = vsub.f32 %v2061_v47, %v11944_v23  ;;  %v11993_v47 = vand.u32 4294901760, %v2064_v13 }
  0xfe   :  { %9142 = vmatmul.mubr.f32.gmra.mxu1 %v11133_v14  ;;  %9070 = vmatprep.mubr.f32.mxu0 %v11203_v2  ;;  %v2046_v14 = vsel %vm11958_vm14, 1.0, %v16203_v59  ;;  %v12016_v59 = vsub.f32 %v2063_v43, %v11983_v31  ;;  %v2735_v43 = vsub.f32 %v11963_v32, %v11997_v48  ;;  %16320 = vst [vmem:[#allocation67_spill] sm:$0xff] %v12032_v37 }
  0xff   :  { %9182 = vmatprep.subr.msk.mxu0 %vm11838_vm10, %v16122_v12  ;;  %9144 = vmatprep.mubr.f32.mxu1 %v11139_v53  ;;  %16308 = vst [vmem:[#allocation60_spill] sm:$0xff] %v11978_v60  ;;  %v11991_v53 = vsub.f32 %v2062_v5, %v11946_v25  ;;  %16311 = vst [vmem:[#allocation47_spill] sm:$0xff] %v11993_v47  ;;  %v12004_v45 = vsub.f32 %v2046_v14, %v2046_v14  ;;  %v12006_v5 = vand.u32 4294901760, %v2065_v11 }
 0x100   :  { %9183 = vmatpush3.msk.msra.mxu0 %vm11838_vm10, %v16122_v12  ;;  %9286 = vmatprep.subr.mxu1 %v2718_v24  ;;  %16316 = vst [vmem:[#allocation62_spill] sm:$0xff] %v12016_v59  ;;  %v2730_v14 = vand.u32 4294901760, %v2729_v30  ;;  %v12025_v38 = vsub.f32 %v2064_v13, %v11993_v47  ;;  %v12069_v9 = vsub.f32 %v2066_v19, %v12032_v37 }
 0x101   :  { %16310 = vst [vmem:[#allocation42_spill] sm:$0xff] %v11991_v53  ;;  %9071 = vmatmul.mubr.f32.gmra.mxu0 %v11217_v42  ;;  %9287 = vmatpush3.msra.mxu1 %v2718_v24  ;;  %16313 = vst [vmem:[#allocation54_spill] sm:$0xff] %v12004_v45  ;;  %v12013_v24 = vand.u32 4294901760, %v11978_v60  ;;  %v12022_v17 = vand.u32 4294901760, %v11991_v53  ;;  %v12037_v30 = vand.u32 4294901760, %v12004_v45  ;;  %v12040_v13 = vsub.f32 %v2065_v11, %v12006_v5 }
 0x102   :  { %9145 = vmatmul.mubr.f32.gmra.mxu1 %v11161_v57  ;;  %9073 = vmatprep.mubr.f32.mxu0 %v11231_v34  ;;  %16314 = vst [vmem:[#allocation58_spill] sm:$0xff] %v12006_v5  ;;  %v2067_v57 = vld [vmem:[#allocation7 + $0x30] sm:$0xff]  ;;  %16318 = vst [vmem:[#allocation65_spill] sm:$0xff] %v12025_v38  ;;  %v12059_v48 = vand.u32 4294901760, %v12025_v38 }
 0x103   :  { %9184 = vmatprep.subr.msk.mxu0 %vm11864_vm11, %v16122_v12  ;;  %9147 = vmatprep.mubr.f32.mxu1 %v11175_v56  ;;  %16315 = vst [vmem:[#allocation59_spill] sm:$0xff] %v12013_v24  ;;  %16317 = vst [vmem:[#allocation63_spill] sm:$0xff] %v12022_v17  ;;  %v12027_v56 = vsub.f32 %v2045_v18, %v2045_v18  ;;  %v12042_v18 = vand.u32 4294901760, %v2067_v57  ;;  %v2177_v11 = vsub.f32 %v11978_v60, %v12013_v24 }
 0x104   :  { %9185 = vmatpush3.msk.msra.mxu0 %vm11864_vm11, %v16122_v12  ;;  %9288 = vmatprep.subr.mxu1 %v2724_v49  ;;  %16321 = vst [vmem:[#allocation68_spill] sm:$0xff] %v12037_v30  ;;  %16322 = vst [vmem:[#allocation70_spill] sm:$0xff] %v12040_v13  ;;  %v12071_v24 = vand.u32 4294901760, %v2068_v4  ;;  %v12073_v60 = vand.u32 4294901760, %v2069_v16  ;;  %v12080_v62 = vand.u32 4294901760, %v12040_v13 }
 0x105   :  { %16319 = vst [vmem:[#allocation66_spill] sm:$0xff] %v12027_v56  ;;  %9074 = vmatmul.mubr.f32.gmra.mxu0 %v11245_v10  ;;  %9289 = vmatpush3.msra.mxu1 %v2724_v49  ;;  %16323 = vst [vmem:[#allocation72_spill] sm:$0xff] %v12042_v18  ;;  %v2187_v49 = vsub.f32 %v11991_v53, %v12022_v17  ;;  %v12062_v32 = vand.u32 4294901760, %v12027_v56  ;;  %v2070_v17 = vld [vmem:[#allocation7 + $0x48] sm:$0xff]  ;;  %v2741_v53 = vsub.f32 %v12004_v45, %v12037_v30 }
 0x106   :  { %9148 = vmatmul.mubr.f32.gmra.mxu1 %v11179_v35  ;;  %9076 = vmatprep.mubr.f32.mxu0 %v11259_v7  ;;  %v12049_v35 = vand.u32 4294901760, %v12016_v59  ;;  %16325 = vst [vmem:[#allocation79_spill] sm:$0xff] %v12059_v48  ;;  %16327 = vst [vmem:[#allocation81_spill] sm:$0xff] %v12069_v9  ;;  %v12094_v30 = vand.u32 4294901760, %v2177_v11  ;;  %v12112_v11 = vsub.f32 %v2069_v16, %v12073_v60 }
 0x107   :  { %9186 = vmatprep.subr.msk.mxu0 %vm11890_vm12, %v16122_v12  ;;  %9150 = vmatprep.mubr.f32.mxu1 %v11203_v2  ;;  %16326 = vst [vmem:[#allocation80_spill] sm:$0xff] %v12062_v32  ;;  %v2736_v2 = vand.u32 4294901760, %v2735_v43  ;;  %16328 = vst [vmem:[#allocation82_spill] sm:$0xff] %v12071_v24  ;;  %v12083_v43 = vsub.f32 %v2067_v57, %v12042_v18  ;;  %v12096_v45 = vand.u32 4294901760, %v2187_v49  ;;  %v2072_v49 = vld [vmem:[#allocation7 + $0x58] sm:$0xff] }
 0x108   :  { %16324 = vst [vmem:[#allocation78_spill] sm:$0xff] %v12049_v35  ;;  %9187 = vmatpush3.msk.msra.mxu0 %vm11890_vm12, %v16122_v12  ;;  %9290 = vmatprep.subr.mxu1 %v2730_v14  ;;  %16329 = vst [vmem:[#allocation83_spill] sm:$0xff] %v12073_v60  ;;  %v2197_v19 = vsub.f32 %v12016_v59, %v12049_v35  ;;  %v2747_v57 = vsub.f32 %v12027_v56, %v12062_v32  ;;  %v2742_v32 = vand.u32 4294901760, %v2741_v53 }
 0x109   :  { %9077 = vmatmul.mubr.f32.gmra.mxu0 %v11273_v1  ;;  %9188 = vmatprep.subr.msk.mxu0 %vm11920_vm13, %v16122_v12  ;;  %16330 = vst [vmem:[#allocation84_spill] sm:$0xff] %v12080_v62  ;;  %16331 = vst [vmem:[#allocation85_spill] sm:$0xff] %v12083_v43  ;;  %v2207_v35 = vsub.f32 %v12025_v38, %v12059_v48  ;;  %v12109_v59 = vsub.f32 %v2068_v4, %v12071_v24  ;;  %v12121_v38 = vand.u32 4294901760, %v12083_v43 }
 0x10a   :  { %9151 = vmatmul.mubr.f32.gmra.mxu1 %v11217_v42  ;;  %9079 = vmatprep.mubr.f32.mxu0 %v11289_v39  ;;  %v2071_v42 = vld [vmem:[#allocation7 + $0x50] sm:$0xff]  ;;  %16332 = vst [vmem:[#allocation86_spill] sm:$0xff] %v12094_v30  ;;  %16333 = vst [vmem:[#allocation87_spill] sm:$0xff] %v12096_v45  ;;  %v2217_v48 = vsub.f32 %v12040_v13, %v12080_v62  ;;  %v12128_v4 = vand.u32 4294901760, %v2197_v19  ;;  %v2748_v53 = vand.u32 4294901760, %v2747_v57  ;;  %v12139_v13 = vand.u32 4294901760, %v2072_v49 }
 0x10b   :  { %9291 = vmatpush3.msra.mxu1 %v2730_v14  ;;  %9189 = vmatpush3.msk.msra.mxu0 %vm11920_vm13, %v16122_v12  ;;  %v12100_v14 = vand.u32 4294901760, %v2070_v17  ;;  %16336 = vst [vmem:[#allocation90_spill] sm:$0xff] %v12109_v59  ;;  %16337 = vst [vmem:[#allocation91_spill] sm:$0xff] %v12112_v11  ;;  %v12123_v56 = vand.u32 4294901760, %v2071_v42  ;;  %v12148_v61 = vand.u32 4294901760, %v12109_v59 }
 0x10c   :  { %9153 = vmatprep.mubr.f32.mxu1 %v11231_v34  ;;  %9190 = vmatprep.subr.msk.mxu0 %vm11958_vm14, %v16122_v12  ;;  %v12106_v34 = vand.u32 4294901760, %v12069_v9  ;;  %16338 = vst [vmem:[#allocation92_spill] sm:$0xff] %v12121_v38  ;;  %16340 = vst [vmem:[#allocation94_spill] sm:$0xff] %v12128_v4  ;;  %v12154_v57 = vand.u32 4294901760, %v2217_v48  ;;  %v12171_v48 = vsub.f32 %v2072_v49, %v12139_v13 }
 0x10d   :  { %16334 = vst [vmem:[#allocation88_spill] sm:$0xff] %v12100_v14  ;;  %9080 = vmatmul.mubr.f32.gmra.mxu0 %v11301_v0  ;;  %9292 = vmatprep.subr.mxu1 %v2736_v2  ;;  %16339 = vst [vmem:[#allocation93_spill] sm:$0xff] %v12123_v56  ;;  %v12137_v62 = vsub.f32 %v2070_v17, %v12100_v14 }
 0x10e   :  { %16335 = vst [vmem:[#allocation89_spill] sm:$0xff] %v12106_v34  ;;  %9154 = vmatmul.mubr.f32.gmra.mxu1 %v11245_v10  ;;  %9191 = vmatpush3.msk.msra.mxu0 %vm11958_vm14, %v16122_v12  ;;  %v2073_v10 = vld [vmem:[#allocation7 + $0x60] sm:$0xff]  ;;  %16342 = vst [vmem:[#allocation96_spill] sm:$0xff] %v12139_v13  ;;  %v2227_v19 = vsub.f32 %v12069_v9, %v12106_v34  ;;  %v2074_v34 = vld [vmem:[#allocation7 + $0x68] sm:$0xff] }
 0x10f   :  { %9192 = vmatprep.subr.msk.mxu0 %vm11969_vm15, %v16122_v12  ;;  %9293 = vmatpush3.msra.mxu1 %v2736_v2  ;;  %16341 = vst [vmem:[#allocation95_spill] sm:$0xff] %v12137_v62  ;;  %v12143_v2 = vand.u32 4294901760, %v2207_v35  ;;  %16344 = vst [vmem:[#allocation98_spill] sm:$0xff] %v12148_v61  ;;  %v12159_v35 = vsub.f32 %v2071_v42, %v12123_v56  ;;  %v2075_v9 = vld [vmem:[#allocation7 + $0x70] sm:$0xff] }
 0x110   :  { %9193 = vmatpush3.msk.msra.mxu0 %vm11969_vm15, %v16122_v12  ;;  %9194 = vmatprep.mubr.f32.mxu0 %v12094_v30  ;;  %v12134_v16 = vpop.f32.mrf.mxu0  ;;  %v12151_v30 = vand.u32 4294901760, %v12112_v11  ;;  %16346 = vst [vmem:[#allocation100_spill] sm:$0xff] %v12154_v57  ;;  %16350 = vst [vmem:[#allocation104_spill] sm:$0xff] %v12171_v48  ;;  %v12174_v42 = vand.u32 4294901760, %v2227_v19 }
 0x111   :  { %9156 = vmatprep.mubr.f32.mxu1 %v11259_v7  ;;  %9195 = vmatmul.mubr.f32.vlgmr.msra.gmra.mxu0 %v12096_v45  ;;  %16343 = vst [vmem:[#allocation97_spill] sm:$0xff] %v12143_v2  ;;  %v2237_v7 = vsub.f32 %v12083_v43, %v12121_v38  ;;  %16347 = vst [vmem:[#allocation101_spill] sm:$0xff] %v12159_v35  ;;  %v12161_v45 = vand.u32 4294901760, %v2073_v10  ;;  %v12180_v38 = vand.u32 4294901760, %v2074_v34 }
 0x112   :  { %16345 = vst [vmem:[#allocation99_spill] sm:$0xff] %v12151_v30  ;;  %9157 = vmatmul.mubr.f32.gmra.mxu1 %v11273_v1  ;;  %9294 = vmatprep.subr.mxu1 %v2742_v32  ;;  %v217_v17 = vpop.f32.mrf.mxu0  ;;  %v12168_v1 = vand.u32 4294901760, %v12137_v62  ;;  %16351 = vst [vmem:[#allocation105_spill] sm:$0xff] %v12174_v42 }
 0x113   :  { %16348 = vst [vmem:[#allocation102_spill] sm:$0xff] %v12161_v45  ;;  %9295 = vmatpush3.msra.mxu1 %v2742_v32  ;;  %9197 = vmatprep.mubr.f32.mxu0 %v12128_v4  ;;  %v2247_v32 = vsub.f32 %v12109_v59, %v12148_v61  ;;  %v2257_v4 = vsub.f32 %v12112_v11, %v12151_v30  ;;  %16352 = vst [vmem:[#allocation106_spill] sm:$0xff] %v12180_v38  ;;  %v12186_v49 = vand.u32 4294901760, %v2237_v7  ;;  %v2076_v61 = vld [vmem:[#allocation7 + $0x78] sm:$0xff]  ;;  %v2078_v59 = vld [vmem:[#allocation7 + $0x88] sm:$0xff] }
 0x114   :  { %v12164_v58 = vpop.f32.mrf.mxu0  ;;  %9159 = vmatprep.mubr.f32.mxu1 %v11289_v39  ;;  %9296 = vmatprep.subr.mxu1 %v2748_v53  ;;  %16349 = vst [vmem:[#allocation103_spill] sm:$0xff] %v12168_v1  ;;  %v12192_v19 = vsub.f32 %v2073_v10, %v12161_v45  ;;  %v2267_v10 = vsub.f32 %v12137_v62, %v12168_v1  ;;  %v12207_v7 = vand.u32 4294901760, %v12171_v48  ;;  %v12218_v11 = vand.u32 4294901760, %v2076_v61  ;;  %v2079_v62 = vld [vmem:[#allocation7 + $0x90] sm:$0xff] }
 0x115   :  { %9198 = vmatmul.mubr.f32.gmra.mxu0 %v12143_v2  ;;  %9297 = vmatpush3.msra.mxu1 %v2748_v53  ;;  %16353 = vst [vmem:[#allocation107_spill] sm:$0xff] %v12186_v49  ;;  %v12189_v53 = vand.u32 4294901760, %v12159_v35  ;;  %v12194_v2 = vand.u32 4294901760, %v2075_v9 }
 0x116   :  { %9160 = vmatmul.mubr.f32.gmra.mxu1 %v11301_v0  ;;  %v12183_v39 = vpop.f32.mrf.mxu0  ;;  %9200 = vmatprep.mubr.f32.mxu0 %v12154_v57  ;;  %16355 = vst [vmem:[#allocation109_spill] sm:$0xff] %v12192_v19  ;;  %v2077_v0 = vld [vmem:[#allocation7 + $0x80] sm:$0xff]  ;;  %16357 = vst [vmem:[#allocation111_spill] sm:$0xff] %v12207_v7  ;;  %v12210_v57 = vand.u32 4294901760, %v2247_v32 }
 0x117   :  { %16354 = vst [vmem:[#allocation108_spill] sm:$0xff] %v12189_v53  ;;  %16356 = vst [vmem:[#allocation110_spill] sm:$0xff] %v12194_v2  ;;  %9370 = vmatprep.subr.mxu0 %v11606_v8  ;;  %9298 = vmatprep.mubr.f32.mxu1 %v11944_v23  ;;  %v12213_v23 = vand.u32 4294901760, %v2257_v4  ;;  %v2277_v32 = vsub.f32 %v12159_v35, %v12189_v53  ;;  %v12230_v4 = vsub.f32 %v2075_v9, %v12194_v2  ;;  %v2080_v35 = vld [vmem:[#allocation7 + $0x98] sm:$0xff] }
 0x118   :  { %v12198_v30 = vpop.f32.mrf.mxu0  ;;  %9371 = vmatpush3.msra.mxu0 %v11606_v8  ;;  %9474 = vmatprep.subr.msk.mxu1 %vm11572_vm0, %v16122_v12  ;;  %16358 = vst [vmem:[#allocation112_spill] sm:$0xff] %v12210_v57  ;;  %v12216_v8 = vsub.f32 %v2074_v34, %v12180_v38  ;;  %16361 = vst [vmem:[#allocation115_spill] sm:$0xff] %v12218_v11  ;;  %v12232_v34 = vand.u32 4294901760, %v2077_v0  ;;  %v12247_v9 = vand.u32 4294901760, %v2267_v10  ;;  %v12265_v10 = vand.u32 4294901760, %v2079_v62 }
 0x119   :  { %9201 = vmatmul.mubr.f32.gmra.mxu0 %v12174_v42  ;;  %9372 = vmatprep.subr.mxu0 %v11632_v44  ;;  %16359 = vst [vmem:[#allocation113_spill] sm:$0xff] %v12213_v23  ;;  %v12227_v42 = vand.u32 4294901760, %v12192_v19  ;;  %16363 = vst [vmem:[#allocation117_spill] sm:$0xff] %v12230_v4 }
 0x11a   :  { %16360 = vst [vmem:[#allocation114_spill] sm:$0xff] %v12216_v8  ;;  %v8796_v43 = vpop.f32.mrf.mxu1  ;;  %9299 = vmatmul.mubr.f32.vlgmr.msra.gmra.mxu1 %v11946_v25  ;;  %v12221_v1 = vpop.f32.mrf.mxu0  ;;  %9203 = vmatprep.mubr.f32.mxu0 %v12186_v49  ;;  %16364 = vst [vmem:[#allocation118_spill] sm:$0xff] %v12232_v34 }
 0x11b   :  { %16362 = vst [vmem:[#allocation116_spill] sm:$0xff] %v12227_v42  ;;  %v12235_v27 = vadd.f32 %v8796_v43, %v12134_v16  ;;  %9475 = vmatpush3.msk.msra.mxu1 %vm11572_vm0, %v16122_v12  ;;  %9301 = vmatprep.mubr.f32.mxu1 %v11983_v31  ;;  %16365 = vst [vmem:[#allocation119_spill] sm:$0xff] %v12247_v9  ;;  %v2287_v43 = vsub.f32 %v12171_v48, %v12207_v7  ;;  %v12251_v16 = vand.u32 4294901760, %v2078_v59 }
 0x11c   :  { %v662_v49 = vpop.f32.mrf.mxu1  ;;  %v12241_v25 = vpop.f32.mrf.mxu0  ;;  %9373 = vmatpush3.msra.mxu0 %v11632_v44  ;;  %9476 = vmatprep.subr.msk.mxu1 %vm11595_vm1, %v16122_v12  ;;  %v12260_v44 = vand.u32 4294901760, %v12216_v8  ;;  %v12263_v31 = vsub.f32 %v2076_v61, %v12218_v11  ;;  %16369 = vst [vmem:[#allocation123_spill] sm:$0xff] %v12265_v10  ;;  %v12276_v48 = vand.u32 4294901760, %v12230_v4  ;;  %v12279_v61 = vsub.f32 %v2077_v0, %v12232_v34 }
 0x11d   :  { %16366 = vst [vmem:[#allocation120_spill] sm:$0xff] %v12251_v16  ;;  %v12253_v53 = vadd.f32 %v662_v49, %v217_v17  ;;  %9204 = vmatmul.mubr.f32.gmra.mxu0 %v12210_v57  ;;  %9477 = vmatpush3.msk.msra.mxu1 %vm11595_vm1, %v16122_v12  ;;  %v12271_v49 = vand.u32 4294901760, %v2277_v32  ;;  %v2297_v57 = vsub.f32 %v12192_v19, %v12227_v42  ;;  %v12288_v22 = vand.u32 4294901760, %v2287_v43 }
 0x11e   :  { %16367 = vst [vmem:[#allocation121_spill] sm:$0xff] %v12260_v44  ;;  %16368 = vst [vmem:[#allocation122_spill] sm:$0xff] %v12263_v31  ;;  %v8799_v7 = vpop.f32.mrf.mxu1  ;;  %9302 = vmatmul.mubr.f32.gmra.mxu1 %v11993_v47  ;;  %v12268_v17 = vpop.f32.mrf.mxu0  ;;  %9206 = vmatprep.mubr.f32.mxu0 %v12213_v23  ;;  %v2081_v47 = vld [vmem:[#allocation7 + $0xa0] sm:$0xff]  ;;  %v12295_v0 = vsub.f32 %v2078_v59, %v12251_v16  ;;  %v12309_v43 = vand.u32 4294901760, %v12263_v31  ;;  %v12312_v59 = vsub.f32 %v2079_v62, %v12265_v10 }
 0x11f   :  { %16370 = vst [vmem:[#allocation124_spill] sm:$0xff] %v12271_v49  ;;  %16371 = vst [vmem:[#allocation125_spill] sm:$0xff] %v12276_v48  ;;  %v12282_v52 = vadd.f32 %v8799_v7, %v12164_v58  ;;  %9304 = vmatprep.mubr.f32.mxu1 %v12006_v5  ;;  %9374 = vmatprep.subr.mxu0 %v11661_v33  ;;  %v12297_v58 = vand.u32 4294901760, %v2080_v35  ;;  %v2082_v5 = vld [vmem:[#allocation7 + $0xa8] sm:$0xff] }
 0x120   :  { %16372 = vst [vmem:[#allocation126_spill] sm:$0xff] %v12279_v61  ;;  %v674_v23 = vpop.f32.mrf.mxu1  ;;  %v12286_v32 = vpop.f32.mrf.mxu0  ;;  %16373 = vst [vmem:[#allocation127_spill] sm:$0xff] %v12288_v22  ;;  %9375 = vmatpush3.msra.mxu0 %v11661_v33  ;;  %9478 = vmatprep.subr.msk.mxu1 %vm11618_vm2, %v16122_v12  ;;  %v2307_v33 = vsub.f32 %v12216_v8, %v12260_v44  ;;  %v12323_v44 = vand.u32 4294901760, %v12279_v61  ;;  %v12325_v8 = vand.u32 4294901760, %v2081_v47 }
 0x121   :  { %16374 = vst [vmem:[#allocation128_spill] sm:$0xff] %v12295_v0  ;;  %16375 = vst [vmem:[#allocation129_spill] sm:$0xff] %v12297_v58  ;;  %v12300_v7 = vadd.f32 %v674_v23, %v12183_v39  ;;  %9207 = vmatmul.mubr.f32.gmra.mxu0 %v12247_v9  ;;  %9479 = vmatpush3.msk.msra.mxu1 %vm11618_vm2, %v16122_v12  ;;  %v12318_v39 = vand.u32 4294901760, %v2297_v57  ;;  %v2317_v9 = vsub.f32 %v12230_v4, %v12276_v48 }
 0x122   :  { %16376 = vst [vmem:[#allocation130_spill] sm:$0xff] %v12309_v43  ;;  %16377 = vst [vmem:[#allocation131_spill] sm:$0xff] %v12312_v59  ;;  %v8802_v42 = vpop.f32.mrf.mxu1  ;;  %9305 = vmatmul.mubr.f32.gmra.mxu1 %v12032_v37  ;;  %v12315_v23 = vpop.f32.mrf.mxu0  ;;  %9209 = vmatprep.mubr.f32.mxu0 %v12271_v49  ;;  %v2083_v37 = vld [vmem:[#allocation7 + $0xb0] sm:$0xff]  ;;  %v12339_v57 = vand.u32 4294901760, %v12295_v0  ;;  %v12350_v48 = vand.u32 4294901760, %v2307_v33  ;;  %v12358_v4 = vand.u32 4294901760, %v12312_v59  ;;  %v12369_v33 = vsub.f32 %v2081_v47, %v12325_v8 }
 0x123   :  { %16378 = vst [vmem:[#allocation132_spill] sm:$0xff] %v12318_v39  ;;  %16379 = vst [vmem:[#allocation133_spill] sm:$0xff] %v12323_v44  ;;  %v12328_v62 = vadd.f32 %v8802_v42, %v12198_v30  ;;  %9307 = vmatprep.mubr.f32.mxu1 %v12042_v18  ;;  %9376 = vmatprep.subr.mxu0 %v11694_v54  ;;  %v12342_v30 = vsub.f32 %v2080_v35, %v12297_v58  ;;  %v12344_v42 = vand.u32 4294901760, %v2082_v5 }
 0x124   :  { %16380 = vst [vmem:[#allocation134_spill] sm:$0xff] %v12325_v8  ;;  %v686_v19 = vpop.f32.mrf.mxu1  ;;  %v12332_v49 = vpop.f32.mrf.mxu0  ;;  %9377 = vmatpush3.msra.mxu0 %v11694_v54  ;;  %9480 = vmatprep.subr.msk.mxu1 %vm11646_vm3, %v16122_v12  ;;  %16381 = vst [vmem:[#allocation135_spill] sm:$0xff] %v12339_v57  ;;  %v2327_v54 = vsub.f32 %v12263_v31, %v12309_v43  ;;  %v2084_v43 = vld [vmem:[#allocation7 + $0xb8] sm:$0xff] }
 0x125   :  { %16382 = vst [vmem:[#allocation136_spill] sm:$0xff] %v12342_v30  ;;  %16383 = vst [vmem:[#allocation137_spill] sm:$0xff] %v12344_v42  ;;  %v12347_v18 = vadd.f32 %v686_v19, %v12221_v1  ;;  %9210 = vmatmul.mubr.f32.gmra.mxu0 %v12288_v22  ;;  %9481 = vmatpush3.msk.msra.mxu1 %vm11646_vm3, %v16122_v12  ;;  %v12364_v1 = vand.u32 4294901760, %v2317_v9  ;;  %v2337_v19 = vsub.f32 %v12279_v61, %v12323_v44 }
 0x126   :  { %16384 = vst [vmem:[#allocation138_spill] sm:$0xff] %v12350_v48  ;;  %16385 = vst [vmem:[#allocation139_spill] sm:$0xff] %v12358_v4  ;;  %v8805_v35 = vpop.f32.mrf.mxu1  ;;  %9308 = vmatmul.mubr.f32.gmra.mxu1 %v12071_v24  ;;  %v12361_v26 = vpop.f32.mrf.mxu0  ;;  %9212 = vmatprep.mubr.f32.mxu0 %v12318_v39  ;;  %v12371_v22 = vand.u32 4294901760, %v2083_v37  ;;  %v2085_v24 = vld [vmem:[#allocation7 + $0xc0] sm:$0xff]  ;;  %v2347_v44 = vsub.f32 %v12295_v0, %v12339_v57  ;;  %v12390_v47 = vsub.f32 %v2082_v5, %v12344_v42 }
 0x127   :  { %16386 = vst [vmem:[#allocation140_spill] sm:$0xff] %v12364_v1  ;;  %16387 = vst [vmem:[#allocation141_spill] sm:$0xff] %v12369_v33  ;;  %v12374_v31 = vadd.f32 %v8805_v35, %v12241_v25  ;;  %9310 = vmatprep.mubr.f32.mxu1 %v12073_v60  ;;  %9378 = vmatprep.subr.mxu0 %v11724_v6  ;;  %v12387_v25 = vand.u32 4294901760, %v12342_v30  ;;  %v12396_v60 = vand.u32 4294901760, %v2327_v54  ;;  %v12403_v57 = vand.u32 4294901760, %v2084_v43 }
 0x128   :  { %16388 = vst [vmem:[#allocation142_spill] sm:$0xff] %v12371_v22  ;;  %v698_v39 = vpop.f32.mrf.mxu1  ;;  %v12378_v9 = vpop.f32.mrf.mxu0  ;;  %9379 = vmatpush3.msra.mxu0 %v11724_v6  ;;  %9482 = vmatprep.subr.msk.mxu1 %vm11676_vm4, %v16122_v12  ;;  %16390 = vst [vmem:[#allocation144_spill] sm:$0xff] %v12390_v47  ;;  %v2357_v6 = vsub.f32 %v12312_v59, %v12358_v4  ;;  %v12415_v54 = vsub.f32 %v2083_v37, %v12371_v22  ;;  %v2086_v4 = vld [vmem:[#allocation7 + $0xc8] sm:$0xff]  ;;  %v12426_v61 = vand.u32 4294901760, %v2347_v44 }
 0x129   :  { %16389 = vst [vmem:[#allocation143_spill] sm:$0xff] %v12387_v25  ;;  %v12393_v35 = vadd.f32 %v698_v39, %v12268_v17  ;;  %9213 = vmatmul.mubr.f32.gmra.mxu0 %v12350_v48  ;;  %16391 = vst [vmem:[#allocation145_spill] sm:$0xff] %v12396_v60  ;;  %9483 = vmatpush3.msk.msra.mxu1 %vm11676_vm4, %v16122_v12  ;;  %v12409_v17 = vand.u32 4294901760, %v2337_v19  ;;  %v12412_v39 = vand.u32 4294901760, %v12369_v33  ;;  %v12417_v48 = vand.u32 4294901760, %v2085_v24 }
 0x12a   :  { %16392 = vst [vmem:[#allocation146_spill] sm:$0xff] %v12403_v57  ;;  %v8808_v0 = vpop.f32.mrf.mxu1  ;;  %9311 = vmatmul.mubr.f32.gmra.mxu1 %v12100_v14  ;;  %v12406_v5 = vpop.f32.mrf.mxu0  ;;  %9215 = vmatprep.mubr.f32.mxu0 %v12364_v1  ;;  %16395 = vst [vmem:[#allocation149_spill] sm:$0xff] %v12415_v54  ;;  %v2087_v14 = vld [vmem:[#allocation7 + $0xd0] sm:$0xff]  ;;  %v2367_v37 = vsub.f32 %v12342_v30, %v12387_v25  ;;  %v12449_v44 = vand.u32 4294901760, %v2086_v4  ;;  %v2088_v25 = vld [vmem:[#allocation7 + $0xd8] sm:$0xff] }
 0x12b   :  { %16393 = vst [vmem:[#allocation147_spill] sm:$0xff] %v12409_v17  ;;  %16394 = vst [vmem:[#allocation148_spill] sm:$0xff] %v12412_v39  ;;  %v12420_v59 = vadd.f32 %v8808_v0, %v12286_v32  ;;  %9313 = vmatprep.mubr.f32.mxu1 %v12123_v56  ;;  %9380 = vmatprep.subr.mxu0 %v11750_v36  ;;  %v12435_v32 = vand.u32 4294901760, %v12390_v47  ;;  %v12441_v56 = vand.u32 4294901760, %v2357_v6 }
 0x12c   :  { %16396 = vst [vmem:[#allocation150_spill] sm:$0xff] %v12417_v48  ;;  %v710_v1 = vpop.f32.mrf.mxu1  ;;  %v12424_v19 = vpop.f32.mrf.mxu0  ;;  %16397 = vst [vmem:[#allocation151_spill] sm:$0xff] %v12426_v61  ;;  %9381 = vmatpush3.msra.mxu0 %v11750_v36  ;;  %9484 = vmatprep.subr.msk.mxu1 %vm11708_vm5, %v16122_v12  ;;  %v12447_v36 = vsub.f32 %v2084_v43, %v12403_v57  ;;  %v12461_v6 = vsub.f32 %v2085_v24, %v12417_v48  ;;  %v12463_v43 = vand.u32 4294901760, %v2087_v14 }
 0x12d   :  { %16398 = vst [vmem:[#allocation152_spill] sm:$0xff] %v12435_v32  ;;  %v12438_v0 = vadd.f32 %v710_v1, %v12315_v23  ;;  %9216 = vmatmul.mubr.f32.gmra.mxu0 %v12396_v60  ;;  %16399 = vst [vmem:[#allocation153_spill] sm:$0xff] %v12441_v56  ;;  %9485 = vmatpush3.msk.msra.mxu1 %vm11708_vm5, %v16122_v12  ;;  %v2377_v23 = vsub.f32 %v12369_v33, %v12412_v39  ;;  %v12458_v1 = vand.u32 4294901760, %v12415_v54  ;;  %v2089_v60 = vld [vmem:[#allocation7 + $0xe0] sm:$0xff] }
 0x12e   :  { %16400 = vst [vmem:[#allocation154_spill] sm:$0xff] %v12447_v36  ;;  %16401 = vst [vmem:[#allocation155_spill] sm:$0xff] %v12449_v44  ;;  %v8811_v30 = vpop.f32.mrf.mxu1  ;;  %9314 = vmatmul.mubr.f32.gmra.mxu1 %v12139_v13  ;;  %v12452_v63 = vpop.f32.mrf.mxu0  ;;  %9218 = vmatprep.mubr.f32.mxu0 %v12409_v17  ;;  %v12472_v39 = vand.u32 4294901760, %v2367_v37  ;;  %v2387_v33 = vsub.f32 %v12390_v47, %v12435_v32  ;;  %v12480_v24 = vand.u32 4294901760, %v2088_v25  ;;  %v12495_v37 = vand.u32 4294901760, %v2089_v60 }
 0x12f   :  { %16402 = vst [vmem:[#allocation156_spill] sm:$0xff] %v12458_v1  ;;  %16403 = vst [vmem:[#allocation157_spill] sm:$0xff] %v12461_v6  ;;  %v12466_v50 = vadd.f32 %v8811_v30, %v12332_v49  ;;  %9316 = vmatprep.mubr.f32.mxu1 %v12161_v45  ;;  %9382 = vmatprep.subr.mxu0 %v11776_v51  ;;  %v12487_v30 = vand.u32 4294901760, %v12447_v36  ;;  %v2090_v45 = vld [vmem:[#allocation7 + $0xe8] sm:$0xff]  ;;  %v12506_v47 = vand.u32 4294901760, %v12461_v6 }
 0x130   :  { %16404 = vst [vmem:[#allocation158_spill] sm:$0xff] %v12463_v43  ;;  %v722_v17 = vpop.f32.mrf.mxu1  ;;  %v12470_v13 = vpop.f32.mrf.mxu0  ;;  %16405 = vst [vmem:[#allocation159_spill] sm:$0xff] %v12472_v39  ;;  %9383 = vmatpush3.msra.mxu0 %v11776_v51  ;;  %9486 = vmatprep.subr.msk.mxu1 %vm11737_vm6, %v16122_v12  ;;  %v12493_v51 = vsub.f32 %v2086_v4, %v12449_v44  ;;  %v12509_v4 = vsub.f32 %v2087_v14, %v12463_v43  ;;  %v12518_v29 = vand.u32 4294901760, %v2387_v33 }
 0x131   :  { %16406 = vst [vmem:[#allocation160_spill] sm:$0xff] %v12480_v24  ;;  %v12483_v49 = vadd.f32 %v722_v17, %v12361_v26  ;;  %9219 = vmatmul.mubr.f32.gmra.mxu0 %v12426_v61  ;;  %16407 = vst [vmem:[#allocation161_spill] sm:$0xff] %v12487_v30  ;;  %9487 = vmatpush3.msk.msra.mxu1 %vm11737_vm6, %v16122_v12  ;;  %v12501_v17 = vand.u32 4294901760, %v2377_v23  ;;  %v2397_v61 = vsub.f32 %v12415_v54, %v12458_v1 }
 0x132   :  { %16408 = vst [vmem:[#allocation162_spill] sm:$0xff] %v12493_v51  ;;  %16409 = vst [vmem:[#allocation163_spill] sm:$0xff] %v12495_v37  ;;  %v8814_v32 = vpop.f32.mrf.mxu1  ;;  %9317 = vmatmul.mubr.f32.gmra.mxu1 %v12180_v38  ;;  %v12498_v26 = vpop.f32.mrf.mxu0  ;;  %9221 = vmatprep.mubr.f32.mxu0 %v12441_v56  ;;  %v2091_v38 = vld [vmem:[#allocation7 + $0xf0] sm:$0xff]  ;;  %v12525_v14 = vsub.f32 %v2088_v25, %v12480_v24  ;;  %v2407_v33 = vsub.f32 %v12447_v36, %v12487_v30  ;;  %v2092_v25 = vld [vmem:[#allocation7 + $0xf8] sm:$0xff]  ;;  %v12553_v30 = vand.u32 4294901760, %v12509_v4 }
 0x133   :  { %16410 = vst [vmem:[#allocation164_spill] sm:$0xff] %v12501_v17  ;;  %16411 = vst [vmem:[#allocation165_spill] sm:$0xff] %v12506_v47  ;;  %v12512_v15 = vadd.f32 %v8814_v32, %v12378_v9  ;;  %9319 = vmatprep.mubr.f32.mxu1 %v12194_v2  ;;  %9384 = vmatprep.subr.mxu0 %v11802_v28  ;;  %v12527_v9 = vand.u32 4294901760, %v2090_v45  ;;  %v12536_v2 = vand.u32 4294901760, %v12493_v51  ;;  %v12555_v36 = vand.u32 4294901760, %v2091_v38 }
 0x134   :  { %16412 = vst [vmem:[#allocation166_spill] sm:$0xff] %v12509_v4  ;;  %v734_v56 = vpop.f32.mrf.mxu1  ;;  %v12516_v23 = vpop.f32.mrf.mxu0  ;;  %16413 = vst [vmem:[#allocation167_spill] sm:$0xff] %v12518_v29  ;;  %9385 = vmatpush3.msra.mxu0 %v11802_v28  ;;  %9488 = vmatprep.subr.msk.mxu1 %vm11760_vm7, %v16122_v12  ;;  %v12542_v28 = vsub.f32 %v2089_v60, %v12495_v37 }
 0x135   :  { %16414 = vst [vmem:[#allocation168_spill] sm:$0xff] %v12525_v14  ;;  %16415 = vst [vmem:[#allocation169_spill] sm:$0xff] %v12527_v9  ;;  %v12530_v32 = vadd.f32 %v734_v56, %v12406_v5  ;;  %9222 = vmatmul.mubr.f32.gmra.mxu0 %v12472_v39  ;;  %9489 = vmatpush3.msk.msra.mxu1 %vm11760_vm7, %v16122_v12  ;;  %v12548_v5 = vand.u32 4294901760, %v2397_v61  ;;  %v2417_v39 = vsub.f32 %v12461_v6, %v12506_v47 }
 0x136   :  { %16416 = vst [vmem:[#allocation170_spill] sm:$0xff] %v12536_v2  ;;  %16417 = vst [vmem:[#allocation171_spill] sm:$0xff] %v12542_v28  ;;  %v8817_v1 = vpop.f32.mrf.mxu1  ;;  %9320 = vmatmul.mubr.f32.gmra.mxu1 %v12218_v11  ;;  %v12545_v56 = vpop.f32.mrf.mxu0  ;;  %9224 = vmatprep.mubr.f32.mxu0 %v12501_v17  ;;  %v2093_v11 = vld [vmem:[#allocation7 + $0x100] sm:$0xff]  ;;  %v12565_v61 = vand.u32 4294901760, %v12525_v14  ;;  %v12568_v47 = vsub.f32 %v2090_v45, %v12527_v9  ;;  %v2427_v6 = vsub.f32 %v12493_v51, %v12536_v2  ;;  %v2094_v2 = vld [vmem:[#allocation7 + $0x108] sm:$0xff] }
 0x137   :  { %16418 = vst [vmem:[#allocation172_spill] sm:$0xff] %v12548_v5  ;;  %16419 = vst [vmem:[#allocation173_spill] sm:$0xff] %v12553_v30  ;;  %v12558_v60 = vadd.f32 %v8817_v1, %v12424_v19  ;;  %9322 = vmatprep.mubr.f32.mxu1 %v12232_v34  ;;  %9386 = vmatprep.subr.mxu0 %v11828_v21  ;;  %v12574_v19 = vand.u32 4294901760, %v2092_v25  ;;  %v12580_v34 = vand.u32 4294901760, %v2407_v33  ;;  %v12585_v45 = vand.u32 4294901760, %v12542_v28 }
 0x138   :  { %16420 = vst [vmem:[#allocation174_spill] sm:$0xff] %v12555_v36  ;;  %v746_v54 = vpop.f32.mrf.mxu1  ;;  %v12562_v17 = vpop.f32.mrf.mxu0  ;;  %16421 = vst [vmem:[#allocation175_spill] sm:$0xff] %v12565_v61  ;;  %9387 = vmatpush3.msra.mxu0 %v11828_v21  ;;  %9490 = vmatprep.subr.msk.mxu1 %vm11786_vm8, %v16122_v12  ;;  %v12599_v33 = vsub.f32 %v2091_v38, %v12555_v36  ;;  %v12613_v38 = vand.u32 4294901760, %v12568_v47 }
 0x139   :  { %16422 = vst [vmem:[#allocation176_spill] sm:$0xff] %v12568_v47  ;;  %16423 = vst [vmem:[#allocation177_spill] sm:$0xff] %v12574_v19  ;;  %v12577_v1 = vadd.f32 %v746_v54, %v12452_v63  ;;  %9225 = vmatmul.mubr.f32.gmra.mxu0 %v12518_v29  ;;  %9491 = vmatpush3.msk.msra.mxu1 %vm11786_vm8, %v16122_v12  ;;  %v12594_v63 = vand.u32 4294901760, %v2417_v39  ;;  %v2437_v54 = vsub.f32 %v12509_v4, %v12553_v30 }
 0x13a   :  { %16424 = vst [vmem:[#allocation178_spill] sm:$0xff] %v12580_v34  ;;  %16425 = vst [vmem:[#allocation179_spill] sm:$0xff] %v12585_v45  ;;  %v8820_v21 = vpop.f32.mrf.mxu1  ;;  %9323 = vmatmul.mubr.f32.gmra.mxu1 %v12251_v16  ;;  %v12591_v41 = vpop.f32.mrf.mxu0  ;;  %9227 = vmatprep.mubr.f32.mxu0 %v12548_v5  ;;  %v12601_v29 = vand.u32 4294901760, %v2093_v11  ;;  %v2095_v16 = vld [vmem:[#allocation7 + $0x110] sm:$0xff]  ;;  %v2447_v30 = vsub.f32 %v12525_v14, %v12565_v61  ;;  %v12616_v4 = vsub.f32 %v2092_v25, %v12574_v19 }
 0x13b   :  { %16426 = vst [vmem:[#allocation180_spill] sm:$0xff] %v12594_v63  ;;  %16427 = vst [vmem:[#allocation181_spill] sm:$0xff] %v12599_v33  ;;  %v12604_v51 = vadd.f32 %v8820_v21, %v12470_v13  ;;  %9325 = vmatprep.mubr.f32.mxu1 %v12265_v10  ;;  %9388 = vmatprep.subr.mxu0 %v11854_v20  ;;  %v12626_v21 = vand.u32 4294901760, %v2427_v6  ;;  %v2457_v10 = vsub.f32 %v12542_v28, %v12585_v45  ;;  %v2096_v45 = vld [vmem:[#allocation7 + $0x118] sm:$0xff] }
 0x13c   :  { %16428 = vst [vmem:[#allocation182_spill] sm:$0xff] %v12601_v29  ;;  %v758_v5 = vpop.f32.mrf.mxu1  ;;  %v12608_v39 = vpop.f32.mrf.mxu0  ;;  %16429 = vst [vmem:[#allocation183_spill] sm:$0xff] %v12613_v38  ;;  %9389 = vmatpush3.msra.mxu0 %v11854_v20  ;;  %9492 = vmatprep.subr.msk.mxu1 %vm11812_vm9, %v16122_v12  ;;  %v12630_v61 = vand.u32 4294901760, %v2094_v2  ;;  %v12642_v6 = vand.u32 4294901760, %v12599_v33  ;;  %v12656_v14 = vand.u32 4294901760, %v2447_v30  ;;  %v12661_v55 = vand.u32 4294901760, %v12616_v4 }
 0x13d   :  { %16430 = vst [vmem:[#allocation184_spill] sm:$0xff] %v12616_v4  ;;  %v12623_v13 = vadd.f32 %v758_v5, %v12498_v26  ;;  %9228 = vmatmul.mubr.f32.gmra.mxu0 %v12580_v34  ;;  %16431 = vst [vmem:[#allocation185_spill] sm:$0xff] %v12626_v21  ;;  %9493 = vmatpush3.msk.msra.mxu1 %vm11812_vm9, %v16122_v12  ;;  %v12639_v26 = vand.u32 4294901760, %v2437_v54  ;;  %v12645_v5 = vsub.f32 %v2093_v11, %v12601_v29 }
 0x13e   :  { %16432 = vst [vmem:[#allocation186_spill] sm:$0xff] %v12630_v61  ;;  %v8823_v20 = vpop.f32.mrf.mxu1  ;;  %9326 = vmatmul.mubr.f32.gmra.mxu1 %v12297_v58  ;;  %v12636_v25 = vpop.f32.mrf.mxu0  ;;  %9230 = vmatprep.mubr.f32.mxu0 %v12594_v63  ;;  %16434 = vst [vmem:[#allocation188_spill] sm:$0xff] %v12642_v6  ;;  %v12647_v34 = vand.u32 4294901760, %v2095_v16  ;;  %v2097_v58 = vld [vmem:[#allocation7 + $0x120] sm:$0xff]  ;;  %v2467_v11 = vsub.f32 %v12568_v47, %v12613_v38  ;;  %v12671_v30 = vand.u32 4294901760, %v2457_v10  ;;  %v12676_v38 = vand.u32 4294901760, %v2096_v45 }
 0x13f   :  { %16433 = vst [vmem:[#allocation187_spill] sm:$0xff] %v12639_v26  ;;  %16435 = vst [vmem:[#allocation189_spill] sm:$0xff] %v12645_v5  ;;  %v12650_v28 = vadd.f32 %v8823_v20, %v12516_v23  ;;  %9328 = vmatprep.mubr.f32.mxu1 %v12325_v8  ;;  %9390 = vmatprep.subr.mxu0 %v11880_v40  ;;  %v2098_v23 = vld [vmem:[#allocation7 + $0x128] sm:$0xff]  ;;  %v12674_v8 = vsub.f32 %v2094_v2, %v12630_v61 }
 0x140   :  { %16436 = vst [vmem:[#allocation190_spill] sm:$0xff] %v12647_v34  ;;  %v770_v63 = vpop.f32.mrf.mxu1  ;;  %v12654_v54 = vpop.f32.mrf.mxu0  ;;  %16438 = vst [vmem:[#allocation192_spill] sm:$0xff] %v12656_v14  ;;  %9391 = vmatpush3.msra.mxu0 %v11880_v40  ;;  %9494 = vmatprep.subr.msk.mxu1 %vm11838_vm10, %v16122_v12  ;;  %v2477_v10 = vsub.f32 %v12599_v33, %v12642_v6  ;;  %v12691_v2 = vsub.f32 %v2095_v16, %v12647_v34  ;;  %v12704_v33 = vand.u32 4294901760, %v2467_v11 }
 0x141   :  { %16437 = vst [vmem:[#allocation191_spill] sm:$0xff] %v12650_v28  ;;  %16439 = vst [vmem:[#allocation193_spill] sm:$0xff] %v12661_v55  ;;  %v12668_v20 = vadd.f32 %v770_v63, %v12545_v56  ;;  %9231 = vmatmul.mubr.f32.gmra.mxu0 %v12626_v21  ;;  %9495 = vmatpush3.msk.msra.mxu1 %vm11838_vm10, %v16122_v12  ;;  %v12688_v56 = vand.u32 4294901760, %v12645_v5  ;;  %v12693_v63 = vand.u32 4294901760, %v2097_v58  ;;  %v2099_v21 = vld [vmem:[#allocation7 + $0x130] sm:$0xff] }
 0x142   :  { %16441 = vst [vmem:[#allocation195_spill] sm:$0xff] %v12671_v30  ;;  %16442 = vst [vmem:[#allocation196_spill] sm:$0xff] %v12674_v8  ;;  %v8826_v40 = vpop.f32.mrf.mxu1  ;;  %9329 = vmatmul.mubr.f32.gmra.mxu1 %v12344_v42  ;;  %v12682_v47 = vpop.f32.mrf.mxu0  ;;  %9233 = vmatprep.mubr.f32.mxu0 %v12639_v26  ;;  %v12699_v42 = vand.u32 4294901760, %v2098_v23  ;;  %v16449_v26 = vld [vmem:[#allocation35_spill] sm:$0xff]  ;;  %v2487_v16 = vsub.f32 %v12616_v4, %v12661_v55  ;;  %v12720_v11 = vsub.f32 %v2096_v45, %v12676_v38 }
 0x143   :  { %16440 = vst [vmem:[#allocation194_spill] sm:$0xff] %v12668_v20  ;;  %16443 = vst [vmem:[#allocation197_spill] sm:$0xff] %v12676_v38  ;;  %v12696_v46 = vadd.f32 %v8826_v40, %v12562_v17  ;;  %9331 = vmatprep.mubr.f32.mxu1 %v12371_v22  ;;  %9392 = vmatprep.subr.mxu0 %v16449_v26  ;;  %v12717_v40 = vand.u32 4294901760, %v12674_v8  ;;  %v12722_v22 = vand.u32 4294901760, %v2099_v21  ;;  %v2100_v55 = vld [vmem:[#allocation7 + $0x138] sm:$0xff] }
 0x144   :  { %16444 = vst [vmem:[#allocation198_spill] sm:$0xff] %v12688_v56  ;;  %16445 = vst [vmem:[#allocation199_spill] sm:$0xff] %v12691_v2  ;;  %v782_v3 = vpop.f32.mrf.mxu1  ;;  %v12702_v6 = vpop.f32.mrf.mxu0  ;;  %9393 = vmatpush3.msra.mxu0 %v16449_v26  ;;  %9496 = vmatprep.subr.msk.mxu1 %vm11864_vm11, %v16122_v12  ;;  %v2101_v26 = vld [vmem:[#allocation7 + $0x140] sm:$0xff]  ;;  %v2497_v45 = vsub.f32 %v12645_v5, %v12688_v56  ;;  %v12751_v56 = vand.u32 4294901760, %v2487_v16  ;;  %v12753_v5 = vand.u32 4294901760, %v2100_v55 }
 0x145   :  { %16446 = vst [vmem:[#allocation200_spill] sm:$0xff] %v12693_v63  ;;  %16447 = vst [vmem:[#allocation201_spill] sm:$0xff] %v12696_v46  ;;  %v12713_v17 = vadd.f32 %v782_v3, %v12591_v41  ;;  %9234 = vmatmul.mubr.f32.gmra.mxu0 %v12656_v14  ;;  %9497 = vmatpush3.msk.msra.mxu1 %vm11864_vm11, %v16122_v12  ;;  %v12731_v3 = vand.u32 4294901760, %v2477_v10  ;;  %v12736_v14 = vand.u32 4294901760, %v12691_v2  ;;  %v12755_v28 = vand.u32 4294901760, %v2101_v26 }
 0x146   :  { %16448 = vst [vmem:[#allocation202_spill] sm:$0xff] %v12699_v42  ;;  %16450 = vst [vmem:[#allocation35_spill] sm:$0xff] %v12704_v33  ;;  %v8829_v4 = vpop.f32.mrf.mxu1  ;;  %9332 = vmatmul.mubr.f32.gmra.mxu1 %v12403_v57  ;;  %v12728_v41 = vpop.f32.mrf.mxu0  ;;  %9236 = vmatprep.mubr.f32.mxu0 %v12671_v30  ;;  %v12746_v57 = vsub.f32 %v2098_v23, %v12699_v42  ;;  %v16460_v30 = vld [vmem:[#allocation39_spill] sm:$0xff]  ;;  %v12768_v23 = vand.u32 4294901760, %v12720_v11  ;;  %v12771_v16 = vsub.f32 %v2099_v21, %v12722_v22 }
 0x147   :  { %16452 = vst [vmem:[#allocation203_spill] sm:$0xff] %v12713_v17  ;;  %16453 = vst [vmem:[#allocation204_spill] sm:$0xff] %v12717_v40  ;;  %v12739_v17 = vsub.f32 %v2097_v58, %v12693_v63  ;;  %v12742_v20 = vadd.f32 %v8829_v4, %v12608_v39  ;;  %9334 = vmatprep.mubr.f32.mxu1 %v12417_v48  ;;  %9394 = vmatprep.subr.mxu0 %v16460_v30  ;;  %v2102_v48 = vld [vmem:[#allocation7 + $0x148] sm:$0xff]  ;;  %v16472_v58 = vld [vmem:[#allocation51_spill] sm:$0xff] }
 0x148   :  { %16454 = vst [vmem:[#allocation205_spill] sm:$0xff] %v12720_v11  ;;  %16455 = vst [vmem:[#allocation206_spill] sm:$0xff] %v12722_v22  ;;  %v794_v10 = vpop.f32.mrf.mxu1  ;;  %v12749_v46 = vpop.f32.mrf.mxu0  ;;  %9395 = vmatpush3.msra.mxu0 %v16460_v30  ;;  %9498 = vmatprep.subr.msk.mxu1 %vm11890_vm12, %v16122_v12  ;;  %v2507_v39 = vsub.f32 %v12674_v8, %v12717_v40  ;;  %v12792_v8 = vand.u32 4294901760, %v12746_v57 }
 0x149   :  { %16456 = vst [vmem:[#allocation207_spill] sm:$0xff] %v12731_v3  ;;  %16457 = vst [vmem:[#allocation208_spill] sm:$0xff] %v12736_v14  ;;  %v12762_v4 = vadd.f32 %v794_v10, %v12636_v25  ;;  %9237 = vmatmul.mubr.f32.gmra.mxu0 %v12704_v33  ;;  %9499 = vmatpush3.msk.msra.mxu1 %vm11890_vm12, %v16122_v12  ;;  %v12780_v10 = vand.u32 4294901760, %v2497_v45  ;;  %v2517_v33 = vsub.f32 %v12691_v2, %v12736_v14 }
 0x14a   :  { %16458 = vst [vmem:[#allocation209_spill] sm:$0xff] %v12739_v17  ;;  %16459 = vst [vmem:[#allocation210_spill] sm:$0xff] %v12746_v57  ;;  %v8832_v30 = vpop.f32.mrf.mxu1  ;;  %9335 = vmatmul.mubr.f32.gmra.mxu1 %v12449_v44  ;;  %v12777_v25 = vpop.f32.mrf.mxu0  ;;  %9239 = vmatprep.mubr.f32.mxu0 %v12731_v3  ;;  %v12785_v21 = vand.u32 4294901760, %v12739_v17  ;;  %v2103_v44 = vld [vmem:[#allocation7 + $0x150] sm:$0xff]  ;;  %v12801_v14 = vsub.f32 %v2101_v26, %v12755_v28  ;;  %v12803_v2 = vand.u32 4294901760, %v2102_v48  ;;  %v12818_v26 = vand.u32 4294901760, %v12771_v16 }
 0x14b   :  { %16461 = vst [vmem:[#allocation39_spill] sm:$0xff] %v12751_v56  ;;  %16462 = vst [vmem:[#allocation211_spill] sm:$0xff] %v12753_v5  ;;  %v12788_v40 = vadd.f32 %v8832_v30, %v12654_v54  ;;  %9337 = vmatprep.mubr.f32.mxu1 %v12463_v43  ;;  %9396 = vmatprep.subr.mxu0 %v16472_v58  ;;  %v12813_v43 = vand.u32 4294901760, %v2507_v39  ;;  %v12831_v39 = vand.u32 4294901760, %v2103_v44  ;;  %v16483_v54 = vld [vmem:[#allocation54_spill] sm:$0xff] }
 0x14c   :  { %16463 = vst [vmem:[#allocation212_spill] sm:$0xff] %v12755_v28  ;;  %16465 = vst [vmem:[#allocation213_spill] sm:$0xff] %v12762_v4  ;;  %v806_v3 = vpop.f32.mrf.mxu1  ;;  %v12795_v45 = vpop.f32.mrf.mxu0  ;;  %v12798_v4 = vsub.f32 %v2100_v55, %v12753_v5  ;;  %9397 = vmatpush3.msra.mxu0 %v16472_v58  ;;  %9500 = vmatprep.subr.msk.mxu1 %vm11920_vm13, %v16122_v12  ;;  %v2527_v55 = vsub.f32 %v12720_v11, %v12768_v23  ;;  %v2105_v11 = vld [vmem:[#allocation7 + $0x160] sm:$0xff] }
 0x14d   :  { %16466 = vst [vmem:[#allocation214_spill] sm:$0xff] %v12768_v23  ;;  %16467 = vst [vmem:[#allocation215_spill] sm:$0xff] %v12771_v16  ;;  %v12810_v30 = vadd.f32 %v806_v3, %v12682_v47  ;;  %9240 = vmatmul.mubr.f32.gmra.mxu0 %v12751_v56  ;;  %9501 = vmatpush3.msk.msra.mxu1 %vm11920_vm13, %v16122_v12  ;;  %v12827_v47 = vand.u32 4294901760, %v2517_v33  ;;  %v2537_v3 = vsub.f32 %v12739_v17, %v12785_v21  ;;  %v2104_v56 = vld [vmem:[#allocation7 + $0x158] sm:$0xff] }
 0x14e   :  { %16468 = vst [vmem:[#allocation216_spill] sm:$0xff] %v12780_v10  ;;  %16469 = vst [vmem:[#allocation217_spill] sm:$0xff] %v12785_v21  ;;  %v8835_v58 = vpop.f32.mrf.mxu1  ;;  %9338 = vmatmul.mubr.f32.gmra.mxu1 %v12480_v24  ;;  %9242 = vmatprep.mubr.f32.mxu0 %v12780_v10  ;;  %v2547_v24 = vsub.f32 %v12746_v57, %v12792_v8  ;;  %v12841_v33 = vand.u32 4294901760, %v12798_v4  ;;  %v12844_v21 = vand.u32 4294901760, %v12801_v14 }
 0x14f   :  { %16470 = vst [vmem:[#allocation218_spill] sm:$0xff] %v12788_v40  ;;  %16471 = vst [vmem:[#allocation219_spill] sm:$0xff] %v12792_v8  ;;  %v12824_v40 = vpop.f32.mrf.mxu0  ;;  %v12834_v23 = vadd.f32 %v8835_v58, %v12702_v6  ;;  %9340 = vmatprep.mubr.f32.mxu1 %v12495_v37  ;;  %9398 = vmatprep.subr.mxu0 %v16483_v54  ;;  %v12847_v17 = vsub.f32 %v2102_v48, %v12803_v2  ;;  %v12857_v8 = vand.u32 4294901760, %v2527_v55  ;;  %v16490_v48 = vld [vmem:[#allocation66_spill] sm:$0xff] }
 0x150   :  { %16473 = vst [vmem:[#allocation51_spill] sm:$0xff] %v12798_v4  ;;  %16474 = vst [vmem:[#allocation220_spill] sm:$0xff] %v12801_v14  ;;  %v818_v10 = vpop.f32.mrf.mxu1  ;;  %9399 = vmatpush3.msra.mxu0 %v16483_v54  ;;  %9502 = vmatprep.subr.msk.mxu1 %vm11958_vm14, %v16122_v12  ;;  %v2557_v57 = vsub.f32 %v12771_v16, %v12818_v26  ;;  %v12872_v55 = vand.u32 4294901760, %v2105_v11 }
 0x151   :  { %16475 = vst [vmem:[#allocation221_spill] sm:$0xff] %v12803_v2  ;;  %16477 = vst [vmem:[#allocation222_spill] sm:$0xff] %v12810_v30  ;;  %v12854_v58 = vadd.f32 %v818_v10, %v12728_v41  ;;  %v8876_v37 = vpop.f32.mrf.mxu0  ;;  %9243 = vmatmul.mubr.f32.gmra.mxu0 %v12813_v43  ;;  %9400 = vmatprep.subr.mxu0 %v16490_v48  ;;  %v12867_v41 = vand.u32 4294901760, %v2537_v3  ;;  %v12870_v10 = vsub.f32 %v2103_v44, %v12831_v39 }
 0x152   :  { %16478 = vst [vmem:[#allocation223_spill] sm:$0xff] %v12813_v43  ;;  %16479 = vst [vmem:[#allocation224_spill] sm:$0xff] %v12818_v26  ;;  %v944_v54 = vadd.f32 %v8876_v37, %v12235_v27  ;;  %v8838_v30 = vpop.f32.mrf.mxu1  ;;  %9341 = vmatmul.mubr.f32.gmra.mxu1 %v12527_v9  ;;  %9245 = vmatprep.mubr.f32.mxu0 %v12827_v47  ;;  %v2106_v43 = vld [vmem:[#allocation7 + $0x168] sm:$0xff]  ;;  %v12878_v27 = vand.u32 4294901760, %v2547_v24  ;;  %v2107_v37 = vld [vmem:[#allocation7 + $0x170] sm:$0xff] }
 0x153   :  { %16480 = vst [vmem:[#allocation225_spill] sm:$0xff] %v12827_v47  ;;  %16481 = vst [vmem:[#allocation226_spill] sm:$0xff] %v12831_v39  ;;  %v12875_v26 = vadd.f32 %v8838_v30, %v12749_v46  ;;  %v936_v16 = vpop.f32.mrf.mxu0  ;;  %9343 = vmatprep.mubr.f32.mxu1 %v12555_v36  ;;  %9503 = vmatpush3.msk.msra.mxu1 %vm11958_vm14, %v16122_v12  ;;  %v2567_v47 = vsub.f32 %v12798_v4, %v12841_v33  ;;  %v12889_v30 = vand.u32 4294901760, %v12847_v17 }
 0x154   :  { %16482 = vst [vmem:[#allocation227_spill] sm:$0xff] %v12834_v23  ;;  %16484 = vst [vmem:[#allocation54_spill] sm:$0xff] %v12841_v33  ;;  %v12861_v23 = vand.u32 4294901760, %v2104_v56  ;;  %v937_v3 = vadd.f32 %v936_v16, %v12253_v53  ;;  %v830_v44 = vpop.f32.mrf.mxu1  ;;  %v2577_v46 = vsub.f32 %v12801_v14, %v12844_v21  ;;  %9401 = vmatpush3.msra.mxu0 %v16490_v48  ;;  %9504 = vmatprep.subr.msk.mxu1 %vm11969_vm15, %v16122_v12 }
 0x155   :  { %16485 = vst [vmem:[#allocation228_spill] sm:$0xff] %v12844_v21  ;;  %16486 = vst [vmem:[#allocation229_spill] sm:$0xff] %v12847_v17  ;;  %v12896_v36 = vadd.f32 %v830_v44, %v12777_v25  ;;  %v8879_v53 = vpop.f32.mrf.mxu0  ;;  %9246 = vmatmul.mubr.f32.gmra.mxu0 %v12857_v8  ;;  %v12899_v16 = vand.u32 4294901760, %v2557_v57  ;;  %v12904_v21 = vand.u32 4294901760, %v2106_v43  ;;  %9505 = vmatpush3.msk.msra.mxu1 %vm11969_vm15, %v16122_v12  ;;  %v12913_v25 = vand.u32 4294901760, %v12870_v10  ;;  %v2108_v44 = vld [vmem:[#allocation7 + $0x178] sm:$0xff] }
 0x156   :  { %16488 = vst [vmem:[#allocation48_spill] sm:$0xff] %v12857_v8  ;;  %16489 = vst [vmem:[#allocation230_spill] sm:$0xff] %v12861_v23  ;;  %v12902_v9 = vsub.f32 %v2104_v56, %v12861_v23  ;;  %v958_v48 = vadd.f32 %v8879_v53, %v12282_v52  ;;  %v8841_v33 = vpop.f32.mrf.mxu1  ;;  %9344 = vmatmul.mubr.f32.gmra.mxu1 %v12574_v19  ;;  %9248 = vmatprep.mubr.f32.mxu0 %v12867_v41  ;;  %v12918_v56 = vand.u32 4294901760, %v2107_v37  ;;  %v16503_v52 = vld [vmem:[#allocation41_spill] sm:$0xff] }
 0x157   :  { %16491 = vst [vmem:[#allocation66_spill] sm:$0xff] %v12867_v41  ;;  %16492 = vst [vmem:[#allocation231_spill] sm:$0xff] %v12870_v10  ;;  %v12916_v57 = vsub.f32 %v2105_v11, %v12872_v55  ;;  %v12921_v8 = vadd.f32 %v8841_v33, %v12795_v45  ;;  %v950_v14 = vpop.f32.mrf.mxu0  ;;  %9346 = vmatprep.mubr.f32.mxu1 %v12601_v29  ;;  %9578 = vmatprep.subr.mxu0 %v16503_v52  ;;  %v12926_v19 = vand.u32 4294901760, %v2567_v47 }
 0x158   :  { %16493 = vst [vmem:[#allocation232_spill] sm:$0xff] %v12872_v55  ;;  %16494 = vst [vmem:[#allocation233_spill] sm:$0xff] %v12878_v27  ;;  %v951_v53 = vadd.f32 %v950_v14, %v12300_v7  ;;  %v842_v41 = vpop.f32.mrf.mxu1  ;;  %v12928_v4 = vand.u32 4294901760, %v2577_v46  ;;  %v2587_v11 = vsub.f32 %v12847_v17, %v12889_v30  ;;  %9682 = vmatprep.subr.msk.mxu1 %vm11572_vm0, %v16122_v12  ;;  %v12940_v7 = vand.u32 4294901760, %v12902_v9 }
 0x159   :  { %16495 = vst [vmem:[#allocation234_spill] sm:$0xff] %v12889_v30  ;;  %16497 = vst [vmem:[#allocation235_spill] sm:$0xff] %v12899_v16  ;;  %v12936_v45 = vadd.f32 %v842_v41, %v12824_v40  ;;  %v8882_v33 = vpop.f32.mrf.mxu0  ;;  %9249 = vmatmul.mubr.f32.gmra.mxu0 %v12878_v27  ;;  %v12943_v14 = vsub.f32 %v2106_v43, %v12904_v21  ;;  %v12945_v47 = vand.u32 4294901760, %v2108_v44  ;;  %v12953_v41 = vand.u32 4294901760, %v12916_v57 }
 0x15a   :  { %16498 = vst [vmem:[#allocation236_spill] sm:$0xff] %v12902_v9  ;;  %16499 = vst [vmem:[#allocation237_spill] sm:$0xff] %v12904_v21  ;;  %v972_v46 = vadd.f32 %v8882_v33, %v12328_v62  ;;  %v8956_v29 = vpop.f32.mrf.mxu1  ;;  %9347 = vmatmul.mubr.f32.gmra.mxu1 %v12630_v61  ;;  %9251 = vmatprep.mubr.f32.mxu0 %v12899_v16  ;;  %v2597_v40 = vsub.f32 %v12870_v10, %v12913_v25  ;;  %v12962_v61 = vand.u32 4294901760, %v2587_v11 }
 0x15b   :  { %16500 = vst [vmem:[#allocation238_spill] sm:$0xff] %v12913_v25  ;;  %16501 = vst [vmem:[#allocation239_spill] sm:$0xff] %v12916_v57  ;;  %v12956_v27 = vsub.f32 %v2107_v37, %v12918_v56  ;;  %v12958_v43 = vadd.f32 %v8956_v29, %v944_v54  ;;  %v964_v30 = vpop.f32.mrf.mxu0  ;;  %9349 = vmatprep.mubr.f32.mxu1 %v12647_v34  ;;  %v2607_v25 = vsub.f32 %v12902_v9, %v12940_v7 }
 0x15c   :  { %16502 = vst [vmem:[#allocation240_spill] sm:$0xff] %v12918_v56  ;;  %16504 = vst [vmem:[#allocation41_spill] sm:$0xff] %v12926_v19  ;;  %v965_v62 = vadd.f32 %v964_v30, %v12347_v18  ;;  %v1226_v33 = vpop.f32.mrf.mxu1  ;;  %v12970_v37 = vand.u32 4294901760, %v12943_v14  ;;  %v12973_v29 = vsub.f32 %v2108_v44, %v12945_v47  ;;  %v2617_v30 = vsub.f32 %v12916_v57, %v12953_v41 }
 0x15d   :  { %16505 = vst [vmem:[#allocation241_spill] sm:$0xff] %v12928_v4  ;;  %16507 = vst [vmem:[#allocation53_spill] sm:$0xff] %v12940_v7  ;;  %v12964_v16 = vadd.f32 %v1226_v33, %v937_v3  ;;  %v8885_v17 = vpop.f32.mrf.mxu0  ;;  %9252 = vmatmul.mubr.f32.gmra.mxu0 %v12926_v19  ;;  %v12978_v3 = vand.u32 4294901760, %v2597_v40  ;;  %v12983_v11 = vand.u32 4294901760, %v12956_v27  ;;  %v12992_v40 = vand.u32 4294901760, %v2607_v25 }
 0x15e   :  { %16508 = vst [vmem:[#allocation242_spill] sm:$0xff] %v12943_v14  ;;  %16509 = vst [vmem:[#allocation243_spill] sm:$0xff] %v12945_v47  ;;  %v986_v54 = vadd.f32 %v8885_v17, %v12374_v31  ;;  %v8959_v18 = vpop.f32.mrf.mxu1  ;;  %9350 = vmatmul.mubr.f32.gmra.mxu1 %v12676_v38  ;;  %9254 = vmatprep.mubr.f32.mxu0 %v12928_v4  ;;  %v2627_v4 = vsub.f32 %v12943_v14, %v12970_v37  ;;  %v12997_v34 = vand.u32 4294901760, %v12973_v29 }
 0x15f   :  { %16510 = vst [vmem:[#allocation244_spill] sm:$0xff] %v12953_v41  ;;  %16511 = vst [vmem:[#allocation245_spill] sm:$0xff] %v12956_v27  ;;  %v12985_v33 = vadd.f32 %v8959_v18, %v958_v48  ;;  %v978_v19 = vpop.f32.mrf.mxu0  ;;  %9352 = vmatprep.mubr.f32.mxu1 %v12693_v63 }
 0x160   :  { %16512 = vst [vmem:[#allocation246_spill] sm:$0xff] %v12962_v61  ;;  %16513 = vst [vmem:[#allocation247_spill] sm:$0xff] %v12970_v37  ;;  %v979_v31 = vadd.f32 %v978_v19, %v12393_v35  ;;  %v1242_v17 = vpop.f32.mrf.mxu1  ;;  %v13002_v35 = vand.u32 4294901760, %v2617_v30  ;;  %v2637_v19 = vsub.f32 %v12956_v27, %v12983_v11  ;;  %v2647_v30 = vsub.f32 %v12973_v29, %v12997_v34 }
 0x161   :  { %16514 = vst [vmem:[#allocation248_spill] sm:$0xff] %v12973_v29  ;;  %16515 = vst [vmem:[#allocation249_spill] sm:$0xff] %v12978_v3  ;;  %v12989_v44 = vadd.f32 %v1242_v17, %v951_v53  ;;  %v8888_v38 = vpop.f32.mrf.mxu0  ;;  %9255 = vmatmul.mubr.f32.gmra.mxu0 %v12962_v61 }
 0x162   :  { %16516 = vst [vmem:[#allocation250_spill] sm:$0xff] %v12983_v11  ;;  %16517 = vst [vmem:[#allocation251_spill] sm:$0xff] %v12992_v40  ;;  %v1000_v48 = vadd.f32 %v8888_v38, %v12420_v59  ;;  %v8962_v18 = vpop.f32.mrf.mxu1  ;;  %9353 = vmatmul.mubr.f32.gmra.mxu1 %v12699_v42  ;;  %9257 = vmatprep.mubr.f32.mxu0 %v12978_v3  ;;  %v13013_v38 = vand.u32 4294901760, %v2627_v4 }
 0x163   :  { %16518 = vst [vmem:[#allocation252_spill] sm:$0xff] %v12997_v34  ;;  %16519 = vst [vmem:[#allocation253_spill] sm:$0xff] %v13002_v35  ;;  %v13006_v25 = vadd.f32 %v8962_v18, %v972_v46  ;;  %v992_v53 = vpop.f32.mrf.mxu0  ;;  %9355 = vmatprep.mubr.f32.mxu1 %v12722_v22  ;;  %v13020_v18 = vand.u32 4294901760, %v2637_v19 }
 0x164   :  { %v993_v17 = vadd.f32 %v992_v53, %v12438_v0  ;;  %v1258_v61 = vpop.f32.mrf.mxu1  ;;  %16520 = vst [vmem:[#allocation254_spill] sm:$0xff] %v13013_v38 }
 0x165   :  { %v13010_v63 = vadd.f32 %v1258_v61, %v965_v62  ;;  %v8891_v59 = vpop.f32.mrf.mxu0  ;;  %9258 = vmatmul.mubr.f32.gmra.mxu0 %v12992_v40  ;;  %16521 = vst [vmem:[#allocation255_spill] sm:$0xff] %v13020_v18 }
 0x166   :  { %v1014_v3 = vadd.f32 %v8891_v59, %v12466_v50  ;;  %v8965_v46 = vpop.f32.mrf.mxu1  ;;  %9356 = vmatmul.mubr.f32.gmra.mxu1 %v12753_v5  ;;  %9260 = vmatprep.mubr.f32.mxu0 %v13002_v35  ;;  %v13029_v50 = vand.u32 4294901760, %v2647_v30  ;;  %v16523_v30 = vld [vmem:[#allocation60_spill] sm:$0xff] }
 0x167   :  { %v13022_v0 = vadd.f32 %v8965_v46, %v986_v54  ;;  %v1006_v61 = vpop.f32.mrf.mxu0  ;;  %9358 = vmatprep.mubr.f32.mxu1 %v12755_v28 }
 0x168   :  { %v1007_v4 = vadd.f32 %v1006_v61, %v12483_v49  ;;  %v1274_v62 = vpop.f32.mrf.mxu1  ;;  %16522 = vst [vmem:[#allocation256_spill] sm:$0xff] %v13029_v50 }
 0x169   :  { %v13026_v53 = vadd.f32 %v1274_v62, %v979_v31  ;;  %v8894_v40 = vpop.f32.mrf.mxu0  ;;  %9261 = vmatmul.mubr.f32.gmra.mxu0 %v13013_v38  ;;  %v16534_v38 = vld [vmem:[#allocation201_spill] sm:$0xff] }
 0x16a   :  { %v1028_v59 = vadd.f32 %v8894_v40, %v12512_v15  ;;  %v8968_v35 = vpop.f32.mrf.mxu1  ;;  %9359 = vmatmul.mubr.f32.gmra.mxu1 %v12803_v2  ;;  %9263 = vmatprep.mubr.f32.mxu0 %v13020_v18  ;;  %v16530_v18 = vld [vmem:[#allocation59_spill] sm:$0xff] }
 0x16b   :  { %v13034_v54 = vadd.f32 %v8968_v35, %v1000_v48  ;;  %v1020_v19 = vpop.f32.mrf.mxu0  ;;  %9361 = vmatprep.mubr.f32.mxu1 %v12831_v39 }
 0x16c   :  { %v1021_v49 = vadd.f32 %v1020_v19, %v12530_v32  ;;  %v1290_v31 = vpop.f32.mrf.mxu1 }
 0x16d   :  { %v13038_v46 = vadd.f32 %v1290_v31, %v993_v17  ;;  %v8897_v61 = vpop.f32.mrf.mxu0  ;;  %9264 = vmatmul.mubr.f32.gmra.mxu0 %v13029_v50  ;;  %v16524_v31 = vld [vmem:[#allocation42_spill] sm:$0xff] }
 0x16e   :  { %v1042_v15 = vadd.f32 %v8897_v61, %v12558_v60  ;;  %v8971_v40 = vpop.f32.mrf.mxu1  ;;  %9362 = vmatmul.mubr.f32.gmra.mxu1 %v12861_v23  ;;  %9402 = vmatprep.mubr.f32.mxu0 %v16523_v30  ;;  %v16525_v50 = vld [vmem:[#allocation62_spill] sm:$0xff]  ;;  %v16560_v23 = vld [vmem:[#allocation99_spill] sm:$0xff] }
 0x16f   :  { %v13044_v48 = vadd.f32 %v8971_v40, %v1014_v3  ;;  %v1034_v35 = vpop.f32.mrf.mxu0  ;;  %9364 = vmatprep.mubr.f32.mxu1 %v12872_v55 }
 0x170   :  { %v1035_v32 = vadd.f32 %v1034_v35, %v12577_v1  ;;  %v1306_v62 = vpop.f32.mrf.mxu1  ;;  %v16526_v35 = vld [vmem:[#allocation40_spill] sm:$0xff] }
 0x171   :  { %v13048_v17 = vadd.f32 %v1306_v62, %v1007_v4  ;;  %v8900_v19 = vpop.f32.mrf.mxu0  ;;  %9403 = vmatmul.mubr.f32.vlgmr.msra.gmra.mxu0 %v16524_v31  ;;  %v16528_v31 = vld [vmem:[#allocation191_spill] sm:$0xff] }
 0x172   :  { %v1056_v60 = vadd.f32 %v8900_v19, %v12604_v51  ;;  %v8974_v61 = vpop.f32.mrf.mxu1  ;;  %9365 = vmatmul.mubr.f32.gmra.mxu1 %v12904_v21  ;;  %9405 = vmatprep.mubr.f32.mxu0 %v16525_v50  ;;  %v16527_v19 = vld [vmem:[#allocation65_spill] sm:$0xff]  ;;  %v16552_v21 = vld [vmem:[#allocation92_spill] sm:$0xff] }
 0x173   :  { %v13054_v3 = vadd.f32 %v8974_v61, %v1028_v59  ;;  %v1048_v40 = vpop.f32.mrf.mxu0  ;;  %9367 = vmatprep.mubr.f32.mxu1 %v12918_v56  ;;  %9579 = vmatpush3.msra.mxu0 %v16503_v52  ;;  %v16529_v59 = vld [vmem:[#allocation70_spill] sm:$0xff] }
 0x174   :  { %v1049_v1 = vadd.f32 %v1048_v40, %v12623_v13  ;;  %v1322_v4 = vpop.f32.mrf.mxu1  ;;  %9580 = vmatprep.subr.mxu0 %v16526_v35  ;;  %v16531_v13 = vld [vmem:[#allocation194_spill] sm:$0xff] }
 0x175   :  { %v13060_v62 = vadd.f32 %v1322_v4, %v1021_v49  ;;  %v8903_v51 = vpop.f32.mrf.mxu0  ;;  %9406 = vmatmul.mubr.f32.gmra.mxu0 %v16527_v19  ;;  %v16532_v4 = vld [vmem:[#allocation45_spill] sm:$0xff] }
 0x176   :  { %v1070_v30 = vadd.f32 %v8903_v51, %v16528_v31  ;;  %v8977_v50 = vpop.f32.mrf.mxu1  ;;  %9368 = vmatmul.mubr.f32.gmra.mxu1 %v12945_v47  ;;  %9408 = vmatprep.mubr.f32.mxu0 %v16529_v59  ;;  %v16533_v51 = vld [vmem:[#allocation81_spill] sm:$0xff] }
 0x177   :  { %v13066_v61 = vadd.f32 %v8977_v50, %v1042_v15  ;;  %v1062_v52 = vpop.f32.mrf.mxu0  ;;  %9506 = vmatprep.mubr.f32.mxu1 %v16530_v18  ;;  %9581 = vmatpush3.msra.mxu0 %v16526_v35  ;;  %v16535_v50 = vld [vmem:[#allocation63_spill] sm:$0xff]  ;;  %v16536_v15 = vld [vmem:[#allocation85_spill] sm:$0xff] }
 0x178   :  { %v1063_v49 = vadd.f32 %v1062_v52, %v16531_v13  ;;  %v1338_v40 = vpop.f32.mrf.mxu1  ;;  %9582 = vmatprep.subr.mxu0 %v16532_v4  ;;  %v16537_v52 = vld [vmem:[#allocation78_spill] sm:$0xff] }
 0x179   :  { %v13072_v19 = vadd.f32 %v1338_v40, %v1035_v32  ;;  %v8906_v31 = vpop.f32.mrf.mxu0  ;;  %9409 = vmatmul.mubr.f32.gmra.mxu0 %v16533_v51  ;;  %v16538_v32 = vld [vmem:[#allocation203_spill] sm:$0xff] }
 0x17a   :  { %v1084_v47 = vadd.f32 %v8906_v31, %v16534_v38  ;;  %v8980_v59 = vpop.f32.mrf.mxu1  ;;  %9507 = vmatmul.mubr.f32.vlgmr.msra.gmra.mxu1 %v16535_v50  ;;  %9411 = vmatprep.mubr.f32.mxu0 %v16536_v15 }
 0x17b   :  { %v13078_v18 = vadd.f32 %v8980_v59, %v1056_v60  ;;  %v1076_v35 = vpop.f32.mrf.mxu0  ;;  %9683 = vmatpush3.msk.msra.mxu1 %vm11572_vm0, %v16122_v12  ;;  %9509 = vmatprep.mubr.f32.mxu1 %v16537_v52  ;;  %v16540_v59 = vld [vmem:[#allocation90_spill] sm:$0xff] }
 0x17c   :  { %v1077_v13 = vadd.f32 %v1076_v35, %v16538_v32  ;;  %v1354_v40 = vpop.f32.mrf.mxu1  ;;  %9684 = vmatprep.subr.msk.mxu1 %vm11595_vm1, %v16122_v12  ;;  %9583 = vmatpush3.msra.mxu0 %v16532_v4  ;;  %v16541_v35 = vld [vmem:[#allocation79_spill] sm:$0xff]  ;;  %v16543_v4 = vld [vmem:[#allocation84_spill] sm:$0xff] }
 0x17d   :  { %v13089_v38 = vadd.f32 %v1354_v40, %v1049_v1  ;;  %v8909_v60 = vpop.f32.mrf.mxu0  ;;  %9412 = vmatmul.mubr.f32.gmra.mxu0 %v16540_v59  ;;  %9685 = vmatpush3.msk.msra.mxu1 %vm11595_vm1, %v16122_v12  ;;  %v16542_v32 = vld [vmem:[#allocation91_spill] sm:$0xff]  ;;  %v16545_v40 = vld [vmem:[#allocation213_spill] sm:$0xff] }
 0x17e   :  { %v1098_v24 = vadd.f32 %v8909_v60, %v12742_v20  ;;  %v8983_v31 = vpop.f32.mrf.mxu1  ;;  %9510 = vmatmul.mubr.f32.gmra.mxu1 %v16541_v35  ;;  %9414 = vmatprep.mubr.f32.mxu0 %v16542_v32  ;;  %v16546_v20 = vld [vmem:[#allocation57_spill] sm:$0xff]  ;;  %v16549_v32 = vld [vmem:[#allocation218_spill] sm:$0xff] }
 0x17f   :  { %v13098_v52 = vadd.f32 %v8983_v31, %v1070_v30  ;;  %v1090_v15 = vpop.f32.mrf.mxu0  ;;  %9512 = vmatprep.mubr.f32.mxu1 %v16543_v4  ;;  %9686 = vmatprep.subr.msk.mxu1 %vm11618_vm2, %v16122_v12  ;;  %v16547_v31 = vld [vmem:[#allocation95_spill] sm:$0xff] }
 0x180   :  { %v1091_v59 = vadd.f32 %v1090_v15, %v16545_v40  ;;  %v1370_v51 = vpop.f32.mrf.mxu1  ;;  %9687 = vmatpush3.msk.msra.mxu1 %vm11618_vm2, %v16122_v12  ;;  %9584 = vmatprep.subr.mxu0 %v16546_v20  ;;  %v16550_v15 = vld [vmem:[#allocation89_spill] sm:$0xff] }
 0x181   :  { %v13109_v60 = vadd.f32 %v1370_v51, %v1063_v49  ;;  %v8912_v30 = vpop.f32.mrf.mxu0  ;;  %9415 = vmatmul.mubr.f32.gmra.mxu0 %v16547_v31  ;;  %9688 = vmatprep.subr.msk.mxu1 %vm11646_vm3, %v16122_v12  ;;  %v16551_v40 = vld [vmem:[#allocation101_spill] sm:$0xff]  ;;  %v16553_v49 = vld [vmem:[#allocation222_spill] sm:$0xff] }
 0x182   :  { %v1112_v35 = vadd.f32 %v8912_v30, %v16549_v32  ;;  %v8986_v50 = vpop.f32.mrf.mxu1  ;;  %9513 = vmatmul.mubr.f32.gmra.mxu1 %v16550_v15  ;;  %9417 = vmatprep.mubr.f32.mxu0 %v16551_v40  ;;  %v16554_v32 = vld [vmem:[#allocation28_spill] sm:$0xff] }
 0x183   :  { %v13118_v1 = vadd.f32 %v8986_v50, %v1084_v47  ;;  %v1104_v56 = vpop.f32.mrf.mxu0  ;;  %9515 = vmatprep.mubr.f32.mxu1 %v16552_v21  ;;  %9585 = vmatpush3.msra.mxu0 %v16546_v20  ;;  %v16555_v40 = vld [vmem:[#allocation104_spill] sm:$0xff]  ;;  %v16557_v50 = vld [vmem:[#allocation227_spill] sm:$0xff] }
 0x184   :  { %v1105_v51 = vadd.f32 %v1104_v56, %v16553_v49  ;;  %v1386_v31 = vpop.f32.mrf.mxu1  ;;  %9689 = vmatpush3.msk.msra.mxu1 %vm11646_vm3, %v16122_v12  ;;  %9586 = vmatprep.subr.mxu0 %v16554_v32  ;;  %v16558_v56 = vld [vmem:[#allocation98_spill] sm:$0xff]  ;;  %v16559_v49 = vld [vmem:[#allocation109_spill] sm:$0xff] }
 0x185   :  { %v13127_v30 = vadd.f32 %v1386_v31, %v1077_v13  ;;  %v8915_v15 = vpop.f32.mrf.mxu0  ;;  %9418 = vmatmul.mubr.f32.gmra.mxu0 %v16555_v40  ;;  %9690 = vmatprep.subr.msk.mxu1 %vm11676_vm4, %v16122_v12  ;;  %v16566_v40 = vld [vmem:[#allocation108_spill] sm:$0xff] }
 0x186   :  { %v1126_v20 = vadd.f32 %v8915_v15, %v16557_v50  ;;  %v8989_v21 = vpop.f32.mrf.mxu1  ;;  %9516 = vmatmul.mubr.f32.gmra.mxu1 %v16558_v56  ;;  %9420 = vmatprep.mubr.f32.mxu0 %v16559_v49  ;;  %v16561_v15 = vld [vmem:[#allocation64_spill] sm:$0xff]  ;;  %v16562_v49 = vld [vmem:[#allocation114_spill] sm:$0xff] }
 0x187   :  { %v13136_v4 = vadd.f32 %v8989_v21, %v1098_v24  ;;  %v1118_v55 = vpop.f32.mrf.mxu0  ;;  %9518 = vmatprep.mubr.f32.mxu1 %v16560_v23  ;;  %9587 = vmatpush3.msra.mxu0 %v16554_v32 }
 0x188   :  { %v1119_v13 = vadd.f32 %v1118_v55, %v12854_v58  ;;  %v1402_v31 = vpop.f32.mrf.mxu1  ;;  %9691 = vmatpush3.msk.msra.mxu1 %vm11676_vm4, %v16122_v12  ;;  %9588 = vmatprep.subr.mxu0 %v16561_v15  ;;  %v16564_v58 = vld [vmem:[#allocation103_spill] sm:$0xff]  ;;  %v16565_v55 = vld [vmem:[#allocation117_spill] sm:$0xff] }
 0x189   :  { %v13145_v50 = vadd.f32 %v1402_v31, %v1091_v59  ;;  %v8918_v56 = vpop.f32.mrf.mxu0  ;;  %9421 = vmatmul.mubr.f32.gmra.mxu0 %v16562_v49  ;;  %9692 = vmatprep.subr.msk.mxu1 %vm11708_vm5, %v16122_v12  ;;  %v16572_v49 = vld [vmem:[#allocation116_spill] sm:$0xff] }
 0x18a   :  { %v1140_v24 = vadd.f32 %v8918_v56, %v12875_v26  ;;  %v8992_v32 = vpop.f32.mrf.mxu1  ;;  %9519 = vmatmul.mubr.f32.gmra.mxu1 %v16564_v58  ;;  %9423 = vmatprep.mubr.f32.mxu0 %v16565_v55  ;;  %v16567_v26 = vld [vmem:[#allocation30_spill] sm:$0xff] }
 0x18b   :  { %v13154_v47 = vadd.f32 %v8992_v32, %v1112_v35  ;;  %v1132_v23 = vpop.f32.mrf.mxu0  ;;  %9521 = vmatprep.mubr.f32.mxu1 %v16566_v40  ;;  %9589 = vmatpush3.msra.mxu0 %v16561_v15  ;;  %v16568_v55 = vld [vmem:[#allocation122_spill] sm:$0xff] }
 0x18c   :  { %v1133_v59 = vadd.f32 %v1132_v23, %v12896_v36  ;;  %v1418_v31 = vpop.f32.mrf.mxu1  ;;  %9693 = vmatpush3.msk.msra.mxu1 %vm11708_vm5, %v16122_v12  ;;  %9590 = vmatprep.subr.mxu0 %v16567_v26  ;;  %v16570_v36 = vld [vmem:[#allocation111_spill] sm:$0xff]  ;;  %v16571_v23 = vld [vmem:[#allocation126_spill] sm:$0xff] }
 0x18d   :  { %v13163_v56 = vadd.f32 %v1418_v31, %v1105_v51  ;;  %v8921_v58 = vpop.f32.mrf.mxu0  ;;  %9424 = vmatmul.mubr.f32.gmra.mxu0 %v16568_v55  ;;  %9694 = vmatprep.subr.msk.mxu1 %vm11737_vm6, %v16122_v12  ;;  %v16578_v55 = vld [vmem:[#allocation125_spill] sm:$0xff] }
 0x18e   :  { %v1154_v15 = vadd.f32 %v8921_v58, %v12921_v8  ;;  %v8995_v32 = vpop.f32.mrf.mxu1  ;;  %9522 = vmatmul.mubr.f32.gmra.mxu1 %v16570_v36  ;;  %9426 = vmatprep.mubr.f32.mxu0 %v16571_v23  ;;  %v16573_v8 = vld [vmem:[#allocation71_spill] sm:$0xff]  ;;  %v16574_v23 = vld [vmem:[#allocation128_spill] sm:$0xff] }
 0x18f   :  { %v13172_v21 = vadd.f32 %v8995_v32, %v1126_v20  ;;  %v1146_v40 = vpop.f32.mrf.mxu0  ;;  %9524 = vmatprep.mubr.f32.mxu1 %v16572_v49  ;;  %9591 = vmatpush3.msra.mxu0 %v16567_v26 }
 0x190   :  { %v1147_v51 = vadd.f32 %v1146_v40, %v12936_v45  ;;  %v1434_v31 = vpop.f32.mrf.mxu1  ;;  %9695 = vmatpush3.msk.msra.mxu1 %vm11737_vm6, %v16122_v12  ;;  %9592 = vmatprep.subr.mxu0 %v16573_v8  ;;  %v16576_v45 = vld [vmem:[#allocation121_spill] sm:$0xff]  ;;  %v16577_v40 = vld [vmem:[#allocation131_spill] sm:$0xff] }
 0x191   :  { %v13181_v58 = vadd.f32 %v1434_v31, %v1119_v13  ;;  %v9036_v36 = vpop.f32.mrf.mxu0  ;;  %9427 = vmatmul.mubr.f32.gmra.mxu0 %v16574_v23  ;;  %9696 = vmatprep.subr.msk.mxu1 %vm11760_vm7, %v16122_v12  ;;  %v16584_v23 = vld [vmem:[#allocation133_spill] sm:$0xff] }
 0x192   :  { %v1584_v26 = vadd.f32 %v9036_v36, %v12958_v43  ;;  %v8998_v32 = vpop.f32.mrf.mxu1  ;;  %9525 = vmatmul.mubr.f32.gmra.mxu1 %v16576_v45  ;;  %9429 = vmatprep.mubr.f32.mxu0 %v16577_v40  ;;  %v16579_v43 = vld [vmem:[#allocation73_spill] sm:$0xff]  ;;  %v16580_v40 = vld [vmem:[#allocation136_spill] sm:$0xff] }
 0x193   :  { %v13190_v35 = vadd.f32 %v8998_v32, %v1140_v24  ;;  %v1577_v49 = vpop.f32.mrf.mxu0  ;;  %9527 = vmatprep.mubr.f32.mxu1 %v16578_v55  ;;  %9593 = vmatpush3.msra.mxu0 %v16573_v8 }
 0x194   :  { %v1578_v13 = vadd.f32 %v1577_v49, %v12964_v16  ;;  %v1450_v31 = vpop.f32.mrf.mxu1  ;;  %9697 = vmatpush3.msk.msra.mxu1 %vm11760_vm7, %v16122_v12  ;;  %9594 = vmatprep.subr.mxu0 %v16579_v43  ;;  %v16582_v16 = vld [vmem:[#allocation130_spill] sm:$0xff]  ;;  %v16583_v49 = vld [vmem:[#allocation141_spill] sm:$0xff] }
 0x195   :  { %v13199_v36 = vadd.f32 %v1450_v31, %v1133_v59  ;;  %v9039_v45 = vpop.f32.mrf.mxu0  ;;  %9430 = vmatmul.mubr.f32.gmra.mxu0 %v16580_v40  ;;  %9698 = vmatprep.subr.msk.mxu1 %vm11786_vm8, %v16122_v12  ;;  %v16591_v40 = vld [vmem:[#allocation139_spill] sm:$0xff] }
 0x196   :  { %v1596_v8 = vadd.f32 %v9039_v45, %v12985_v33  ;;  %v9001_v32 = vpop.f32.mrf.mxu1  ;;  %9528 = vmatmul.mubr.f32.gmra.mxu1 %v16582_v16  ;;  %9432 = vmatprep.mubr.f32.mxu0 %v16583_v49  ;;  %v16585_v33 = vld [vmem:[#allocation34_spill] sm:$0xff]  ;;  %v16586_v49 = vld [vmem:[#allocation144_spill] sm:$0xff] }
 0x197   :  { %v13208_v20 = vadd.f32 %v9001_v32, %v1154_v15  ;;  %v1589_v55 = vpop.f32.mrf.mxu0  ;;  %9530 = vmatprep.mubr.f32.mxu1 %v16584_v23  ;;  %9595 = vmatpush3.msra.mxu0 %v16579_v43  ;;  %v16596_v15 = vld [vmem:[#allocation143_spill] sm:$0xff] }
 0x198   :  { %v1590_v59 = vadd.f32 %v1589_v55, %v12989_v44  ;;  %v1466_v31 = vpop.f32.mrf.mxu1  ;;  %9699 = vmatpush3.msk.msra.mxu1 %vm11786_vm8, %v16122_v12  ;;  %9596 = vmatprep.subr.mxu0 %v16585_v33  ;;  %v16588_v44 = vld [vmem:[#allocation135_spill] sm:$0xff]  ;;  %v16589_v55 = vld [vmem:[#allocation149_spill] sm:$0xff] }
 0x199   :  { %v13217_v45 = vadd.f32 %v1466_v31, %v1147_v51  ;;  %v9042_v16 = vpop.f32.mrf.mxu0  ;;  %9433 = vmatmul.mubr.f32.gmra.mxu0 %v16586_v49  ;;  %9700 = vmatprep.subr.msk.mxu1 %vm11812_vm9, %v16122_v12 }
 0x19a   :  { %v1608_v43 = vadd.f32 %v9042_v16, %v13006_v25  ;;  %v9116_v32 = vpop.f32.mrf.mxu1  ;;  %9531 = vmatmul.mubr.f32.gmra.mxu1 %v16588_v44  ;;  %9435 = vmatprep.mubr.f32.mxu0 %v16589_v55  ;;  %v16592_v25 = vld [vmem:[#allocation75_spill] sm:$0xff]  ;;  %v16597_v55 = vld [vmem:[#allocation157_spill] sm:$0xff] }
 0x19b   :  { %v13226_v24 = vadd.f32 %v9116_v32, %v1584_v26  ;;  %v1601_v23 = vpop.f32.mrf.mxu0  ;;  %9533 = vmatprep.mubr.f32.mxu1 %v16591_v40  ;;  %9597 = vmatpush3.msra.mxu0 %v16585_v33  ;;  %v13238_v16 = vld [vmem:[%s15326_s2] ss:$0 sm:$0xff]  ;;  %v16594_v40 = vld [vmem:[#allocation154_spill] sm:$0xff]  ;;  %v16609_v33 = vmov 0.0   ;;  %s10511_s2 = smov [#allocation8]  }
 0x19c   :  { %v1602_v51 = vadd.f32 %v1601_v23, %v13010_v63  ;;  %v1834_v31 = vpop.f32.mrf.mxu1  ;;  %9701 = vmatpush3.msk.msra.mxu1 %vm11812_vm9, %v16122_v12  ;;  %9598 = vmatprep.subr.mxu0 %v16592_v25  ;;  %s7469_s11 = sshll.u32 %s10511_s2, 4  ;;  %s7470_s11 = int_to_ptr.vmem [resolvable:$true] %s7469_s11 }
 0x19d   :  { %16590 = vst [vmem:[#allocation40_spill] sm:$0xff] %v13226_v24  ;;  %v13240_v26 = vadd.f32 %v1834_v31, %v1578_v13  ;;  %v9045_v32 = vpop.f32.mrf.mxu0  ;;  %9436 = vmatmul.mubr.f32.gmra.mxu0 %v16594_v40  ;;  %9702 = vmatprep.subr.msk.mxu1 %vm11838_vm10, %v16122_v12  ;;  %v16599_v24 = vld [vmem:[#allocation148_spill] sm:$0xff]  ;;  %v16600_v13 = vld [vmem:[#allocation13_spill] sm:$0xff]  ;;  %s10478_s12 = scalar_lea.vmem %s7470_s11, 16  ;;  %s10482_s13 = scalar_lea.vmem %s7470_s11, 32 }
 0x19e   :  { %v1620_v63 = vadd.f32 %v9045_v32, %v13022_v0  ;;  %v9119_v23 = vpop.f32.mrf.mxu1  ;;  %9534 = vmatmul.mubr.f32.gmra.mxu1 %v16596_v15  ;;  %9438 = vmatprep.mubr.f32.mxu0 %v16597_v55  ;;  %vm13255_vm0 = vcmp.eq.s32.totalorder %v16600_v13, %v13238_v16  ;;  %v16605_v55 = vld [vmem:[#allocation162_spill] sm:$0xff]  ;;  %p10479_p1 = scmp.ne.s32.totalorder %s7470_s11, %s10478_s12  ;;  %p10483_p2 = scmp.lt.s32.totalorder %s7470_s11, %s7470_s11 }
 0x19f   :  { %16593 = vst [vmem:[#allocation191_spill] sm:$0xff] %v13240_v26  ;;  %v13249_v44 = vadd.f32 %v9119_v23, %v1596_v8  ;;  %v1613_v49 = vpop.f32.mrf.mxu0  ;;  %9536 = vmatprep.mubr.f32.mxu1 %v16599_v24  ;;  %9599 = vmatpush3.msra.mxu0 %v16592_v25  ;;  %v16603_v8 = vld [vmem:[#allocation36_spill] sm:$0xff]  ;;  %v4711_v40 = vsel %vm13255_vm0, 1.0, %v16609_v33  ;;  %v16617_v25 = vld [vmem:[#allocation171_spill] sm:$0xff]  ;;  %p10484_p3 = scmp.lt.s32.totalorder %s10482_s13, %s10478_s12 }
 0x1a0   :  { %v1614_v0 = vadd.f32 %v1613_v49, %v13026_v53  ;;  %v1846_v32 = vpop.f32.mrf.mxu1  ;;  %9703 = vmatpush3.msk.msra.mxu1 %vm11838_vm10, %v16122_v12  ;;  %9600 = vmatprep.subr.mxu0 %v16603_v8  ;;  %v16607_v53 = vld [vmem:[#allocation152_spill] sm:$0xff]  ;;  %v16608_v49 = vld [vmem:[#allocation166_spill] sm:$0xff] }
 0x1a1   :  { %16598 = vst [vmem:[#allocation194_spill] sm:$0xff] %v13249_v44  ;;  %v13264_v23 = vadd.f32 %v1846_v32, %v1590_v59  ;;  %v9048_v24 = vpop.f32.mrf.mxu0  ;;  %9439 = vmatmul.mubr.f32.gmra.mxu0 %v16605_v55  ;;  %9704 = vmatprep.subr.msk.mxu1 %vm11864_vm11, %v16122_v12  ;;  %p10485_p4 = por %p10484_p3, %p10483_p2 }
 0x1a2   :  { %v1632_v13 = vadd.f32 %v9048_v24, %v13034_v54  ;;  %v9122_v15 = vpop.f32.mrf.mxu1  ;;  %9537 = vmatmul.mubr.f32.gmra.mxu1 %v16607_v53  ;;  %9441 = vmatprep.mubr.f32.mxu0 %v16608_v49  ;;  %v16612_v54 = vld [vmem:[#allocation46_spill] sm:$0xff]  ;;  %v16614_v53 = vld [vmem:[#allocation168_spill] sm:$0xff] }
 0x1a3   :  { %16604 = vst [vmem:[#allocation45_spill] sm:$0xff] %v13264_v23  ;;  %v13276_v59 = vadd.f32 %v9122_v15, %v1608_v43  ;;  %v1625_v32 = vpop.f32.mrf.mxu0  ;;  %v16611_v23 = vld [vmem:[#allocation156_spill] sm:$0xff]  ;;  %9601 = vmatpush3.msra.mxu0 %v16603_v8  ;;  %9705 = vmatpush3.msk.msra.mxu1 %vm11864_vm11, %v16122_v12  ;;  %v13291_v15 = vsub.f32 %v4711_v40, %v4711_v40  ;;  %v16626_v43 = vld [vmem:[#allocation181_spill] sm:$0xff]  ;;  %p10486_p5 = pnand %p10485_p4, %p10479_p1 }
 0x1a4   :  { %9539 = vmatprep.mubr.f32.mxu1 %v16611_v23  ;;  %v1626_v55 = vadd.f32 %v1625_v32, %v13038_v46  ;;  %v1858_v44 = vpop.f32.mrf.mxu1  ;;  %9602 = vmatprep.subr.mxu0 %v16612_v54  ;;  %v16616_v32 = vld [vmem:[#allocation161_spill] sm:$0xff] }
 0x1a5   :  { %16610 = vst [vmem:[#allocation201_spill] sm:$0xff] %v13276_v59  ;;  %v13285_v24 = vadd.f32 %v1858_v44, %v1602_v51  ;;  %v9051_v49 = vpop.f32.mrf.mxu0  ;;  %9442 = vmatmul.mubr.f32.gmra.mxu0 %v16614_v53  ;;  %9706 = vmatprep.subr.msk.mxu1 %vm11890_vm12, %v16122_v12  ;;  %v16619_v51 = vld [vmem:[#allocation165_spill] sm:$0xff] }
 0x1a6   :  { %v1644_v46 = vadd.f32 %v9051_v49, %v13044_v48  ;;  %v9125_v8 = vpop.f32.mrf.mxu1  ;;  %9540 = vmatmul.mubr.f32.gmra.mxu1 %v16616_v32  ;;  %9444 = vmatprep.mubr.f32.mxu0 %v16617_v25  ;;  %v16620_v48 = vld [vmem:[#allocation50_spill] sm:$0xff]  ;;  %v16622_v25 = vld [vmem:[#allocation176_spill] sm:$0xff] }
 0x1a7   :  { %16613 = vst [vmem:[#allocation203_spill] sm:$0xff] %v13285_v24  ;;  %v13296_v23 = vadd.f32 %v9125_v8, %v1620_v63  ;;  %v1637_v44 = vpop.f32.mrf.mxu0  ;;  %9542 = vmatprep.mubr.f32.mxu1 %v16619_v51  ;;  %9603 = vmatpush3.msra.mxu0 %v16612_v54  ;;  %v13312_v54 = vand.u32 4294901760, %v13291_v15  ;;  %v16633_v63 = vld [vmem:[#allocation189_spill] sm:$0xff] }
 0x1a8   :  { %v1638_v53 = vadd.f32 %v1637_v44, %v13048_v17  ;;  %v1870_v24 = vpop.f32.mrf.mxu1  ;;  %9707 = vmatpush3.msk.msra.mxu1 %vm11890_vm12, %v16122_v12  ;;  %9604 = vmatprep.subr.mxu0 %v16620_v48  ;;  %v16625_v44 = vld [vmem:[#allocation170_spill] sm:$0xff] }
 0x1a9   :  { %16618 = vst [vmem:[#allocation38_spill] sm:$0xff] %v13296_v23  ;;  %v13305_v40 = vadd.f32 %v1870_v24, %v1614_v0  ;;  %v9054_v49 = vpop.f32.mrf.mxu0  ;;  %9445 = vmatmul.mubr.f32.gmra.mxu0 %v16622_v25  ;;  %9708 = vmatprep.subr.msk.mxu1 %vm11920_vm13, %v16122_v12  ;;  %16624 = vst [vmem:[#allocation213_spill] sm:$0xff] %v13312_v54  ;;  %v16628_v24 = vld [vmem:[#allocation173_spill] sm:$0xff] }
 0x1aa   :  { %v1656_v17 = vadd.f32 %v9054_v49, %v13054_v3  ;;  %v9128_v8 = vpop.f32.mrf.mxu1  ;;  %9543 = vmatmul.mubr.f32.gmra.mxu1 %v16625_v44  ;;  %9447 = vmatprep.mubr.f32.mxu0 %v16626_v43  ;;  %v16629_v3 = vld [vmem:[#allocation68_spill] sm:$0xff] }
 0x1ab   :  { %16621 = vst [vmem:[#allocation56_spill] sm:$0xff] %v13305_v40  ;;  %v13317_v51 = vadd.f32 %v9128_v8, %v1632_v13  ;;  %v1649_v0 = vpop.f32.mrf.mxu0  ;;  %9545 = vmatprep.mubr.f32.mxu1 %v16628_v24  ;;  %9605 = vmatpush3.msra.mxu0 %v16620_v48  ;;  %v16631_v43 = vld [vmem:[#allocation184_spill] sm:$0xff]  ;;  %v5260_v13 = vsub.f32 %v13291_v15, %v13312_v54  ;;  %v16632_v8 = vld [vmem:[#allocation175_spill] sm:$0xff] }
 0x1ac   :  { %v1650_v25 = vadd.f32 %v1649_v0, %v13060_v62  ;;  %v1882_v32 = vpop.f32.mrf.mxu1  ;;  %9709 = vmatpush3.msk.msra.mxu1 %vm11920_vm13, %v16122_v12  ;;  %9606 = vmatprep.subr.mxu0 %v16629_v3 }
 0x1ad   :  { %16627 = vst [vmem:[#allocation57_spill] sm:$0xff] %v13317_v51  ;;  %v13326_v49 = vadd.f32 %v1882_v32, %v1626_v55  ;;  %v9057_v44 = vpop.f32.mrf.mxu0  ;;  %9448 = vmatmul.mubr.f32.gmra.mxu0 %v16631_v43  ;;  %9710 = vmatprep.subr.msk.mxu1 %vm11958_vm14, %v16122_v12  ;;  %v16635_v32 = vld [vmem:[#allocation179_spill] sm:$0xff]  ;;  %v16728_v51 = vld [vmem:[#allocation88_spill] sm:$0xff] }
 0x1ae   :  { %v1668_v62 = vadd.f32 %v9057_v44, %v13066_v61  ;;  %v9131_v48 = vpop.f32.mrf.mxu1  ;;  %9546 = vmatmul.mubr.f32.gmra.mxu1 %v16632_v8  ;;  %9450 = vmatprep.mubr.f32.mxu0 %v16633_v63  ;;  %v16638_v63 = vld [vmem:[#allocation196_spill] sm:$0xff] }
 0x1af   :  { %16630 = vst [vmem:[#allocation44_spill] sm:$0xff] %v13326_v49  ;;  %v13337_v0 = vadd.f32 %v9131_v48, %v1644_v46  ;;  %v1661_v55 = vpop.f32.mrf.mxu0  ;;  %9548 = vmatprep.mubr.f32.mxu1 %v16635_v32  ;;  %9607 = vmatpush3.msra.mxu0 %v16629_v3  ;;  %v16636_v49 = vld [vmem:[#allocation80_spill] sm:$0xff]  ;;  %v13352_v48 = vand.u32 4294901760, %v5260_v13  ;;  %v16641_v32 = vld [vmem:[#allocation199_spill] sm:$0xff]  ;;  %v16645_v13 = vld [vmem:[#allocation205_spill] sm:$0xff] }
 0x1b0   :  { %v1662_v43 = vadd.f32 %v1661_v55, %v13072_v19  ;;  %v1894_v24 = vpop.f32.mrf.mxu1  ;;  %9608 = vmatprep.subr.mxu0 %v16636_v49  ;;  %9711 = vmatpush3.msk.msra.mxu1 %vm11958_vm14, %v16122_v12  ;;  %v16640_v55 = vld [vmem:[#allocation183_spill] sm:$0xff] }
 0x1b1   :  { %16634 = vst [vmem:[#allocation218_spill] sm:$0xff] %v13337_v0  ;;  %v13346_v61 = vadd.f32 %v1894_v24, %v1638_v53  ;;  %v9060_v44 = vpop.f32.mrf.mxu0  ;;  %9451 = vmatmul.mubr.f32.gmra.mxu0 %v16638_v63  ;;  %9712 = vmatprep.subr.msk.mxu1 %vm11969_vm15, %v16122_v12  ;;  %v16643_v24 = vld [vmem:[#allocation188_spill] sm:$0xff] }
 0x1b2   :  { %v1680_v19 = vadd.f32 %v9060_v44, %v13078_v18  ;;  %v9134_v3 = vpop.f32.mrf.mxu1  ;;  %9549 = vmatmul.mubr.f32.gmra.mxu1 %v16640_v55  ;;  %9453 = vmatprep.mubr.f32.mxu0 %v16641_v32  ;;  %v16651_v55 = vld [vmem:[#allocation210_spill] sm:$0xff] }
 0x1b3   :  { %16637 = vst [vmem:[#allocation222_spill] sm:$0xff] %v13346_v61  ;;  %v13357_v6 = vadd.f32 %v9134_v3, %v1656_v17  ;;  %v1673_v53 = vpop.f32.mrf.mxu0  ;;  %9551 = vmatprep.mubr.f32.mxu1 %v16643_v24  ;;  %9609 = vmatpush3.msra.mxu0 %v16636_v49  ;;  %v16647_v3 = vld [vmem:[#allocation209_spill] sm:$0xff]  ;;  %v16649_v24 = vld [vmem:[#allocation198_spill] sm:$0xff] }
 0x1b4   :  { %v1674_v63 = vadd.f32 %v1673_v53, %v13089_v38  ;;  %v1906_v8 = vpop.f32.mrf.mxu1  ;;  %9713 = vmatpush3.msk.msra.mxu1 %vm11969_vm15, %v16122_v12  ;;  %9786 = vmatprep.subr.msk.mxu0 %vm13255_vm0, %v16122_v12  ;;  %v16646_v38 = vld [vmem:[#allocation193_spill] sm:$0xff] }
 0x1b5   :  { %16642 = vst [vmem:[#allocation28_spill] sm:$0xff] %v13357_v6  ;;  %v13368_v18 = vadd.f32 %v1906_v8, %v1650_v25  ;;  %v9063_v17 = vpop.f32.mrf.mxu0  ;;  %9454 = vmatmul.mubr.f32.gmra.mxu0 %v16645_v13  ;;  %9890 = vmatprep.subr.mxu1 %v13352_v48  ;;  %v16724_v6 = vld [vmem:[#allocation21_spill] sm:$0xff] }
 0x1b6   :  { %v1692_v49 = vadd.f32 %v9063_v17, %v13098_v52  ;;  %v9137_v44 = vpop.f32.mrf.mxu1  ;;  %9552 = vmatmul.mubr.f32.gmra.mxu1 %v16646_v38  ;;  %9456 = vmatprep.mubr.f32.mxu0 %v16647_v3  ;;  %v16653_v38 = vld [vmem:[#allocation215_spill] sm:$0xff]  ;;  %v16655_v3 = vld [vmem:[#allocation208_spill] sm:$0xff]  ;;  %vm13584_vm8 = vcmp.eq.s32.totalorder %v16724_v6, %v13238_v16 }
 0x1b7   :  { %16644 = vst [vmem:[#allocation49_spill] sm:$0xff] %v13368_v18  ;;  %v13375_v46 = vadd.f32 %v9137_v44, %v1668_v62  ;;  %v1685_v53 = vpop.f32.mrf.mxu0  ;;  %9554 = vmatprep.mubr.f32.mxu1 %v16649_v24  ;;  %v16652_v18 = vld [vmem:[#allocation204_spill] sm:$0xff]  ;;  %v16657_v24 = vld [vmem:[#allocation51_spill] sm:$0xff] }
 0x1b8   :  { %v1686_v25 = vadd.f32 %v1685_v53, %v13109_v60  ;;  %v1918_v8 = vpop.f32.mrf.mxu1 }
 0x1b9   :  { %16648 = vst [vmem:[#allocation227_spill] sm:$0xff] %v13375_v46  ;;  %v13379_v32 = vadd.f32 %v1918_v8, %v1662_v43  ;;  %v9066_v13 = vpop.f32.mrf.mxu0  ;;  %9457 = vmatmul.mubr.f32.gmra.mxu0 %v16651_v55  ;;  %v16658_v55 = vld [vmem:[#allocation214_spill] sm:$0xff] }
 0x1ba   :  { %v1704_v52 = vadd.f32 %v9066_v13, %v13118_v1  ;;  %v9140_v17 = vpop.f32.mrf.mxu1  ;;  %9555 = vmatmul.mubr.f32.gmra.mxu1 %v16652_v18  ;;  %9459 = vmatprep.mubr.f32.mxu0 %v16653_v38  ;;  %v16659_v18 = vld [vmem:[#allocation220_spill] sm:$0xff] }
 0x1bb   :  { %16650 = vst [vmem:[#allocation64_spill] sm:$0xff] %v13379_v32  ;;  %v13385_v62 = vadd.f32 %v9140_v17, %v1680_v19  ;;  %v1697_v44 = vpop.f32.mrf.mxu0  ;;  %9557 = vmatprep.mubr.f32.mxu1 %v16655_v3  ;;  %v16723_v32 = vld [vmem:[#allocation83_spill] sm:$0xff] }
 0x1bc   :  { %v1698_v60 = vadd.f32 %v1697_v44, %v13127_v30  ;;  %v1930_v53 = vpop.f32.mrf.mxu1 }
 0x1bd   :  { %16654 = vst [vmem:[#allocation52_spill] sm:$0xff] %v13385_v62  ;;  %v13389_v43 = vadd.f32 %v1930_v53, %v1674_v63  ;;  %v9069_v8 = vpop.f32.mrf.mxu0  ;;  %9460 = vmatmul.mubr.f32.gmra.mxu0 %v16657_v24  ;;  %v16661_v62 = vld [vmem:[#allocation217_spill] sm:$0xff]  ;;  %v16664_v24 = vld [vmem:[#allocation219_spill] sm:$0xff] }
 0x1be   :  { %v1716_v1 = vadd.f32 %v9069_v8, %v13136_v4  ;;  %v9143_v13 = vpop.f32.mrf.mxu1  ;;  %9558 = vmatmul.mubr.f32.gmra.mxu1 %v16658_v55  ;;  %9462 = vmatprep.mubr.f32.mxu0 %v16659_v18  ;;  %v16721_v55 = vld [vmem:[#allocation82_spill] sm:$0xff] }
 0x1bf   :  { %16656 = vst [vmem:[#allocation30_spill] sm:$0xff] %v13389_v43  ;;  %v13395_v19 = vadd.f32 %v9143_v13, %v1692_v49  ;;  %v1709_v17 = vpop.f32.mrf.mxu0  ;;  %9560 = vmatprep.mubr.f32.mxu1 %v16661_v62  ;;  %v16663_v43 = vld [vmem:[#allocation229_spill] sm:$0xff] }
 0x1c0   :  { %v1710_v30 = vadd.f32 %v1709_v17, %v13145_v50  ;;  %v1942_v44 = vpop.f32.mrf.mxu1 }
 0x1c1   :  { %16660 = vst [vmem:[#allocation27_spill] sm:$0xff] %v13395_v19  ;;  %v13399_v63 = vadd.f32 %v1942_v44, %v1686_v25  ;;  %v9072_v53 = vpop.f32.mrf.mxu0  ;;  %9463 = vmatmul.mubr.f32.gmra.mxu0 %v16663_v43  ;;  %v16666_v19 = vld [vmem:[#allocation224_spill] sm:$0xff] }
 0x1c2   :  { %v1728_v4 = vadd.f32 %v9072_v53, %v13154_v47  ;;  %v9146_v8 = vpop.f32.mrf.mxu1  ;;  %9561 = vmatmul.mubr.f32.gmra.mxu1 %v16664_v24  ;;  %9465 = vmatprep.mubr.f32.mxu0 %v12870_v10  ;;  %v16714_v10 = vld [vmem:[#allocation67_spill] sm:$0xff] }
 0x1c3   :  { %16662 = vst [vmem:[#allocation71_spill] sm:$0xff] %v13399_v63  ;;  %v13405_v49 = vadd.f32 %v9146_v8, %v1704_v52  ;;  %v1721_v13 = vpop.f32.mrf.mxu0  ;;  %9563 = vmatprep.mubr.f32.mxu1 %v16666_v19  ;;  %v16668_v63 = vld [vmem:[#allocation54_spill] sm:$0xff] }
 0x1c4   :  { %v1722_v50 = vadd.f32 %v1721_v13, %v13163_v56  ;;  %v1954_v17 = vpop.f32.mrf.mxu1  ;;  %v16669_v52 = vld [vmem:[#allocation14_spill] sm:$0xff]  ;;  %v16673_v13 = vld [vmem:[#allocation228_spill] sm:$0xff] }
 0x1c5   :  { %16665 = vst [vmem:[#allocation61_spill] sm:$0xff] %v13405_v49  ;;  %v13409_v25 = vadd.f32 %v1954_v17, %v1698_v60  ;;  %v9075_v44 = vpop.f32.mrf.mxu0  ;;  %9466 = vmatmul.mubr.f32.gmra.mxu0 %v12902_v9  ;;  %vm13417_vm1 = vcmp.eq.s32.totalorder %v16669_v52, %v13238_v16  ;;  %v16675_v49 = vld [vmem:[#allocation15_spill] sm:$0xff] }
 0x1c6   :  { %v1740_v47 = vadd.f32 %v9075_v44, %v13172_v21  ;;  %v9149_v53 = vpop.f32.mrf.mxu1  ;;  %9564 = vmatmul.mubr.f32.gmra.mxu1 %v16668_v63  ;;  %9468 = vmatprep.mubr.f32.mxu0 %v12916_v57  ;;  %v4710_v52 = vsel %vm13417_vm1, 1.0, %v16609_v33  ;;  %vm13433_vm2 = vcmp.eq.s32.totalorder %v16675_v49, %v13238_v16  ;;  %v16705_v57 = vld [vmem:[#allocation58_spill] sm:$0xff] }
 0x1c7   :  { %16667 = vst [vmem:[#allocation73_spill] sm:$0xff] %v13409_v25  ;;  %v13421_v56 = vadd.f32 %v9149_v53, %v1716_v1  ;;  %v1733_v60 = vpop.f32.mrf.mxu0  ;;  %9566 = vmatprep.mubr.f32.mxu1 %v16673_v13  ;;  %v16984_v1 = vld [vmem:[#allocation101_spill] sm:$0xff] }
 0x1c8   :  { %v1734_v17 = vadd.f32 %v1733_v60, %v13181_v58  ;;  %v1966_v25 = vpop.f32.mrf.mxu1  ;;  %v16678_v58 = vld [vmem:[#allocation234_spill] sm:$0xff] }
 0x1c9   :  { %16672 = vst [vmem:[#allocation29_spill] sm:$0xff] %v13421_v56  ;;  %v13425_v21 = vadd.f32 %v1966_v25, %v1710_v30  ;;  %v9078_v44 = vpop.f32.mrf.mxu0  ;;  %9469 = vmatmul.mubr.f32.gmra.mxu0 %v12943_v14  ;;  %v16680_v60 = vld [vmem:[#allocation238_spill] sm:$0xff]  ;;  %v16993_v14 = vld [vmem:[#allocation109_spill] sm:$0xff] }
 0x1ca   :  { %v1752_v53 = vadd.f32 %v9078_v44, %v13190_v35  ;;  %v9152_v56 = vpop.f32.mrf.mxu1  ;;  %9567 = vmatmul.mubr.f32.gmra.mxu1 %v16678_v58  ;;  %9471 = vmatprep.mubr.f32.mxu0 %v12956_v27  ;;  %v13450_v35 = vsub.f32 %v4710_v52, %v4710_v52  ;;  %v4709_v44 = vsel %vm13433_vm2, 1.0, %v16609_v33  ;;  %v16686_v52 = vld [vmem:[#allocation17_spill] sm:$0xff] }
 0x1cb   :  { %16674 = vst [vmem:[#allocation34_spill] sm:$0xff] %v13425_v21  ;;  %v13440_v30 = vadd.f32 %v9152_v56, %v1728_v4  ;;  %v1745_v25 = vpop.f32.mrf.mxu0  ;;  %9569 = vmatprep.mubr.f32.mxu1 %v16680_v60  ;;  %v16681_v21 = vld [vmem:[#allocation16_spill] sm:$0xff]  ;;  %v16685_v60 = vld [vmem:[#allocation77_spill] sm:$0xff]  ;;  %vm13466_vm4 = vcmp.eq.s32.totalorder %v16686_v52, %v13238_v16  ;;  %v16693_v52 = vld [vmem:[#allocation43_spill] sm:$0xff] }
 0x1cc   :  { %vm13445_vm3 = vcmp.eq.s32.totalorder %v16681_v21, %v13238_v16  ;;  %v1746_v49 = vadd.f32 %v1745_v25, %v13199_v36  ;;  %v1978_v13 = vpop.f32.mrf.mxu1  ;;  %v16687_v25 = vmov 0 }
 0x1cd   :  { %16679 = vst [vmem:[#allocation69_spill] sm:$0xff] %v13440_v30  ;;  %v13455_v4 = vadd.f32 %v1978_v13, %v1722_v50  ;;  %v9081_v56 = vpop.f32.mrf.mxu0  ;;  %9472 = vmatmul.mubr.f32.gmra.mxu0 %v12973_v29  ;;  %v4708_v36 = vsel %vm13445_vm3, 1.0, %v16609_v33  ;;  %v16688_v25 = vsel %vm13466_vm4, 4294967295, %v16687_v25 }
 0x1ce   :  { %v1764_v30 = vadd.f32 %v9081_v56, %v13208_v20  ;;  %v9155_v21 = vpop.f32.mrf.mxu1  ;;  %9570 = vmatmul.mubr.f32.gmra.mxu1 %v12940_v7  ;;  %9610 = vmatprep.mubr.f32.mxu0 %v16685_v60  ;;  %16689 = vst [vmem:[#allocation31_spill] sm:$0xff] %v16688_v25  ;;  %v13473_v20 = vsub.f32 %v4709_v44, %v4709_v44  ;;  %v13477_v7 = vand.u32 4294901760, %v13450_v35  ;;  %v16694_v44 = vld [vmem:[#allocation37_spill] sm:$0xff] }
 0x1cf   :  { %16684 = vst [vmem:[#allocation75_spill] sm:$0xff] %v13455_v4  ;;  %v13470_v50 = vadd.f32 %v9155_v21, %v1740_v47  ;;  %v1757_v13 = vpop.f32.mrf.mxu0  ;;  %9572 = vmatprep.mubr.f32.mxu1 %v12953_v41  ;;  %v13482_v58 = vsub.f32 %v4708_v36, %v4708_v36  ;;  %v4707_v47 = vsel %vm13466_vm4, 1.0, %v16609_v33 }
 0x1d0   :  { %v1758_v56 = vadd.f32 %v1757_v13, %v13217_v45  ;;  %v1990_v4 = vpop.f32.mrf.mxu1  ;;  %16691 = vst [vmem:[#allocation36_spill] sm:$0xff] %v13477_v7  ;;  %v16695_v45 = vld [vmem:[#allocation18_spill] sm:$0xff]  ;;  %v16696_v13 = vmov 0  ;;  %v13502_v36 = vand.u32 4294901760, %v13473_v20 }
 0x1d1   :  { %16690 = vst [vmem:[#allocation13_spill] sm:$0xff] %v13470_v50  ;;  %v13479_v29 = vadd.f32 %v1990_v4, %v1734_v17  ;;  %v9196_v27 = vpop.f32.mrf.mxu0  ;;  %9611 = vmatmul.mubr.f32.vlgmr.msra.gmra.mxu0 %v16693_v52  ;;  %vm13491_vm5 = vcmp.eq.s32.totalorder %v16695_v45, %v13238_v16  ;;  %v5266_v45 = vsub.f32 %v13450_v35, %v13477_v7  ;;  %v16703_v50 = vld [vmem:[#allocation47_spill] sm:$0xff] }
 0x1d2   :  { %v9158_v21 = vpop.f32.mrf.mxu1  ;;  %9573 = vmatmul.mubr.f32.gmra.mxu1 %v12970_v37  ;;  %9613 = vmatprep.mubr.f32.mxu0 %v16694_v44  ;;  %v16697_v13 = vsel %vm13491_vm5, 4294967295, %v16696_v13  ;;  %16700 = vst [vmem:[#allocation50_spill] sm:$0xff] %v13502_v36  ;;  %v4706_v37 = vsel %vm13491_vm5, 1.0, %v16609_v33 }
 0x1d3   :  { %16692 = vst [vmem:[#allocation32_spill] sm:$0xff] %v13479_v29  ;;  %16698 = vst [vmem:[#allocation46_spill] sm:$0xff] %v16697_v13  ;;  %v13495_v17 = vadd.f32 %v9158_v21, %v1752_v53  ;;  %v2180_v4 = vpop.f32.mrf.mxu0  ;;  %9575 = vmatprep.mubr.f32.mxu1 %v12983_v11  ;;  %9787 = vmatpush3.msk.msra.mxu0 %vm13255_vm0, %v16122_v12  ;;  %v13509_v53 = vsub.f32 %v4707_v47, %v4707_v47  ;;  %v13515_v11 = vand.u32 4294901760, %v13482_v58 }
 0x1d4   :  { %v2002_v29 = vpop.f32.mrf.mxu1  ;;  %9788 = vmatprep.subr.msk.mxu0 %vm13417_vm1, %v16122_v12  ;;  %v5267_v9 = vand.u32 4294901760, %v5266_v45  ;;  %v16715_v45 = vld [vmem:[#allocation72_spill] sm:$0xff] }
 0x1d5   :  { %16699 = vst [vmem:[#allocation74_spill] sm:$0xff] %v13495_v17  ;;  %16701 = vst [vmem:[#allocation76_spill] sm:$0xff] %v13509_v53  ;;  %v13511_v21 = vadd.f32 %v2002_v29, %v1746_v49  ;;  %v9199_v17 = vpop.f32.mrf.mxu0  ;;  %9614 = vmatmul.mubr.f32.gmra.mxu0 %v16703_v50  ;;  %v5272_v29 = vsub.f32 %v13473_v20, %v13502_v36  ;;  %v16707_v49 = vld [vmem:[#allocation19_spill] sm:$0xff] }
 0x1d6   :  { %16704 = vst [vmem:[#allocation80_spill] sm:$0xff] %v13515_v11  ;;  %v9161_v41 = vpop.f32.mrf.mxu1  ;;  %9576 = vmatmul.mubr.f32.gmra.mxu1 %v12997_v34  ;;  %9616 = vmatprep.mubr.f32.mxu0 %v16705_v57  ;;  %vm13532_vm6 = vcmp.eq.s32.totalorder %v16707_v49, %v13238_v16  ;;  %v5278_v49 = vsub.f32 %v13482_v58, %v13515_v11 }
 0x1d7   :  { %16702 = vst [vmem:[#allocation68_spill] sm:$0xff] %v13511_v21  ;;  %v13522_v63 = vadd.f32 %v9161_v41, %v1764_v30  ;;  %v2200_v47 = vpop.f32.mrf.mxu0  ;;  %9714 = vmatprep.mubr.f32.mxu1 %v16685_v60  ;;  %9789 = vmatpush3.msk.msra.mxu0 %vm13417_vm1, %v16122_v12  ;;  %v16708_v21 = vmov 0  ;;  %v13540_v41 = vand.u32 4294901760, %v13509_v53  ;;  %v13542_v30 = vsub.f32 %v4706_v37, %v4706_v37 }
 0x1d8   :  { %v16709_v21 = vsel %vm13532_vm6, 4294967295, %v16708_v21  ;;  %v2014_v34 = vpop.f32.mrf.mxu1  ;;  %9790 = vmatprep.subr.msk.mxu0 %vm13433_vm2, %v16122_v12  ;;  %v4705_v43 = vsel %vm13532_vm6, 1.0, %v16609_v33 }
 0x1d9   :  { %16706 = vst [vmem:[#allocation55_spill] sm:$0xff] %v13522_v63  ;;  %16710 = vst [vmem:[#allocation14_spill] sm:$0xff] %v16709_v21  ;;  %v13544_v63 = vadd.f32 %v2014_v34, %v1758_v56  ;;  %v9202_v19 = vpop.f32.mrf.mxu0  ;;  %9617 = vmatmul.mubr.f32.gmra.mxu0 %v16714_v10  ;;  %v5273_v34 = vand.u32 4294901760, %v5272_v29  ;;  %v16716_v56 = vld [vmem:[#allocation20_spill] sm:$0xff]  ;;  %v13575_v3 = vsub.f32 %v4705_v43, %v4705_v43 }
 0x1da   :  { %16711 = vst [vmem:[#allocation15_spill] sm:$0xff] %v13540_v41  ;;  %16712 = vst [vmem:[#allocation16_spill] sm:$0xff] %v13542_v30  ;;  %v9300_v24 = vpop.f32.mrf.mxu1  ;;  %9715 = vmatmul.mubr.f32.vlgmr.msra.gmra.mxu1 %v16693_v52  ;;  %9619 = vmatprep.mubr.f32.mxu0 %v16715_v45  ;;  %vm13560_vm7 = vcmp.eq.s32.totalorder %v16716_v56, %v13238_v16  ;;  %v5279_v56 = vand.u32 4294901760, %v5278_v49 }
 0x1db   :  { %16713 = vst [vmem:[#allocation17_spill] sm:$0xff] %v13544_v63  ;;  %v13554_v62 = vadd.f32 %v9300_v24, %v9196_v27  ;;  %v2220_v37 = vpop.f32.mrf.mxu0  ;;  %9891 = vmatpush3.msra.mxu1 %v13352_v48  ;;  %9717 = vmatprep.mubr.f32.mxu1 %v16694_v44  ;;  %v16717_v63 = vmov 0  ;;  %v5284_v27 = vsub.f32 %v13509_v53, %v13540_v41  ;;  %v13570_v48 = vand.u32 4294901760, %v13542_v30  ;;  %16722 = vst [vmem:[#allocation20_spill] sm:$0xff] %v13575_v3  ;;  %v16756_v53 = vld [vmem:[#allocation118_spill] sm:$0xff] }
 0x1dc   :  { %v16718_v63 = vsel %vm13560_vm7, 4294967295, %v16717_v63  ;;  %v2785_v18 = vpop.f32.mrf.mxu1  ;;  %9892 = vmatprep.subr.mxu1 %v5267_v9  ;;  %9791 = vmatpush3.msk.msra.mxu0 %vm13433_vm2, %v16122_v12  ;;  %v4704_v46 = vsel %vm13560_vm7, 1.0, %v16609_v33 }
 0x1dd   :  { %16719 = vst [vmem:[#allocation18_spill] sm:$0xff] %v16718_v63  ;;  %16720 = vst [vmem:[#allocation19_spill] sm:$0xff] %v13570_v48  ;;  %v13572_v24 = vadd.f32 %v2785_v18, %v2180_v4  ;;  %v9205_v29 = vpop.f32.mrf.mxu0  ;;  %9620 = vmatmul.mubr.f32.gmra.mxu0 %v16721_v55  ;;  %9893 = vmatpush3.msra.mxu1 %v5267_v9  ;;  %v16725_v18 = vmov 0  ;;  %v5285_v49 = vand.u32 4294901760, %v5284_v27  ;;  %v5290_v61 = vsub.f32 %v13542_v30, %v13570_v48  ;;  %v16731_v27 = vld [vmem:[#allocation93_spill] sm:$0xff]  ;;  %v16746_v30 = vld [vmem:[#allocation106_spill] sm:$0xff] }
 0x1de   :  { %v9303_v38 = vpop.f32.mrf.mxu1  ;;  %9718 = vmatmul.mubr.f32.gmra.mxu1 %v16703_v50  ;;  %9622 = vmatprep.mubr.f32.mxu0 %v16723_v32  ;;  %v16726_v18 = vsel %vm13584_vm8, 4294967295, %v16725_v18 }
 0x1df   :  { %16727 = vst [vmem:[#allocation21_spill] sm:$0xff] %v16726_v18  ;;  %v13588_v4 = vadd.f32 %v9303_v38, %v9199_v17  ;;  %v2240_v9 = vpop.f32.mrf.mxu0  ;;  %9720 = vmatprep.mubr.f32.mxu1 %v16705_v57  ;;  %9894 = vmatprep.subr.mxu1 %v5273_v34  ;;  %v13600_v38 = vand.u32 4294901760, %v13575_v3  ;;  %v13602_v17 = vsub.f32 %v4704_v46, %v4704_v46  ;;  %v5291_v59 = vand.u32 4294901760, %v5290_v61  ;;  %v16739_v61 = vld [vmem:[#allocation102_spill] sm:$0xff] }
 0x1e0   :  { %v2797_v43 = vpop.f32.mrf.mxu1  ;;  %9895 = vmatpush3.msra.mxu1 %v5273_v34  ;;  %9792 = vmatprep.subr.msk.mxu0 %vm13445_vm3, %v16122_v12  ;;  %v4703_v34 = vsel %vm13584_vm8, 1.0, %v16609_v33 }
 0x1e1   :  { %v13596_v6 = vadd.f32 %v2797_v43, %v2200_v47  ;;  %v9208_v0 = vpop.f32.mrf.mxu0  ;;  %9623 = vmatmul.mubr.f32.gmra.mxu0 %v16728_v51  ;;  %9896 = vmatprep.subr.mxu1 %v5279_v56  ;;  %16729 = vst [vmem:[#allocation257_spill] sm:$0xff] %v13600_v38  ;;  %16730 = vst [vmem:[#allocation258_spill] sm:$0xff] %v13602_v17  ;;  %v16732_v47 = vld [vmem:[#allocation22_spill] sm:$0xff]  ;;  %v16733_v43 = vmov 0  ;;  %v5296_v11 = vsub.f32 %v13575_v3, %v13600_v38  ;;  %v13632_v26 = vand.u32 4294901760, %v13602_v17 }
 0x1e2   :  { %v9306_v40 = vpop.f32.mrf.mxu1  ;;  %9721 = vmatmul.mubr.f32.gmra.mxu1 %v16714_v10  ;;  %9625 = vmatprep.mubr.f32.mxu0 %v16731_v27  ;;  %vm13611_vm9 = vcmp.eq.s32.totalorder %v16732_v47, %v13238_v16  ;;  %v13624_v47 = vsub.f32 %v4703_v34, %v4703_v34  ;;  %v16741_v38 = vmov 0 }
 0x1e3   :  { %v16734_v43 = vsel %vm13611_vm9, 4294967295, %v16733_v43  ;;  %v13615_v23 = vadd.f32 %v9306_v40, %v9202_v19  ;;  %v2260_v48 = vpop.f32.mrf.mxu0  ;;  %9723 = vmatprep.mubr.f32.mxu1 %v16715_v45  ;;  %9793 = vmatpush3.msk.msra.mxu0 %vm13445_vm3, %v16122_v12  ;;  %v16737_v19 = vld [vmem:[#allocation96_spill] sm:$0xff]  ;;  %16738 = vst [vmem:[#allocation260_spill] sm:$0xff] %v13632_v26 }
 0x1e4   :  { %16735 = vst [vmem:[#allocation22_spill] sm:$0xff] %v16734_v43  ;;  %v2809_v46 = vpop.f32.mrf.mxu1  ;;  %9897 = vmatpush3.msra.mxu1 %v5279_v56  ;;  %9794 = vmatprep.subr.msk.mxu0 %vm13466_vm4, %v16122_v12  ;;  %16736 = vst [vmem:[#allocation259_spill] sm:$0xff] %v13624_v47  ;;  %v4702_v56 = vsel %vm13611_vm9, 1.0, %v16609_v33  ;;  %v16794_v43 = vld [vmem:[#allocation150_spill] sm:$0xff] }
 0x1e5   :  { %v13626_v41 = vadd.f32 %v2809_v46, %v2220_v37  ;;  %v9211_v40 = vpop.f32.mrf.mxu0  ;;  %9626 = vmatmul.mubr.f32.gmra.mxu0 %v16737_v19  ;;  %9898 = vmatprep.subr.mxu1 %v5285_v49  ;;  %v16740_v46 = vld [vmem:[#allocation23_spill] sm:$0xff] }
 0x1e6   :  { %v9309_v36 = vpop.f32.mrf.mxu1  ;;  %9724 = vmatmul.mubr.f32.gmra.mxu1 %v16721_v55  ;;  %9628 = vmatprep.mubr.f32.mxu0 %v16739_v61  ;;  %vm13647_vm10 = vcmp.eq.s32.totalorder %v16740_v46, %v13238_v16  ;;  %v5297_v46 = vand.u32 4294901760, %v5296_v11  ;;  %v16747_v55 = vld [vmem:[#allocation110_spill] sm:$0xff]  ;;  %v16748_v11 = vld [vmem:[#allocation24_spill] sm:$0xff] }
 0x1e7   :  { %v13639_v37 = vadd.f32 %v9309_v36, %v9205_v29  ;;  %v2280_v34 = vpop.f32.mrf.mxu0  ;;  %9726 = vmatprep.mubr.f32.mxu1 %v16723_v32  ;;  %9795 = vmatpush3.msk.msra.mxu0 %vm13466_vm4, %v16122_v12  ;;  %v16742_v38 = vsel %vm13647_vm10, 4294967295, %v16741_v38  ;;  %v13655_v36 = vand.u32 4294901760, %v13624_v47  ;;  %v13657_v29 = vsub.f32 %v4702_v56, %v4702_v56 }
 0x1e8   :  { %16743 = vst [vmem:[#allocation23_spill] sm:$0xff] %v16742_v38  ;;  %v2821_v7 = vpop.f32.mrf.mxu1  ;;  %9899 = vmatpush3.msra.mxu1 %v5285_v49  ;;  %9796 = vmatprep.subr.msk.mxu0 %vm13491_vm5, %v16122_v12  ;;  %v5302_v32 = vsub.f32 %v13602_v17, %v13632_v26  ;;  %v4701_v56 = vsel %vm13647_vm10, 1.0, %v16609_v33  ;;  %vm13677_vm11 = vcmp.eq.s32.totalorder %v16748_v11, %v13238_v16  ;;  %v16798_v38 = vld [vmem:[#allocation158_spill] sm:$0xff] }
 0x1e9   :  { %16744 = vst [vmem:[#allocation261_spill] sm:$0xff] %v13655_v36  ;;  %16745 = vst [vmem:[#allocation262_spill] sm:$0xff] %v13657_v29  ;;  %v13659_v54 = vadd.f32 %v2821_v7, %v2240_v9  ;;  %v9214_v3 = vpop.f32.mrf.mxu0  ;;  %9629 = vmatmul.mubr.f32.gmra.mxu0 %v16746_v30  ;;  %9900 = vmatprep.subr.mxu1 %v5291_v59  ;;  %v16749_v9 = vmov 0  ;;  %v13692_v13 = vsub.f32 %v4701_v56, %v4701_v56 }
 0x1ea   :  { %v9312_v49 = vpop.f32.mrf.mxu1  ;;  %9727 = vmatmul.mubr.f32.gmra.mxu1 %v16728_v51  ;;  %9631 = vmatprep.mubr.f32.mxu0 %v16747_v55  ;;  %v16750_v9 = vsel %vm13677_vm11, 4294967295, %v16749_v9  ;;  %v16754_v51 = vld [vmem:[#allocation115_spill] sm:$0xff]  ;;  %v5303_v11 = vand.u32 4294901760, %v5302_v32 }
 0x1eb   :  { %v13669_v25 = vadd.f32 %v9312_v49, %v9208_v0  ;;  %v2300_v7 = vpop.f32.mrf.mxu0  ;;  %9729 = vmatprep.mubr.f32.mxu1 %v16731_v27  ;;  %9797 = vmatpush3.msk.msra.mxu0 %vm13491_vm5, %v16122_v12  ;;  %16751 = vst [vmem:[#allocation24_spill] sm:$0xff] %v16750_v9  ;;  %v5308_v0 = vsub.f32 %v13624_v47, %v13655_v36  ;;  %v13687_v49 = vand.u32 4294901760, %v13657_v29  ;;  %16755 = vst [vmem:[#allocation265_spill] sm:$0xff] %v13692_v13  ;;  %v16757_v47 = vld [vmem:[#allocation25_spill] sm:$0xff] }
 0x1ec   :  { %v2833_v26 = vpop.f32.mrf.mxu1  ;;  %9901 = vmatpush3.msra.mxu1 %v5291_v59  ;;  %9798 = vmatprep.subr.msk.mxu0 %vm13532_vm6, %v16122_v12  ;;  %v4700_v36 = vsel %vm13677_vm11, 1.0, %v16609_v33  ;;  %vm13701_vm12 = vcmp.eq.s32.totalorder %v16757_v47, %v13238_v16 }
 0x1ed   :  { %16752 = vst [vmem:[#allocation263_spill] sm:$0xff] %v13687_v49  ;;  %v13689_v17 = vadd.f32 %v2833_v26, %v2260_v48  ;;  %v9217_v27 = vpop.f32.mrf.mxu0  ;;  %9632 = vmatmul.mubr.f32.gmra.mxu0 %v16754_v51  ;;  %9902 = vmatprep.subr.mxu1 %v5297_v46  ;;  %v16758_v26 = vmov 0  ;;  %v5314_v47 = vsub.f32 %v13657_v29, %v13687_v49  ;;  %v16769_v49 = vmov 0 }
 0x1ee   :  { %v9315_v59 = vpop.f32.mrf.mxu1  ;;  %9730 = vmatmul.mubr.f32.gmra.mxu1 %v16737_v19  ;;  %9634 = vmatprep.mubr.f32.mxu0 %v16756_v53  ;;  %v16759_v26 = vsel %vm13701_vm12, 4294967295, %v16758_v26  ;;  %v5309_v19 = vand.u32 4294901760, %v5308_v0  ;;  %v13722_v21 = vsub.f32 %v4700_v36, %v4700_v36  ;;  %v16766_v0 = vld [vmem:[#allocation123_spill] sm:$0xff]  ;;  %v16768_v36 = vld [vmem:[#allocation26_spill] sm:$0xff] }
 0x1ef   :  { %16753 = vst [vmem:[#allocation264_spill] sm:$0xff] %v13689_v17  ;;  %16760 = vst [vmem:[#allocation25_spill] sm:$0xff] %v16759_v26  ;;  %v13705_v48 = vadd.f32 %v9315_v59, %v9211_v40  ;;  %v2320_v32 = vpop.f32.mrf.mxu0  ;;  %9732 = vmatprep.mubr.f32.mxu1 %v16739_v61  ;;  %9799 = vmatpush3.msk.msra.mxu0 %vm13532_vm6, %v16122_v12  ;;  %v16763_v59 = vld [vmem:[#allocation120_spill] sm:$0xff]  ;;  %v13720_v61 = vand.u32 4294901760, %v13692_v13  ;;  %vm13737_vm13 = vcmp.eq.s32.totalorder %v16768_v36, %v13238_v16 }
 0x1f0   :  { %v2845_v56 = vpop.f32.mrf.mxu1  ;;  %9903 = vmatpush3.msra.mxu1 %v5297_v46  ;;  %9800 = vmatprep.subr.msk.mxu0 %vm13560_vm7, %v16122_v12  ;;  %16765 = vst [vmem:[#allocation269_spill] sm:$0xff] %v13722_v21  ;;  %v4699_v46 = vsel %vm13701_vm12, 1.0, %v16609_v33  ;;  %v16770_v49 = vsel %vm13737_vm13, 4294967295, %v16769_v49  ;;  %v5315_v63 = vand.u32 4294901760, %v5314_v47  ;;  %v16778_v47 = vld [vmem:[#allocation33_spill] sm:$0xff] }
 0x1f1   :  { %16761 = vst [vmem:[#allocation266_spill] sm:$0xff] %v13705_v48  ;;  %v13716_v17 = vadd.f32 %v2845_v56, %v2280_v34  ;;  %v9220_v40 = vpop.f32.mrf.mxu0  ;;  %9635 = vmatmul.mubr.f32.gmra.mxu0 %v16763_v59  ;;  %9904 = vmatprep.subr.mxu1 %v5303_v11  ;;  %16764 = vst [vmem:[#allocation268_spill] sm:$0xff] %v13720_v61  ;;  %v5320_v36 = vsub.f32 %v13692_v13, %v13720_v61  ;;  %v16779_v61 = vmov 0 }
 0x1f2   :  { %v9318_v48 = vpop.f32.mrf.mxu1  ;;  %9733 = vmatmul.mubr.f32.gmra.mxu1 %v16746_v30  ;;  %9637 = vmatprep.mubr.f32.mxu0 %v16766_v0  ;;  %16771 = vst [vmem:[#allocation26_spill] sm:$0xff] %v16770_v49  ;;  %v16774_v30 = vld [vmem:[#allocation129_spill] sm:$0xff]  ;;  %vm13767_vm14 = vcmp.eq.s32.totalorder %v16778_v47, %v13238_v16 }
 0x1f3   :  { %16762 = vst [vmem:[#allocation267_spill] sm:$0xff] %v13716_v17  ;;  %v13729_v34 = vadd.f32 %v9318_v48, %v9214_v3  ;;  %v2340_v56 = vpop.f32.mrf.mxu0  ;;  %9735 = vmatprep.mubr.f32.mxu1 %v16747_v55  ;;  %9801 = vmatpush3.msk.msra.mxu0 %vm13560_vm7, %v16122_v12  ;;  %v13744_v3 = vsub.f32 %v4699_v46, %v4699_v46  ;;  %v16776_v17 = vld [vmem:[#allocation134_spill] sm:$0xff]  ;;  %v16780_v61 = vsel %vm13767_vm14, 4294967295, %v16779_v61  ;;  %v5321_v18 = vand.u32 4294901760, %v5320_v36  ;;  %v16787_v36 = vld [vmem:[#allocation12_spill] sm:$0xff] }
 0x1f4   :  { %v2857_v29 = vpop.f32.mrf.mxu1  ;;  %9905 = vmatpush3.msra.mxu1 %v5303_v11  ;;  %9802 = vmatprep.subr.msk.mxu0 %vm13584_vm8, %v16122_v12  ;;  %16781 = vst [vmem:[#allocation33_spill] sm:$0xff] %v16780_v61  ;;  %vm13797_vm15 = vcmp.eq.s32.totalorder %v16787_v36, %v13238_v16  ;;  %v16809_v61 = vld [vmem:[#allocation197_spill] sm:$0xff] }
 0x1f5   :  { %16767 = vst [vmem:[#allocation270_spill] sm:$0xff] %v13729_v34  ;;  %16772 = vst [vmem:[#allocation271_spill] sm:$0xff] %v13744_v3  ;;  %v13746_v48 = vadd.f32 %v2857_v29, %v2300_v7  ;;  %v9223_v55 = vpop.f32.mrf.mxu0  ;;  %9638 = vmatmul.mubr.f32.gmra.mxu0 %v16774_v30  ;;  %9906 = vmatprep.subr.mxu1 %v5309_v19  ;;  %v13752_v34 = vand.u32 4294901760, %v13722_v21  ;;  %v4698_v29 = vsel %vm13737_vm13, 1.0, %v16609_v33 }
 0x1f6   :  { %v9321_v11 = vpop.f32.mrf.mxu1  ;;  %9736 = vmatmul.mubr.f32.gmra.mxu1 %v16754_v51  ;;  %9640 = vmatprep.mubr.f32.mxu0 %v16776_v17  ;;  %v16784_v51 = vld [vmem:[#allocation137_spill] sm:$0xff] }
 0x1f7   :  { %16773 = vst [vmem:[#allocation272_spill] sm:$0xff] %v13746_v48  ;;  %16775 = vst [vmem:[#allocation273_spill] sm:$0xff] %v13752_v34  ;;  %v13759_v7 = vadd.f32 %v9321_v11, %v9217_v27  ;;  %v2360_v46 = vpop.f32.mrf.mxu0  ;;  %9738 = vmatprep.mubr.f32.mxu1 %v16756_v53  ;;  %9803 = vmatpush3.msk.msra.mxu0 %vm13584_vm8, %v16122_v12  ;;  %v13775_v27 = vand.u32 4294901760, %v13744_v3  ;;  %v5326_v47 = vsub.f32 %v13722_v21, %v13752_v34  ;;  %v16786_v48 = vld [vmem:[#allocation142_spill] sm:$0xff] }
 0x1f8   :  { %v2869_v13 = vpop.f32.mrf.mxu1  ;;  %9907 = vmatpush3.msra.mxu1 %v5309_v19  ;;  %9804 = vmatprep.subr.msk.mxu0 %vm13611_vm9, %v16122_v12 }
 0x1f9   :  { %16777 = vst [vmem:[#allocation274_spill] sm:$0xff] %v13759_v7  ;;  %16782 = vst [vmem:[#allocation275_spill] sm:$0xff] %v13775_v27  ;;  %v13777_v11 = vadd.f32 %v2869_v13, %v2320_v32  ;;  %v9226_v53 = vpop.f32.mrf.mxu0  ;;  %9641 = vmatmul.mubr.f32.gmra.mxu0 %v16784_v51  ;;  %9908 = vmatprep.subr.mxu1 %v5315_v63  ;;  %v13782_v7 = vsub.f32 %v4698_v29, %v4698_v29  ;;  %v4697_v13 = vsel %vm13767_vm14, 1.0, %v16609_v33  ;;  %v16788_v29 = vmov 0 }
 0x1fa   :  { %v9324_v19 = vpop.f32.mrf.mxu1  ;;  %9739 = vmatmul.mubr.f32.gmra.mxu1 %v16763_v59  ;;  %9643 = vmatprep.mubr.f32.mxu0 %v16786_v48  ;;  %v16789_v29 = vsel %vm13797_vm15, 4294967295, %v16788_v29  ;;  %v5327_v59 = vand.u32 4294901760, %v5326_v47  ;;  %v13812_v36 = vsub.f32 %v4697_v13, %v4697_v13 }
 0x1fb   :  { %16783 = vst [vmem:[#allocation276_spill] sm:$0xff] %v13777_v11  ;;  %16785 = vst [vmem:[#allocation277_spill] sm:$0xff] %v13782_v7  ;;  %v13789_v32 = vadd.f32 %v9324_v19, %v9220_v40  ;;  %v2380_v11 = vpop.f32.mrf.mxu0  ;;  %9741 = vmatprep.mubr.f32.mxu1 %v16766_v0  ;;  %9805 = vmatpush3.msk.msra.mxu0 %vm13611_vm9, %v16122_v12  ;;  %v5332_v40 = vsub.f32 %v13744_v3, %v13775_v27  ;;  %v16791_v0 = vld [vmem:[#allocation146_spill] sm:$0xff]  ;;  %v13810_v16 = vand.u32 4294901760, %v13782_v7 }
 0x1fc   :  { %16790 = vst [vmem:[#allocation12_spill] sm:$0xff] %v16789_v29  ;;  %v2881_v34 = vpop.f32.mrf.mxu1  ;;  %9909 = vmatpush3.msra.mxu1 %v5315_v63  ;;  %9806 = vmatprep.subr.msk.mxu0 %vm13647_vm10, %v16122_v12  ;;  %16793 = vst [vmem:[#allocation279_spill] sm:$0xff] %v13812_v36 }
 0x1fd   :  { %v13806_v19 = vadd.f32 %v2881_v34, %v2340_v56  ;;  %v9229_v21 = vpop.f32.mrf.mxu0  ;;  %9644 = vmatmul.mubr.f32.gmra.mxu0 %v16791_v0  ;;  %9910 = vmatprep.subr.mxu1 %v5321_v18  ;;  %16792 = vst [vmem:[#allocation278_spill] sm:$0xff] %v13810_v16  ;;  %v4696_v34 = vsel %vm13797_vm15, 1.0, %v16609_v33  ;;  %v5333_v13 = vand.u32 4294901760, %v5332_v40  ;;  %v16795_v33 = vld [vmem:[#allocation155_spill] sm:$0xff] }
 0x1fe   :  { %v9327_v63 = vpop.f32.mrf.mxu1  ;;  %9742 = vmatmul.mubr.f32.gmra.mxu1 %v16774_v30  ;;  %9646 = vmatprep.mubr.f32.mxu0 %v16794_v43 }
 0x1ff   :  { %v13819_v56 = vadd.f32 %v9327_v63, %v9223_v55  ;;  %v2400_v27 = vpop.f32.mrf.mxu0  ;;  %9744 = vmatprep.mubr.f32.mxu1 %v16776_v17  ;;  %9807 = vmatpush3.msk.msra.mxu0 %vm13647_vm10, %v16122_v12  ;;  %v5338_v55 = vsub.f32 %v13782_v7, %v13810_v16  ;;  %v13834_v63 = vand.u32 4294901760, %v13812_v36  ;;  %v13836_v17 = vsub.f32 %v4696_v34, %v4696_v34  ;;  %v16799_v7 = vld [vmem:[#allocation160_spill] sm:$0xff] }
 0x200   :  { %v2893_v47 = vpop.f32.mrf.mxu1  ;;  %9911 = vmatpush3.msra.mxu1 %v5321_v18  ;;  %9808 = vmatprep.subr.msk.mxu0 %vm13677_vm11, %v16122_v12 }
 0x201   :  { %v13828_v3 = vadd.f32 %v2893_v47, %v2360_v46  ;;  %v9232_v30 = vpop.f32.mrf.mxu0  ;;  %9647 = vmatmul.mubr.f32.gmra.mxu0 %v16795_v33  ;;  %9912 = vmatprep.subr.mxu1 %v5327_v59  ;;  %16796 = vst [vmem:[#allocation280_spill] sm:$0xff] %v13834_v63  ;;  %16797 = vst [vmem:[#allocation281_spill] sm:$0xff] %v13836_v17 }
 0x202   :  { %v9330_v18 = vpop.f32.mrf.mxu1  ;;  %9745 = vmatmul.mubr.f32.gmra.mxu1 %v16784_v51  ;;  %9649 = vmatprep.mubr.f32.mxu0 %v16798_v38 }
 0x203   :  { %v13840_v40 = vadd.f32 %v9330_v18, %v9226_v53  ;;  %v2420_v46 = vpop.f32.mrf.mxu0  ;;  %9747 = vmatprep.mubr.f32.mxu1 %v16786_v48  ;;  %9809 = vmatpush3.msk.msra.mxu0 %vm13677_vm11, %v16122_v12  ;;  %v5339_v53 = vand.u32 4294901760, %v5338_v55  ;;  %v5344_v18 = vsub.f32 %v13812_v36, %v13834_v63  ;;  %v13855_v48 = vand.u32 4294901760, %v13836_v17  ;;  %v16802_v36 = vld [vmem:[#allocation169_spill] sm:$0xff] }
 0x204   :  { %v2905_v47 = vpop.f32.mrf.mxu1  ;;  %9913 = vmatpush3.msra.mxu1 %v5327_v59  ;;  %9810 = vmatprep.subr.msk.mxu0 %vm13701_vm12, %v16122_v12  ;;  %v16801_v59 = vld [vmem:[#allocation163_spill] sm:$0xff] }
 0x205   :  { %v13849_v34 = vadd.f32 %v2905_v47, %v2380_v11  ;;  %v9235_v16 = vpop.f32.mrf.mxu0  ;;  %9650 = vmatmul.mubr.f32.gmra.mxu0 %v16799_v7  ;;  %9914 = vmatprep.subr.mxu1 %v5333_v13  ;;  %16800 = vst [vmem:[#allocation282_spill] sm:$0xff] %v13855_v48 }
 0x206   :  { %v9333_v51 = vpop.f32.mrf.mxu1  ;;  %9748 = vmatmul.mubr.f32.gmra.mxu1 %v16791_v0  ;;  %9652 = vmatprep.mubr.f32.mxu0 %v16801_v59  ;;  %v16803_v0 = vld [vmem:[#allocation174_spill] sm:$0xff] }
 0x207   :  { %v13859_v9 = vadd.f32 %v9333_v51, %v9229_v21  ;;  %v2440_v11 = vpop.f32.mrf.mxu0  ;;  %9750 = vmatprep.mubr.f32.mxu1 %v16794_v43  ;;  %9811 = vmatpush3.msk.msra.mxu0 %vm13701_vm12, %v16122_v12  ;;  %v5345_v51 = vand.u32 4294901760, %v5344_v18  ;;  %v5350_v21 = vsub.f32 %v13836_v17, %v13855_v48  ;;  %v16804_v48 = vld [vmem:[#allocation177_spill] sm:$0xff]  ;;  %v16805_v17 = vld [vmem:[#allocation182_spill] sm:$0xff] }
 0x208   :  { %v2917_v55 = vpop.f32.mrf.mxu1  ;;  %9915 = vmatpush3.msra.mxu1 %v5333_v13  ;;  %9812 = vmatprep.subr.msk.mxu0 %vm13737_vm13, %v16122_v12 }
 0x209   :  { %v13868_v47 = vadd.f32 %v2917_v55, %v2400_v27  ;;  %v9238_v63 = vpop.f32.mrf.mxu0  ;;  %9653 = vmatmul.mubr.f32.gmra.mxu0 %v16802_v36  ;;  %9916 = vmatprep.subr.mxu1 %v5339_v53 }
 0x20a   :  { %v9336_v43 = vpop.f32.mrf.mxu1  ;;  %9751 = vmatmul.mubr.f32.gmra.mxu1 %v16795_v33  ;;  %9655 = vmatprep.mubr.f32.mxu0 %v16803_v0 }
 0x20b   :  { %v13875_v13 = vadd.f32 %v9336_v43, %v9232_v30  ;;  %v2460_v26 = vpop.f32.mrf.mxu0  ;;  %9753 = vmatprep.mubr.f32.mxu1 %v16798_v38  ;;  %9813 = vmatpush3.msk.msra.mxu0 %vm13737_vm13, %v16122_v12  ;;  %v5351_v30 = vand.u32 4294901760, %v5350_v21 }
 0x20c   :  { %v2929_v27 = vpop.f32.mrf.mxu1  ;;  %9917 = vmatpush3.msra.mxu1 %v5339_v53  ;;  %9814 = vmatprep.subr.msk.mxu0 %vm13767_vm14, %v16122_v12 }
 0x20d   :  { %v13884_v18 = vadd.f32 %v2929_v27, %v2420_v46  ;;  %v9241_v55 = vpop.f32.mrf.mxu0  ;;  %9656 = vmatmul.mubr.f32.gmra.mxu0 %v16804_v48  ;;  %9918 = vmatprep.subr.mxu1 %v5345_v51  ;;  %v16806_v27 = vld [vmem:[#allocation186_spill] sm:$0xff] }
 0x20e   :  { %v9339_v43 = vpop.f32.mrf.mxu1  ;;  %9754 = vmatmul.mubr.f32.gmra.mxu1 %v16799_v7  ;;  %9658 = vmatprep.mubr.f32.mxu0 %v16805_v17 }
 0x20f   :  { %v13889_v38 = vadd.f32 %v9339_v43, %v9235_v16  ;;  %v2480_v33 = vpop.f32.mrf.mxu0  ;;  %9756 = vmatprep.mubr.f32.mxu1 %v16801_v59  ;;  %9815 = vmatpush3.msk.msra.mxu0 %vm13767_vm14, %v16122_v12  ;;  %v16807_v43 = vld [vmem:[#allocation190_spill] sm:$0xff] }
 0x210   :  { %v2941_v46 = vpop.f32.mrf.mxu1  ;;  %9816 = vmatprep.subr.msk.mxu0 %vm13797_vm15, %v16122_v12  ;;  %9919 = vmatpush3.msra.mxu1 %v5345_v51 }
 0x211   :  { %v13898_v53 = vadd.f32 %v2941_v46, %v2440_v11  ;;  %v9244_v21 = vpop.f32.mrf.mxu0  ;;  %9659 = vmatmul.mubr.f32.gmra.mxu0 %v16806_v27  ;;  %9920 = vmatprep.subr.mxu1 %v5351_v30 }
 0x212   :  { %v9342_v16 = vpop.f32.mrf.mxu1  ;;  %9757 = vmatmul.mubr.f32.gmra.mxu1 %v16802_v36  ;;  %9661 = vmatprep.mubr.f32.mxu0 %v16807_v43 }
 0x213   :  { %v13903_v59 = vadd.f32 %v9342_v16, %v9238_v63  ;;  %v2500_v7 = vpop.f32.mrf.mxu0  ;;  %9759 = vmatprep.mubr.f32.mxu1 %v16803_v0  ;;  %9817 = vmatpush3.msk.msra.mxu0 %vm13797_vm15, %v16122_v12  ;;  %v16810_v16 = vld [vmem:[#allocation200_spill] sm:$0xff] }
 0x214   :  { %v2953_v11 = vpop.f32.mrf.mxu1  ;;  %9921 = vmatpush3.msra.mxu1 %v5351_v30  ;;  %9994 = vmatprep.subr.mxu0 %v13291_v15 }
 0x215   :  { %v13910_v51 = vadd.f32 %v2953_v11, %v2460_v26  ;;  %v9247_v46 = vpop.f32.mrf.mxu0  ;;  %9662 = vmatmul.mubr.f32.gmra.mxu0 %v16809_v61  ;;  %10098 = vmatprep.subr.msk.mxu1 %vm13255_vm0, %v16122_v12 }
 0x216   :  { %v9345_v63 = vpop.f32.mrf.mxu1  ;;  %9760 = vmatmul.mubr.f32.gmra.mxu1 %v16804_v48  ;;  %9664 = vmatprep.mubr.f32.mxu0 %v16810_v16 }
 0x217   :  { %16808 = vst [vmem:[#allocation283_spill] sm:$0xff] %v13910_v51  ;;  %v13918_v0 = vadd.f32 %v9345_v63, %v9241_v55  ;;  %v2520_v36 = vpop.f32.mrf.mxu0  ;;  %9762 = vmatprep.mubr.f32.mxu1 %v16805_v17 }
 0x218   :  { %v2965_v30 = vpop.f32.mrf.mxu1 }
 0x219   :  { %v13921_v26 = vadd.f32 %v2965_v30, %v2480_v33  ;;  %v9250_v11 = vpop.f32.mrf.mxu0  ;;  %9665 = vmatmul.mubr.f32.gmra.mxu0 %v12699_v42 }
 0x21a   :  { %v9348_v29 = vpop.f32.mrf.mxu1  ;;  %9763 = vmatmul.mubr.f32.gmra.mxu1 %v16806_v27  ;;  %9667 = vmatprep.mubr.f32.mxu0 %v12722_v22 }
 0x21b   :  { %v13926_v51 = vadd.f32 %v9348_v29, %v9244_v21  ;;  %v2540_v48 = vpop.f32.mrf.mxu0  ;;  %9765 = vmatprep.mubr.f32.mxu1 %v16807_v43 }
 0x21c   :  { %v2977_v55 = vpop.f32.mrf.mxu1 }
 0x21d   :  { %v13929_v63 = vadd.f32 %v2977_v55, %v2500_v7  ;;  %v9253_v17 = vpop.f32.mrf.mxu0  ;;  %9668 = vmatmul.mubr.f32.gmra.mxu0 %v12753_v5 }
 0x21e   :  { %v9351_v33 = vpop.f32.mrf.mxu1  ;;  %9766 = vmatmul.mubr.f32.gmra.mxu1 %v16809_v61  ;;  %9670 = vmatprep.mubr.f32.mxu0 %v12755_v28 }
 0x21f   :  { %v13934_v30 = vadd.f32 %v9351_v33, %v9247_v46  ;;  %v2560_v27 = vpop.f32.mrf.mxu0  ;;  %9768 = vmatprep.mubr.f32.mxu1 %v16810_v16 }
 0x220   :  { %v2989_v29 = vpop.f32.mrf.mxu1 }
 0x221   :  { %16811 = vst [vmem:[#allocation284_spill] sm:$0xff] %v13934_v30  ;;  %v13937_v21 = vadd.f32 %v2989_v29, %v2520_v36  ;;  %v9256_v43 = vpop.f32.mrf.mxu0  ;;  %9671 = vmatmul.mubr.f32.gmra.mxu0 %v12803_v2  ;;  %v16815_v30 = vld [vmem:[#allocation230_spill] sm:$0xff]  ;;  %v16816_v29 = vld [vmem:[#allocation232_spill] sm:$0xff] }
 0x222   :  { %v9354_v7 = vpop.f32.mrf.mxu1  ;;  %9769 = vmatmul.mubr.f32.gmra.mxu1 %v12699_v42  ;;  %9673 = vmatprep.mubr.f32.mxu0 %v12831_v39 }
 0x223   :  { %16812 = vst [vmem:[#allocation285_spill] sm:$0xff] %v13937_v21  ;;  %v13942_v55 = vadd.f32 %v9354_v7, %v9250_v11  ;;  %v2580_v61 = vpop.f32.mrf.mxu0  ;;  %9771 = vmatprep.mubr.f32.mxu1 %v12722_v22 }
 0x224   :  { %v3001_v46 = vpop.f32.mrf.mxu1 }
 0x225   :  { %16813 = vst [vmem:[#allocation286_spill] sm:$0xff] %v13942_v55  ;;  %v13945_v33 = vadd.f32 %v3001_v46, %v2540_v48  ;;  %v9259_v16 = vpop.f32.mrf.mxu0  ;;  %9674 = vmatmul.mubr.f32.gmra.mxu0 %v16815_v30  ;;  %v16819_v55 = vld [vmem:[#allocation237_spill] sm:$0xff]  ;;  %v16820_v46 = vld [vmem:[#allocation240_spill] sm:$0xff] }
 0x226   :  { %v9357_v36 = vpop.f32.mrf.mxu1  ;;  %9772 = vmatmul.mubr.f32.gmra.mxu1 %v12753_v5  ;;  %9676 = vmatprep.mubr.f32.mxu0 %v16816_v29 }
 0x227   :  { %16814 = vst [vmem:[#allocation287_spill] sm:$0xff] %v13945_v33  ;;  %v13950_v21 = vadd.f32 %v9357_v36, %v9253_v17  ;;  %v2600_v42 = vpop.f32.mrf.mxu0  ;;  %9774 = vmatprep.mubr.f32.mxu1 %v12755_v28 }
 0x228   :  { %v3013_v11 = vpop.f32.mrf.mxu1 }
 0x229   :  { %16817 = vst [vmem:[#allocation232_spill] sm:$0xff] %v13950_v21  ;;  %v13953_v7 = vadd.f32 %v3013_v11, %v2560_v27  ;;  %v9262_v22 = vpop.f32.mrf.mxu0  ;;  %9677 = vmatmul.mubr.f32.gmra.mxu0 %v16819_v55  ;;  %v16823_v21 = vld [vmem:[#allocation243_spill] sm:$0xff]  ;;  %v16824_v11 = vld [vmem:[#allocation86_spill] sm:$0xff] }
 0x22a   :  { %v9360_v48 = vpop.f32.mrf.mxu1  ;;  %9775 = vmatmul.mubr.f32.gmra.mxu1 %v12803_v2  ;;  %9679 = vmatprep.mubr.f32.mxu0 %v16820_v46 }
 0x22b   :  { %16818 = vst [vmem:[#allocation288_spill] sm:$0xff] %v13953_v7  ;;  %v13958_v33 = vadd.f32 %v9360_v48, %v9256_v43  ;;  %v2620_v5 = vpop.f32.mrf.mxu0  ;;  %9777 = vmatprep.mubr.f32.mxu1 %v12831_v39 }
 0x22c   :  { %v3025_v17 = vpop.f32.mrf.mxu1 }
 0x22d   :  { %16821 = vst [vmem:[#allocation237_spill] sm:$0xff] %v13958_v33  ;;  %v13961_v36 = vadd.f32 %v3025_v17, %v2580_v61  ;;  %v9265_v28 = vpop.f32.mrf.mxu0  ;;  %9680 = vmatmul.mubr.f32.gmra.mxu0 %v16823_v21  ;;  %v16825_v33 = vld [vmem:[#allocation87_spill] sm:$0xff] }
 0x22e   :  { %v9363_v27 = vpop.f32.mrf.mxu1  ;;  %9778 = vmatmul.mubr.f32.gmra.mxu1 %v16815_v30  ;;  %9818 = vmatprep.mubr.f32.mxu0 %v16824_v11 }
 0x22f   :  { %16822 = vst [vmem:[#allocation240_spill] sm:$0xff] %v13961_v36  ;;  %v13966_v7 = vadd.f32 %v9363_v27, %v9259_v16  ;;  %v2640_v2 = vpop.f32.mrf.mxu0  ;;  %9780 = vmatprep.mubr.f32.mxu1 %v16816_v29  ;;  %v16826_v36 = vld [vmem:[#allocation94_spill] sm:$0xff] }
 0x230   :  { %v3037_v43 = vpop.f32.mrf.mxu1 }
 0x231   :  { %v13969_v48 = vadd.f32 %v3037_v43, %v2600_v42  ;;  %v9404_v39 = vpop.f32.mrf.mxu0  ;;  %9819 = vmatmul.mubr.f32.vlgmr.msra.gmra.mxu0 %v16825_v33 }
 0x232   :  { %v3163_v61 = vadd.f32 %v9404_v39, %v13554_v62  ;;  %v9366_v17 = vpop.f32.mrf.mxu1  ;;  %9781 = vmatmul.mubr.f32.gmra.mxu1 %v16819_v55  ;;  %9821 = vmatprep.mubr.f32.mxu0 %v16826_v36  ;;  %v16827_v62 = vld [vmem:[#allocation97_spill] sm:$0xff] }
 0x233   :  { %v13975_v30 = vadd.f32 %v9366_v17, %v9262_v22  ;;  %v3155_v16 = vpop.f32.mrf.mxu0  ;;  %9783 = vmatprep.mubr.f32.mxu1 %v16820_v46  ;;  %9995 = vmatpush3.msra.mxu0 %v13291_v15  ;;  %v16828_v22 = vld [vmem:[#allocation100_spill] sm:$0xff] }
 0x234   :  { %v3156_v42 = vadd.f32 %v3155_v16, %v13572_v24  ;;  %v3049_v27 = vpop.f32.mrf.mxu1  ;;  %9996 = vmatprep.subr.mxu0 %v13450_v35  ;;  %v16829_v16 = vld [vmem:[#allocation105_spill] sm:$0xff] }
 0x235   :  { %v13981_v33 = vadd.f32 %v3049_v27, %v2620_v5  ;;  %v9407_v39 = vpop.f32.mrf.mxu0  ;;  %9822 = vmatmul.mubr.f32.gmra.mxu0 %v16827_v62 }
 0x236   :  { %v3177_v11 = vadd.f32 %v9407_v39, %v13588_v4  ;;  %v9369_v36 = vpop.f32.mrf.mxu1  ;;  %9784 = vmatmul.mubr.f32.gmra.mxu1 %v16823_v21  ;;  %9824 = vmatprep.mubr.f32.mxu0 %v16828_v22 }
 0x237   :  { %v13987_v43 = vadd.f32 %v9369_v36, %v9265_v28  ;;  %v3169_v15 = vpop.f32.mrf.mxu0  ;;  %9922 = vmatprep.mubr.f32.mxu1 %v16685_v60  ;;  %9997 = vmatpush3.msra.mxu0 %v13450_v35  ;;  %v16830_v28 = vld [vmem:[#allocation107_spill] sm:$0xff]  ;;  %v16831_v36 = vld [vmem:[#allocation112_spill] sm:$0xff] }
 0x238   :  { %v3170_v5 = vadd.f32 %v3169_v15, %v13596_v6  ;;  %v3061_v24 = vpop.f32.mrf.mxu1  ;;  %9998 = vmatprep.subr.mxu0 %v13473_v20 }
 0x239   :  { %v13993_v17 = vadd.f32 %v3061_v24, %v2640_v2  ;;  %v9410_v4 = vpop.f32.mrf.mxu0  ;;  %9825 = vmatmul.mubr.f32.gmra.mxu0 %v16829_v16  ;;  %v16833_v16 = vld [vmem:[#allocation119_spill] sm:$0xff] }
 0x23a   :  { %v3191_v27 = vadd.f32 %v9410_v4, %v13615_v23  ;;  %v9508_v39 = vpop.f32.mrf.mxu1  ;;  %9923 = vmatmul.mubr.f32.vlgmr.msra.gmra.mxu1 %v16693_v52  ;;  %9827 = vmatprep.mubr.f32.mxu0 %v16830_v28  ;;  %v16858_v52 = vld [vmem:[#allocation102_spill] sm:$0xff] }
 0x23b   :  { %v13999_v62 = vadd.f32 %v9508_v39, %v3163_v61  ;;  %v3183_v35 = vpop.f32.mrf.mxu0  ;;  %10099 = vmatpush3.msk.msra.mxu1 %vm13255_vm0, %v16122_v12  ;;  %9925 = vmatprep.mubr.f32.mxu1 %v16694_v44 }
 0x23c   :  { %v3184_v2 = vadd.f32 %v3183_v35, %v13626_v41  ;;  %v3557_v6 = vpop.f32.mrf.mxu1  ;;  %10100 = vmatprep.subr.msk.mxu1 %vm13417_vm1, %v16122_v12  ;;  %9999 = vmatpush3.msra.mxu0 %v13473_v20  ;;  %v16832_v41 = vld [vmem:[#allocation113_spill] sm:$0xff] }
 0x23d   :  { %v14010_v23 = vadd.f32 %v3557_v6, %v3156_v42  ;;  %v9413_v61 = vpop.f32.mrf.mxu0  ;;  %9828 = vmatmul.mubr.f32.gmra.mxu0 %v16831_v36  ;;  %10101 = vmatpush3.msk.msra.mxu1 %vm13417_vm1, %v16122_v12 }
 0x23e   :  { %v3205_v22 = vadd.f32 %v9413_v61, %v13639_v37  ;;  %v9511_v15 = vpop.f32.mrf.mxu1  ;;  %9926 = vmatmul.mubr.f32.gmra.mxu1 %v16703_v50  ;;  %9830 = vmatprep.mubr.f32.mxu0 %v16832_v41 }
 0x23f   :  { %v14019_v24 = vadd.f32 %v9511_v15, %v3177_v11  ;;  %v3197_v4 = vpop.f32.mrf.mxu0  ;;  %9928 = vmatprep.mubr.f32.mxu1 %v16705_v57  ;;  %10102 = vmatprep.subr.msk.mxu1 %vm13433_vm2, %v16122_v12  ;;  %v16850_v57 = vld [vmem:[#allocation93_spill] sm:$0xff] }
 0x240   :  { %v3198_v20 = vadd.f32 %v3197_v4, %v13659_v54  ;;  %v3573_v42 = vpop.f32.mrf.mxu1  ;;  %10103 = vmatpush3.msk.msra.mxu1 %vm13433_vm2, %v16122_v12  ;;  %10000 = vmatprep.subr.mxu0 %v13482_v58  ;;  %v16834_v54 = vld [vmem:[#allocation124_spill] sm:$0xff]  ;;  %v16837_v4 = vld [vmem:[#allocation127_spill] sm:$0xff] }
 0x241   :  { %v14030_v37 = vadd.f32 %v3573_v42, %v3170_v5  ;;  %v9416_v11 = vpop.f32.mrf.mxu0  ;;  %9831 = vmatmul.mubr.f32.gmra.mxu0 %v16833_v16  ;;  %10104 = vmatprep.subr.msk.mxu1 %vm13445_vm3, %v16122_v12  ;;  %v16835_v5 = vld [vmem:[#allocation264_spill] sm:$0xff]  ;;  %v16839_v42 = vld [vmem:[#allocation266_spill] sm:$0xff] }
 0x242   :  { %v3219_v39 = vadd.f32 %v9416_v11, %v13669_v25  ;;  %v9514_v28 = vpop.f32.mrf.mxu1  ;;  %9929 = vmatmul.mubr.f32.gmra.mxu1 %v16714_v10  ;;  %9833 = vmatprep.mubr.f32.mxu0 %v16834_v54  ;;  %v16836_v25 = vld [vmem:[#allocation76_spill] sm:$0xff]  ;;  %v16840_v16 = vld [vmem:[#allocation82_spill] sm:$0xff] }
 0x243   :  { %v14039_v35 = vadd.f32 %v9514_v28, %v3191_v27  ;;  %v3211_v6 = vpop.f32.mrf.mxu0  ;;  %9931 = vmatprep.mubr.f32.mxu1 %v16715_v45  ;;  %10001 = vmatpush3.msra.mxu0 %v13482_v58  ;;  %v16841_v28 = vld [vmem:[#allocation132_spill] sm:$0xff]  ;;  %v17002_v27 = vld [vmem:[#allocation117_spill] sm:$0xff] }
 0x244   :  { %v3212_v61 = vadd.f32 %v3211_v6, %v16835_v5  ;;  %v3589_v36 = vpop.f32.mrf.mxu1  ;;  %10105 = vmatpush3.msk.msra.mxu1 %vm13445_vm3, %v16122_v12  ;;  %10002 = vmatprep.subr.mxu0 %v16836_v25  ;;  %v16842_v5 = vld [vmem:[#allocation83_spill] sm:$0xff] }
 0x245   :  { %v14048_v15 = vadd.f32 %v3589_v36, %v3184_v2  ;;  %v9419_v41 = vpop.f32.mrf.mxu0  ;;  %9834 = vmatmul.mubr.f32.gmra.mxu0 %v16837_v4  ;;  %10106 = vmatprep.subr.msk.mxu1 %vm13466_vm4, %v16122_v12  ;;  %v16843_v2 = vld [vmem:[#allocation267_spill] sm:$0xff] }
 0x246   :  { %v3233_v58 = vadd.f32 %v9419_v41, %v16839_v42  ;;  %v9517_v11 = vpop.f32.mrf.mxu1  ;;  %9932 = vmatmul.mubr.f32.gmra.mxu1 %v16840_v16  ;;  %9836 = vmatprep.mubr.f32.mxu0 %v16841_v28  ;;  %v16844_v41 = vld [vmem:[#allocation16_spill] sm:$0xff]  ;;  %v16845_v28 = vld [vmem:[#allocation138_spill] sm:$0xff] }
 0x247   :  { %v14057_v54 = vadd.f32 %v9517_v11, %v3205_v22  ;;  %v3225_v6 = vpop.f32.mrf.mxu0  ;;  %9934 = vmatprep.mubr.f32.mxu1 %v16842_v5  ;;  %10003 = vmatpush3.msra.mxu0 %v16836_v25  ;;  %v16847_v11 = vld [vmem:[#allocation270_spill] sm:$0xff] }
 0x248   :  { %v3226_v36 = vadd.f32 %v3225_v6, %v16843_v2  ;;  %v3605_v4 = vpop.f32.mrf.mxu1  ;;  %10107 = vmatpush3.msk.msra.mxu1 %vm13466_vm4, %v16122_v12  ;;  %10004 = vmatprep.subr.mxu0 %v16844_v41  ;;  %v16848_v6 = vld [vmem:[#allocation88_spill] sm:$0xff]  ;;  %v17012_v22 = vld [vmem:[#allocation126_spill] sm:$0xff] }
 0x249   :  { %v14066_v42 = vadd.f32 %v3605_v4, %v3198_v20  ;;  %v9422_v16 = vpop.f32.mrf.mxu0  ;;  %9837 = vmatmul.mubr.f32.gmra.mxu0 %v16845_v28  ;;  %10108 = vmatprep.subr.msk.mxu1 %vm13491_vm5, %v16122_v12  ;;  %v16849_v2 = vld [vmem:[#allocation140_spill] sm:$0xff] }
 0x24a   :  { %v3247_v25 = vadd.f32 %v9422_v16, %v16847_v11  ;;  %v9520_v5 = vpop.f32.mrf.mxu1  ;;  %9935 = vmatmul.mubr.f32.gmra.mxu1 %v16848_v6  ;;  %9839 = vmatprep.mubr.f32.mxu0 %v16849_v2  ;;  %v16851_v20 = vld [vmem:[#allocation272_spill] sm:$0xff]  ;;  %v16853_v2 = vld [vmem:[#allocation145_spill] sm:$0xff] }
 0x24b   :  { %v14075_v45 = vadd.f32 %v9520_v5, %v3219_v39  ;;  %v3239_v10 = vpop.f32.mrf.mxu0  ;;  %9937 = vmatprep.mubr.f32.mxu1 %v16850_v57  ;;  %10005 = vmatpush3.msra.mxu0 %v16844_v41  ;;  %v16852_v16 = vld [vmem:[#allocation20_spill] sm:$0xff]  ;;  %v16855_v5 = vld [vmem:[#allocation274_spill] sm:$0xff] }
 0x24c   :  { %v3240_v4 = vadd.f32 %v3239_v10, %v16851_v20  ;;  %v3621_v28 = vpop.f32.mrf.mxu1  ;;  %10109 = vmatpush3.msk.msra.mxu1 %vm13491_vm5, %v16122_v12  ;;  %10006 = vmatprep.subr.mxu0 %v16852_v16  ;;  %v16856_v10 = vld [vmem:[#allocation96_spill] sm:$0xff]  ;;  %v16857_v20 = vld [vmem:[#allocation147_spill] sm:$0xff]  ;;  %v16865_v39 = vld [vmem:[#allocation110_spill] sm:$0xff] }
 0x24d   :  { %v14084_v11 = vadd.f32 %v3621_v28, %v3212_v61  ;;  %v9425_v6 = vpop.f32.mrf.mxu0  ;;  %9840 = vmatmul.mubr.f32.gmra.mxu0 %v16853_v2  ;;  %10110 = vmatprep.subr.msk.mxu1 %vm13532_vm6, %v16122_v12  ;;  %v16859_v61 = vld [vmem:[#allocation276_spill] sm:$0xff] }
 0x24e   :  { %v3261_v41 = vadd.f32 %v9425_v6, %v16855_v5  ;;  %v9523_v57 = vpop.f32.mrf.mxu1  ;;  %9938 = vmatmul.mubr.f32.gmra.mxu1 %v16856_v10  ;;  %9842 = vmatprep.mubr.f32.mxu0 %v16857_v20  ;;  %v16860_v6 = vld [vmem:[#allocation258_spill] sm:$0xff]  ;;  %v16861_v20 = vld [vmem:[#allocation151_spill] sm:$0xff] }
 0x24f   :  { %v14093_v50 = vadd.f32 %v9523_v57, %v3233_v58  ;;  %v3253_v44 = vpop.f32.mrf.mxu0  ;;  %9940 = vmatprep.mubr.f32.mxu1 %v16858_v52  ;;  %10007 = vmatpush3.msra.mxu0 %v16852_v16  ;;  %v16871_v57 = vld [vmem:[#allocation118_spill] sm:$0xff] }
 0x250   :  { %v3254_v28 = vadd.f32 %v3253_v44, %v16859_v61  ;;  %v3637_v2 = vpop.f32.mrf.mxu1  ;;  %10111 = vmatpush3.msk.msra.mxu1 %vm13532_vm6, %v16122_v12  ;;  %10008 = vmatprep.subr.mxu0 %v16860_v6  ;;  %v16863_v44 = vld [vmem:[#allocation106_spill] sm:$0xff]  ;;  %v16864_v61 = vld [vmem:[#allocation153_spill] sm:$0xff] }
 0x251   :  { %v14102_v5 = vadd.f32 %v3637_v2, %v3226_v36  ;;  %v9428_v10 = vpop.f32.mrf.mxu0  ;;  %9843 = vmatmul.mubr.f32.gmra.mxu0 %v16861_v20  ;;  %10112 = vmatprep.subr.msk.mxu1 %vm13560_vm7, %v16122_v12 }
 0x252   :  { %v3275_v58 = vadd.f32 %v9428_v10, %v13789_v32  ;;  %v9526_v16 = vpop.f32.mrf.mxu1  ;;  %9941 = vmatmul.mubr.f32.gmra.mxu1 %v16863_v44  ;;  %9845 = vmatprep.mubr.f32.mxu0 %v16864_v61  ;;  %v16866_v32 = vld [vmem:[#allocation259_spill] sm:$0xff] }
 0x253   :  { %v14111_v52 = vadd.f32 %v9526_v16, %v3247_v25  ;;  %v3267_v60 = vpop.f32.mrf.mxu0  ;;  %9943 = vmatprep.mubr.f32.mxu1 %v16865_v39  ;;  %10009 = vmatpush3.msra.mxu0 %v16860_v6  ;;  %v16867_v61 = vld [vmem:[#allocation159_spill] sm:$0xff] }
 0x254   :  { %v3268_v36 = vadd.f32 %v3267_v60, %v13806_v19  ;;  %v3653_v2 = vpop.f32.mrf.mxu1  ;;  %10113 = vmatpush3.msk.msra.mxu1 %vm13560_vm7, %v16122_v12  ;;  %10010 = vmatprep.subr.mxu0 %v16866_v32  ;;  %v16869_v60 = vld [vmem:[#allocation115_spill] sm:$0xff]  ;;  %v16870_v19 = vld [vmem:[#allocation164_spill] sm:$0xff] }
 0x255   :  { %v14120_v10 = vadd.f32 %v3653_v2, %v3240_v4  ;;  %v9431_v20 = vpop.f32.mrf.mxu0  ;;  %9846 = vmatmul.mubr.f32.gmra.mxu0 %v16867_v61  ;;  %10114 = vmatprep.subr.msk.mxu1 %vm13584_vm8, %v16122_v12  ;;  %v16877_v25 = vld [vmem:[#allocation123_spill] sm:$0xff] }
 0x256   :  { %v3289_v6 = vadd.f32 %v9431_v20, %v13819_v56  ;;  %v9529_v16 = vpop.f32.mrf.mxu1  ;;  %9944 = vmatmul.mubr.f32.gmra.mxu1 %v16869_v60  ;;  %9848 = vmatprep.mubr.f32.mxu0 %v16870_v19  ;;  %v16872_v56 = vld [vmem:[#allocation262_spill] sm:$0xff]  ;;  %v16873_v19 = vld [vmem:[#allocation167_spill] sm:$0xff] }
 0x257   :  { %v14129_v39 = vadd.f32 %v9529_v16, %v3261_v41  ;;  %v3281_v44 = vpop.f32.mrf.mxu0  ;;  %9946 = vmatprep.mubr.f32.mxu1 %v16871_v57  ;;  %10011 = vmatpush3.msra.mxu0 %v16866_v32  ;;  %v16883_v41 = vld [vmem:[#allocation134_spill] sm:$0xff] }
 0x258   :  { %v3282_v4 = vadd.f32 %v3281_v44, %v13828_v3  ;;  %v3669_v2 = vpop.f32.mrf.mxu1  ;;  %10115 = vmatpush3.msk.msra.mxu1 %vm13584_vm8, %v16122_v12  ;;  %10012 = vmatprep.subr.mxu0 %v16872_v56  ;;  %v16875_v3 = vld [vmem:[#allocation120_spill] sm:$0xff] }
 0x259   :  { %v14138_v20 = vadd.f32 %v3669_v2, %v3254_v28  ;;  %v9434_v61 = vpop.f32.mrf.mxu0  ;;  %9849 = vmatmul.mubr.f32.gmra.mxu0 %v16873_v19  ;;  %10116 = vmatprep.subr.msk.mxu1 %vm13611_vm9, %v16122_v12  ;;  %v16876_v44 = vld [vmem:[#allocation172_spill] sm:$0xff] }
 0x25a   :  { %v3303_v32 = vadd.f32 %v9434_v61, %v13840_v40  ;;  %v9532_v16 = vpop.f32.mrf.mxu1  ;;  %9947 = vmatmul.mubr.f32.gmra.mxu1 %v16875_v3  ;;  %9851 = vmatprep.mubr.f32.mxu0 %v16876_v44  ;;  %v16878_v40 = vld [vmem:[#allocation265_spill] sm:$0xff]  ;;  %v16879_v44 = vld [vmem:[#allocation178_spill] sm:$0xff] }
 0x25b   :  { %v14147_v57 = vadd.f32 %v9532_v16, %v3275_v58  ;;  %v3295_v60 = vpop.f32.mrf.mxu0  ;;  %9949 = vmatprep.mubr.f32.mxu1 %v16877_v25  ;;  %10013 = vmatpush3.msra.mxu0 %v16872_v56  ;;  %v16889_v58 = vld [vmem:[#allocation142_spill] sm:$0xff] }
 0x25c   :  { %v3296_v28 = vadd.f32 %v3295_v60, %v13849_v34  ;;  %v3685_v2 = vpop.f32.mrf.mxu1  ;;  %10117 = vmatpush3.msk.msra.mxu1 %vm13611_vm9, %v16122_v12  ;;  %10014 = vmatprep.subr.mxu0 %v16878_v40  ;;  %v16881_v34 = vld [vmem:[#allocation129_spill] sm:$0xff]  ;;  %v16882_v60 = vld [vmem:[#allocation180_spill] sm:$0xff] }
 0x25d   :  { %v14156_v61 = vadd.f32 %v3685_v2, %v3268_v36  ;;  %v9437_v19 = vpop.f32.mrf.mxu0  ;;  %9852 = vmatmul.mubr.f32.gmra.mxu0 %v16879_v44  ;;  %10118 = vmatprep.subr.msk.mxu1 %vm13647_vm10, %v16122_v12 }
 0x25e   :  { %v3317_v56 = vadd.f32 %v9437_v19, %v13859_v9  ;;  %v9535_v16 = vpop.f32.mrf.mxu1  ;;  %9950 = vmatmul.mubr.f32.gmra.mxu1 %v16881_v34  ;;  %9854 = vmatprep.mubr.f32.mxu0 %v16882_v60  ;;  %v16884_v9 = vld [vmem:[#allocation269_spill] sm:$0xff] }
 0x25f   :  { %v14165_v25 = vadd.f32 %v9535_v16, %v3289_v6  ;;  %v3309_v3 = vpop.f32.mrf.mxu0  ;;  %9952 = vmatprep.mubr.f32.mxu1 %v16883_v41  ;;  %10015 = vmatpush3.msra.mxu0 %v16878_v40  ;;  %v16885_v60 = vld [vmem:[#allocation185_spill] sm:$0xff]  ;;  %v16895_v6 = vld [vmem:[#allocation150_spill] sm:$0xff] }
 0x260   :  { %v3310_v36 = vadd.f32 %v3309_v3, %v13868_v47  ;;  %v3701_v2 = vpop.f32.mrf.mxu1  ;;  %10119 = vmatpush3.msk.msra.mxu1 %vm13647_vm10, %v16122_v12  ;;  %10016 = vmatprep.subr.mxu0 %v16884_v9  ;;  %v16887_v47 = vld [vmem:[#allocation137_spill] sm:$0xff]  ;;  %v16888_v3 = vld [vmem:[#allocation187_spill] sm:$0xff] }
 0x261   :  { %v14174_v19 = vadd.f32 %v3701_v2, %v3282_v4  ;;  %v9440_v44 = vpop.f32.mrf.mxu0  ;;  %9855 = vmatmul.mubr.f32.gmra.mxu0 %v16885_v60  ;;  %10120 = vmatprep.subr.msk.mxu1 %vm13677_vm11, %v16122_v12 }
 0x262   :  { %v3331_v40 = vadd.f32 %v9440_v44, %v13875_v13  ;;  %v9538_v16 = vpop.f32.mrf.mxu1  ;;  %9953 = vmatmul.mubr.f32.gmra.mxu1 %v16887_v47  ;;  %9857 = vmatprep.mubr.f32.mxu0 %v16888_v3  ;;  %v16890_v13 = vld [vmem:[#allocation271_spill] sm:$0xff]  ;;  %v16891_v3 = vld [vmem:[#allocation192_spill] sm:$0xff] }
 0x263   :  { %v14183_v41 = vadd.f32 %v9538_v16, %v3303_v32  ;;  %v3323_v34 = vpop.f32.mrf.mxu0  ;;  %9955 = vmatprep.mubr.f32.mxu1 %v16889_v58  ;;  %10017 = vmatpush3.msra.mxu0 %v16884_v9  ;;  %v16909_v32 = vld [vmem:[#allocation163_spill] sm:$0xff] }
 0x264   :  { %v3324_v4 = vadd.f32 %v3323_v34, %v13884_v18  ;;  %v3717_v2 = vpop.f32.mrf.mxu1  ;;  %10121 = vmatpush3.msk.msra.mxu1 %vm13677_vm11, %v16122_v12  ;;  %10018 = vmatprep.subr.mxu0 %v16890_v13  ;;  %v16893_v18 = vld [vmem:[#allocation146_spill] sm:$0xff]  ;;  %v16894_v34 = vld [vmem:[#allocation195_spill] sm:$0xff] }
 0x265   :  { %v14192_v44 = vadd.f32 %v3717_v2, %v3296_v28  ;;  %v9443_v60 = vpop.f32.mrf.mxu0  ;;  %9858 = vmatmul.mubr.f32.gmra.mxu0 %v16891_v3  ;;  %10122 = vmatprep.subr.msk.mxu1 %vm13701_vm12, %v16122_v12 }
 0x266   :  { %v3345_v9 = vadd.f32 %v9443_v60, %v13889_v38  ;;  %v9541_v16 = vpop.f32.mrf.mxu1  ;;  %9956 = vmatmul.mubr.f32.gmra.mxu1 %v16893_v18  ;;  %9860 = vmatprep.mubr.f32.mxu0 %v16894_v34  ;;  %v16896_v38 = vld [vmem:[#allocation277_spill] sm:$0xff]  ;;  %v16897_v34 = vld [vmem:[#allocation35_spill] sm:$0xff]  ;;  %v16900_v18 = vld [vmem:[#allocation158_spill] sm:$0xff] }
 0x267   :  { %v14201_v58 = vadd.f32 %v9541_v16, %v3317_v56  ;;  %v3337_v47 = vpop.f32.mrf.mxu0  ;;  %9958 = vmatprep.mubr.f32.mxu1 %v16895_v6  ;;  %10019 = vmatpush3.msra.mxu0 %v16890_v13 }
 0x268   :  { %v3338_v28 = vadd.f32 %v3337_v47, %v13898_v53  ;;  %v3733_v2 = vpop.f32.mrf.mxu1  ;;  %10123 = vmatpush3.msk.msra.mxu1 %vm13701_vm12, %v16122_v12  ;;  %10020 = vmatprep.subr.mxu0 %v16896_v38  ;;  %v16898_v53 = vld [vmem:[#allocation155_spill] sm:$0xff] }
 0x269   :  { %v14210_v60 = vadd.f32 %v3733_v2, %v3310_v36  ;;  %v9446_v3 = vpop.f32.mrf.mxu0  ;;  %9861 = vmatmul.mubr.f32.gmra.mxu0 %v16897_v34  ;;  %10124 = vmatprep.subr.msk.mxu1 %vm13737_vm13, %v16122_v12  ;;  %v16899_v47 = vld [vmem:[#allocation207_spill] sm:$0xff] }
 0x26a   :  { %v3359_v56 = vadd.f32 %v9446_v3, %v13903_v59  ;;  %v9544_v13 = vpop.f32.mrf.mxu1  ;;  %9959 = vmatmul.mubr.f32.gmra.mxu1 %v16898_v53  ;;  %9863 = vmatprep.mubr.f32.mxu0 %v16899_v47  ;;  %v16901_v36 = vld [vmem:[#allocation283_spill] sm:$0xff] }
 0x26b   :  { %v14219_v16 = vadd.f32 %v9544_v13, %v3331_v40  ;;  %v3351_v6 = vpop.f32.mrf.mxu0  ;;  %9961 = vmatprep.mubr.f32.mxu1 %v16900_v18  ;;  %10021 = vmatpush3.msra.mxu0 %v16896_v38  ;;  %v16902_v59 = vld [vmem:[#allocation279_spill] sm:$0xff]  ;;  %v16917_v40 = vld [vmem:[#allocation174_spill] sm:$0xff] }
 0x26c   :  { %v3352_v2 = vadd.f32 %v3351_v6, %v16901_v36  ;;  %v3749_v34 = vpop.f32.mrf.mxu1  ;;  %10125 = vmatpush3.msk.msra.mxu1 %vm13737_vm13, %v16122_v12  ;;  %10022 = vmatprep.subr.mxu0 %v16902_v59  ;;  %v16904_v47 = vld [vmem:[#allocation39_spill] sm:$0xff]  ;;  %v16906_v6 = vld [vmem:[#allocation160_spill] sm:$0xff] }
 0x26d   :  { %v14228_v3 = vadd.f32 %v3749_v34, %v3324_v4  ;;  %v9449_v53 = vpop.f32.mrf.mxu0  ;;  %9864 = vmatmul.mubr.f32.gmra.mxu0 %v16904_v47  ;;  %10126 = vmatprep.subr.msk.mxu1 %vm13767_vm14, %v16122_v12  ;;  %v16907_v36 = vld [vmem:[#allocation216_spill] sm:$0xff]  ;;  %v16910_v47 = vld [vmem:[#allocation281_spill] sm:$0xff] }
 0x26e   :  { %v3373_v38 = vadd.f32 %v9449_v53, %v13918_v0  ;;  %v9547_v13 = vpop.f32.mrf.mxu1  ;;  %9962 = vmatmul.mubr.f32.gmra.mxu1 %v16906_v6  ;;  %9866 = vmatprep.mubr.f32.mxu0 %v16907_v36  ;;  %v16912_v36 = vld [vmem:[#allocation223_spill] sm:$0xff] }
 0x26f   :  { %16903 = vst [vmem:[#allocation86_spill] sm:$0xff] %v14228_v3  ;;  %v14237_v18 = vadd.f32 %v9547_v13, %v3345_v9  ;;  %v3365_v49 = vpop.f32.mrf.mxu0  ;;  %9964 = vmatprep.mubr.f32.mxu1 %v16909_v32  ;;  %10023 = vmatpush3.msra.mxu0 %v16902_v59  ;;  %v16925_v9 = vld [vmem:[#allocation182_spill] sm:$0xff] }
 0x270   :  { %v3366_v4 = vadd.f32 %v3365_v49, %v13921_v26  ;;  %v3765_v34 = vpop.f32.mrf.mxu1  ;;  %10024 = vmatprep.subr.mxu0 %v16910_v47  ;;  %10127 = vmatpush3.msk.msra.mxu1 %vm13767_vm14, %v16122_v12  ;;  %v16914_v49 = vld [vmem:[#allocation169_spill] sm:$0xff]  ;;  %v16930_v3 = vld [vmem:[#allocation186_spill] sm:$0xff] }
 0x271   :  { %16908 = vst [vmem:[#allocation87_spill] sm:$0xff] %v14237_v18  ;;  %v14246_v0 = vadd.f32 %v3765_v34, %v3338_v28  ;;  %v9452_v53 = vpop.f32.mrf.mxu0  ;;  %9867 = vmatmul.mubr.f32.gmra.mxu0 %v16912_v36  ;;  %10128 = vmatprep.subr.msk.mxu1 %vm13797_vm15, %v16122_v12  ;;  %v16915_v26 = vld [vmem:[#allocation225_spill] sm:$0xff]  ;;  %v16929_v18 = vld [vmem:[#allocation286_spill] sm:$0xff] }
 0x272   :  { %v3387_v59 = vadd.f32 %v9452_v53, %v13926_v51  ;;  %v9550_v13 = vpop.f32.mrf.mxu1  ;;  %9965 = vmatmul.mubr.f32.gmra.mxu1 %v16914_v49  ;;  %9869 = vmatprep.mubr.f32.mxu0 %v16915_v26  ;;  %v16918_v51 = vld [vmem:[#allocation213_spill] sm:$0xff]  ;;  %v16920_v26 = vld [vmem:[#allocation48_spill] sm:$0xff] }
 0x273   :  { %16911 = vst [vmem:[#allocation94_spill] sm:$0xff] %v14246_v0  ;;  %v14255_v32 = vadd.f32 %v9550_v13, %v3359_v56  ;;  %v3379_v6 = vpop.f32.mrf.mxu0  ;;  %9967 = vmatprep.mubr.f32.mxu1 %v16917_v40  ;;  %10025 = vmatpush3.msra.mxu0 %v16910_v47  ;;  %v16921_v56 = vld [vmem:[#allocation284_spill] sm:$0xff]  ;;  %v16928_v0 = vld [vmem:[#allocation233_spill] sm:$0xff] }
 0x274   :  { %v3380_v28 = vadd.f32 %v3379_v6, %v13929_v63  ;;  %v3781_v34 = vpop.f32.mrf.mxu1  ;;  %10129 = vmatpush3.msk.msra.mxu1 %vm13797_vm15, %v16122_v12  ;;  %10202 = vmatprep.subr.mxu0 %v16918_v51  ;;  %v16922_v63 = vld [vmem:[#allocation177_spill] sm:$0xff]  ;;  %v16923_v6 = vld [vmem:[#allocation66_spill] sm:$0xff] }
 0x275   :  { %16916 = vst [vmem:[#allocation97_spill] sm:$0xff] %v14255_v32  ;;  %v14264_v53 = vadd.f32 %v3781_v34, %v3352_v2  ;;  %v9455_v36 = vpop.f32.mrf.mxu0  ;;  %9870 = vmatmul.mubr.f32.gmra.mxu0 %v16920_v26  ;;  %10306 = vmatprep.subr.msk.mxu1 %vm13255_vm0, %v16122_v12  ;;  %v16926_v2 = vld [vmem:[#allocation285_spill] sm:$0xff] }
 0x276   :  { %v3401_v47 = vadd.f32 %v9455_v36, %v16921_v56  ;;  %v9553_v13 = vpop.f32.mrf.mxu1  ;;  %9968 = vmatmul.mubr.f32.gmra.mxu1 %v16922_v63  ;;  %9872 = vmatprep.mubr.f32.mxu0 %v16923_v6  ;;  %v16931_v63 = vld [vmem:[#allocation235_spill] sm:$0xff]  ;;  %v16933_v6 = vld [vmem:[#allocation190_spill] sm:$0xff] }
 0x277   :  { %16919 = vst [vmem:[#allocation100_spill] sm:$0xff] %v14264_v53  ;;  %v14273_v40 = vadd.f32 %v9553_v13, %v3373_v38  ;;  %v3393_v49 = vpop.f32.mrf.mxu0  ;;  %9970 = vmatprep.mubr.f32.mxu1 %v16925_v9  ;;  %v16934_v9 = vld [vmem:[#allocation287_spill] sm:$0xff] }
 0x278   :  { %v3394_v34 = vadd.f32 %v3393_v49, %v16926_v2  ;;  %v3797_v53 = vpop.f32.mrf.mxu1 }
 0x279   :  { %16924 = vst [vmem:[#allocation105_spill] sm:$0xff] %v14273_v40  ;;  %v14277_v26 = vadd.f32 %v3797_v53, %v3366_v4  ;;  %v9458_v32 = vpop.f32.mrf.mxu0  ;;  %9873 = vmatmul.mubr.f32.gmra.mxu0 %v16928_v0  ;;  %v16937_v0 = vld [vmem:[#allocation232_spill] sm:$0xff]  ;;  %v16938_v40 = vld [vmem:[#allocation197_spill] sm:$0xff] }
 0x27a   :  { %v3415_v36 = vadd.f32 %v9458_v32, %v16929_v18  ;;  %v9556_v56 = vpop.f32.mrf.mxu1  ;;  %9971 = vmatmul.mubr.f32.gmra.mxu1 %v16930_v3  ;;  %9875 = vmatprep.mubr.f32.mxu0 %v16931_v63  ;;  %v16939_v3 = vld [vmem:[#allocation241_spill] sm:$0xff] }
 0x27b   :  { %16927 = vst [vmem:[#allocation107_spill] sm:$0xff] %v14277_v26  ;;  %v14283_v38 = vadd.f32 %v9556_v56, %v3387_v59  ;;  %v3407_v13 = vpop.f32.mrf.mxu0  ;;  %9973 = vmatprep.mubr.f32.mxu1 %v16933_v6  ;;  %v16936_v26 = vld [vmem:[#allocation41_spill] sm:$0xff]  ;;  %v16940_v56 = vld [vmem:[#allocation200_spill] sm:$0xff] }
 0x27c   :  { %v3408_v49 = vadd.f32 %v3407_v13, %v16934_v9  ;;  %v3813_v2 = vpop.f32.mrf.mxu1  ;;  %v16941_v6 = vld [vmem:[#allocation288_spill] sm:$0xff] }
 0x27d   :  { %16932 = vst [vmem:[#allocation112_spill] sm:$0xff] %v14283_v38  ;;  %v14287_v4 = vadd.f32 %v3813_v2, %v3380_v28  ;;  %v9461_v53 = vpop.f32.mrf.mxu0  ;;  %9876 = vmatmul.mubr.f32.gmra.mxu0 %v16936_v26  ;;  %v16944_v26 = vld [vmem:[#allocation237_spill] sm:$0xff]  ;;  %v16945_v38 = vld [vmem:[#allocation202_spill] sm:$0xff] }
 0x27e   :  { %v3429_v32 = vadd.f32 %v9461_v53, %v16937_v0  ;;  %v9559_v18 = vpop.f32.mrf.mxu1  ;;  %9974 = vmatmul.mubr.f32.gmra.mxu1 %v16938_v40  ;;  %9878 = vmatprep.mubr.f32.mxu0 %v16939_v3  ;;  %v16946_v40 = vld [vmem:[#allocation249_spill] sm:$0xff] }
 0x27f   :  { %16935 = vst [vmem:[#allocation113_spill] sm:$0xff] %v14287_v4  ;;  %v14293_v59 = vadd.f32 %v9559_v18, %v3401_v47  ;;  %v3421_v63 = vpop.f32.mrf.mxu0  ;;  %9976 = vmatprep.mubr.f32.mxu1 %v16940_v56  ;;  %v16943_v4 = vld [vmem:[#allocation246_spill] sm:$0xff]  ;;  %v16948_v56 = vld [vmem:[#allocation240_spill] sm:$0xff] }
 0x280   :  { %v3422_v9 = vadd.f32 %v3421_v63, %v16941_v6  ;;  %v3829_v13 = vpop.f32.mrf.mxu1  ;;  %v16947_v18 = vld [vmem:[#allocation206_spill] sm:$0xff] }
 0x281   :  { %v14297_v28 = vadd.f32 %v3829_v13, %v3394_v34  ;;  %v9464_v2 = vpop.f32.mrf.mxu0  ;;  %9879 = vmatmul.mubr.f32.gmra.mxu0 %v16943_v4 }
 0x282   :  { %v3443_v53 = vadd.f32 %v9464_v2, %v16944_v26  ;;  %v9562_v0 = vpop.f32.mrf.mxu1  ;;  %9977 = vmatmul.mubr.f32.gmra.mxu1 %v16945_v38  ;;  %9881 = vmatprep.mubr.f32.mxu0 %v16946_v40  ;;  %v16950_v26 = vld [vmem:[#allocation211_spill] sm:$0xff]  ;;  %v16951_v38 = vld [vmem:[#allocation253_spill] sm:$0xff] }
 0x283   :  { %16942 = vst [vmem:[#allocation119_spill] sm:$0xff] %v14297_v28  ;;  %v14303_v3 = vadd.f32 %v9562_v0, %v3415_v36  ;;  %v3435_v47 = vpop.f32.mrf.mxu0  ;;  %9979 = vmatprep.mubr.f32.mxu1 %v16947_v18  ;;  %v16949_v28 = vld [vmem:[#allocation251_spill] sm:$0xff]  ;;  %v16952_v0 = vld [vmem:[#allocation212_spill] sm:$0xff]  ;;  %v16953_v18 = vld [vmem:[#allocation254_spill] sm:$0xff] }
 0x284   :  { %v3436_v6 = vadd.f32 %v3435_v47, %v16948_v56  ;;  %v3845_v63 = vpop.f32.mrf.mxu1 }
 0x285   :  { %v14307_v34 = vadd.f32 %v3845_v63, %v3408_v49  ;;  %v9467_v13 = vpop.f32.mrf.mxu0  ;;  %9882 = vmatmul.mubr.f32.gmra.mxu0 %v16949_v28 }
 0x286   :  { %v3457_v4 = vadd.f32 %v9467_v13, %v13966_v7  ;;  %v9565_v2 = vpop.f32.mrf.mxu1  ;;  %9980 = vmatmul.mubr.f32.gmra.mxu1 %v16950_v26  ;;  %9884 = vmatprep.mubr.f32.mxu0 %v16951_v38  ;;  %v16954_v13 = vld [vmem:[#allocation221_spill] sm:$0xff]  ;;  %v16955_v26 = vld [vmem:[#allocation255_spill] sm:$0xff] }
 0x287   :  { %v14313_v40 = vadd.f32 %v9565_v2, %v3429_v32  ;;  %v3449_v36 = vpop.f32.mrf.mxu0  ;;  %9982 = vmatprep.mubr.f32.mxu1 %v16952_v0  ;;  %v16956_v2 = vld [vmem:[#allocation226_spill] sm:$0xff]  ;;  %v16957_v0 = vld [vmem:[#allocation256_spill] sm:$0xff] }
 0x288   :  { %v3450_v56 = vadd.f32 %v3449_v36, %v13969_v48  ;;  %v3861_v47 = vpop.f32.mrf.mxu1 }
 0x289   :  { %v14317_v49 = vadd.f32 %v3861_v47, %v3422_v9  ;;  %v9470_v63 = vpop.f32.mrf.mxu0  ;;  %9885 = vmatmul.mubr.f32.gmra.mxu0 %v16953_v18 }
 0x28a   :  { %v3471_v7 = vadd.f32 %v9470_v63, %v13975_v30  ;;  %v9568_v28 = vpop.f32.mrf.mxu1  ;;  %9983 = vmatmul.mubr.f32.gmra.mxu1 %v16954_v13  ;;  %9887 = vmatprep.mubr.f32.mxu0 %v16955_v26  ;;  %v16958_v63 = vld [vmem:[#allocation230_spill] sm:$0xff]  ;;  %v16959_v13 = vld [vmem:[#allocation60_spill] sm:$0xff] }
 0x28b   :  { %v14323_v38 = vadd.f32 %v9568_v28, %v3443_v53  ;;  %v3463_v32 = vpop.f32.mrf.mxu0  ;;  %9985 = vmatprep.mubr.f32.mxu1 %v16956_v2 }
 0x28c   :  { %v3464_v48 = vadd.f32 %v3463_v32, %v13981_v33  ;;  %v3877_v36 = vpop.f32.mrf.mxu1 }
 0x28d   :  { %v14327_v9 = vadd.f32 %v3877_v36, %v3436_v6  ;;  %v9473_v47 = vpop.f32.mrf.mxu0  ;;  %9888 = vmatmul.mubr.f32.gmra.mxu0 %v16957_v0  ;;  %v16960_v36 = vld [vmem:[#allocation42_spill] sm:$0xff] }
 0x28e   :  { %v3485_v30 = vadd.f32 %v9473_v47, %v13987_v43  ;;  %v9571_v18 = vpop.f32.mrf.mxu1  ;;  %9986 = vmatmul.mubr.f32.gmra.mxu1 %v16958_v63  ;;  %10026 = vmatprep.mubr.f32.mxu0 %v16959_v13  ;;  %v16961_v47 = vld [vmem:[#allocation62_spill] sm:$0xff] }
 0x28f   :  { %v14333_v53 = vadd.f32 %v9571_v18, %v3457_v4  ;;  %v3477_v26 = vpop.f32.mrf.mxu0  ;;  %9988 = vmatprep.mubr.f32.mxu1 %v16816_v29  ;;  %v16962_v18 = vld [vmem:[#allocation36_spill] sm:$0xff] }
 0x290   :  { %v3478_v33 = vadd.f32 %v3477_v26, %v13993_v17  ;;  %v3893_v28 = vpop.f32.mrf.mxu1 }
 0x291   :  { %v14337_v6 = vadd.f32 %v3893_v28, %v3450_v56  ;;  %v9612_v32 = vpop.f32.mrf.mxu0  ;;  %10027 = vmatmul.mubr.f32.vlgmr.msra.gmra.mxu0 %v16960_v36  ;;  %v16963_v28 = vld [vmem:[#allocation65_spill] sm:$0xff] }
 0x292   :  { %v4043_v43 = vadd.f32 %v9612_v32, %v13999_v62  ;;  %v9574_v0 = vpop.f32.mrf.mxu1  ;;  %9989 = vmatmul.mubr.f32.gmra.mxu1 %v16819_v55  ;;  %10029 = vmatprep.mubr.f32.mxu0 %v16961_v47  ;;  %v16965_v47 = vld [vmem:[#allocation59_spill] sm:$0xff] }
 0x293   :  { %v14343_v4 = vadd.f32 %v9574_v0, %v3471_v7  ;;  %v4036_v13 = vpop.f32.mrf.mxu0  ;;  %9991 = vmatprep.mubr.f32.mxu1 %v16820_v46  ;;  %10203 = vmatpush3.msra.mxu0 %v16918_v51  ;;  %v16964_v7 = vld [vmem:[#allocation70_spill] sm:$0xff] }
 0x294   :  { %v4037_v17 = vadd.f32 %v4036_v13, %v14010_v23  ;;  %v3909_v56 = vpop.f32.mrf.mxu1  ;;  %10204 = vmatprep.subr.mxu0 %v16962_v18  ;;  %v16966_v13 = vld [vmem:[#allocation50_spill] sm:$0xff] }
 0x295   :  { %v14349_v26 = vadd.f32 %v3909_v56, %v3464_v48  ;;  %v9615_v62 = vpop.f32.mrf.mxu0  ;;  %10030 = vmatmul.mubr.f32.gmra.mxu0 %v16963_v28 }
 0x296   :  { %v4055_v32 = vadd.f32 %v9615_v62, %v14019_v24  ;;  %v9577_v36 = vpop.f32.mrf.mxu1  ;;  %9992 = vmatmul.mubr.f32.gmra.mxu1 %v16823_v21  ;;  %10032 = vmatprep.mubr.f32.mxu0 %v16964_v7  ;;  %v16967_v62 = vld [vmem:[#allocation81_spill] sm:$0xff] }
 0x297   :  { %v14355_v0 = vadd.f32 %v9577_v36, %v3485_v30  ;;  %v4048_v51 = vpop.f32.mrf.mxu0  ;;  %10130 = vmatprep.mubr.f32.mxu1 %v16965_v47  ;;  %10205 = vmatpush3.msra.mxu0 %v16962_v18  ;;  %v16968_v30 = vld [vmem:[#allocation63_spill] sm:$0xff]  ;;  %v16969_v36 = vld [vmem:[#allocation85_spill] sm:$0xff] }
 0x298   :  { %v4049_v23 = vadd.f32 %v4048_v51, %v14030_v37  ;;  %v3925_v48 = vpop.f32.mrf.mxu1  ;;  %10206 = vmatprep.subr.mxu0 %v16966_v13  ;;  %v16970_v37 = vld [vmem:[#allocation78_spill] sm:$0xff] }
 0x299   :  { %v14361_v56 = vadd.f32 %v3925_v48, %v3478_v33  ;;  %v9618_v24 = vpop.f32.mrf.mxu0  ;;  %10033 = vmatmul.mubr.f32.gmra.mxu0 %v16967_v62  ;;  %v16975_v62 = vld [vmem:[#allocation91_spill] sm:$0xff] }
 0x29a   :  { %v4067_v28 = vadd.f32 %v9618_v24, %v14039_v35  ;;  %v9716_v7 = vpop.f32.mrf.mxu1  ;;  %10131 = vmatmul.mubr.f32.vlgmr.msra.gmra.mxu1 %v16968_v30  ;;  %10035 = vmatprep.mubr.f32.mxu0 %v16969_v36  ;;  %v16971_v35 = vld [vmem:[#allocation40_spill] sm:$0xff]  ;;  %v16973_v24 = vld [vmem:[#allocation90_spill] sm:$0xff] }
 0x29b   :  { %v4396_v47 = vadd.f32 %v9716_v7, %v4043_v43  ;;  %v4060_v21 = vpop.f32.mrf.mxu0  ;;  %10307 = vmatpush3.msk.msra.mxu1 %vm13255_vm0, %v16122_v12  ;;  %10133 = vmatprep.mubr.f32.mxu1 %v16970_v37  ;;  %v16976_v7 = vld [vmem:[#allocation191_spill] sm:$0xff]  ;;  %v16980_v37 = vld [vmem:[#allocation194_spill] sm:$0xff] }
 0x29c   :  { %v4061_v33 = vadd.f32 %v4060_v21, %v14048_v15  ;;  %v4389_v18 = vpop.f32.mrf.mxu1  ;;  %10308 = vmatprep.subr.msk.mxu1 %vm13417_vm1, %v16122_v12  ;;  %10207 = vmatpush3.msra.mxu0 %v16966_v13  ;;  %v16974_v15 = vld [vmem:[#allocation79_spill] sm:$0xff] }
 0x29d   :  { %v14377_v51 = vsub.f32 %v16971_v35, %v4396_v47  ;;  %v4390_v43 = vadd.f32 %v4389_v18, %v4037_v17  ;;  %v9621_v48 = vpop.f32.mrf.mxu0  ;;  %10036 = vmatmul.mubr.f32.gmra.mxu0 %v16973_v24  ;;  %10309 = vmatpush3.msk.msra.mxu1 %vm13417_vm1, %v16122_v12  ;;  %v16978_v17 = vld [vmem:[#allocation84_spill] sm:$0xff] }
 0x29e   :  { %v4079_v31 = vadd.f32 %v9621_v48, %v14057_v54  ;;  %v9719_v21 = vpop.f32.mrf.mxu1  ;;  %10134 = vmatmul.mubr.f32.gmra.mxu1 %v16974_v15  ;;  %10038 = vmatprep.mubr.f32.mxu0 %v16975_v62  ;;  %v16979_v54 = vld [vmem:[#allocation80_spill] sm:$0xff]  ;;  %v16982_v48 = vld [vmem:[#allocation95_spill] sm:$0xff]  ;;  %v16985_v15 = vld [vmem:[#allocation45_spill] sm:$0xff] }
 0x29f   :  { %16972 = vst [vmem:[#allocation124_spill] sm:$0xff] %v14377_v51  ;;  %v14387_v13 = vsub.f32 %v16976_v7, %v4390_v43  ;;  %v4408_v30 = vadd.f32 %v9719_v21, %v4055_v32  ;;  %v4072_v36 = vpop.f32.mrf.mxu0  ;;  %10136 = vmatprep.mubr.f32.mxu1 %v16978_v17  ;;  %10310 = vmatprep.subr.msk.mxu1 %vm13433_vm2, %v16122_v12  ;;  %v16983_v21 = vld [vmem:[#allocation89_spill] sm:$0xff] }
 0x2a0   :  { %v4073_v8 = vadd.f32 %v4072_v36, %v14066_v42  ;;  %v4401_v47 = vpop.f32.mrf.mxu1  ;;  %10311 = vmatpush3.msk.msra.mxu1 %vm13433_vm2, %v16122_v12  ;;  %10208 = vmatprep.subr.mxu0 %v16979_v54 }
 0x2a1   :  { %16977 = vst [vmem:[#allocation264_spill] sm:$0xff] %v14387_v13  ;;  %v14399_v18 = vsub.f32 %v16980_v37, %v4408_v30  ;;  %v4402_v32 = vadd.f32 %v4401_v47, %v4049_v23  ;;  %v9624_v43 = vpop.f32.mrf.mxu0  ;;  %10039 = vmatmul.mubr.f32.gmra.mxu0 %v16982_v48  ;;  %10312 = vmatprep.subr.msk.mxu1 %vm13445_vm3, %v16122_v12  ;;  %v16987_v23 = vld [vmem:[#allocation92_spill] sm:$0xff] }
 0x2a2   :  { %v4091_v42 = vadd.f32 %v9624_v43, %v14075_v45  ;;  %v9722_v24 = vpop.f32.mrf.mxu1  ;;  %10137 = vmatmul.mubr.f32.gmra.mxu1 %v16983_v21  ;;  %10041 = vmatprep.mubr.f32.mxu0 %v16984_v1  ;;  %v16988_v45 = vld [vmem:[#allocation15_spill] sm:$0xff]  ;;  %v16989_v43 = vld [vmem:[#allocation201_spill] sm:$0xff] }
 0x2a3   :  { %16981 = vst [vmem:[#allocation76_spill] sm:$0xff] %v14399_v18  ;;  %v14409_v62 = vsub.f32 %v16985_v15, %v4402_v32  ;;  %v4420_v30 = vadd.f32 %v9722_v24, %v4067_v28  ;;  %v4084_v36 = vpop.f32.mrf.mxu0  ;;  %10139 = vmatprep.mubr.f32.mxu1 %v16987_v23  ;;  %10209 = vmatpush3.msra.mxu0 %v16979_v54  ;;  %v16991_v28 = vld [vmem:[#allocation104_spill] sm:$0xff]  ;;  %v16992_v24 = vld [vmem:[#allocation98_spill] sm:$0xff]  ;;  %v16994_v1 = vld [vmem:[#allocation203_spill] sm:$0xff] }
 0x2a4   :  { %v4085_v17 = vadd.f32 %v4084_v36, %v14084_v11  ;;  %v4413_v47 = vpop.f32.mrf.mxu1  ;;  %10313 = vmatpush3.msk.msra.mxu1 %vm13445_vm3, %v16122_v12  ;;  %10210 = vmatprep.subr.mxu0 %v16988_v45 }
 0x2a5   :  { %16986 = vst [vmem:[#allocation127_spill] sm:$0xff] %v14409_v62  ;;  %v14419_v48 = vsub.f32 %v16989_v43, %v4420_v30  ;;  %v4414_v32 = vadd.f32 %v4413_v47, %v4061_v33  ;;  %v9627_v21 = vpop.f32.mrf.mxu0  ;;  %10042 = vmatmul.mubr.f32.gmra.mxu0 %v16991_v28  ;;  %10314 = vmatprep.subr.msk.mxu1 %vm13466_vm4, %v16122_v12  ;;  %v16996_v33 = vld [vmem:[#allocation99_spill] sm:$0xff] }
 0x2a6   :  { %v4103_v11 = vadd.f32 %v9627_v21, %v14093_v50  ;;  %v9725_v54 = vpop.f32.mrf.mxu1  ;;  %10140 = vmatmul.mubr.f32.gmra.mxu1 %v16992_v24  ;;  %10044 = vmatprep.mubr.f32.mxu0 %v16993_v14  ;;  %v16997_v50 = vld [vmem:[#allocation19_spill] sm:$0xff]  ;;  %v16998_v21 = vld [vmem:[#allocation38_spill] sm:$0xff] }
 0x2a7   :  { %16990 = vst [vmem:[#allocation31_spill] sm:$0xff] %v14419_v48  ;;  %v14429_v36 = vsub.f32 %v16994_v1, %v4414_v32  ;;  %v4432_v30 = vadd.f32 %v9725_v54, %v4079_v31  ;;  %v4096_v23 = vpop.f32.mrf.mxu0  ;;  %10142 = vmatprep.mubr.f32.mxu1 %v16996_v33  ;;  %10211 = vmatpush3.msra.mxu0 %v16988_v45  ;;  %v17000_v31 = vld [vmem:[#allocation114_spill] sm:$0xff]  ;;  %v17001_v54 = vld [vmem:[#allocation103_spill] sm:$0xff]  ;;  %v17195_v1 = vld [vmem:[#allocation221_spill] sm:$0xff] }
 0x2a8   :  { %v4097_v47 = vadd.f32 %v4096_v23, %v14102_v5  ;;  %v4425_v28 = vpop.f32.mrf.mxu1  ;;  %10315 = vmatpush3.msk.msra.mxu1 %vm13466_vm4, %v16122_v12  ;;  %10212 = vmatprep.subr.mxu0 %v16997_v50  ;;  %v17003_v23 = vld [vmem:[#allocation56_spill] sm:$0xff]  ;;  %v17196_v43 = vld [vmem:[#allocation243_spill] sm:$0xff] }
 0x2a9   :  { %16995 = vst [vmem:[#allocation266_spill] sm:$0xff] %v14429_v36  ;;  %v14439_v24 = vsub.f32 %v16998_v21, %v4432_v30  ;;  %v4426_v32 = vadd.f32 %v4425_v28, %v4073_v8  ;;  %v9630_v14 = vpop.f32.mrf.mxu0  ;;  %10045 = vmatmul.mubr.f32.gmra.mxu0 %v17000_v31  ;;  %10316 = vmatprep.subr.msk.mxu1 %vm13491_vm5, %v16122_v12  ;;  %v17005_v8 = vld [vmem:[#allocation108_spill] sm:$0xff]  ;;  %v17072_v36 = vld [vmem:[#allocation165_spill] sm:$0xff] }
 0x2aa   :  { %v4115_v5 = vadd.f32 %v9630_v14, %v14111_v52  ;;  %v9728_v45 = vpop.f32.mrf.mxu1  ;;  %10143 = vmatmul.mubr.f32.gmra.mxu1 %v17001_v54  ;;  %10047 = vmatprep.mubr.f32.mxu0 %v17002_v27  ;;  %v17006_v52 = vld [vmem:[#allocation257_spill] sm:$0xff] }
 0x2ab   :  { %16999 = vst [vmem:[#allocation132_spill] sm:$0xff] %v14439_v24  ;;  %v14449_v33 = vsub.f32 %v17003_v23, %v4426_v32  ;;  %v4444_v30 = vadd.f32 %v9728_v45, %v4091_v42  ;;  %v4108_v24 = vpop.f32.mrf.mxu0  ;;  %10145 = vmatprep.mubr.f32.mxu1 %v17005_v8  ;;  %10213 = vmatpush3.msra.mxu0 %v16997_v50  ;;  %v17007_v14 = vld [vmem:[#allocation57_spill] sm:$0xff]  ;;  %v17009_v42 = vld [vmem:[#allocation122_spill] sm:$0xff]  ;;  %v17013_v8 = vld [vmem:[#allocation44_spill] sm:$0xff] }
 0x2ac   :  { %v4109_v28 = vadd.f32 %v4108_v24, %v14120_v10  ;;  %v4437_v31 = vpop.f32.mrf.mxu1  ;;  %10317 = vmatpush3.msk.msra.mxu1 %vm13491_vm5, %v16122_v12  ;;  %10214 = vmatprep.subr.mxu0 %v17006_v52  ;;  %v17011_v24 = vld [vmem:[#allocation111_spill] sm:$0xff] }
 0x2ad   :  { %17004 = vst [vmem:[#allocation267_spill] sm:$0xff] %v14449_v33  ;;  %v14459_v54 = vsub.f32 %v17007_v14, %v4444_v30  ;;  %v4438_v32 = vadd.f32 %v4437_v31, %v4085_v17  ;;  %v9633_v27 = vpop.f32.mrf.mxu0  ;;  %10048 = vmatmul.mubr.f32.gmra.mxu0 %v17009_v42  ;;  %10318 = vmatprep.subr.msk.mxu1 %vm13532_vm6, %v16122_v12  ;;  %v17015_v17 = vld [vmem:[#allocation116_spill] sm:$0xff]  ;;  %v17022_v45 = vld [vmem:[#allocation131_spill] sm:$0xff] }
 0x2ae   :  { %v4127_v10 = vadd.f32 %v9633_v27, %v14129_v39  ;;  %v9731_v50 = vpop.f32.mrf.mxu1  ;;  %10146 = vmatmul.mubr.f32.gmra.mxu1 %v17011_v24  ;;  %10050 = vmatprep.mubr.f32.mxu0 %v17012_v22  ;;  %v17016_v39 = vld [vmem:[#allocation260_spill] sm:$0xff]  ;;  %v17017_v27 = vld [vmem:[#allocation218_spill] sm:$0xff]  ;;  %v17193_v23 = vld [vmem:[#allocation211_spill] sm:$0xff] }
 0x2af   :  { %17008 = vst [vmem:[#allocation16_spill] sm:$0xff] %v14459_v54  ;;  %v14469_v33 = vsub.f32 %v17013_v8, %v4438_v32  ;;  %v4456_v30 = vadd.f32 %v9731_v50, %v4103_v11  ;;  %v4120_v54 = vpop.f32.mrf.mxu0  ;;  %10148 = vmatprep.mubr.f32.mxu1 %v17015_v17  ;;  %10215 = vmatpush3.msra.mxu0 %v17006_v52  ;;  %v17019_v11 = vld [vmem:[#allocation128_spill] sm:$0xff]  ;;  %v17023_v17 = vld [vmem:[#allocation222_spill] sm:$0xff]  ;;  %v17032_v50 = vld [vmem:[#allocation141_spill] sm:$0xff] }
 0x2b0   :  { %v4121_v31 = vadd.f32 %v4120_v54, %v14138_v20  ;;  %v4449_v42 = vpop.f32.mrf.mxu1  ;;  %10319 = vmatpush3.msk.msra.mxu1 %vm13532_vm6, %v16122_v12  ;;  %10216 = vmatprep.subr.mxu0 %v17016_v39  ;;  %v17021_v54 = vld [vmem:[#allocation121_spill] sm:$0xff]  ;;  %v17191_v8 = vld [vmem:[#allocation202_spill] sm:$0xff] }
 0x2b1   :  { %17014 = vst [vmem:[#allocation138_spill] sm:$0xff] %v14469_v33  ;;  %v14479_v24 = vsub.f32 %v17017_v27, %v4456_v30  ;;  %v4450_v32 = vadd.f32 %v4449_v42, %v4097_v47  ;;  %v9636_v22 = vpop.f32.mrf.mxu0  ;;  %10051 = vmatmul.mubr.f32.gmra.mxu0 %v17019_v11  ;;  %10320 = vmatprep.subr.msk.mxu1 %vm13560_vm7, %v16122_v12  ;;  %v17025_v47 = vld [vmem:[#allocation125_spill] sm:$0xff] }
 0x2b2   :  { %v4139_v20 = vadd.f32 %v9636_v22, %v14147_v57  ;;  %v9734_v52 = vpop.f32.mrf.mxu1  ;;  %10149 = vmatmul.mubr.f32.gmra.mxu1 %v17021_v54  ;;  %10053 = vmatprep.mubr.f32.mxu0 %v17022_v45  ;;  %v17026_v57 = vld [vmem:[#allocation261_spill] sm:$0xff]  ;;  %v17027_v22 = vld [vmem:[#allocation28_spill] sm:$0xff] }
 0x2b3   :  { %17018 = vst [vmem:[#allocation46_spill] sm:$0xff] %v14479_v24  ;;  %v14489_v33 = vsub.f32 %v17023_v17, %v4450_v32  ;;  %v4468_v30 = vadd.f32 %v9734_v52, %v4115_v5  ;;  %v4132_v24 = vpop.f32.mrf.mxu0  ;;  %10151 = vmatprep.mubr.f32.mxu1 %v17025_v47  ;;  %10217 = vmatpush3.msra.mxu0 %v17016_v39  ;;  %v17029_v5 = vld [vmem:[#allocation136_spill] sm:$0xff]  ;;  %v17033_v47 = vld [vmem:[#allocation49_spill] sm:$0xff] }
 0x2b4   :  { %v4133_v42 = vadd.f32 %v4132_v24, %v14156_v61  ;;  %v4461_v11 = vpop.f32.mrf.mxu1  ;;  %10321 = vmatpush3.msk.msra.mxu1 %vm13560_vm7, %v16122_v12  ;;  %10218 = vmatprep.subr.mxu0 %v17026_v57  ;;  %v17031_v24 = vld [vmem:[#allocation130_spill] sm:$0xff]  ;;  %v17042_v52 = vld [vmem:[#allocation149_spill] sm:$0xff] }
 0x2b5   :  { %17024 = vst [vmem:[#allocation270_spill] sm:$0xff] %v14489_v33  ;;  %v14499_v54 = vsub.f32 %v17027_v22, %v4468_v30  ;;  %v4462_v32 = vadd.f32 %v4461_v11, %v4109_v28  ;;  %v9639_v45 = vpop.f32.mrf.mxu0  ;;  %10054 = vmatmul.mubr.f32.gmra.mxu0 %v17029_v5  ;;  %10322 = vmatprep.subr.msk.mxu1 %vm13584_vm8, %v16122_v12  ;;  %v17035_v28 = vld [vmem:[#allocation133_spill] sm:$0xff] }
 0x2b6   :  { %v4151_v61 = vadd.f32 %v9639_v45, %v14165_v25  ;;  %v9737_v39 = vpop.f32.mrf.mxu1  ;;  %10152 = vmatmul.mubr.f32.gmra.mxu1 %v17031_v24  ;;  %10056 = vmatprep.mubr.f32.mxu0 %v17032_v50  ;;  %v17036_v25 = vld [vmem:[#allocation263_spill] sm:$0xff]  ;;  %v17189_v17 = vld [vmem:[#allocation197_spill] sm:$0xff] }
 0x2b7   :  { %17028 = vst [vmem:[#allocation140_spill] sm:$0xff] %v14499_v54  ;;  %v14509_v33 = vsub.f32 %v17033_v47, %v4462_v32  ;;  %v4480_v30 = vadd.f32 %v9737_v39, %v4127_v10  ;;  %v4144_v54 = vpop.f32.mrf.mxu0  ;;  %10154 = vmatprep.mubr.f32.mxu1 %v17035_v28  ;;  %10219 = vmatpush3.msra.mxu0 %v17026_v57  ;;  %v17037_v45 = vld [vmem:[#allocation227_spill] sm:$0xff]  ;;  %v17039_v10 = vld [vmem:[#allocation144_spill] sm:$0xff]  ;;  %v17187_v47 = vld [vmem:[#allocation186_spill] sm:$0xff] }
 0x2b8   :  { %v4145_v11 = vadd.f32 %v4144_v54, %v14174_v19  ;;  %v4473_v5 = vpop.f32.mrf.mxu1  ;;  %10323 = vmatpush3.msk.msra.mxu1 %vm13584_vm8, %v16122_v12  ;;  %10220 = vmatprep.subr.mxu0 %v17036_v25  ;;  %v17041_v54 = vld [vmem:[#allocation135_spill] sm:$0xff]  ;;  %v17043_v28 = vld [vmem:[#allocation64_spill] sm:$0xff] }
 0x2b9   :  { %17034 = vst [vmem:[#allocation272_spill] sm:$0xff] %v14509_v33  ;;  %v14519_v24 = vsub.f32 %v17037_v45, %v4480_v30  ;;  %v4474_v32 = vadd.f32 %v4473_v5, %v4121_v31  ;;  %v9642_v50 = vpop.f32.mrf.mxu0  ;;  %10057 = vmatmul.mubr.f32.gmra.mxu0 %v17039_v10  ;;  %10324 = vmatprep.subr.msk.mxu1 %vm13611_vm9, %v16122_v12  ;;  %v17046_v5 = vld [vmem:[#allocation139_spill] sm:$0xff] }
 0x2ba   :  { %v4163_v19 = vadd.f32 %v9642_v50, %v14183_v41  ;;  %v9740_v57 = vpop.f32.mrf.mxu1  ;;  %10155 = vmatmul.mubr.f32.gmra.mxu1 %v17041_v54  ;;  %10059 = vmatprep.mubr.f32.mxu0 %v17042_v52  ;;  %v17047_v41 = vld [vmem:[#allocation268_spill] sm:$0xff]  ;;  %v17049_v54 = vld [vmem:[#allocation154_spill] sm:$0xff]  ;;  %v17052_v52 = vld [vmem:[#allocation157_spill] sm:$0xff] }
 0x2bb   :  { %17038 = vst [vmem:[#allocation20_spill] sm:$0xff] %v14519_v24  ;;  %v14529_v33 = vsub.f32 %v17043_v28, %v4474_v32  ;;  %v14531_v30 = vadd.f32 %v9740_v57, %v4139_v20  ;;  %v4156_v31 = vpop.f32.mrf.mxu0  ;;  %10157 = vmatprep.mubr.f32.mxu1 %v17046_v5  ;;  %10221 = vmatpush3.msra.mxu0 %v17036_v25  ;;  %v17054_v5 = vld [vmem:[#allocation148_spill] sm:$0xff]  ;;  %v17185_v28 = vld [vmem:[#allocation177_spill] sm:$0xff] }
 0x2bc   :  { %v4157_v10 = vadd.f32 %v4156_v31, %v14192_v44  ;;  %v4485_v24 = vpop.f32.mrf.mxu1  ;;  %10325 = vmatpush3.msk.msra.mxu1 %vm13611_vm9, %v16122_v12  ;;  %10222 = vmatprep.subr.mxu0 %v17047_v41  ;;  %v17051_v44 = vld [vmem:[#allocation143_spill] sm:$0xff] }
 0x2bd   :  { %17044 = vst [vmem:[#allocation145_spill] sm:$0xff] %v14529_v33  ;;  %17045 = vst [vmem:[#allocation274_spill] sm:$0xff] %v14531_v30  ;;  %v14540_v50 = vadd.f32 %v4485_v24, %v4133_v42  ;;  %v9645_v32 = vpop.f32.mrf.mxu0  ;;  %10060 = vmatmul.mubr.f32.gmra.mxu0 %v17049_v54  ;;  %10326 = vmatprep.subr.msk.mxu1 %vm13647_vm10, %v16122_v12  ;;  %v17183_v30 = vld [vmem:[#allocation169_spill] sm:$0xff] }
 0x2be   :  { %v4175_v25 = vadd.f32 %v9645_v32, %v14201_v58  ;;  %v9743_v57 = vpop.f32.mrf.mxu1  ;;  %10158 = vmatmul.mubr.f32.gmra.mxu1 %v17051_v44  ;;  %10062 = vmatprep.mubr.f32.mxu0 %v17052_v52  ;;  %v17055_v58 = vld [vmem:[#allocation273_spill] sm:$0xff]  ;;  %v17057_v44 = vld [vmem:[#allocation162_spill] sm:$0xff] }
 0x2bf   :  { %17048 = vst [vmem:[#allocation147_spill] sm:$0xff] %v14540_v50  ;;  %v14549_v39 = vadd.f32 %v9743_v57, %v4151_v61  ;;  %v4168_v31 = vpop.f32.mrf.mxu0  ;;  %10160 = vmatprep.mubr.f32.mxu1 %v17054_v5  ;;  %10223 = vmatpush3.msra.mxu0 %v17047_v41  ;;  %v17060_v52 = vld [vmem:[#allocation166_spill] sm:$0xff]  ;;  %v17062_v5 = vld [vmem:[#allocation156_spill] sm:$0xff] }
 0x2c0   :  { %v4169_v42 = vadd.f32 %v4168_v31, %v14210_v60  ;;  %v4497_v24 = vpop.f32.mrf.mxu1  ;;  %10327 = vmatpush3.msk.msra.mxu1 %vm13647_vm10, %v16122_v12  ;;  %10224 = vmatprep.subr.mxu0 %v17055_v58  ;;  %v17059_v60 = vld [vmem:[#allocation152_spill] sm:$0xff] }
 0x2c1   :  { %17053 = vst [vmem:[#allocation276_spill] sm:$0xff] %v14549_v39  ;;  %v14558_v32 = vadd.f32 %v4497_v24, %v4145_v11  ;;  %v9648_v54 = vpop.f32.mrf.mxu0  ;;  %10063 = vmatmul.mubr.f32.gmra.mxu0 %v17057_v44  ;;  %10328 = vmatprep.subr.msk.mxu1 %vm13677_vm11, %v16122_v12  ;;  %v17063_v11 = vld [vmem:[#allocation86_spill] sm:$0xff]  ;;  %v17179_v39 = vld [vmem:[#allocation155_spill] sm:$0xff]  ;;  %v17181_v50 = vld [vmem:[#allocation160_spill] sm:$0xff] }
 0x2c2   :  { %v4187_v41 = vadd.f32 %v9648_v54, %v14219_v16  ;;  %v9746_v57 = vpop.f32.mrf.mxu1  ;;  %10161 = vmatmul.mubr.f32.gmra.mxu1 %v17059_v60  ;;  %10065 = vmatprep.mubr.f32.mxu0 %v17060_v52  ;;  %v17064_v16 = vld [vmem:[#allocation275_spill] sm:$0xff]  ;;  %v17066_v52 = vld [vmem:[#allocation168_spill] sm:$0xff] }
 0x2c3   :  { %17056 = vst [vmem:[#allocation258_spill] sm:$0xff] %v14558_v32  ;;  %v14567_v20 = vadd.f32 %v9746_v57, %v4163_v19  ;;  %v4180_v31 = vpop.f32.mrf.mxu0  ;;  %10163 = vmatprep.mubr.f32.mxu1 %v17062_v5  ;;  %10225 = vmatpush3.msra.mxu0 %v17055_v58  ;;  %v17068_v57 = vld [vmem:[#allocation87_spill] sm:$0xff]  ;;  %v17177_v32 = vld [vmem:[#allocation146_spill] sm:$0xff] }
 0x2c4   :  { %v4181_v24 = vadd.f32 %v4180_v31, %v17063_v11  ;;  %v4509_v44 = vpop.f32.mrf.mxu1  ;;  %10329 = vmatpush3.msk.msra.mxu1 %vm13677_vm11, %v16122_v12  ;;  %10226 = vmatprep.subr.mxu0 %v17064_v16  ;;  %v17069_v31 = vld [vmem:[#allocation161_spill] sm:$0xff]  ;;  %v17070_v11 = vld [vmem:[#allocation171_spill] sm:$0xff] }
 0x2c5   :  { %17061 = vst [vmem:[#allocation151_spill] sm:$0xff] %v14567_v20  ;;  %v14576_v54 = vadd.f32 %v4509_v44, %v4157_v10  ;;  %v9651_v60 = vpop.f32.mrf.mxu0  ;;  %10066 = vmatmul.mubr.f32.gmra.mxu0 %v17066_v52  ;;  %10330 = vmatprep.subr.msk.mxu1 %vm13701_vm12, %v16122_v12  ;;  %v17073_v10 = vld [vmem:[#allocation94_spill] sm:$0xff]  ;;  %v17175_v20 = vld [vmem:[#allocation137_spill] sm:$0xff] }
 0x2c6   :  { %v4199_v58 = vadd.f32 %v9651_v60, %v17068_v57  ;;  %v9749_v5 = vpop.f32.mrf.mxu1  ;;  %10164 = vmatmul.mubr.f32.gmra.mxu1 %v17069_v31  ;;  %10068 = vmatprep.mubr.f32.mxu0 %v17070_v11  ;;  %v17074_v60 = vld [vmem:[#allocation278_spill] sm:$0xff]  ;;  %v17076_v11 = vld [vmem:[#allocation176_spill] sm:$0xff] }
 0x2c7   :  { %17065 = vst [vmem:[#allocation153_spill] sm:$0xff] %v14576_v54  ;;  %v14585_v61 = vadd.f32 %v9749_v5, %v4175_v25  ;;  %v4192_v33 = vpop.f32.mrf.mxu0  ;;  %10166 = vmatprep.mubr.f32.mxu1 %v17072_v36  ;;  %10227 = vmatpush3.msra.mxu0 %v17064_v16  ;;  %v17078_v36 = vld [vmem:[#allocation97_spill] sm:$0xff] }
 0x2c8   :  { %v4193_v44 = vadd.f32 %v4192_v33, %v17073_v10  ;;  %v4521_v52 = vpop.f32.mrf.mxu1  ;;  %10331 = vmatpush3.msk.msra.mxu1 %vm13701_vm12, %v16122_v12  ;;  %10228 = vmatprep.subr.mxu0 %v17074_v60  ;;  %v17079_v33 = vld [vmem:[#allocation170_spill] sm:$0xff]  ;;  %v17080_v10 = vld [vmem:[#allocation181_spill] sm:$0xff] }
 0x2c9   :  { %17071 = vst [vmem:[#allocation259_spill] sm:$0xff] %v14585_v61  ;;  %v14594_v57 = vadd.f32 %v4521_v52, %v4169_v42  ;;  %v9654_v31 = vpop.f32.mrf.mxu0  ;;  %10069 = vmatmul.mubr.f32.gmra.mxu0 %v17076_v11  ;;  %10332 = vmatprep.subr.msk.mxu1 %vm13737_vm13, %v16122_v12  ;;  %v17082_v54 = vld [vmem:[#allocation173_spill] sm:$0xff]  ;;  %v17083_v42 = vld [vmem:[#allocation100_spill] sm:$0xff] }
 0x2ca   :  { %v4211_v16 = vadd.f32 %v9654_v31, %v17078_v36  ;;  %v9752_v5 = vpop.f32.mrf.mxu1  ;;  %10167 = vmatmul.mubr.f32.gmra.mxu1 %v17079_v33  ;;  %10071 = vmatprep.mubr.f32.mxu0 %v17080_v10  ;;  %v17084_v31 = vld [vmem:[#allocation280_spill] sm:$0xff] }
 0x2cb   :  { %17075 = vst [vmem:[#allocation159_spill] sm:$0xff] %v14594_v57  ;;  %v14603_v19 = vadd.f32 %v9752_v5, %v4187_v41  ;;  %v4204_v61 = vpop.f32.mrf.mxu0  ;;  %10169 = vmatprep.mubr.f32.mxu1 %v17082_v54  ;;  %10229 = vmatpush3.msra.mxu0 %v17074_v60  ;;  %v17086_v10 = vld [vmem:[#allocation184_spill] sm:$0xff]  ;;  %v17088_v54 = vld [vmem:[#allocation105_spill] sm:$0xff]  ;;  %v17092_v57 = vld [vmem:[#allocation179_spill] sm:$0xff] }
 0x2cc   :  { %v4205_v52 = vadd.f32 %v4204_v61, %v17083_v42  ;;  %v4533_v11 = vpop.f32.mrf.mxu1  ;;  %10333 = vmatpush3.msk.msra.mxu1 %vm13737_vm13, %v16122_v12  ;;  %10230 = vmatprep.subr.mxu0 %v17084_v31  ;;  %v17089_v61 = vld [vmem:[#allocation175_spill] sm:$0xff]  ;;  %v17090_v42 = vld [vmem:[#allocation189_spill] sm:$0xff] }
 0x2cd   :  { %17081 = vst [vmem:[#allocation164_spill] sm:$0xff] %v14603_v19  ;;  %v14612_v36 = vadd.f32 %v4533_v11, %v4181_v24  ;;  %v9657_v33 = vpop.f32.mrf.mxu0  ;;  %10072 = vmatmul.mubr.f32.gmra.mxu0 %v17086_v10  ;;  %10334 = vmatprep.subr.msk.mxu1 %vm13767_vm14, %v16122_v12  ;;  %v17093_v24 = vld [vmem:[#allocation107_spill] sm:$0xff] }
 0x2ce   :  { %v4223_v60 = vadd.f32 %v9657_v33, %v17088_v54  ;;  %v9755_v5 = vpop.f32.mrf.mxu1  ;;  %10170 = vmatmul.mubr.f32.gmra.mxu1 %v17089_v61  ;;  %10074 = vmatprep.mubr.f32.mxu0 %v17090_v42  ;;  %v17096_v61 = vld [vmem:[#allocation196_spill] sm:$0xff]  ;;  %v17100_v42 = vld [vmem:[#allocation199_spill] sm:$0xff] }
 0x2cf   :  { %17085 = vst [vmem:[#allocation262_spill] sm:$0xff] %v14612_v36  ;;  %v14621_v25 = vadd.f32 %v9755_v5, %v4199_v58  ;;  %v4216_v19 = vpop.f32.mrf.mxu0  ;;  %10172 = vmatprep.mubr.f32.mxu1 %v17092_v57  ;;  %10231 = vmatpush3.msra.mxu0 %v17084_v31  ;;  %v17094_v36 = vld [vmem:[#allocation282_spill] sm:$0xff]  ;;  %v17098_v57 = vld [vmem:[#allocation112_spill] sm:$0xff] }
 0x2d0   :  { %v4217_v11 = vadd.f32 %v4216_v19, %v17093_v24  ;;  %v4545_v10 = vpop.f32.mrf.mxu1  ;;  %10232 = vmatprep.subr.mxu0 %v17094_v36  ;;  %10335 = vmatpush3.msk.msra.mxu1 %vm13767_vm14, %v16122_v12  ;;  %v17099_v19 = vld [vmem:[#allocation183_spill] sm:$0xff] }
 0x2d1   :  { %17091 = vst [vmem:[#allocation167_spill] sm:$0xff] %v14621_v25  ;;  %v14630_v33 = vadd.f32 %v4545_v10, %v4193_v44  ;;  %v9660_v54 = vpop.f32.mrf.mxu0  ;;  %10075 = vmatmul.mubr.f32.gmra.mxu0 %v17096_v61  ;;  %10336 = vmatprep.subr.msk.mxu1 %vm13797_vm15, %v16122_v12  ;;  %v17102_v25 = vld [vmem:[#allocation188_spill] sm:$0xff]  ;;  %v17103_v44 = vld [vmem:[#allocation113_spill] sm:$0xff] }
 0x2d2   :  { %v4235_v31 = vadd.f32 %v9660_v54, %v17098_v57  ;;  %v9758_v5 = vpop.f32.mrf.mxu1  ;;  %10173 = vmatmul.mubr.f32.gmra.mxu1 %v17099_v19  ;;  %10077 = vmatprep.mubr.f32.mxu0 %v17100_v42  ;;  %v17105_v19 = vld [vmem:[#allocation205_spill] sm:$0xff] }
 0x2d3   :  { %17095 = vst [vmem:[#allocation172_spill] sm:$0xff] %v14630_v33  ;;  %v14639_v24 = vadd.f32 %v9758_v5, %v4211_v16  ;;  %v4228_v41 = vpop.f32.mrf.mxu0  ;;  %10175 = vmatprep.mubr.f32.mxu1 %v17102_v25  ;;  %10233 = vmatpush3.msra.mxu0 %v17094_v36  ;;  %v17106_v42 = vld [vmem:[#allocation193_spill] sm:$0xff] }
 0x2d4   :  { %v4229_v10 = vadd.f32 %v4228_v41, %v17103_v44  ;;  %v4557_v61 = vpop.f32.mrf.mxu1  ;;  %10337 = vmatpush3.msk.msra.mxu1 %vm13797_vm15, %v16122_v12  ;;  %v17107_v25 = vld [vmem:[#allocation209_spill] sm:$0xff]  ;;  %v17109_v44 = vld [vmem:[#allocation198_spill] sm:$0xff] }
 0x2d5   :  { %17101 = vst [vmem:[#allocation265_spill] sm:$0xff] %v14639_v24  ;;  %v14647_v54 = vadd.f32 %v4557_v61, %v4205_v52  ;;  %v9663_v57 = vpop.f32.mrf.mxu0  ;;  %10078 = vmatmul.mubr.f32.gmra.mxu0 %v17105_v19  ;;  %v17110_v24 = vld [vmem:[#allocation119_spill] sm:$0xff]  ;;  %v17113_v19 = vld [vmem:[#allocation204_spill] sm:$0xff] }
 0x2d6   :  { %v4247_v16 = vadd.f32 %v9663_v57, %v14293_v59  ;;  %v9761_v5 = vpop.f32.mrf.mxu1  ;;  %10176 = vmatmul.mubr.f32.gmra.mxu1 %v17106_v42  ;;  %10080 = vmatprep.mubr.f32.mxu0 %v17107_v25  ;;  %v17114_v42 = vld [vmem:[#allocation215_spill] sm:$0xff]  ;;  %v17116_v25 = vld [vmem:[#allocation208_spill] sm:$0xff] }
 0x2d7   :  { %17104 = vst [vmem:[#allocation178_spill] sm:$0xff] %v14647_v54  ;;  %v14653_v36 = vadd.f32 %v9761_v5, %v4223_v60  ;;  %v4240_v41 = vpop.f32.mrf.mxu0  ;;  %10178 = vmatprep.mubr.f32.mxu1 %v17109_v44  ;;  %v17112_v54 = vld [vmem:[#allocation210_spill] sm:$0xff] }
 0x2d8   :  { %v4241_v58 = vadd.f32 %v4240_v41, %v17110_v24  ;;  %v4569_v12 = vpop.f32.mrf.mxu1 }
 0x2d9   :  { %17108 = vst [vmem:[#allocation180_spill] sm:$0xff] %v14653_v36  ;;  %v14657_v52 = vadd.f32 %v4569_v12, %v4217_v11  ;;  %v9666_v61 = vpop.f32.mrf.mxu0  ;;  %10081 = vmatmul.mubr.f32.gmra.mxu0 %v17112_v54  ;;  %v17118_v12 = vld [vmem:[#allocation51_spill] sm:$0xff]  ;;  %v17173_v36 = vld [vmem:[#allocation129_spill] sm:$0xff] }
 0x2da   :  { %v4259_v59 = vadd.f32 %v9666_v61, %v14303_v3  ;;  %v9764_v57 = vpop.f32.mrf.mxu1  ;;  %10179 = vmatmul.mubr.f32.gmra.mxu1 %v17113_v19  ;;  %10083 = vmatprep.mubr.f32.mxu0 %v17114_v42  ;;  %v17119_v61 = vld [vmem:[#allocation214_spill] sm:$0xff]  ;;  %v17120_v19 = vld [vmem:[#allocation220_spill] sm:$0xff]  ;;  %v17122_v42 = vld [vmem:[#allocation217_spill] sm:$0xff] }
 0x2db   :  { %17111 = vst [vmem:[#allocation269_spill] sm:$0xff] %v14657_v52  ;;  %v14663_v60 = vadd.f32 %v9764_v57, %v4235_v31  ;;  %v4252_v5 = vpop.f32.mrf.mxu0  ;;  %10181 = vmatprep.mubr.f32.mxu1 %v17116_v25 }
 0x2dc   :  { %v4253_v24 = vadd.f32 %v4252_v5, %v14307_v34  ;;  %v4581_v41 = vpop.f32.mrf.mxu1 }
 0x2dd   :  { %17115 = vst [vmem:[#allocation185_spill] sm:$0xff] %v14663_v60  ;;  %v14667_v11 = vadd.f32 %v4581_v41, %v4229_v10  ;;  %v9669_v44 = vpop.f32.mrf.mxu0  ;;  %10084 = vmatmul.mubr.f32.gmra.mxu0 %v17118_v12  ;;  %v17124_v41 = vld [vmem:[#allocation229_spill] sm:$0xff]  ;;  %v17125_v12 = vld [vmem:[#allocation219_spill] sm:$0xff]  ;;  %v17171_v60 = vld [vmem:[#allocation120_spill] sm:$0xff] }
 0x2de   :  { %v4271_v3 = vadd.f32 %v9669_v44, %v14313_v40  ;;  %v9767_v54 = vpop.f32.mrf.mxu1  ;;  %10182 = vmatmul.mubr.f32.gmra.mxu1 %v17119_v61  ;;  %10086 = vmatprep.mubr.f32.mxu0 %v17120_v19  ;;  %v17126_v61 = vld [vmem:[#allocation231_spill] sm:$0xff]  ;;  %v17128_v19 = vld [vmem:[#allocation224_spill] sm:$0xff] }
 0x2df   :  { %17117 = vst [vmem:[#allocation187_spill] sm:$0xff] %v14667_v11  ;;  %v14673_v31 = vadd.f32 %v9767_v54, %v4247_v16  ;;  %v4264_v57 = vpop.f32.mrf.mxu0  ;;  %10184 = vmatprep.mubr.f32.mxu1 %v17122_v42 }
 0x2e0   :  { %v4265_v34 = vadd.f32 %v4264_v57, %v14317_v49  ;;  %v4593_v5 = vpop.f32.mrf.mxu1 }
 0x2e1   :  { %17121 = vst [vmem:[#allocation271_spill] sm:$0xff] %v14673_v31  ;;  %v14677_v10 = vadd.f32 %v4593_v5, %v4241_v58  ;;  %v9672_v25 = vpop.f32.mrf.mxu0  ;;  %10087 = vmatmul.mubr.f32.gmra.mxu0 %v17124_v41  ;;  %v17130_v5 = vld [vmem:[#allocation236_spill] sm:$0xff]  ;;  %v17131_v41 = vld [vmem:[#allocation54_spill] sm:$0xff]  ;;  %v17169_v31 = vld [vmem:[#allocation115_spill] sm:$0xff] }
 0x2e2   :  { %v4283_v40 = vadd.f32 %v9672_v25, %v14323_v38  ;;  %v9770_v44 = vpop.f32.mrf.mxu1  ;;  %10185 = vmatmul.mubr.f32.gmra.mxu1 %v17125_v12  ;;  %10089 = vmatprep.mubr.f32.mxu0 %v17126_v61  ;;  %v17132_v12 = vld [vmem:[#allocation239_spill] sm:$0xff]  ;;  %v17134_v61 = vld [vmem:[#allocation228_spill] sm:$0xff] }
 0x2e3   :  { %17123 = vst [vmem:[#allocation192_spill] sm:$0xff] %v14677_v10  ;;  %v14683_v16 = vadd.f32 %v9770_v44, %v4259_v59  ;;  %v4276_v54 = vpop.f32.mrf.mxu0  ;;  %10187 = vmatprep.mubr.f32.mxu1 %v17128_v19 }
 0x2e4   :  { %v4277_v49 = vadd.f32 %v4276_v54, %v14327_v9  ;;  %v4605_v57 = vpop.f32.mrf.mxu1 }
 0x2e5   :  { %17127 = vst [vmem:[#allocation195_spill] sm:$0xff] %v14683_v16  ;;  %v14687_v58 = vadd.f32 %v4605_v57, %v4253_v24  ;;  %v9675_v42 = vpop.f32.mrf.mxu0  ;;  %10090 = vmatmul.mubr.f32.gmra.mxu0 %v17130_v5  ;;  %v17136_v57 = vld [vmem:[#allocation242_spill] sm:$0xff] }
 0x2e6   :  { %v4295_v38 = vadd.f32 %v9675_v42, %v14333_v53  ;;  %v9773_v25 = vpop.f32.mrf.mxu1  ;;  %10188 = vmatmul.mubr.f32.gmra.mxu1 %v17131_v41  ;;  %10092 = vmatprep.mubr.f32.mxu0 %v17132_v12  ;;  %v17137_v5 = vld [vmem:[#allocation234_spill] sm:$0xff]  ;;  %v17138_v41 = vld [vmem:[#allocation245_spill] sm:$0xff] }
 0x2e7   :  { %17129 = vst [vmem:[#allocation277_spill] sm:$0xff] %v14687_v58  ;;  %v14693_v59 = vadd.f32 %v9773_v25, %v4271_v3  ;;  %v4288_v44 = vpop.f32.mrf.mxu0  ;;  %10190 = vmatprep.mubr.f32.mxu1 %v17134_v61  ;;  %v17140_v12 = vld [vmem:[#allocation238_spill] sm:$0xff] }
 0x2e8   :  { %v4289_v9 = vadd.f32 %v4288_v44, %v14337_v6  ;;  %v4617_v54 = vpop.f32.mrf.mxu1  ;;  %v17167_v16 = vld [vmem:[#allocation106_spill] sm:$0xff] }
 0x2e9   :  { %17133 = vst [vmem:[#allocation35_spill] sm:$0xff] %v14693_v59  ;;  %v14697_v24 = vadd.f32 %v4617_v54, %v4265_v34  ;;  %v9678_v19 = vpop.f32.mrf.mxu0  ;;  %10093 = vmatmul.mubr.f32.gmra.mxu0 %v17136_v57  ;;  %v17142_v54 = vld [vmem:[#allocation248_spill] sm:$0xff]  ;;  %v17143_v57 = vld [vmem:[#allocation53_spill] sm:$0xff] }
 0x2ea   :  { %v4307_v53 = vadd.f32 %v9678_v19, %v14343_v4  ;;  %v9776_v42 = vpop.f32.mrf.mxu1  ;;  %10191 = vmatmul.mubr.f32.gmra.mxu1 %v17137_v5  ;;  %10095 = vmatprep.mubr.f32.mxu0 %v17138_v41  ;;  %v17144_v5 = vld [vmem:[#allocation77_spill] sm:$0xff]  ;;  %v17146_v41 = vld [vmem:[#allocation244_spill] sm:$0xff] }
 0x2eb   :  { %17135 = vst [vmem:[#allocation207_spill] sm:$0xff] %v14697_v24  ;;  %v14703_v3 = vadd.f32 %v9776_v42, %v4283_v40  ;;  %v4300_v25 = vpop.f32.mrf.mxu0  ;;  %10193 = vmatprep.mubr.f32.mxu1 %v17140_v12  ;;  %v17165_v59 = vld [vmem:[#allocation96_spill] sm:$0xff] }
 0x2ec   :  { %v4301_v6 = vadd.f32 %v4300_v25, %v14349_v26  ;;  %v4629_v44 = vpop.f32.mrf.mxu1 }
 0x2ed   :  { %17139 = vst [vmem:[#allocation283_spill] sm:$0xff] %v14703_v3  ;;  %v14707_v34 = vadd.f32 %v4629_v44, %v4277_v49  ;;  %v9681_v61 = vpop.f32.mrf.mxu0  ;;  %10096 = vmatmul.mubr.f32.gmra.mxu0 %v17142_v54  ;;  %v17148_v44 = vld [vmem:[#allocation43_spill] sm:$0xff]  ;;  %v17163_v3 = vld [vmem:[#allocation88_spill] sm:$0xff] }
 0x2ee   :  { %v4319_v4 = vadd.f32 %v9681_v61, %v14355_v0  ;;  %v9779_v19 = vpop.f32.mrf.mxu1  ;;  %10194 = vmatmul.mubr.f32.gmra.mxu1 %v17143_v57  ;;  %10234 = vmatprep.mubr.f32.mxu0 %v17144_v5  ;;  %v17149_v0 = vld [vmem:[#allocation247_spill] sm:$0xff]  ;;  %v17150_v61 = vld [vmem:[#allocation37_spill] sm:$0xff] }
 0x2ef   :  { %17141 = vst [vmem:[#allocation279_spill] sm:$0xff] %v14707_v34  ;;  %v14713_v40 = vadd.f32 %v9779_v19, %v4295_v38  ;;  %v4312_v42 = vpop.f32.mrf.mxu0  ;;  %10196 = vmatprep.mubr.f32.mxu1 %v17146_v41  ;;  %v17152_v19 = vld [vmem:[#allocation250_spill] sm:$0xff] }
 0x2f0   :  { %v4313_v26 = vadd.f32 %v4312_v42, %v14361_v56  ;;  %v4641_v25 = vpop.f32.mrf.mxu1  ;;  %v17154_v42 = vld [vmem:[#allocation47_spill] sm:$0xff] }
 0x2f1   :  { %17145 = vst [vmem:[#allocation39_spill] sm:$0xff] %v14713_v40  ;;  %v14717_v49 = vadd.f32 %v4641_v25, %v4289_v9  ;;  %v9820_v12 = vpop.f32.mrf.mxu0  ;;  %10235 = vmatmul.mubr.f32.vlgmr.msra.gmra.mxu0 %v17148_v44  ;;  %v17155_v25 = vld [vmem:[#allocation252_spill] sm:$0xff] }
 0x2f2   :  { %v9782_v54 = vpop.f32.mrf.mxu1  ;;  %10197 = vmatmul.mubr.f32.gmra.mxu1 %v17149_v0  ;;  %10237 = vmatprep.mubr.f32.mxu0 %v17150_v61 }
 0x2f3   :  { %17147 = vst [vmem:[#allocation216_spill] sm:$0xff] %v14717_v49  ;;  %v14722_v57 = vadd.f32 %v9782_v54, %v4307_v53  ;;  %v4783_v38 = vpop.f32.mrf.mxu0  ;;  %10199 = vmatprep.mubr.f32.mxu1 %v17152_v19  ;;  %v17156_v49 = vld [vmem:[#allocation58_spill] sm:$0xff] }
 0x2f4   :  { %v4653_v40 = vpop.f32.mrf.mxu1 }
 0x2f5   :  { %17151 = vst [vmem:[#allocation281_spill] sm:$0xff] %v14722_v57  ;;  %v14725_v41 = vadd.f32 %v4653_v40, %v4301_v6  ;;  %v9823_v56 = vpop.f32.mrf.mxu0  ;;  %10238 = vmatmul.mubr.f32.gmra.mxu0 %v17154_v42  ;;  %v17159_v57 = vld [vmem:[#allocation67_spill] sm:$0xff]  ;;  %v17160_v40 = vld [vmem:[#allocation72_spill] sm:$0xff] }
 0x2f6   :  { %v9785_v9 = vpop.f32.mrf.mxu1  ;;  %10200 = vmatmul.mubr.f32.gmra.mxu1 %v17155_v25  ;;  %10240 = vmatprep.mubr.f32.mxu0 %v17156_v49 }
 0x2f7   :  { %17153 = vst [vmem:[#allocation223_spill] sm:$0xff] %v14725_v41  ;;  %v14730_v34 = vadd.f32 %v9785_v9, %v4319_v4  ;;  %v4803_v0 = vpop.f32.mrf.mxu0  ;;  %10338 = vmatprep.mubr.f32.mxu1 %v17144_v5 }
 0x2f8   :  { %v4665_v53 = vpop.f32.mrf.mxu1 }
 0x2f9   :  { %17157 = vst [vmem:[#allocation225_spill] sm:$0xff] %v14730_v34  ;;  %v14733_v54 = vadd.f32 %v4665_v53, %v4313_v26  ;;  %v9826_v19 = vpop.f32.mrf.mxu0  ;;  %10241 = vmatmul.mubr.f32.gmra.mxu0 %v17159_v57  ;;  %v17161_v34 = vld [vmem:[#allocation82_spill] sm:$0xff]  ;;  %v17162_v53 = vld [vmem:[#allocation83_spill] sm:$0xff] }
 0x2fa   :  { %v9924_v6 = vpop.f32.mrf.mxu1  ;;  %10339 = vmatmul.mubr.f32.vlgmr.msra.gmra.mxu1 %v17148_v44  ;;  %10243 = vmatprep.mubr.f32.mxu0 %v17160_v40 }
 0x2fb   :  { %17158 = vst [vmem:[#allocation213_spill] sm:$0xff] %v14733_v54  ;;  %v14738_v41 = vadd.f32 %v9924_v6, %v9820_v12  ;;  %v4823_v25 = vpop.f32.mrf.mxu0  ;;  %10341 = vmatprep.mubr.f32.mxu1 %v17150_v61 }
 0x2fc   :  { %v5388_v4 = vpop.f32.mrf.mxu1 }
 0x2fd   :  { %v14741_v9 = vadd.f32 %v5388_v4, %v4783_v38  ;;  %v9829_v5 = vpop.f32.mrf.mxu0  ;;  %10244 = vmatmul.mubr.f32.gmra.mxu0 %v17161_v34  ;;  %v17164_v4 = vld [vmem:[#allocation93_spill] sm:$0xff] }
 0x2fe   :  { %v9927_v26 = vpop.f32.mrf.mxu1  ;;  %10342 = vmatmul.mubr.f32.gmra.mxu1 %v17154_v42  ;;  %10246 = vmatprep.mubr.f32.mxu0 %v17162_v53 }
 0x2ff   :  { %v14746_v54 = vadd.f32 %v9927_v26, %v9823_v56  ;;  %v4843_v44 = vpop.f32.mrf.mxu0  ;;  %10344 = vmatprep.mubr.f32.mxu1 %v17156_v49 }
 0x300   :  { %v5400_v12 = vpop.f32.mrf.mxu1 }
 0x301   :  { %v14749_v6 = vadd.f32 %v5400_v12, %v4803_v0  ;;  %v9832_v61 = vpop.f32.mrf.mxu0  ;;  %10247 = vmatmul.mubr.f32.gmra.mxu0 %v17163_v3  ;;  %v17166_v12 = vld [vmem:[#allocation102_spill] sm:$0xff] }
 0x302   :  { %v9930_v38 = vpop.f32.mrf.mxu1  ;;  %10345 = vmatmul.mubr.f32.gmra.mxu1 %v17159_v57  ;;  %10249 = vmatprep.mubr.f32.mxu0 %v17164_v4 }
 0x303   :  { %v14754_v24 = vadd.f32 %v9930_v38, %v9826_v19  ;;  %v4863_v42 = vpop.f32.mrf.mxu0  ;;  %10347 = vmatprep.mubr.f32.mxu1 %v17160_v40 }
 0x304   :  { %v5412_v56 = vpop.f32.mrf.mxu1 }
 0x305   :  { %v14757_v26 = vadd.f32 %v5412_v56, %v4823_v25  ;;  %v9835_v49 = vpop.f32.mrf.mxu0  ;;  %10250 = vmatmul.mubr.f32.gmra.mxu0 %v17165_v59  ;;  %v17168_v56 = vld [vmem:[#allocation110_spill] sm:$0xff] }
 0x306   :  { %v9933_v0 = vpop.f32.mrf.mxu1  ;;  %10348 = vmatmul.mubr.f32.gmra.mxu1 %v17161_v34  ;;  %10252 = vmatprep.mubr.f32.mxu0 %v17166_v12 }
 0x307   :  { %v14762_v58 = vadd.f32 %v9933_v0, %v9829_v5  ;;  %v4883_v57 = vpop.f32.mrf.mxu0  ;;  %10350 = vmatprep.mubr.f32.mxu1 %v17162_v53 }
 0x308   :  { %v5424_v19 = vpop.f32.mrf.mxu1 }
 0x309   :  { %v14765_v38 = vadd.f32 %v5424_v19, %v4843_v44  ;;  %v9838_v40 = vpop.f32.mrf.mxu0  ;;  %10253 = vmatmul.mubr.f32.gmra.mxu0 %v17167_v16  ;;  %v17170_v19 = vld [vmem:[#allocation118_spill] sm:$0xff] }
 0x30a   :  { %v9936_v25 = vpop.f32.mrf.mxu1  ;;  %10351 = vmatmul.mubr.f32.gmra.mxu1 %v17163_v3  ;;  %10255 = vmatprep.mubr.f32.mxu0 %v17168_v56 }
 0x30b   :  { %v14770_v10 = vadd.f32 %v9936_v25, %v9832_v61  ;;  %v4903_v34 = vpop.f32.mrf.mxu0  ;;  %10353 = vmatprep.mubr.f32.mxu1 %v17164_v4 }
 0x30c   :  { %v5436_v5 = vpop.f32.mrf.mxu1 }
 0x30d   :  { %v14773_v0 = vadd.f32 %v5436_v5, %v4863_v42  ;;  %v9841_v53 = vpop.f32.mrf.mxu0  ;;  %10256 = vmatmul.mubr.f32.gmra.mxu0 %v17169_v31  ;;  %v17172_v5 = vld [vmem:[#allocation123_spill] sm:$0xff] }
 0x30e   :  { %v9939_v44 = vpop.f32.mrf.mxu1  ;;  %10354 = vmatmul.mubr.f32.gmra.mxu1 %v17165_v59  ;;  %10258 = vmatprep.mubr.f32.mxu0 %v17170_v19 }
 0x30f   :  { %v14778_v11 = vadd.f32 %v9939_v44, %v9835_v49  ;;  %v4923_v3 = vpop.f32.mrf.mxu0  ;;  %10356 = vmatprep.mubr.f32.mxu1 %v17166_v12 }
 0x310   :  { %v5448_v61 = vpop.f32.mrf.mxu1 }
 0x311   :  { %v14781_v25 = vadd.f32 %v5448_v61, %v4883_v57  ;;  %v9844_v4 = vpop.f32.mrf.mxu0  ;;  %10259 = vmatmul.mubr.f32.gmra.mxu0 %v17171_v60  ;;  %v17174_v61 = vld [vmem:[#allocation134_spill] sm:$0xff] }
 0x312   :  { %v9942_v42 = vpop.f32.mrf.mxu1  ;;  %10357 = vmatmul.mubr.f32.gmra.mxu1 %v17167_v16  ;;  %10261 = vmatprep.mubr.f32.mxu0 %v17172_v5 }
 0x313   :  { %v14786_v52 = vadd.f32 %v9942_v42, %v9838_v40  ;;  %v4943_v59 = vpop.f32.mrf.mxu0  ;;  %10359 = vmatprep.mubr.f32.mxu1 %v17168_v56 }
 0x314   :  { %v5460_v49 = vpop.f32.mrf.mxu1 }
 0x315   :  { %v14789_v44 = vadd.f32 %v5460_v49, %v4903_v34  ;;  %v9847_v12 = vpop.f32.mrf.mxu0  ;;  %10262 = vmatmul.mubr.f32.gmra.mxu0 %v17173_v36  ;;  %v17176_v49 = vld [vmem:[#allocation142_spill] sm:$0xff] }
 0x316   :  { %v9945_v57 = vpop.f32.mrf.mxu1  ;;  %10360 = vmatmul.mubr.f32.gmra.mxu1 %v17169_v31  ;;  %10264 = vmatprep.mubr.f32.mxu0 %v17174_v61 }
 0x317   :  { %v14794_v33 = vadd.f32 %v9945_v57, %v9841_v53  ;;  %v4963_v16 = vpop.f32.mrf.mxu0  ;;  %10362 = vmatprep.mubr.f32.mxu1 %v17170_v19 }
 0x318   :  { %v5472_v40 = vpop.f32.mrf.mxu1 }
 0x319   :  { %v14797_v42 = vadd.f32 %v5472_v40, %v4923_v3  ;;  %v9850_v56 = vpop.f32.mrf.mxu0  ;;  %10265 = vmatmul.mubr.f32.gmra.mxu0 %v17175_v20  ;;  %v17178_v40 = vld [vmem:[#allocation150_spill] sm:$0xff] }
 0x31a   :  { %v9948_v34 = vpop.f32.mrf.mxu1  ;;  %10363 = vmatmul.mubr.f32.gmra.mxu1 %v17171_v60  ;;  %10267 = vmatprep.mubr.f32.mxu0 %v17176_v49 }
 0x31b   :  { %v14802_v48 = vadd.f32 %v9948_v34, %v9844_v4  ;;  %v4983_v31 = vpop.f32.mrf.mxu0  ;;  %10365 = vmatprep.mubr.f32.mxu1 %v17172_v5 }
 0x31c   :  { %v5484_v53 = vpop.f32.mrf.mxu1 }
 0x31d   :  { %v14805_v57 = vadd.f32 %v5484_v53, %v4943_v59  ;;  %v9853_v19 = vpop.f32.mrf.mxu0  ;;  %10268 = vmatmul.mubr.f32.gmra.mxu0 %v17177_v32  ;;  %v17180_v53 = vld [vmem:[#allocation158_spill] sm:$0xff] }
 0x31e   :  { %v9951_v3 = vpop.f32.mrf.mxu1  ;;  %10366 = vmatmul.mubr.f32.gmra.mxu1 %v17173_v36  ;;  %10270 = vmatprep.mubr.f32.mxu0 %v17178_v40 }
 0x31f   :  { %v14810_v62 = vadd.f32 %v9951_v3, %v9847_v12  ;;  %v5003_v60 = vpop.f32.mrf.mxu0  ;;  %10368 = vmatprep.mubr.f32.mxu1 %v17174_v61 }
 0x320   :  { %v5496_v4 = vpop.f32.mrf.mxu1 }
 0x321   :  { %v14813_v34 = vadd.f32 %v5496_v4, %v4963_v16  ;;  %v9856_v5 = vpop.f32.mrf.mxu0  ;;  %10271 = vmatmul.mubr.f32.gmra.mxu0 %v17179_v39  ;;  %v17182_v4 = vld [vmem:[#allocation163_spill] sm:$0xff] }
 0x322   :  { %v9954_v59 = vpop.f32.mrf.mxu1  ;;  %10369 = vmatmul.mubr.f32.gmra.mxu1 %v17175_v20  ;;  %10273 = vmatprep.mubr.f32.mxu0 %v17180_v53 }
 0x323   :  { %v14818_v18 = vadd.f32 %v9954_v59, %v9850_v56  ;;  %v5023_v36 = vpop.f32.mrf.mxu0  ;;  %10371 = vmatprep.mubr.f32.mxu1 %v17176_v49 }
 0x324   :  { %v5508_v12 = vpop.f32.mrf.mxu1 }
 0x325   :  { %v14821_v3 = vadd.f32 %v5508_v12, %v4983_v31  ;;  %v9859_v61 = vpop.f32.mrf.mxu0  ;;  %10274 = vmatmul.mubr.f32.gmra.mxu0 %v17181_v50  ;;  %v17184_v12 = vld [vmem:[#allocation174_spill] sm:$0xff] }
 0x326   :  { %v9957_v16 = vpop.f32.mrf.mxu1  ;;  %10372 = vmatmul.mubr.f32.gmra.mxu1 %v17177_v32  ;;  %10276 = vmatprep.mubr.f32.mxu0 %v17182_v4 }
 0x327   :  { %v14826_v13 = vadd.f32 %v9957_v16, %v9853_v19  ;;  %v5043_v20 = vpop.f32.mrf.mxu0  ;;  %10374 = vmatprep.mubr.f32.mxu1 %v17178_v40 }
 0x328   :  { %v5520_v56 = vpop.f32.mrf.mxu1 }
 0x329   :  { %v14829_v59 = vadd.f32 %v5520_v56, %v5003_v60  ;;  %v9862_v49 = vpop.f32.mrf.mxu0  ;;  %10277 = vmatmul.mubr.f32.gmra.mxu0 %v17183_v30  ;;  %v17186_v56 = vld [vmem:[#allocation182_spill] sm:$0xff] }
 0x32a   :  { %v9960_v31 = vpop.f32.mrf.mxu1  ;;  %10375 = vmatmul.mubr.f32.gmra.mxu1 %v17179_v39  ;;  %10279 = vmatprep.mubr.f32.mxu0 %v17184_v12 }
 0x32b   :  { %v14834_v51 = vadd.f32 %v9960_v31, %v9856_v5  ;;  %v5063_v32 = vpop.f32.mrf.mxu0  ;;  %10377 = vmatprep.mubr.f32.mxu1 %v17180_v53 }
 0x32c   :  { %v5532_v19 = vpop.f32.mrf.mxu1 }
 0x32d   :  { %v14837_v16 = vadd.f32 %v5532_v19, %v5023_v36  ;;  %v9865_v40 = vpop.f32.mrf.mxu0  ;;  %10280 = vmatmul.mubr.f32.gmra.mxu0 %v17185_v28  ;;  %v17188_v19 = vld [vmem:[#allocation190_spill] sm:$0xff] }
 0x32e   :  { %v9963_v60 = vpop.f32.mrf.mxu1  ;;  %10378 = vmatmul.mubr.f32.gmra.mxu1 %v17181_v50  ;;  %10282 = vmatprep.mubr.f32.mxu0 %v17186_v56 }
 0x32f   :  { %v14842_v45 = vadd.f32 %v9963_v60, %v9859_v61  ;;  %v5083_v39 = vpop.f32.mrf.mxu0  ;;  %10380 = vmatprep.mubr.f32.mxu1 %v17182_v4 }
 0x330   :  { %v5544_v5 = vpop.f32.mrf.mxu1 }
 0x331   :  { %v14845_v31 = vadd.f32 %v5544_v5, %v5043_v20  ;;  %v9868_v53 = vpop.f32.mrf.mxu0  ;;  %10283 = vmatmul.mubr.f32.gmra.mxu0 %v17187_v47  ;;  %v17190_v5 = vld [vmem:[#allocation200_spill] sm:$0xff] }
 0x332   :  { %v9966_v36 = vpop.f32.mrf.mxu1  ;;  %10381 = vmatmul.mubr.f32.gmra.mxu1 %v17183_v30  ;;  %10285 = vmatprep.mubr.f32.mxu0 %v17188_v19 }
 0x333   :  { %v14850_v22 = vadd.f32 %v9966_v36, %v9862_v49  ;;  %v5103_v50 = vpop.f32.mrf.mxu0  ;;  %10383 = vmatprep.mubr.f32.mxu1 %v17184_v12 }
 0x334   :  { %v5556_v61 = vpop.f32.mrf.mxu1 }
 0x335   :  { %v14853_v60 = vadd.f32 %v5556_v61, %v5063_v32  ;;  %v9871_v4 = vpop.f32.mrf.mxu0  ;;  %10286 = vmatmul.mubr.f32.gmra.mxu0 %v17189_v17  ;;  %v17192_v61 = vld [vmem:[#allocation206_spill] sm:$0xff] }
 0x336   :  { %v9969_v20 = vpop.f32.mrf.mxu1  ;;  %10384 = vmatmul.mubr.f32.gmra.mxu1 %v17185_v28  ;;  %10288 = vmatprep.mubr.f32.mxu0 %v17190_v5 }
 0x337   :  { %v14858_v27 = vadd.f32 %v9969_v20, %v9865_v40  ;;  %v5123_v30 = vpop.f32.mrf.mxu0  ;;  %10386 = vmatprep.mubr.f32.mxu1 %v17186_v56 }
 0x338   :  { %v5568_v49 = vpop.f32.mrf.mxu1 }
 0x339   :  { %v14861_v36 = vadd.f32 %v5568_v49, %v5083_v39  ;;  %v9874_v12 = vpop.f32.mrf.mxu0  ;;  %10289 = vmatmul.mubr.f32.gmra.mxu0 %v17191_v8  ;;  %v17194_v49 = vld [vmem:[#allocation212_spill] sm:$0xff] }
 0x33a   :  { %v9972_v32 = vpop.f32.mrf.mxu1  ;;  %10387 = vmatmul.mubr.f32.gmra.mxu1 %v17187_v47  ;;  %10291 = vmatprep.mubr.f32.mxu0 %v17192_v61 }
 0x33b   :  { %v14866_v14 = vadd.f32 %v9972_v32, %v9868_v53  ;;  %v5143_v28 = vpop.f32.mrf.mxu0  ;;  %10389 = vmatprep.mubr.f32.mxu1 %v17188_v19 }
 0x33c   :  { %v5580_v40 = vpop.f32.mrf.mxu1 }
 0x33d   :  { %v14869_v20 = vadd.f32 %v5580_v40, %v5103_v50  ;;  %v9877_v56 = vpop.f32.mrf.mxu0  ;;  %10292 = vmatmul.mubr.f32.gmra.mxu0 %v17193_v23 }
 0x33e   :  { %v9975_v39 = vpop.f32.mrf.mxu1  ;;  %10390 = vmatmul.mubr.f32.gmra.mxu1 %v17189_v17  ;;  %10294 = vmatprep.mubr.f32.mxu0 %v17194_v49 }
 0x33f   :  { %v14874_v21 = vadd.f32 %v9975_v39, %v9871_v4  ;;  %v5163_v47 = vpop.f32.mrf.mxu0  ;;  %10392 = vmatprep.mubr.f32.mxu1 %v17190_v5 }
 0x340   :  { %v5592_v53 = vpop.f32.mrf.mxu1 }
 0x341   :  { %v14877_v32 = vadd.f32 %v5592_v53, %v5123_v30  ;;  %v9880_v19 = vpop.f32.mrf.mxu0  ;;  %10295 = vmatmul.mubr.f32.gmra.mxu0 %v17195_v1 }
 0x342   :  { %v9978_v50 = vpop.f32.mrf.mxu1  ;;  %10393 = vmatmul.mubr.f32.gmra.mxu1 %v17191_v8  ;;  %10297 = vmatprep.mubr.f32.mxu0 %v16956_v2 }
 0x343   :  { %v14882_v40 = vadd.f32 %v9978_v50, %v9874_v12  ;;  %v5183_v17 = vpop.f32.mrf.mxu0  ;;  %10395 = vmatprep.mubr.f32.mxu1 %v17192_v61 }
 0x344   :  { %v5604_v4 = vpop.f32.mrf.mxu1 }
 0x345   :  { %v14885_v39 = vadd.f32 %v5604_v4, %v5143_v28  ;;  %v9883_v5 = vpop.f32.mrf.mxu0  ;;  %10298 = vmatmul.mubr.f32.gmra.mxu0 %v16958_v63 }
 0x346   :  { %v9981_v30 = vpop.f32.mrf.mxu1  ;;  %10396 = vmatmul.mubr.f32.gmra.mxu1 %v17193_v23  ;;  %10300 = vmatprep.mubr.f32.mxu0 %v16816_v29 }
 0x347   :  { %v14890_v53 = vadd.f32 %v9981_v30, %v9877_v56  ;;  %v5203_v8 = vpop.f32.mrf.mxu0  ;;  %10398 = vmatprep.mubr.f32.mxu1 %v17194_v49 }
 0x348   :  { %v5616_v12 = vpop.f32.mrf.mxu1 }
 0x349   :  { %v14893_v50 = vadd.f32 %v5616_v12, %v5163_v47  ;;  %v9886_v61 = vpop.f32.mrf.mxu0  ;;  %10301 = vmatmul.mubr.f32.gmra.mxu0 %v16819_v55 }
 0x34a   :  { %v9984_v28 = vpop.f32.mrf.mxu1  ;;  %10399 = vmatmul.mubr.f32.gmra.mxu1 %v17195_v1  ;;  %10303 = vmatprep.mubr.f32.mxu0 %v16820_v46 }
 0x34b   :  { %v14898_v4 = vadd.f32 %v9984_v28, %v9880_v19  ;;  %v5223_v23 = vpop.f32.mrf.mxu0  ;;  %10401 = vmatprep.mubr.f32.mxu1 %v16956_v2 }
 0x34c   :  { %v5628_v56 = vpop.f32.mrf.mxu1 }
 0x34d   :  { %v14901_v30 = vadd.f32 %v5628_v56, %v5183_v17  ;;  %v9889_v49 = vpop.f32.mrf.mxu0  ;;  %10304 = vmatmul.mubr.f32.gmra.mxu0 %v17196_v43 }
 0x34e   :  { %v9987_v47 = vpop.f32.mrf.mxu1  ;;  %10402 = vmatmul.mubr.f32.gmra.mxu1 %v16958_v63 }
 0x34f   :  { %v14905_v12 = vadd.f32 %v9987_v47, %v9883_v5  ;;  %v5243_v15 = vpop.f32.mrf.mxu0  ;;  %10404 = vmatprep.mubr.f32.mxu1 %v16816_v29 }
 0x350   :  { %v5640_v1 = vpop.f32.mrf.mxu1 }
 0x351   :  { %v14908_v19 = vadd.f32 %v5640_v1, %v5203_v8  ;;  %v10028_v28 = vpop.f32.mrf.mxu0 }
 0x352   :  { %v5766_v2 = vadd.f32 %v10028_v28, %v14738_v41  ;;  %v9990_v37 = vpop.f32.mrf.mxu1  ;;  %10405 = vmatmul.mubr.f32.gmra.mxu1 %v16819_v55 }
 0x353   :  { %v14912_v17 = vadd.f32 %v9990_v37, %v9886_v61  ;;  %v5758_v56 = vpop.f32.mrf.mxu0  ;;  %10407 = vmatprep.mubr.f32.mxu1 %v16820_v46 }
 0x354   :  { %v5759_v63 = vadd.f32 %v5758_v56, %v14741_v9  ;;  %v5652_v5 = vpop.f32.mrf.mxu1 }
 0x355   :  { %v14916_v47 = vadd.f32 %v5652_v5, %v5223_v23  ;;  %v10031_v29 = vpop.f32.mrf.mxu0 }
 0x356   :  { %v5780_v8 = vadd.f32 %v10031_v29, %v14746_v54  ;;  %v9993_v1 = vpop.f32.mrf.mxu1  ;;  %10408 = vmatmul.mubr.f32.gmra.mxu1 %v17196_v43 }
 0x357   :  { %v14920_v41 = vadd.f32 %v9993_v1, %v9889_v49  ;;  %v5772_v28 = vpop.f32.mrf.mxu0 }
 0x358   :  { %v5773_v55 = vadd.f32 %v5772_v28, %v14749_v6  ;;  %v5664_v37 = vpop.f32.mrf.mxu1 }
 0x359   :  { %v14923_v61 = vadd.f32 %v5664_v37, %v5243_v15  ;;  %v10034_v46 = vpop.f32.mrf.mxu0 }
 0x35a   :  { %v5794_v9 = vadd.f32 %v10034_v46, %v14754_v24  ;;  %v10132_v56 = vpop.f32.mrf.mxu1 }
 0x35b   :  { %v14926_v23 = vadd.f32 %v10132_v56, %v5766_v2  ;;  %v5786_v5 = vpop.f32.mrf.mxu0 }
 0x35c   :  { %v5787_v54 = vadd.f32 %v5786_v5, %v14757_v26  ;;  %v6160_v29 = vpop.f32.mrf.mxu1 }
 0x35d   :  { %v14929_v7 = vadd.f32 %v6160_v29, %v5759_v63  ;;  %v10037_v43 = vpop.f32.mrf.mxu0 }
 0x35e   :  { %v5808_v49 = vadd.f32 %v10037_v43, %v14762_v58  ;;  %v10135_v1 = vpop.f32.mrf.mxu1 }
 0x35f   :  { %v14932_v6 = vadd.f32 %v10135_v1, %v5780_v8  ;;  %v5800_v15 = vpop.f32.mrf.mxu0 }
 0x360   :  { %v5801_v28 = vadd.f32 %v5800_v15, %v14765_v38  ;;  %v6176_v37 = vpop.f32.mrf.mxu1 }
 0x361   :  { %v14935_v24 = vadd.f32 %v6176_v37, %v5773_v55  ;;  %v10040_v2 = vpop.f32.mrf.mxu0 }
 0x362   :  { %v5822_v46 = vadd.f32 %v10040_v2, %v14770_v10  ;;  %v10138_v56 = vpop.f32.mrf.mxu1 }
 0x363   :  { %v14938_v26 = vadd.f32 %v10138_v56, %v5794_v9  ;;  %v5814_v63 = vpop.f32.mrf.mxu0 }
 0x364   :  { %v5815_v5 = vadd.f32 %v5814_v63, %v14773_v0  ;;  %v6192_v29 = vpop.f32.mrf.mxu1 }
 0x365   :  { %v14941_v58 = vadd.f32 %v6192_v29, %v5787_v54  ;;  %v10043_v8 = vpop.f32.mrf.mxu0 }
 0x366   :  { %v5836_v43 = vadd.f32 %v10043_v8, %v14778_v11  ;;  %v10141_v1 = vpop.f32.mrf.mxu1 }
 0x367   :  { %v14944_v38 = vadd.f32 %v10141_v1, %v5808_v49  ;;  %v5828_v55 = vpop.f32.mrf.mxu0 }
 0x368   :  { %v5829_v15 = vadd.f32 %v5828_v55, %v14781_v25  ;;  %v6208_v37 = vpop.f32.mrf.mxu1 }
 0x369   :  { %v14947_v10 = vadd.f32 %v6208_v37, %v5801_v28  ;;  %v10046_v9 = vpop.f32.mrf.mxu0 }
 0x36a   :  { %v5850_v2 = vadd.f32 %v10046_v9, %v14786_v52  ;;  %v10144_v56 = vpop.f32.mrf.mxu1 }
 0x36b   :  { %v14950_v0 = vadd.f32 %v10144_v56, %v5822_v46  ;;  %v5842_v54 = vpop.f32.mrf.mxu0 }
 0x36c   :  { %v5843_v63 = vadd.f32 %v5842_v54, %v14789_v44  ;;  %v6224_v29 = vpop.f32.mrf.mxu1 }
 0x36d   :  { %v14953_v11 = vadd.f32 %v6224_v29, %v5815_v5  ;;  %v10049_v49 = vpop.f32.mrf.mxu0 }
 0x36e   :  { %v5864_v8 = vadd.f32 %v10049_v49, %v14794_v33  ;;  %v10147_v1 = vpop.f32.mrf.mxu1 }
 0x36f   :  { %v14956_v25 = vadd.f32 %v10147_v1, %v5836_v43  ;;  %v5856_v28 = vpop.f32.mrf.mxu0 }
 0x370   :  { %v5857_v55 = vadd.f32 %v5856_v28, %v14797_v42  ;;  %v6240_v37 = vpop.f32.mrf.mxu1 }
 0x371   :  { %v14959_v52 = vadd.f32 %v6240_v37, %v5829_v15  ;;  %v10052_v46 = vpop.f32.mrf.mxu0 }
 0x372   :  { %v5878_v9 = vadd.f32 %v10052_v46, %v14802_v48  ;;  %v10150_v56 = vpop.f32.mrf.mxu1 }
 0x373   :  { %v14962_v44 = vadd.f32 %v10150_v56, %v5850_v2  ;;  %v5870_v5 = vpop.f32.mrf.mxu0 }
 0x374   :  { %v5871_v54 = vadd.f32 %v5870_v5, %v14805_v57  ;;  %v6256_v29 = vpop.f32.mrf.mxu1 }
 0x375   :  { %v14965_v33 = vadd.f32 %v6256_v29, %v5843_v63  ;;  %v10055_v43 = vpop.f32.mrf.mxu0 }
 0x376   :  { %v5892_v49 = vadd.f32 %v10055_v43, %v14810_v62  ;;  %v10153_v1 = vpop.f32.mrf.mxu1 }
 0x377   :  { %v14968_v42 = vadd.f32 %v10153_v1, %v5864_v8  ;;  %v5884_v15 = vpop.f32.mrf.mxu0 }
 0x378   :  { %v5885_v28 = vadd.f32 %v5884_v15, %v14813_v34  ;;  %v6272_v37 = vpop.f32.mrf.mxu1 }
 0x379   :  { %v14971_v48 = vadd.f32 %v6272_v37, %v5857_v55  ;;  %v10058_v2 = vpop.f32.mrf.mxu0 }
 0x37a   :  { %v5906_v46 = vadd.f32 %v10058_v2, %v14818_v18  ;;  %v10156_v56 = vpop.f32.mrf.mxu1 }
 0x37b   :  { %v14974_v57 = vadd.f32 %v10156_v56, %v5878_v9  ;;  %v5898_v63 = vpop.f32.mrf.mxu0 }
 0x37c   :  { %v5899_v5 = vadd.f32 %v5898_v63, %v14821_v3  ;;  %v6288_v29 = vpop.f32.mrf.mxu1 }
 0x37d   :  { %v14977_v62 = vadd.f32 %v6288_v29, %v5871_v54  ;;  %v10061_v8 = vpop.f32.mrf.mxu0 }
 0x37e   :  { %v5920_v43 = vadd.f32 %v10061_v8, %v14826_v13  ;;  %v10159_v1 = vpop.f32.mrf.mxu1 }
 0x37f   :  { %v14980_v34 = vadd.f32 %v10159_v1, %v5892_v49  ;;  %v5912_v55 = vpop.f32.mrf.mxu0 }
 0x380   :  { %v5913_v15 = vadd.f32 %v5912_v55, %v14829_v59  ;;  %v6304_v37 = vpop.f32.mrf.mxu1 }
 0x381   :  { %v14983_v18 = vadd.f32 %v6304_v37, %v5885_v28  ;;  %v10064_v9 = vpop.f32.mrf.mxu0 }
 0x382   :  { %v5934_v2 = vadd.f32 %v10064_v9, %v14834_v51  ;;  %v10162_v56 = vpop.f32.mrf.mxu1 }
 0x383   :  { %v14986_v3 = vadd.f32 %v10162_v56, %v5906_v46  ;;  %v5926_v54 = vpop.f32.mrf.mxu0 }
 0x384   :  { %v5927_v63 = vadd.f32 %v5926_v54, %v14837_v16  ;;  %v6320_v29 = vpop.f32.mrf.mxu1 }
 0x385   :  { %v14989_v13 = vadd.f32 %v6320_v29, %v5899_v5  ;;  %v10067_v49 = vpop.f32.mrf.mxu0 }
 0x386   :  { %v5948_v8 = vadd.f32 %v10067_v49, %v14842_v45  ;;  %v10165_v1 = vpop.f32.mrf.mxu1 }
 0x387   :  { %v14992_v59 = vadd.f32 %v10165_v1, %v5920_v43  ;;  %v5940_v28 = vpop.f32.mrf.mxu0 }
 0x388   :  { %v5941_v55 = vadd.f32 %v5940_v28, %v14845_v31  ;;  %v6336_v37 = vpop.f32.mrf.mxu1 }
 0x389   :  { %v14995_v51 = vadd.f32 %v6336_v37, %v5913_v15  ;;  %v10070_v46 = vpop.f32.mrf.mxu0 }
 0x38a   :  { %v5962_v9 = vadd.f32 %v10070_v46, %v14850_v22  ;;  %v10168_v56 = vpop.f32.mrf.mxu1 }
 0x38b   :  { %v14998_v16 = vadd.f32 %v10168_v56, %v5934_v2  ;;  %v5954_v5 = vpop.f32.mrf.mxu0 }
 0x38c   :  { %v5955_v54 = vadd.f32 %v5954_v5, %v14853_v60  ;;  %v6352_v29 = vpop.f32.mrf.mxu1 }
 0x38d   :  { %v15001_v45 = vadd.f32 %v6352_v29, %v5927_v63  ;;  %v10073_v43 = vpop.f32.mrf.mxu0 }
 0x38e   :  { %v5976_v49 = vadd.f32 %v10073_v43, %v14858_v27  ;;  %v10171_v1 = vpop.f32.mrf.mxu1 }
 0x38f   :  { %v15004_v31 = vadd.f32 %v10171_v1, %v5948_v8  ;;  %v5968_v15 = vpop.f32.mrf.mxu0 }
 0x390   :  { %v5969_v28 = vadd.f32 %v5968_v15, %v14861_v36  ;;  %v6368_v37 = vpop.f32.mrf.mxu1 }
 0x391   :  { %v15007_v22 = vadd.f32 %v6368_v37, %v5941_v55  ;;  %v10076_v2 = vpop.f32.mrf.mxu0 }
 0x392   :  { %v5990_v46 = vadd.f32 %v10076_v2, %v14866_v14  ;;  %v10174_v56 = vpop.f32.mrf.mxu1 }
 0x393   :  { %v15010_v60 = vadd.f32 %v10174_v56, %v5962_v9  ;;  %v5982_v63 = vpop.f32.mrf.mxu0 }
 0x394   :  { %v5983_v5 = vadd.f32 %v5982_v63, %v14869_v20  ;;  %v6384_v29 = vpop.f32.mrf.mxu1 }
 0x395   :  { %v15013_v27 = vadd.f32 %v6384_v29, %v5955_v54  ;;  %v10079_v8 = vpop.f32.mrf.mxu0 }
 0x396   :  { %v6004_v43 = vadd.f32 %v10079_v8, %v14874_v21  ;;  %v10177_v1 = vpop.f32.mrf.mxu1 }
 0x397   :  { %v15016_v36 = vadd.f32 %v10177_v1, %v5976_v49  ;;  %v5996_v55 = vpop.f32.mrf.mxu0 }
 0x398   :  { %v5997_v15 = vadd.f32 %v5996_v55, %v14877_v32  ;;  %v6400_v37 = vpop.f32.mrf.mxu1 }
 0x399   :  { %v15019_v14 = vadd.f32 %v6400_v37, %v5969_v28  ;;  %v10082_v9 = vpop.f32.mrf.mxu0 }
 0x39a   :  { %v6018_v2 = vadd.f32 %v10082_v9, %v14882_v40  ;;  %v10180_v56 = vpop.f32.mrf.mxu1 }
 0x39b   :  { %v15022_v20 = vadd.f32 %v10180_v56, %v5990_v46  ;;  %v6010_v54 = vpop.f32.mrf.mxu0 }
 0x39c   :  { %v6011_v63 = vadd.f32 %v6010_v54, %v14885_v39  ;;  %v6416_v29 = vpop.f32.mrf.mxu1 }
 0x39d   :  { %v15025_v21 = vadd.f32 %v6416_v29, %v5983_v5  ;;  %v10085_v49 = vpop.f32.mrf.mxu0 }
 0x39e   :  { %v6032_v8 = vadd.f32 %v10085_v49, %v14890_v53  ;;  %v10183_v1 = vpop.f32.mrf.mxu1 }
 0x39f   :  { %v15028_v32 = vadd.f32 %v10183_v1, %v6004_v43  ;;  %v6024_v28 = vpop.f32.mrf.mxu0 }
 0x3a0   :  { %v6025_v55 = vadd.f32 %v6024_v28, %v14893_v50  ;;  %v6432_v37 = vpop.f32.mrf.mxu1 }
 0x3a1   :  { %v15031_v40 = vadd.f32 %v6432_v37, %v5997_v15  ;;  %v10088_v46 = vpop.f32.mrf.mxu0 }
 0x3a2   :  { %v6046_v9 = vadd.f32 %v10088_v46, %v14898_v4  ;;  %v10186_v56 = vpop.f32.mrf.mxu1 }
 0x3a3   :  { %v15034_v39 = vadd.f32 %v10186_v56, %v6018_v2  ;;  %v6038_v5 = vpop.f32.mrf.mxu0 }
 0x3a4   :  { %v6039_v54 = vadd.f32 %v6038_v5, %v14901_v30  ;;  %v6448_v29 = vpop.f32.mrf.mxu1 }
 0x3a5   :  { %v15037_v53 = vadd.f32 %v6448_v29, %v6011_v63  ;;  %v10091_v43 = vpop.f32.mrf.mxu0 }
 0x3a6   :  { %v6060_v49 = vadd.f32 %v10091_v43, %v14905_v12  ;;  %v10189_v1 = vpop.f32.mrf.mxu1 }
 0x3a7   :  { %v15040_v50 = vadd.f32 %v10189_v1, %v6032_v8  ;;  %v6052_v15 = vpop.f32.mrf.mxu0 }
 0x3a8   :  { %v6053_v28 = vadd.f32 %v6052_v15, %v14908_v19  ;;  %v6464_v37 = vpop.f32.mrf.mxu1 }
 0x3a9   :  { %v15043_v4 = vadd.f32 %v6464_v37, %v6025_v55  ;;  %v10094_v2 = vpop.f32.mrf.mxu0 }
 0x3aa   :  { %v6074_v46 = vadd.f32 %v10094_v2, %v14912_v17  ;;  %v10192_v56 = vpop.f32.mrf.mxu1 }
 0x3ab   :  { %v15046_v30 = vadd.f32 %v10192_v56, %v6046_v9  ;;  %v6066_v63 = vpop.f32.mrf.mxu0 }
 0x3ac   :  { %v6067_v5 = vadd.f32 %v6066_v63, %v14916_v47  ;;  %v6480_v29 = vpop.f32.mrf.mxu1 }
 0x3ad   :  { %v15049_v12 = vadd.f32 %v6480_v29, %v6039_v54  ;;  %v10097_v8 = vpop.f32.mrf.mxu0 }
 0x3ae   :  { %v6088_v43 = vadd.f32 %v10097_v8, %v14920_v41  ;;  %v10195_v1 = vpop.f32.mrf.mxu1 }
 0x3af   :  { %17197 = vst [vmem:[#allocation48_spill] sm:$0xff] %v15049_v12  ;;  %v15052_v19 = vadd.f32 %v10195_v1, %v6060_v49  ;;  %v6080_v55 = vpop.f32.mrf.mxu0 }
 0x3b0   :  { %v6081_v15 = vadd.f32 %v6080_v55, %v14923_v61  ;;  %v6496_v37 = vpop.f32.mrf.mxu1 }
 0x3b1   :  { %17198 = vst [vmem:[#allocation284_spill] sm:$0xff] %v15052_v19  ;;  %v15055_v17 = vadd.f32 %v6496_v37, %v6053_v28  ;;  %v10236_v9 = vpop.f32.mrf.mxu0 }
 0x3b2   :  { %v10198_v2 = vpop.f32.mrf.mxu1  ;;  %v6646_v1 = vadd.f32 %v10236_v9, %v14926_v23  ;;  %v17204_v23 = vld [vmem:[#allocation191_spill] sm:$0xff] }
 0x3b3   :  { %17199 = vst [vmem:[#allocation66_spill] sm:$0xff] %v15055_v17  ;;  %v15057_v56 = vadd.f32 %v10198_v2, %v6074_v46  ;;  %v6639_v47 = vpop.f32.mrf.mxu0  ;;  %v17223_v17 = vld [vmem:[#allocation76_spill] sm:$0xff] }
 0x3b4   :  { %v6512_v63 = vpop.f32.mrf.mxu1  ;;  %v6640_v37 = vadd.f32 %v6639_v47, %v14929_v7  ;;  %v17205_v47 = vld [vmem:[#allocation194_spill] sm:$0xff] }
 0x3b5   :  { %17200 = vst [vmem:[#allocation285_spill] sm:$0xff] %v15057_v56  ;;  %v15059_v54 = vadd.f32 %v6512_v63, %v6067_v5  ;;  %v10239_v29 = vpop.f32.mrf.mxu0 }
 0x3b6   :  { %v10201_v12 = vpop.f32.mrf.mxu1  ;;  %v6658_v5 = vadd.f32 %v10239_v29, %v14932_v6 }
 0x3b7   :  { %17201 = vst [vmem:[#allocation233_spill] sm:$0xff] %v15059_v54  ;;  %v15061_v41 = vadd.f32 %v10201_v12, %v6088_v43  ;;  %v6651_v49 = vpop.f32.mrf.mxu0 }
 0x3b8   :  { %v6528_v8 = vpop.f32.mrf.mxu1  ;;  %v6652_v54 = vadd.f32 %v6651_v49, %v14935_v24 }
 0x3b9   :  { %17202 = vst [vmem:[#allocation286_spill] sm:$0xff] %v15061_v41  ;;  %v15064_v61 = vadd.f32 %v6528_v8, %v6081_v15  ;;  %v10242_v28 = vpop.f32.mrf.mxu0 }
 0x3ba   :  { %v10340_v55 = vpop.f32.mrf.mxu1  ;;  %v6670_v7 = vadd.f32 %v10242_v28, %v14938_v26 }
 0x3bb   :  { %17203 = vst [vmem:[#allocation235_spill] sm:$0xff] %v15064_v61  ;;  %v6999_v46 = vadd.f32 %v10340_v55, %v6646_v1  ;;  %v6663_v2 = vpop.f32.mrf.mxu0  ;;  %v17206_v55 = vld [vmem:[#allocation45_spill] sm:$0xff] }
 0x3bc   :  { %v6992_v56 = vpop.f32.mrf.mxu1 }
 0x3bd   :  { %v15069_v63 = vsub.f32 %v16971_v35, %v6999_v46  ;;  %v6993_v12 = vadd.f32 %v6992_v56, %v6640_v37  ;;  %v10245_v43 = vpop.f32.mrf.mxu0  ;;  %v6664_v56 = vadd.f32 %v6663_v2, %v14941_v58 }
 0x3be   :  { %v10343_v41 = vpop.f32.mrf.mxu1 }
 0x3bf   :  { %v15073_v15 = vsub.f32 %v17204_v23, %v6993_v12  ;;  %v7011_v9 = vadd.f32 %v10343_v41, %v6658_v5  ;;  %v6675_v8 = vpop.f32.mrf.mxu0  ;;  %v6682_v41 = vadd.f32 %v10245_v43, %v14944_v38  ;;  %v17207_v5 = vld [vmem:[#allocation201_spill] sm:$0xff] }
 0x3c0   :  { %v7004_v61 = vpop.f32.mrf.mxu1 }
 0x3c1   :  { %v15077_v1 = vsub.f32 %v17205_v47, %v7011_v9  ;;  %v7005_v6 = vadd.f32 %v7004_v61, %v6652_v54  ;;  %v10248_v29 = vpop.f32.mrf.mxu0  ;;  %v6676_v54 = vadd.f32 %v6675_v8, %v14947_v10  ;;  %v17208_v61 = vld [vmem:[#allocation203_spill] sm:$0xff] }
 0x3c2   :  { %v10346_v35 = vpop.f32.mrf.mxu1 }
 0x3c3   :  { %v15081_v37 = vsub.f32 %v17206_v55, %v7005_v6  ;;  %v7023_v24 = vadd.f32 %v10346_v35, %v6670_v7  ;;  %v6687_v49 = vpop.f32.mrf.mxu0  ;;  %v6694_v7 = vadd.f32 %v10248_v29, %v14950_v0  ;;  %v17209_v6 = vld [vmem:[#allocation38_spill] sm:$0xff] }
 0x3c4   :  { %v7016_v46 = vpop.f32.mrf.mxu1 }
 0x3c5   :  { %v15085_v12 = vsub.f32 %v17207_v5, %v7023_v24  ;;  %v7017_v26 = vadd.f32 %v7016_v46, %v6664_v56  ;;  %v10251_v28 = vpop.f32.mrf.mxu0  ;;  %v6688_v56 = vadd.f32 %v6687_v49, %v14953_v11  ;;  %v17210_v24 = vld [vmem:[#allocation56_spill] sm:$0xff] }
 0x3c6   :  { %v10349_v23 = vpop.f32.mrf.mxu1 }
 0x3c7   :  { %v15089_v9 = vsub.f32 %v17208_v61, %v7017_v26  ;;  %v7035_v58 = vadd.f32 %v10349_v23, %v6682_v41  ;;  %v6699_v2 = vpop.f32.mrf.mxu0  ;;  %v6706_v41 = vadd.f32 %v10251_v28, %v14956_v25  ;;  %v17211_v26 = vld [vmem:[#allocation57_spill] sm:$0xff] }
 0x3c8   :  { %v7028_v47 = vpop.f32.mrf.mxu1 }
 0x3c9   :  { %v15093_v35 = vsub.f32 %v17209_v6, %v7035_v58  ;;  %v7029_v38 = vadd.f32 %v7028_v47, %v6676_v54  ;;  %v10254_v43 = vpop.f32.mrf.mxu0  ;;  %v6700_v54 = vadd.f32 %v6699_v2, %v14959_v52  ;;  %v17212_v58 = vld [vmem:[#allocation44_spill] sm:$0xff] }
 0x3ca   :  { %v10352_v55 = vpop.f32.mrf.mxu1 }
 0x3cb   :  { %v15097_v46 = vsub.f32 %v17210_v24, %v7029_v38  ;;  %v7047_v10 = vadd.f32 %v10352_v55, %v6694_v7  ;;  %v6711_v8 = vpop.f32.mrf.mxu0  ;;  %v6718_v7 = vadd.f32 %v10254_v43, %v14962_v44  ;;  %v17213_v38 = vld [vmem:[#allocation218_spill] sm:$0xff] }
 0x3cc   :  { %v7040_v5 = vpop.f32.mrf.mxu1 }
 0x3cd   :  { %v15101_v23 = vsub.f32 %v17211_v26, %v7047_v10  ;;  %v7041_v0 = vadd.f32 %v7040_v5, %v6688_v56  ;;  %v10257_v29 = vpop.f32.mrf.mxu0  ;;  %v6712_v56 = vadd.f32 %v6711_v8, %v14965_v33  ;;  %v17214_v10 = vld [vmem:[#allocation222_spill] sm:$0xff] }
 0x3ce   :  { %v10355_v61 = vpop.f32.mrf.mxu1 }
 0x3cf   :  { %v15105_v47 = vsub.f32 %v17212_v58, %v7041_v0  ;;  %v7059_v11 = vadd.f32 %v10355_v61, %v6706_v41  ;;  %v6723_v49 = vpop.f32.mrf.mxu0  ;;  %v6730_v41 = vadd.f32 %v10257_v29, %v14968_v42  ;;  %v17215_v0 = vld [vmem:[#allocation28_spill] sm:$0xff] }
 0x3d0   :  { %v7052_v6 = vpop.f32.mrf.mxu1 }
 0x3d1   :  { %v15109_v55 = vsub.f32 %v17213_v38, %v7059_v11  ;;  %v7053_v25 = vadd.f32 %v7052_v6, %v6700_v54  ;;  %v10260_v28 = vpop.f32.mrf.mxu0  ;;  %v6724_v54 = vadd.f32 %v6723_v49, %v14971_v48  ;;  %v17216_v11 = vld [vmem:[#allocation49_spill] sm:$0xff] }
 0x3d2   :  { %v10358_v24 = vpop.f32.mrf.mxu1 }
 0x3d3   :  { %v15113_v5 = vsub.f32 %v17214_v10, %v7053_v25  ;;  %v7071_v52 = vadd.f32 %v10358_v24, %v6718_v7  ;;  %v6735_v2 = vpop.f32.mrf.mxu0  ;;  %v6742_v7 = vadd.f32 %v10260_v28, %v14974_v57  ;;  %v17217_v25 = vld [vmem:[#allocation227_spill] sm:$0xff]  ;;  %v17220_v57 = vld [vmem:[#allocation274_spill] sm:$0xff] }
 0x3d4   :  { %v7064_v26 = vpop.f32.mrf.mxu1 }
 0x3d5   :  { %v15117_v61 = vsub.f32 %v17215_v0, %v7071_v52  ;;  %v7065_v44 = vadd.f32 %v7064_v26, %v6712_v56  ;;  %v10263_v43 = vpop.f32.mrf.mxu0  ;;  %v6736_v56 = vadd.f32 %v6735_v2, %v14977_v62  ;;  %v17218_v52 = vld [vmem:[#allocation64_spill] sm:$0xff]  ;;  %v7359_v62 = vmul.f32 %v15069_v63, %v15069_v63 }
 0x3d6   :  { %v10361_v58 = vpop.f32.mrf.mxu1  ;;  %v17224_v63 = vld [vmem:[#allocation276_spill] sm:$0xff] }
 0x3d7   :  { %v15121_v6 = vsub.f32 %v17216_v11, %v7065_v44  ;;  %v7083_v33 = vadd.f32 %v10361_v58, %v6730_v41  ;;  %v6747_v8 = vpop.f32.mrf.mxu0  ;;  %v17219_v44 = vld [vmem:[#allocation124_spill] sm:$0xff]  ;;  %v6754_v58 = vadd.f32 %v10263_v43, %v14980_v34  ;;  %v7329_v34 = vmul.f32 %v17223_v17, %v17223_v17 }
 0x3d8   :  { %v7076_v38 = vpop.f32.mrf.mxu1  ;;  %v7327_v41 = vmul.f32 %v17219_v44, %v17219_v44  ;;  %v7358_v43 = vmul.f32 %v15073_v15, %v15073_v15 }
 0x3d9   :  { %v15125_v24 = vsub.f32 %v17217_v25, %v7083_v33  ;;  %v7077_v42 = vadd.f32 %v7076_v38, %v6724_v54  ;;  %v10266_v29 = vpop.f32.mrf.mxu0  ;;  %v17221_v54 = vld [vmem:[#allocation264_spill] sm:$0xff] }
 0x3da   :  { %v10364_v10 = vpop.f32.mrf.mxu1  ;;  %v7326_v38 = vmul.f32 %v17221_v54, %v17221_v54 }
 0x3db   :  { %v15129_v26 = vsub.f32 %v17218_v52, %v7077_v42  ;;  %v7095_v48 = vadd.f32 %v10364_v10, %v6742_v7  ;;  %v6759_v49 = vpop.f32.mrf.mxu0  ;;  %v6748_v7 = vadd.f32 %v6747_v8, %v14983_v18  ;;  %v17222_v42 = vld [vmem:[#allocation147_spill] sm:$0xff] }
 0x3dc   :  { %v7088_v0 = vpop.f32.mrf.mxu1  ;;  %v17225_v8 = vld [vmem:[#allocation127_spill] sm:$0xff]  ;;  %v6760_v17 = vadd.f32 %v6759_v49, %v14989_v13 }
 0x3dd   :  { %v7311_v28 = vsub.f32 %v17220_v57, %v7095_v48  ;;  %v7089_v11 = vadd.f32 %v7088_v0, %v6736_v56  ;;  %v10269_v33 = vpop.f32.mrf.mxu0  ;;  %v6766_v56 = vadd.f32 %v10266_v29, %v14986_v3 }
 0x3de   :  { %v10367_v2 = vpop.f32.mrf.mxu1 }
 0x3df   :  { %v7343_v25 = vadd.f32 %v7327_v41, %v7311_v28  ;;  %v7310_v10 = vsub.f32 %v17222_v42, %v7089_v11  ;;  %v7107_v52 = vadd.f32 %v10367_v2, %v6754_v58  ;;  %v6771_v44 = vpop.f32.mrf.mxu0  ;;  %v7328_v41 = vmul.f32 %v17225_v8, %v17225_v8  ;;  %v17226_v2 = vld [vmem:[#allocation258_spill] sm:$0xff] }
 0x3e0   :  { %v7100_v48 = vpop.f32.mrf.mxu1  ;;  %v7361_v58 = vmul.f32 %v15077_v1, %v15077_v1  ;;  %v6778_v42 = vadd.f32 %v10269_v33, %v14992_v59  ;;  %v17231_v59 = vld [vmem:[#allocation30_spill] sm:$0xff] }
 0x3e1   :  { %v7375_v0 = vsub.f32 %v7343_v25, %v7359_v62  ;;  %v7342_v57 = vadd.f32 %v7326_v38, %v7310_v10  ;;  %v7313_v54 = vsub.f32 %v17224_v63, %v7107_v52  ;;  %v7101_v19 = vadd.f32 %v7100_v48, %v6748_v7  ;;  %v10272_v18 = vpop.f32.mrf.mxu0  ;;  %v17227_v38 = vld [vmem:[#allocation31_spill] sm:$0xff]  ;;  %v17228_v52 = vld [vmem:[#allocation52_spill] sm:$0xff] }
 0x3e2   :  { %v10370_v28 = vpop.f32.mrf.mxu1  ;;  %v7331_v25 = vmul.f32 %v17227_v38, %v17227_v38  ;;  %v7360_v7 = vmul.f32 %v15081_v37, %v15081_v37  ;;  %v7363_v63 = vmul.f32 %v15085_v12, %v15085_v12  ;;  %v6772_v37 = vadd.f32 %v6771_v44, %v14995_v51  ;;  %v17234_v51 = vld [vmem:[#allocation27_spill] sm:$0xff] }
 0x3e3   :  { %v7374_v11 = vsub.f32 %v7342_v57, %v7358_v43  ;;  %v7345_v15 = vadd.f32 %v7329_v34, %v7313_v54  ;;  %v7312_v3 = vsub.f32 %v17226_v2, %v7101_v19  ;;  %v7119_v29 = vadd.f32 %v10370_v28, %v6766_v56  ;;  %v6783_v62 = vpop.f32.mrf.mxu0  ;;  %v17229_v43 = vld [vmem:[#allocation151_spill] sm:$0xff]  ;;  %v17230_v56 = vld [vmem:[#allocation266_spill] sm:$0xff] }
 0x3e4   :  { %v7112_v10 = vpop.f32.mrf.mxu1  ;;  %v15159_v1 = vmul.f32 %v7375_v0, %v17228_v52  ;;  %v7330_v57 = vmul.f32 %v17230_v56, %v17230_v56  ;;  %v6790_v12 = vadd.f32 %v10272_v18, %v14998_v16  ;;  %v17237_v16 = vld [vmem:[#allocation71_spill] sm:$0xff] }
 0x3e5   :  { %v7377_v13 = vsub.f32 %v7345_v15, %v7361_v58  ;;  %v7344_v49 = vadd.f32 %v7328_v41, %v7312_v3  ;;  %v7315_v34 = vsub.f32 %v17229_v43, %v7119_v29  ;;  %v7113_v48 = vadd.f32 %v7112_v10, %v6760_v17  ;;  %v10275_v19 = vpop.f32.mrf.mxu0  ;;  %v17232_v58 = vld [vmem:[#allocation153_spill] sm:$0xff]  ;;  %v17233_v17 = vld [vmem:[#allocation132_spill] sm:$0xff]  ;;  %v17238_v56 = vld [vmem:[#allocation159_spill] sm:$0xff] }
 0x3e6   :  { %v10373_v54 = vpop.f32.mrf.mxu1  ;;  %v15168_v33 = vmul.f32 %v7374_v11, %v17231_v59  ;;  %v7333_v2 = vmul.f32 %v17233_v17, %v17233_v17  ;;  %v7362_v3 = vmul.f32 %v15089_v9, %v15089_v9  ;;  %v7365_v43 = vmul.f32 %v15093_v35, %v15093_v35 }
 0x3e7   :  { %v7376_v0 = vsub.f32 %v7344_v49, %v7360_v7  ;;  %v7347_v8 = vadd.f32 %v7331_v25, %v7315_v34  ;;  %v7314_v41 = vsub.f32 %v17232_v58, %v7113_v48  ;;  %v7131_v28 = vadd.f32 %v10373_v54, %v6778_v42  ;;  %v6795_v15 = vpop.f32.mrf.mxu0  ;;  %v17235_v7 = vld [vmem:[#allocation259_spill] sm:$0xff] }
 0x3e8   :  { %v7124_v29 = vpop.f32.mrf.mxu1  ;;  %v15177_v44 = vmul.f32 %v7377_v13, %v17234_v51  ;;  %v17236_v42 = vld [vmem:[#allocation267_spill] sm:$0xff]  ;;  %v6784_v9 = vadd.f32 %v6783_v62, %v15001_v45  ;;  %v6802_v35 = vadd.f32 %v10275_v19, %v15004_v31  ;;  %v17240_v45 = vld [vmem:[#allocation61_spill] sm:$0xff]  ;;  %v7367_v51 = vmul.f32 %v15101_v23, %v15101_v23 }
 0x3e9   :  { %v7379_v11 = vsub.f32 %v7347_v8, %v7363_v63  ;;  %v7346_v38 = vadd.f32 %v7330_v57, %v7314_v41  ;;  %v7317_v25 = vsub.f32 %v17235_v7, %v7131_v28  ;;  %v7125_v10 = vadd.f32 %v7124_v29, %v6772_v37  ;;  %v10278_v52 = vpop.f32.mrf.mxu0  ;;  %v17239_v37 = vld [vmem:[#allocation16_spill] sm:$0xff]  ;;  %v17243_v31 = vld [vmem:[#allocation73_spill] sm:$0xff] }
 0x3ea   :  { %v7332_v49 = vmul.f32 %v17236_v42, %v17236_v42  ;;  %v10376_v34 = vpop.f32.mrf.mxu1  ;;  %v15186_v18 = vmul.f32 %v7376_v0, %v17237_v16  ;;  %v7335_v59 = vmul.f32 %v17239_v37, %v17239_v37  ;;  %v7364_v8 = vmul.f32 %v15097_v46, %v15097_v46  ;;  %v17241_v28 = vld [vmem:[#allocation164_spill] sm:$0xff] }
 0x3eb   :  { %v7378_v13 = vsub.f32 %v7346_v38, %v7362_v3  ;;  %v7349_v48 = vadd.f32 %v7333_v2, %v7317_v25  ;;  %v7316_v57 = vsub.f32 %v17238_v56, %v7125_v10  ;;  %v7143_v63 = vadd.f32 %v10376_v34, %v6790_v12  ;;  %v6807_v54 = vpop.f32.mrf.mxu0  ;;  %v17242_v12 = vld [vmem:[#allocation138_spill] sm:$0xff]  ;;  %v17247_v56 = vld [vmem:[#allocation167_spill] sm:$0xff] }
 0x3ec   :  { %v7136_v58 = vpop.f32.mrf.mxu1  ;;  %v15195_v62 = vmul.f32 %v7379_v11, %v17240_v45  ;;  %v7334_v29 = vmul.f32 %v17242_v12, %v17242_v12  ;;  %v6796_v46 = vadd.f32 %v6795_v15, %v15007_v22  ;;  %v17244_v25 = vld [vmem:[#allocation262_spill] sm:$0xff]  ;;  %v7366_v34 = vmul.f32 %v15105_v47, %v15105_v47  ;;  %v17246_v22 = vld [vmem:[#allocation29_spill] sm:$0xff]  ;;  %v17251_v12 = vld [vmem:[#allocation140_spill] sm:$0xff] }
 0x3ed   :  { %v7381_v0 = vsub.f32 %v7349_v48, %v7365_v43  ;;  %v7348_v41 = vadd.f32 %v7332_v49, %v7316_v57  ;;  %v7319_v17 = vsub.f32 %v17241_v28, %v7143_v63  ;;  %v7137_v2 = vadd.f32 %v7136_v58, %v6784_v9  ;;  %v10281_v3 = vpop.f32.mrf.mxu0  ;;  %v17245_v43 = vld [vmem:[#allocation46_spill] sm:$0xff] }
 0x3ee   :  { %v10379_v38 = vpop.f32.mrf.mxu1  ;;  %v15204_v19 = vmul.f32 %v7378_v13, %v17243_v31  ;;  %v7337_v9 = vmul.f32 %v17245_v43, %v17245_v43  ;;  %v6814_v23 = vadd.f32 %v10278_v52, %v15010_v60  ;;  %v6808_v47 = vadd.f32 %v6807_v54, %v15013_v27  ;;  %v17249_v60 = vld [vmem:[#allocation34_spill] sm:$0xff]  ;;  %v17252_v27 = vld [vmem:[#allocation69_spill] sm:$0xff] }
 0x3ef   :  { %v7380_v11 = vsub.f32 %v7348_v41, %v7364_v8  ;;  %v7351_v7 = vadd.f32 %v7335_v59, %v7319_v17  ;;  %v7318_v10 = vsub.f32 %v17244_v25, %v7137_v2  ;;  %v7155_v42 = vadd.f32 %v10379_v38, %v6802_v35  ;;  %v6819_v49 = vpop.f32.mrf.mxu0  ;;  %v17248_v59 = vld [vmem:[#allocation270_spill] sm:$0xff]  ;;  %v17250_v41 = vld [vmem:[#allocation172_spill] sm:$0xff] }
 0x3f0   :  { %v7148_v16 = vpop.f32.mrf.mxu1  ;;  %v15213_v15 = vmul.f32 %v7381_v0, %v17246_v22  ;;  %v7336_v8 = vmul.f32 %v17248_v59, %v17248_v59  ;;  %v7369_v35 = vmul.f32 %v15109_v55, %v15109_v55  ;;  %v6826_v55 = vadd.f32 %v10281_v3, %v15016_v36  ;;  %v17255_v36 = vld [vmem:[#allocation75_spill] sm:$0xff]  ;;  %v17256_v22 = vld [vmem:[#allocation178_spill] sm:$0xff] }
 0x3f1   :  { %v7383_v13 = vsub.f32 %v7351_v7, %v7367_v51  ;;  %v7350_v48 = vadd.f32 %v7334_v29, %v7318_v10  ;;  %v7321_v57 = vsub.f32 %v17247_v56, %v7155_v42  ;;  %v7149_v63 = vadd.f32 %v7148_v16, %v6796_v46  ;;  %v10284_v37 = vpop.f32.mrf.mxu0  ;;  %v17254_v42 = vld [vmem:[#allocation272_spill] sm:$0xff] }
 0x3f2   :  { %v10382_v58 = vpop.f32.mrf.mxu1  ;;  %v15222_v52 = vmul.f32 %v7380_v11, %v17249_v60  ;;  %v7339_v29 = vmul.f32 %v17251_v12, %v17251_v12  ;;  %v7368_v51 = vmul.f32 %v15113_v5, %v15113_v5  ;;  %v17253_v11 = vld [vmem:[#allocation265_spill] sm:$0xff]  ;;  %v7338_v43 = vmul.f32 %v17254_v42, %v17254_v42 }
 0x3f3   :  { %v7382_v45 = vsub.f32 %v7350_v48, %v7366_v34  ;;  %v7353_v0 = vadd.f32 %v7337_v9, %v7321_v57  ;;  %v7320_v28 = vsub.f32 %v17250_v41, %v7149_v63  ;;  %v7167_v17 = vadd.f32 %v10382_v58, %v6814_v23  ;;  %v6831_v2 = vpop.f32.mrf.mxu0  ;;  %v17257_v57 = vld [vmem:[#allocation20_spill] sm:$0xff]  ;;  %v17260_v41 = vld [vmem:[#allocation145_spill] sm:$0xff] }
 0x3f4   :  { %v7160_v46 = vpop.f32.mrf.mxu1  ;;  %v15231_v54 = vmul.f32 %v7383_v13, %v17252_v27  ;;  %v7371_v9 = vmul.f32 %v15117_v61, %v15117_v61  ;;  %v6820_v5 = vadd.f32 %v6819_v49, %v15019_v14  ;;  %v7341_v63 = vmul.f32 %v17257_v57, %v17257_v57  ;;  %v17258_v14 = vld [vmem:[#allocation13_spill] sm:$0xff]  ;;  %v17259_v58 = vld [vmem:[#allocation180_spill] sm:$0xff] }
 0x3f5   :  { %v7385_v38 = vsub.f32 %v7353_v0, %v7369_v35  ;;  %v7352_v31 = vadd.f32 %v7336_v8, %v7320_v28  ;;  %v7323_v7 = vsub.f32 %v17253_v11, %v7167_v17  ;;  %v7161_v25 = vadd.f32 %v7160_v46, %v6808_v47  ;;  %v10287_v10 = vpop.f32.mrf.mxu0  ;;  %v17264_v42 = vld [vmem:[#allocation185_spill] sm:$0xff] }
 0x3f6   :  { %v10385_v34 = vpop.f32.mrf.mxu1  ;;  %v15240_v3 = vmul.f32 %v7382_v45, %v17255_v36  ;;  %v7370_v59 = vmul.f32 %v15121_v6, %v15121_v6  ;;  %v6838_v61 = vadd.f32 %v10284_v37, %v15022_v20  ;;  %v7340_v28 = vmul.f32 %v17260_v41, %v17260_v41  ;;  %v17261_v20 = vld [vmem:[#allocation32_spill] sm:$0xff] }
 0x3f7   :  { %v7384_v23 = vsub.f32 %v7352_v31, %v7368_v51  ;;  %v7355_v16 = vadd.f32 %v7339_v29, %v7323_v7  ;;  %v7322_v13 = vsub.f32 %v17256_v22, %v7161_v25  ;;  %v7179_v48 = vadd.f32 %v10385_v34, %v6826_v55  ;;  %v6843_v56 = vpop.f32.mrf.mxu0  ;;  %v17262_v55 = vld [vmem:[#allocation269_spill] sm:$0xff]  ;;  %v17263_v25 = vld [vmem:[#allocation74_spill] sm:$0xff] }
 0x3f8   :  { %v7172_v8 = vpop.f32.mrf.mxu1  ;;  %v15249_v49 = vmul.f32 %v7385_v38, %v17258_v14  ;;  %v7373_v17 = vmul.f32 %v15125_v24, %v15125_v24  ;;  %v6832_v6 = vadd.f32 %v6831_v2, %v15025_v21  ;;  %v7372_v31 = vmul.f32 %v15129_v26, %v15129_v26 }
 0x3f9   :  { %v7387_v35 = vsub.f32 %v7355_v16, %v7371_v9  ;;  %v7354_v47 = vadd.f32 %v7338_v43, %v7322_v13  ;;  %v7325_v60 = vsub.f32 %v17259_v58, %v7179_v48  ;;  %v7173_v45 = vadd.f32 %v7172_v8, %v6820_v5  ;;  %v10290_v0 = vpop.f32.mrf.mxu0 }
 0x3fa   :  { %v10388_v12 = vpop.f32.mrf.mxu1  ;;  %v15258_v37 = vmul.f32 %v7384_v23, %v17261_v20  ;;  %v6850_v11 = vadd.f32 %v10287_v10, %v15028_v32  ;;  %v6844_v34 = vadd.f32 %v6843_v56, %v15031_v40  ;;  %v17265_v23 = vld [vmem:[#allocation68_spill] sm:$0xff]  ;;  %v17266_v32 = vld [vmem:[#allocation187_spill] sm:$0xff]  ;;  %v6862_v57 = vadd.f32 %v10290_v0, %v15034_v39 }
 0x3fb   :  { %v7386_v29 = vsub.f32 %v7354_v47, %v7370_v59  ;;  %v7357_v51 = vadd.f32 %v7341_v63, %v7325_v60  ;;  %v7324_v46 = vsub.f32 %v17262_v55, %v7173_v45  ;;  %v7191_v27 = vadd.f32 %v10388_v12, %v6838_v61  ;;  %v6855_v38 = vpop.f32.mrf.mxu0  ;;  %v17267_v59 = vld [vmem:[#allocation55_spill] sm:$0xff]  ;;  %v17269_v47 = vld [vmem:[#allocation17_spill] sm:$0xff]  ;;  %v17270_v39 = vld [vmem:[#allocation192_spill] sm:$0xff] }
 0x3fc   :  { %v7184_v7 = vpop.f32.mrf.mxu1  ;;  %v15265_v24 = vmul.f32 %v7387_v35, %v17263_v25  ;;  %v17268_v40 = vld [vmem:[#allocation271_spill] sm:$0xff] }
 0x3fd   :  { %v7389_v21 = vsub.f32 %v7357_v51, %v7373_v17  ;;  %v7356_v2 = vadd.f32 %v7340_v28, %v7324_v46  ;;  %v7407_v43 = vsub.f32 %v17264_v42, %v7191_v27  ;;  %v7185_v9 = vadd.f32 %v7184_v7, %v6832_v6  ;;  %v10293_v5 = vpop.f32.mrf.mxu0  ;;  %v17271_v20 = vld [vmem:[#allocation195_spill] sm:$0xff] }
 0x3fe   :  { %v10391_v36 = vpop.f32.mrf.mxu1  ;;  %v15270_v16 = vmul.f32 %v7386_v29, %v17265_v23  ;;  %v17275_v23 = vld [vmem:[#allocation207_spill] sm:$0xff] }
 0x3ff   :  { %v7388_v22 = vsub.f32 %v7356_v2, %v7372_v31  ;;  %v7423_v26 = vadd.f32 %v7407_v43, %v15159_v1  ;;  %v7406_v10 = vsub.f32 %v17266_v32, %v7185_v9  ;;  %v7203_v13 = vadd.f32 %v10391_v36, %v6850_v11  ;;  %v6867_v48 = vpop.f32.mrf.mxu0  ;;  %v17273_v2 = vld [vmem:[#allocation35_spill] sm:$0xff] }
 0x400   :  { %v7196_v63 = vpop.f32.mrf.mxu1  ;;  %v15276_v61 = vmul.f32 %v7389_v21, %v17267_v59  ;;  %v6856_v1 = vadd.f32 %v6855_v38, %v15037_v53  ;;  %v6868_v46 = vadd.f32 %v6867_v48, %v15043_v4 }
 0x401   :  { %v7422_v8 = vadd.f32 %v7406_v10, %v15168_v33  ;;  %v7409_v56 = vsub.f32 %v17268_v40, %v7203_v13  ;;  %v7197_v14 = vadd.f32 %v7196_v63, %v6844_v34  ;;  %v10296_v35 = vpop.f32.mrf.mxu0  ;;  %v15281_v58 = vmul.f32 %v7388_v22, %v17269_v47  ;;  %v17276_v10 = vld [vmem:[#allocation284_spill] sm:$0xff] }
 0x402   :  { %v10394_v60 = vpop.f32.mrf.mxu1  ;;  %v6874_v33 = vadd.f32 %v10293_v5, %v15040_v50  ;;  %v6886_v25 = vadd.f32 %v10296_v35, %v15046_v30  ;;  %v17274_v5 = vld [vmem:[#allocation48_spill] sm:$0xff] }
 0x403   :  { %v7438_v45 = vadd.f32 %v7423_v26, %v7422_v8  ;;  %v7425_v41 = vadd.f32 %v7409_v56, %v15177_v44  ;;  %v7408_v0 = vsub.f32 %v17270_v39, %v7197_v14  ;;  %v7215_v28 = vadd.f32 %v10394_v60, %v6862_v57  ;;  %v6879_v17 = vpop.f32.mrf.mxu0  ;;  %v17272_v44 = vld [vmem:[#allocation277_spill] sm:$0xff]  ;;  %v17277_v57 = vld [vmem:[#allocation283_spill] sm:$0xff]  ;;  %v17278_v8 = vld [vmem:[#allocation66_spill] sm:$0xff] }
 0x404   :  { %v7208_v6 = vpop.f32.mrf.mxu1  ;;  %v6880_v4 = vadd.f32 %v6879_v17, %v17274_v5 }
 0x405   :  { %v7424_v12 = vadd.f32 %v7408_v0, %v15186_v18  ;;  %v7411_v29 = vsub.f32 %v17271_v20, %v7215_v28  ;;  %v7209_v51 = vadd.f32 %v7208_v6, %v6856_v1  ;;  %v10299_v55 = vpop.f32.mrf.mxu0  ;;  %v17281_v28 = vld [vmem:[#allocation39_spill] sm:$0xff] }
 0x406   :  { %v10397_v53 = vpop.f32.mrf.mxu1  ;;  %v6898_v30 = vadd.f32 %v10299_v55, %v17276_v10  ;;  %v17283_v55 = vld [vmem:[#allocation216_spill] sm:$0xff] }
 0x407   :  { %v7439_v27 = vadd.f32 %v7438_v45, %v7424_v12  ;;  %v7427_v38 = vadd.f32 %v7411_v29, %v15195_v62  ;;  %v7410_v31 = vsub.f32 %v17272_v44, %v7209_v51  ;;  %v7227_v11 = vadd.f32 %v10397_v53, %v6874_v33  ;;  %v6891_v7 = vpop.f32.mrf.mxu0  ;;  %v17280_v45 = vld [vmem:[#allocation285_spill] sm:$0xff] }
 0x408   :  { %v7220_v21 = vpop.f32.mrf.mxu1  ;;  %v6892_v40 = vadd.f32 %v6891_v7, %v17278_v8  ;;  %v17282_v33 = vld [vmem:[#allocation233_spill] sm:$0xff] }
 0x409   :  { %v7426_v50 = vadd.f32 %v7410_v31, %v15204_v19  ;;  %v7440_v18 = vadd.f32 %v7439_v27, %v7425_v41  ;;  %v7413_v42 = vsub.f32 %v17273_v2, %v7227_v11  ;;  %v7221_v43 = vadd.f32 %v7220_v21, %v6868_v46  ;;  %v10302_v9 = vpop.f32.mrf.mxu0  ;;  %v17284_v27 = vld [vmem:[#allocation286_spill] sm:$0xff]  ;;  %v17285_v11 = vld [vmem:[#allocation281_spill] sm:$0xff]  ;;  %v17286_v21 = vld [vmem:[#allocation235_spill] sm:$0xff] }
 0x40a   :  { %v10400_v34 = vpop.f32.mrf.mxu1  ;;  %v6910_v41 = vadd.f32 %v10302_v9, %v17280_v45 }
 0x40b   :  { %v7441_v36 = vadd.f32 %v7440_v18, %v7426_v50  ;;  %v7429_v62 = vadd.f32 %v7413_v42, %v15213_v15  ;;  %v7412_v22 = vsub.f32 %v17275_v23, %v7221_v43  ;;  %v7239_v26 = vadd.f32 %v10400_v34, %v6886_v25  ;;  %v6903_v32 = vpop.f32.mrf.mxu0  ;;  %v17279_v15 = vld [vmem:[#allocation279_spill] sm:$0xff] }
 0x40c   :  { %v7232_v13 = vpop.f32.mrf.mxu1  ;;  %v6904_v12 = vadd.f32 %v6903_v32, %v17282_v33 }
 0x40d   :  { %v7428_v19 = vadd.f32 %v7412_v22, %v15222_v52  ;;  %v7442_v48 = vadd.f32 %v7441_v36, %v7427_v38  ;;  %v7415_v63 = vsub.f32 %v17277_v57, %v7239_v26  ;;  %v7233_v59 = vadd.f32 %v7232_v13, %v6880_v4  ;;  %v10305_v1 = vpop.f32.mrf.mxu0  ;;  %v17288_v36 = vld [vmem:[#allocation225_spill] sm:$0xff] }
 0x40e   :  { %v10403_v56 = vpop.f32.mrf.mxu1  ;;  %v6922_v38 = vadd.f32 %v10305_v1, %v17284_v27  ;;  %v17289_v26 = vld [vmem:[#allocation213_spill] sm:$0xff] }
 0x40f   :  { %v7443_v14 = vadd.f32 %v7442_v48, %v7428_v19  ;;  %v7431_v35 = vadd.f32 %v7415_v63, %v15231_v54  ;;  %v7414_v47 = vsub.f32 %v17279_v15, %v7233_v59  ;;  %v7251_v60 = vadd.f32 %v10403_v56, %v6898_v30  ;;  %v6915_v54 = vpop.f32.mrf.mxu0 }
 0x410   :  { %v7244_v39 = vpop.f32.mrf.mxu1  ;;  %v6916_v50 = vadd.f32 %v6915_v54, %v17286_v21 }
 0x411   :  { %v7430_v0 = vadd.f32 %v7414_v47, %v15240_v3  ;;  %v7444_v52 = vadd.f32 %v7443_v14, %v7429_v62  ;;  %v7417_v17 = vsub.f32 %v17281_v28, %v7251_v60  ;;  %v7245_v6 = vadd.f32 %v7244_v39, %v6892_v40 }
 0x412   :  { %v10406_v20 = vpop.f32.mrf.mxu1 }
 0x413   :  { %v7445_v29 = vadd.f32 %v7444_v52, %v7430_v0  ;;  %v7433_v51 = vadd.f32 %v7417_v17, %v15249_v49  ;;  %v7416_v46 = vsub.f32 %v17283_v55, %v7245_v6  ;;  %v7263_v53 = vadd.f32 %v10406_v20, %v6910_v41  ;;  %v17287_v49 = vld [vmem:[#allocation223_spill] sm:$0xff] }
 0x414   :  { %v7256_v44 = vpop.f32.mrf.mxu1 }
 0x415   :  { %v7432_v31 = vadd.f32 %v7416_v46, %v15258_v37  ;;  %v7446_v3 = vadd.f32 %v7445_v29, %v7431_v35  ;;  %v7419_v7 = vsub.f32 %v17285_v11, %v7263_v53  ;;  %v7257_v25 = vadd.f32 %v7256_v44, %v6904_v12 }
 0x416   :  { %v10409_v18 = vpop.f32.mrf.mxu1 }
 0x417   :  { %v7447_v2 = vadd.f32 %v7446_v3, %v7432_v31  ;;  %v7435_v42 = vadd.f32 %v7419_v7, %v15265_v24  ;;  %v7418_v43 = vsub.f32 %v17287_v49, %v7257_v25  ;;  %v7275_v9 = vadd.f32 %v10409_v18, %v6922_v38 }
 0x418   :  { %v7268_v5 = vpop.f32.mrf.mxu1 }
 0x419   :  { %v7434_v4 = vadd.f32 %v7418_v43, %v15270_v16  ;;  %v7448_v34 = vadd.f32 %v7447_v2, %v7433_v51  ;;  %v7421_v62 = vsub.f32 %v17288_v36, %v7275_v9  ;;  %v7269_v37 = vadd.f32 %v7268_v5, %v6916_v50 }
 0x41b   :  { %v7449_v23 = vadd.f32 %v7448_v34, %v7434_v4  ;;  %v7437_v22 = vadd.f32 %v7421_v62, %v15276_v61  ;;  %v7420_v32 = vsub.f32 %v17289_v26, %v7269_v37 }
 0x41d   :  { %v7436_v10 = vadd.f32 %v7420_v32, %v15281_v58  ;;  %v7450_v30 = vadd.f32 %v7449_v23, %v7435_v42 }
 0x41f   :  { %v7451_v13 = vadd.f32 %v7450_v30, %v7436_v10 }
 0x421   :  { %v7452_v24 = vadd.f32 %v7451_v13, %v7437_v22 }
 0x423   :  { %v7453_v19 = vrot.slane %v7452_v24, 4 }
 0x425   :  { %v7454_v48 = vadd.f32 %v7453_v19, %v7452_v24 }
 0x427   :  { %v7455_v57 = vrot.slane %v7454_v48, 2 }
 0x429   :  { %v7456_v63 = vadd.f32 %v7455_v57, %v7454_v48 }
 0x42b   :  { %v7457_v59 = vrot.slane %v7456_v63, 1 }
 0x42d   :  { %v7458_v16 = vadd.f32 %v7457_v59, %v7456_v63 }
 0x42f   :  { %v7459_v8 = vmul.f32 0.5, %v7458_v16 }
 0x431   :  { %v7460_v40 = vadd.f32 1.0, %v7459_v8 }
 0x433   :  { %v7461_v56 = vmax.f32 %v7460_v40, 0.0 }
 0x435   :  { %7462 = vst [vmem:[#allocation8] sm:$0x1] %v7461_v56 }
 0x436   :  { %10489 = shalt.err (!%p10486_p5)
}
 0x437   :  { %7472 = dma.vmem_to_hbm [thread:$0]  %s7470_s11, 16, %s15329_s5, [#allocation4]  }
 0x438   :  { %10502 = dma.done.wait [#allocation4], 16  }
 0x439   :  { %10503 = vsyncadd [#allocation4], 4294967280 }
 0x43a   :  { %7476 = vsyncpa [#allocation3], 1 }
 0x43b   :  { %7477 = vsyncpa [#allocation6], 1 }
 0x43c   :  { %7478 = vsyncpa [#allocation4], 1 }

</bundles_post_ra>
